<compile_context>
chip_gen: v5e
topology: v5e:2x2
jax: 0.10.0
libtpu: 0.0.40
codegen_flags: <defaults>
</compile_context>

<pallas_src>
import functools

import numpy as np
import jax
import jax.numpy as jnp
from jax import lax
from jax.experimental import pallas as pl
from jax.experimental.pallas import tpu as pltpu


# ----------------------------------------------------------------------------
# Gaussian kernel (exactly separable): torch builds
#   A[i,j] = exp(-((i-k)^2 + (j-k)^2)/(2*sigma)) / (2*pi*sigma), A /= A.sum()
# which equals outer(g1, g1) with g1 = v / v.sum(), v[i] = exp(-(i-k)^2/(2*sigma)).
# ----------------------------------------------------------------------------
def get_gauss_1d(kernel_size=1, sigma=0.8):
    size = 2 * kernel_size + 1
    sig = np.float64(sigma)
    v = np.exp(-np.array([(i - kernel_size) ** 2 for i in range(size)],
                         dtype=np.float64) / (2.0 * sig))
    g1 = v / v.sum()
    return tuple(float(x) for x in g1)


def _l2_normalize_rows(x):
    # Matches torch semantics (no eps clamp in the reference): zero rows -> NaN.
    return x * lax.rsqrt(jnp.sum(x * x, axis=-1, keepdims=True))


def _pick_qt(qm, max_qt=8):
    for t in range(min(qm, max_qt), 0, -1):
        if qm % t == 0:
            return t
    return 1


# ----------------------------------------------------------------------------
# Banded conv+pool operators (host-side constants).
# Round r maps a [n_cols, D] slab (row = flattened spatial position) to
# [4*blk_pad, D]:   row = parity_block*blk_pad + hp*Wp + wp, value =
#   sum_{dy,dx} g[dy]*g[dx] * x[(2hp+par_h+dy)*stride + (2wp+par_w+dx), :]
# so the stride-2 2x2 max-pool is simply max over the 4 parity blocks.
# Rows >= blk inside each block are zero (exact zeros propagate).
# ----------------------------------------------------------------------------
def _build_conv_pool_mats(ph, pw, g1, n_rounds=2):
    size = len(g1)
    g = [float(v) for v in g1]
    mats = []
    H, W = ph, pw
    n_cols, col_stride = H * W, W
    for _ in range(n_rounds):
        Ho, Wo = H - (size - 1), W - (size - 1)
        Hp, Wp = Ho // 2, Wo // 2
        assert Hp >= 1 and Wp >= 1, "spatial size too small for conv+pool"
        blk = Hp * Wp
        blk_pad = max(8, ((blk + 7) // 8) * 8)
        K = np.zeros((4 * blk_pad, n_cols), dtype=np.float32)
        for par_h in range(2):
            for par_w in range(2):
                base = (par_h * 2 + par_w) * blk_pad
                for hp in range(Hp):
                    for wp in range(Wp):
                        r = base + hp * Wp + wp
                        ho, wo = 2 * hp + par_h, 2 * wp + par_w
                        for dy in range(size):
                            for dx in range(size):
                                K[r, (ho + dy) * col_stride + (wo + dx)] += g[dy] * g[dx]
        mats.append((K, blk, blk_pad, Hp, Wp))
        # Next round's input is the pooled map, flattened (Hp, Wp), stored in a
        # blk_pad-row slab whose padding rows are exact zeros.
        H, W = Hp, Wp
        n_cols, col_stride = blk_pad, Wp
    return mats


# ----------------------------------------------------------------------------
# Per-row top-k threshold (k-th largest), chunked along lanes.
# TODO(synk): ties equal to the k-th value keep >k entries (torch.topk breaks
# ties by index); exact for continuous float inputs (same as previous version).
# ----------------------------------------------------------------------------
def _chunk_topk_desc(x, k):
    """Top-k values per row of x [M, n] as a list of k [M, 1] cols, descending."""
    vals, thr = [], None
    for _ in range(k):
        if thr is None:
            m = jnp.max(x, axis=-1, keepdims=True)
        else:
            # no-carry recurrence: mask recomputed from the ORIGINAL chunk +
            # a per-row scalar, so no masked copy is carried across passes.
            m = jnp.max(jnp.where(x >= thr, -jnp.inf, x), axis=-1, keepdims=True)
        vals.append(m)
        thr = m
    return vals


def _merge_topk_desc(a, b, k):
    """Descending top-k of the union of two descending top-k column lists."""
    out = []
    for j in range(1, k + 1):            # j-th largest of the union
        cand = None
        for i in range(0, j + 1):        # i elements taken from a, j-i from b
            l = j - i
            if i == 0:
                v = b[l - 1]
            elif l == 0:
                v = a[i - 1]
            else:
                v = jnp.minimum(a[i - 1], b[l - 1])
            cand = v if cand is None else jnp.maximum(cand, v)
        out.append(cand)
    return out


def _row_topk_kth(sim, k):
    n = sim.shape[-1]
    if k <= 1:
        return jnp.max(sim, axis=-1, keepdims=True)
    if n % 128 == 0 and n > 128 and k <= 32:
        run = None
        for c in range(n // 128):
            vals = _chunk_topk_desc(sim[:, c * 128:(c + 1) * 128], k)
            run = vals if run is None else _merge_topk_desc(run, vals, k)
        return run[k - 1]
    return _chunk_topk_desc(sim, k)[k - 1]


# ----------------------------------------------------------------------------
# Fused kernel: cosine (MXU) -> top-k sparsify -> per query: 2 x
# (Gaussian conv as banded-operator matmul on the MXU -> pool as max of 4
#  sublane-aligned parity blocks).  Valid when qh*qw == ph*pw.
# ----------------------------------------------------------------------------
def _imse_group_kernel(q_ref, p_ref, k1_ref, k2_ref, o_ref, *,
                       neighbor_k, blk_pad1, blk2, blk_pad2):
    qt, qfs, _ = q_ref.shape
    pfs = p_ref.shape[2]

    # Cosine similarity: contract the channel axis of both operands directly
    # (rows were L2-normalized once in the wrapper).
    qb = q_ref[...].reshape(qt * qfs, q_ref.shape[2])
    pb = p_ref[0, 0]
    sim = lax.dot_general(qb, pb, (((1,), (1,)), ((), ())),
                          preferred_element_type=jnp.float32)      # [QT*qfs, pfs]

    # Sparsify: keep values >= k-th largest per row, zero elsewhere.
    kth = _row_topk_kth(sim, neighbor_k)                           # [QT*qfs, 1]
    sp = jnp.where(sim >= kth, sim, jnp.float32(0.0))

    k1 = k1_ref[...]                                               # [4*bp1, HW]
    k2 = k2_ref[...]                                               # [4*bp2, bp1]

    # torch permute+reshape: conv spatial grid (ph, pw) enumerates the query
    # positions (rows of sp), the depth/lane axis d enumerates prototype
    # positions -> the per-query slab IS sp's row block, no relayout needed.
    for qi in range(qt):
        x = sp[qi * qfs:(qi + 1) * qfs, :]                         # [HW, pfs]
        y1 = lax.dot_general(k1, x, (((1,), (0,)), ((), ())),
                             preferred_element_type=jnp.float32)   # [4*bp1, pfs]
        p1 = jnp.maximum(
            jnp.maximum(y1[0 * blk_pad1:1 * blk_pad1], y1[1 * blk_pad1:2 * blk_pad1]),
            jnp.maximum(y1[2 * blk_pad1:3 * blk_pad1], y1[3 * blk_pad1:4 * blk_pad1]))
        y2 = lax.dot_general(k2, p1, (((1,), (0,)), ((), ())),
                             preferred_element_type=jnp.float32)   # [4*bp2, pfs]
        p2 = jnp.maximum(
            jnp.maximum(y2[0 * blk_pad2:1 * blk_pad2], y2[1 * blk_pad2:2 * blk_pad2]),
            jnp.maximum(y2[2 * blk_pad2:3 * blk_pad2], y2[3 * blk_pad2:4 * blk_pad2]))
        o_ref[0, qi, 0, :, :] = p2[:blk2, :]                       # [hf*wf, pfs]


def imse_group_conv(q_n, p_stack, neighbor_k, g1, ph, pw, *,
                    cosine_dtype=jnp.float32, max_qt=8):
    qm, qfs, C = q_n.shape
    ns, pm, pfs, _ = p_stack.shape
    assert qfs == pfs, "fused path requires qh*qw == ph*pw"
    assert 1 <= neighbor_k <= pfs, "degenerate neighbor_k"

    (k1, _, blk_pad1, _, _), (k2, blk2, blk_pad2, hf, wf) = \
        _build_conv_pool_mats(ph, pw, g1, n_rounds=2)
    qt = _pick_qt(qm, max_qt)

    kern = functools.partial(_imse_group_kernel, neighbor_k=neighbor_k,
                             blk_pad1=blk_pad1, blk2=blk2, blk_pad2=blk_pad2)
    out = pl.pallas_call(
        kern,
        out_shape=jax.ShapeDtypeStruct((ns, qm, pm, blk2, pfs), jnp.float32),
        grid=(ns, qm // qt, pm),
        in_specs=[
            pl.BlockSpec((qt, qfs, C), lambda c, i, j: (i, 0, 0)),
            pl.BlockSpec((1, 1, pfs, C), lambda c, i, j: (c, j, 0, 0)),
            pl.BlockSpec(k1.shape, lambda c, i, j: (0, 0)),   # VMEM-resident const
            pl.BlockSpec(k2.shape, lambda c, i, j: (0, 0)),   # VMEM-resident const
        ],
        out_specs=pl.BlockSpec((1, qt, 1, blk2, pfs),
                               lambda c, i, j: (c, i, j, 0, 0)),
        compiler_params=pltpu.CompilerParams(
            dimension_semantics=("parallel", "parallel", "parallel")),
    )(q_n.astype(cosine_dtype), p_stack.astype(cosine_dtype),
      jnp.asarray(k1), jnp.asarray(k2))
    return out, (hf, wf)                 # out: [ns, qm, pm, hf*wf, pfs]


# ----------------------------------------------------------------------------
# Plain-XLA fallback for the rare qh*qw != ph*pw case (the torch reshape then
# scrambles axes; reproduce it literally with a row-major reshape).
# TODO(synk): this path is not a Pallas kernel; it exists only for shape
# generality and is never hit for the standard equal-spatial-size setup.
# ----------------------------------------------------------------------------
def _imse_class_fallback(q_n, p_n, neighbor_k, g1, qh, qw, ph, pw, n_rounds=2):
    qm = q_n.shape[0]
    pm = p_n.shape[0]
    size = len(g1)
    g = jnp.asarray(g1, jnp.float32)
    sim = jnp.einsum('iqc,jpc->ijqp', q_n, p_n)
    kth = lax.top_k(sim, neighbor_k)[0][..., -1:]
    sp = jnp.where(sim >= kth, sim, 0.0)
    x = jnp.transpose(sp, (0, 1, 3, 2)).reshape(qm * pm, qh * qw, ph, pw)
    for _ in range(n_rounds):
        N, D, H, W = x.shape
        Ho, Wo = H - (size - 1), W - (size - 1)
        t = sum(g[d] * x[:, :, :, d:d + Wo] for d in range(size))
        y = sum(g[d] * t[:, :, d:d + Ho, :] for d in range(size))
        Hp, Wp = Ho // 2, Wo // 2
        y = y[:, :, :2 * Hp, :2 * Wp].reshape(N, D, Hp, 2, Wp, 2)
        x = jnp.max(y, axis=(3, 5))
    return x[:, None]                                  # [qm*pm, 1, D, hf, wf]


# ----------------------------------------------------------------------------
# Forward pass: mirrors IMSE.cal_cosinesimilarity.
# ----------------------------------------------------------------------------
def imse_forward(query_x, support_x, neighbor_k=3, kernel_size=1, sigma=0.8,
                 cosine_in_bf16=False):
    g1 = get_gauss_1d(kernel_size, sigma)

    qm, C, qh, qw = query_x.shape
    qfs = qh * qw
    q = jnp.reshape(jnp.transpose(query_x, (0, 2, 3, 1)), (qm, qfs, C))
    q_n = _l2_normalize_rows(q)                        # normalize once (qm rows)

    # Group support classes sharing (pm, ph, pw) into one pallas_call each.
    n_cls = len(support_x)
    groups = {}
    for ci, s in enumerate(support_x):
        pm, _, ph, pw = s.shape
        groups.setdefault((pm, ph, pw), []).append(ci)

    res_per_class = [None] * n_cls
    cosine_dtype = jnp.bfloat16 if cosine_in_bf16 else jnp.float32
    for (pm, ph, pw), idxs in groups.items():
        pfs = ph * pw
        p = jnp.stack([support_x[ci] for ci in idxs], 0)           # [ns,pm,C,ph,pw]
        p = jnp.reshape(jnp.transpose(p, (0, 1, 3, 4, 2)), (len(idxs), pm, pfs, C))
        p_n = _l2_normalize_rows(p)                    # normalize once (pm rows)

        if qfs == pfs:
            y, (hf, wf) = imse_group_conv(q_n, p_n, neighbor_k, g1, ph, pw,
                                          cosine_dtype=cosine_dtype)
            # back to the torch layout [qm*pm, 1, D, hf, wf] (tiny tensor)
            for gi, ci in enumerate(idxs):
                r = jnp.transpose(y[gi], (0, 1, 3, 2))             # [qm,pm,D,hf*wf]
                res_per_class[ci] = jnp.reshape(r, (qm * pm, 1, pfs, hf, wf))
        else:
            for gi, ci in enumerate(idxs):
                res_per_class[ci] = _imse_class_fallback(
                    q_n, p_n[gi], neighbor_k, g1, qh, qw, ph, pw)

    similarity_list, cov_list = [], []
    for ci in range(n_cls):
        ph, pw = support_x[ci].shape[2], support_x[ci].shape[3]
        res = res_per_class[ci]
        cov_list.append(jnp.reshape(res, (-1, ph * pw)))
        similarity_list.append(jnp.sum(jnp.reshape(res, (qm, -1)), axis=-1))
    logits = jnp.stack(similarity_list, 0).T           # [qm, n_support]
    return {"logits": logits, "cov_list": cov_list}


if __name__ == "__main__":
    key = jax.random.PRNGKey(0)
    k1, k2, k3 = jax.random.split(key, 3)

    qm, C, qh, qw = 2, 32, 16, 16
    pm, ph, pw = 2, 16, 16

    x1 = jax.random.normal(k1, (qm, C, qh, qw), dtype=jnp.float32)
    x2 = [
        jax.random.normal(k2, (pm, C, ph, pw), dtype=jnp.float32),
        jax.random.normal(k3, (pm, C, ph, pw), dtype=jnp.float32),
    ]

    fwd = jax.jit(lambda q, s: imse_forward(q, s))
    out = fwd(x1, x2)
    jax.block_until_ready(out)

    assert out["logits"].shape == (qm, len(x2))
    assert all(c.shape[-1] == ph * pw for c in out["cov_list"])
    print("KERNEL_OK")
</pallas_src>

<mosaic_0001>
module attributes {stable_mosaic.version = 11 : i64} {
  func.func @_imse_group_kernel(%arg0: i32, %arg1: i32, %arg2: i32, %arg3: memref<2x256x32xf32, #tpu.memory_space<vmem>>, %arg4: memref<1x1x256x32xf32, #tpu.memory_space<vmem>>, %arg5: memref<224x256xf32, #tpu.memory_space<vmem>>, %arg6: memref<32x56xf32, #tpu.memory_space<vmem>>, %arg7: memref<1x2x1x4x256xf32, #tpu.memory_space<vmem>>) attributes {dimension_semantics = [#tpu.dimension_semantics<parallel>, #tpu.dimension_semantics<parallel>, #tpu.dimension_semantics<parallel>], iteration_bounds = array<i64: 2, 1, 2>, scalar_prefetch = 0 : i64, scratch_operands = 0 : i64, tpu.core_type = #tpu.core_type<tc>, window_params = [{transform_indices = @transform_0, window_bounds = array<i64: 2, 256, 32>}, {transform_indices = @transform_1, window_bounds = array<i64: 1, 1, 256, 32>}, {pipeline_mode = #tpu.pipeline_mode<synchronous>, transform_indices = @transform_2, window_bounds = array<i64: 224, 256>}, {pipeline_mode = #tpu.pipeline_mode<synchronous>, transform_indices = @transform_3, window_bounds = array<i64: 32, 56>}, {transform_indices = @transform_4, window_bounds = array<i64: 1, 2, 1, 4, 256>}]} {
    %c0 = arith.constant 0 : index
    %c0_0 = arith.constant 0 : index
    %c0_1 = arith.constant 0 : index
    %0 = vector.load %arg3[%c0, %c0_0, %c0_1] : memref<2x256x32xf32, #tpu.memory_space<vmem>>, vector<2x256x32xf32>
    %1 = vector.shape_cast %0 : vector<2x256x32xf32> to vector<512x32xf32>
    %c0_2 = arith.constant 0 : index
    %c0_3 = arith.constant 0 : index
    %c0_4 = arith.constant 0 : index
    %c0_5 = arith.constant 0 : index
    %2 = vector.load %arg4[%c0_2, %c0_3, %c0_4, %c0_5] : memref<1x1x256x32xf32, #tpu.memory_space<vmem>>, vector<1x1x256x32xf32>
    %3 = vector.shape_cast %2 : vector<1x1x256x32xf32> to vector<256x32xf32>
    %cst = arith.constant dense<0.000000e+00> : vector<512x256xf32>
    %4 = tpu.matmul %1, %3, %cst {dimension_numbers = #tpu.dot_dimension_numbers<[1], [1], [0], [0], [0, 0, 1, 0], [], []>} : vector<512x32xf32>, vector<256x32xf32>, vector<512x256xf32> -> vector<512x256xf32>
    %5 = vector.extract_strided_slice %4 {offsets = [0, 0], sizes = [512, 128], strides = [1, 1]} : vector<512x256xf32> to vector<512x128xf32>
    %cst_6 = arith.constant dense<0xFF800000> : vector<512xf32>
    %6 = vector.multi_reduction <maximumf>, %5, %cst_6 [1] : vector<512x128xf32> to vector<512xf32>
    %7 = vector.shape_cast %6 : vector<512xf32> to vector<512x1xf32>
    %8 = vector.broadcast %7 : vector<512x1xf32> to vector<512x128xf32>
    %9 = arith.cmpf oge, %5, %8 : vector<512x128xf32>
    %cst_7 = arith.constant 0xFF800000 : f32
    %10 = vector.broadcast %cst_7 : f32 to vector<512x128xf32>
    %11 = arith.select %9, %10, %5 : vector<512x128xi1>, vector<512x128xf32>
    %cst_8 = arith.constant dense<0xFF800000> : vector<512xf32>
    %12 = vector.multi_reduction <maximumf>, %11, %cst_8 [1] : vector<512x128xf32> to vector<512xf32>
    %13 = vector.shape_cast %12 : vector<512xf32> to vector<512x1xf32>
    %14 = vector.broadcast %13 : vector<512x1xf32> to vector<512x128xf32>
    %15 = arith.cmpf oge, %5, %14 : vector<512x128xf32>
    %cst_9 = arith.constant 0xFF800000 : f32
    %16 = vector.broadcast %cst_9 : f32 to vector<512x128xf32>
    %17 = arith.select %15, %16, %5 : vector<512x128xi1>, vector<512x128xf32>
    %cst_10 = arith.constant dense<0xFF800000> : vector<512xf32>
    %18 = vector.multi_reduction <maximumf>, %17, %cst_10 [1] : vector<512x128xf32> to vector<512xf32>
    %19 = vector.shape_cast %18 : vector<512xf32> to vector<512x1xf32>
    %20 = vector.extract_strided_slice %4 {offsets = [0, 128], sizes = [512, 128], strides = [1, 1]} : vector<512x256xf32> to vector<512x128xf32>
    %cst_11 = arith.constant dense<0xFF800000> : vector<512xf32>
    %21 = vector.multi_reduction <maximumf>, %20, %cst_11 [1] : vector<512x128xf32> to vector<512xf32>
    %22 = vector.shape_cast %21 : vector<512xf32> to vector<512x1xf32>
    %23 = vector.broadcast %22 : vector<512x1xf32> to vector<512x128xf32>
    %24 = arith.cmpf oge, %20, %23 : vector<512x128xf32>
    %cst_12 = arith.constant 0xFF800000 : f32
    %25 = vector.broadcast %cst_12 : f32 to vector<512x128xf32>
    %26 = arith.select %24, %25, %20 : vector<512x128xi1>, vector<512x128xf32>
    %cst_13 = arith.constant dense<0xFF800000> : vector<512xf32>
    %27 = vector.multi_reduction <maximumf>, %26, %cst_13 [1] : vector<512x128xf32> to vector<512xf32>
    %28 = vector.shape_cast %27 : vector<512xf32> to vector<512x1xf32>
    %29 = vector.broadcast %28 : vector<512x1xf32> to vector<512x128xf32>
    %30 = arith.cmpf oge, %20, %29 : vector<512x128xf32>
    %cst_14 = arith.constant 0xFF800000 : f32
    %31 = vector.broadcast %cst_14 : f32 to vector<512x128xf32>
    %32 = arith.select %30, %31, %20 : vector<512x128xi1>, vector<512x128xf32>
    %cst_15 = arith.constant dense<0xFF800000> : vector<512xf32>
    %33 = vector.multi_reduction <maximumf>, %32, %cst_15 [1] : vector<512x128xf32> to vector<512xf32>
    %34 = vector.shape_cast %33 : vector<512xf32> to vector<512x1xf32>
    %35 = arith.minimumf %7, %28 : vector<512x1xf32>
    %36 = arith.maximumf %34, %35 : vector<512x1xf32>
    %37 = arith.minimumf %13, %22 : vector<512x1xf32>
    %38 = arith.maximumf %36, %37 : vector<512x1xf32>
    %39 = arith.maximumf %38, %19 : vector<512x1xf32>
    %40 = vector.broadcast %39 : vector<512x1xf32> to vector<512x256xf32>
    %41 = arith.cmpf oge, %4, %40 : vector<512x256xf32>
    %cst_16 = arith.constant 0.000000e+00 : f32
    %42 = vector.broadcast %cst_16 : f32 to vector<512x256xf32>
    %43 = arith.select %41, %4, %42 : vector<512x256xi1>, vector<512x256xf32>
    %c0_17 = arith.constant 0 : index
    %c0_18 = arith.constant 0 : index
    %44 = vector.load %arg5[%c0_17, %c0_18] : memref<224x256xf32, #tpu.memory_space<vmem>>, vector<224x256xf32>
    %c0_19 = arith.constant 0 : index
    %c0_20 = arith.constant 0 : index
    %45 = vector.load %arg6[%c0_19, %c0_20] : memref<32x56xf32, #tpu.memory_space<vmem>>, vector<32x56xf32>
    %46 = vector.extract_strided_slice %43 {offsets = [0, 0], sizes = [256, 256], strides = [1, 1]} : vector<512x256xf32> to vector<256x256xf32>
    %cst_21 = arith.constant dense<0.000000e+00> : vector<224x256xf32>
    %47 = tpu.matmul %44, %46, %cst_21 {dimension_numbers = #tpu.dot_dimension_numbers<[1], [0], [0], [1], [0, 0, 1, 1], [], []>} : vector<224x256xf32>, vector<256x256xf32>, vector<224x256xf32> -> vector<224x256xf32>
    %48 = vector.extract_strided_slice %47 {offsets = [0, 0], sizes = [56, 256], strides = [1, 1]} : vector<224x256xf32> to vector<56x256xf32>
    %49 = vector.extract_strided_slice %47 {offsets = [56, 0], sizes = [56, 256], strides = [1, 1]} : vector<224x256xf32> to vector<56x256xf32>
    %50 = arith.maximumf %48, %49 : vector<56x256xf32>
    %51 = vector.extract_strided_slice %47 {offsets = [112, 0], sizes = [56, 256], strides = [1, 1]} : vector<224x256xf32> to vector<56x256xf32>
    %52 = vector.extract_strided_slice %47 {offsets = [168, 0], sizes = [56, 256], strides = [1, 1]} : vector<224x256xf32> to vector<56x256xf32>
    %53 = arith.maximumf %51, %52 : vector<56x256xf32>
    %54 = arith.maximumf %50, %53 : vector<56x256xf32>
    %cst_22 = arith.constant dense<0.000000e+00> : vector<32x256xf32>
    %55 = tpu.matmul %45, %54, %cst_22 {dimension_numbers = #tpu.dot_dimension_numbers<[1], [0], [0], [1], [0, 0, 1, 1], [], []>} : vector<32x56xf32>, vector<56x256xf32>, vector<32x256xf32> -> vector<32x256xf32>
    %56 = vector.extract_strided_slice %55 {offsets = [0, 0], sizes = [8, 256], strides = [1, 1]} : vector<32x256xf32> to vector<8x256xf32>
    %57 = vector.extract_strided_slice %55 {offsets = [8, 0], sizes = [8, 256], strides = [1, 1]} : vector<32x256xf32> to vector<8x256xf32>
    %58 = arith.maximumf %56, %57 : vector<8x256xf32>
    %59 = vector.extract_strided_slice %55 {offsets = [16, 0], sizes = [8, 256], strides = [1, 1]} : vector<32x256xf32> to vector<8x256xf32>
    %60 = vector.extract_strided_slice %55 {offsets = [24, 0], sizes = [8, 256], strides = [1, 1]} : vector<32x256xf32> to vector<8x256xf32>
    %61 = arith.maximumf %59, %60 : vector<8x256xf32>
    %62 = arith.maximumf %58, %61 : vector<8x256xf32>
    %63 = vector.extract_strided_slice %62 {offsets = [0, 0], sizes = [4, 256], strides = [1, 1]} : vector<8x256xf32> to vector<4x256xf32>
    %c0_23 = arith.constant 0 : index
    %c0_24 = arith.constant 0 : index
    %c0_25 = arith.constant 0 : index
    %c0_26 = arith.constant 0 : index
    %c0_27 = arith.constant 0 : index
    %64 = vector.load %arg7[%c0_23, %c0_24, %c0_25, %c0_26, %c0_27] : memref<1x2x1x4x256xf32, #tpu.memory_space<vmem>>, vector<1x1x1x4x256xf32>
    %65 = vector.shape_cast %64 : vector<1x1x1x4x256xf32> to vector<4x256xf32>
    %66 = vector.shape_cast %63 : vector<4x256xf32> to vector<1x1x1x4x256xf32>
    tpu.vector_store %arg7[%c0_23, %c0_24, %c0_25, %c0_26, %c0_27], %66 {strides = array<i32>} : memref<1x2x1x4x256xf32, #tpu.memory_space<vmem>>, vector<1x1x1x4x256xf32>,
    %67 = vector.extract_strided_slice %43 {offsets = [256, 0], sizes = [256, 256], strides = [1, 1]} : vector<512x256xf32> to vector<256x256xf32>
    %cst_28 = arith.constant dense<0.000000e+00> : vector<224x256xf32>
    %68 = tpu.matmul %44, %67, %cst_28 {dimension_numbers = #tpu.dot_dimension_numbers<[1], [0], [0], [1], [0, 0, 1, 1], [], []>} : vector<224x256xf32>, vector<256x256xf32>, vector<224x256xf32> -> vector<224x256xf32>
    %69 = vector.extract_strided_slice %68 {offsets = [0, 0], sizes = [56, 256], strides = [1, 1]} : vector<224x256xf32> to vector<56x256xf32>
    %70 = vector.extract_strided_slice %68 {offsets = [56, 0], sizes = [56, 256], strides = [1, 1]} : vector<224x256xf32> to vector<56x256xf32>
    %71 = arith.maximumf %69, %70 : vector<56x256xf32>
    %72 = vector.extract_strided_slice %68 {offsets = [112, 0], sizes = [56, 256], strides = [1, 1]} : vector<224x256xf32> to vector<56x256xf32>
    %73 = vector.extract_strided_slice %68 {offsets = [168, 0], sizes = [56, 256], strides = [1, 1]} : vector<224x256xf32> to vector<56x256xf32>
    %74 = arith.maximumf %72, %73 : vector<56x256xf32>
    %75 = arith.maximumf %71, %74 : vector<56x256xf32>
    %cst_29 = arith.constant dense<0.000000e+00> : vector<32x256xf32>
    %76 = tpu.matmul %45, %75, %cst_29 {dimension_numbers = #tpu.dot_dimension_numbers<[1], [0], [0], [1], [0, 0, 1, 1], [], []>} : vector<32x56xf32>, vector<56x256xf32>, vector<32x256xf32> -> vector<32x256xf32>
    %77 = vector.extract_strided_slice %76 {offsets = [0, 0], sizes = [8, 256], strides = [1, 1]} : vector<32x256xf32> to vector<8x256xf32>
    %78 = vector.extract_strided_slice %76 {offsets = [8, 0], sizes = [8, 256], strides = [1, 1]} : vector<32x256xf32> to vector<8x256xf32>
    %79 = arith.maximumf %77, %78 : vector<8x256xf32>
    %80 = vector.extract_strided_slice %76 {offsets = [16, 0], sizes = [8, 256], strides = [1, 1]} : vector<32x256xf32> to vector<8x256xf32>
    %81 = vector.extract_strided_slice %76 {offsets = [24, 0], sizes = [8, 256], strides = [1, 1]} : vector<32x256xf32> to vector<8x256xf32>
    %82 = arith.maximumf %80, %81 : vector<8x256xf32>
    %83 = arith.maximumf %79, %82 : vector<8x256xf32>
    %84 = vector.extract_strided_slice %83 {offsets = [0, 0], sizes = [4, 256], strides = [1, 1]} : vector<8x256xf32> to vector<4x256xf32>
    %c0_30 = arith.constant 0 : index
    %c1 = arith.constant 1 : index
    %c0_31 = arith.constant 0 : index
    %c0_32 = arith.constant 0 : index
    %c0_33 = arith.constant 0 : index
    %85 = vector.load %arg7[%c0_30, %c1, %c0_31, %c0_32, %c0_33] : memref<1x2x1x4x256xf32, #tpu.memory_space<vmem>>, vector<1x1x1x4x256xf32>
    %86 = vector.shape_cast %85 : vector<1x1x1x4x256xf32> to vector<4x256xf32>
    %87 = vector.shape_cast %84 : vector<4x256xf32> to vector<1x1x1x4x256xf32>
    tpu.vector_store %arg7[%c0_30, %c1, %c0_31, %c0_32, %c0_33], %87 {strides = array<i32>} : memref<1x2x1x4x256xf32, #tpu.memory_space<vmem>>, vector<1x1x1x4x256xf32>,
    return
  }
  func.func @transform_0(%arg0: i32, %arg1: i32, %arg2: i32) -> (i32, i32, i32) {
    %c0_i32 = arith.constant 0 : i32
    %c0_i32_0 = arith.constant 0 : i32
    %c0_i32_1 = arith.constant 0 : i32
    return %arg1, %c0_i32, %c0_i32_0 : i32, i32, i32
  }
  func.func @transform_1(%arg0: i32, %arg1: i32, %arg2: i32) -> (i32, i32, i32, i32) {
    %c0_i32 = arith.constant 0 : i32
    %c0_i32_0 = arith.constant 0 : i32
    %c0_i32_1 = arith.constant 0 : i32
    return %arg0, %arg2, %c0_i32, %c0_i32_0 : i32, i32, i32, i32
  }
  func.func @transform_2(%arg0: i32, %arg1: i32, %arg2: i32) -> (i32, i32) {
    %c0_i32 = arith.constant 0 : i32
    %c0_i32_0 = arith.constant 0 : i32
    %c0_i32_1 = arith.constant 0 : i32
    return %c0_i32, %c0_i32_0 : i32, i32
  }
  func.func @transform_3(%arg0: i32, %arg1: i32, %arg2: i32) -> (i32, i32) {
    %c0_i32 = arith.constant 0 : i32
    %c0_i32_0 = arith.constant 0 : i32
    %c0_i32_1 = arith.constant 0 : i32
    return %c0_i32, %c0_i32_0 : i32, i32
  }
  func.func @transform_4(%arg0: i32, %arg1: i32, %arg2: i32) -> (i32, i32, i32, i32, i32) {
    %c0_i32 = arith.constant 0 : i32
    %c0_i32_0 = arith.constant 0 : i32
    %c0_i32_1 = arith.constant 0 : i32
    return %arg0, %arg1, %arg2, %c0_i32, %c0_i32_0 : i32, i32, i32, i32, i32
  }
}

</mosaic_0001>

<bundles_post_ra>
// kernel: _lambda_.1
= control target key start
LH: loop header
LB: loop body
LE: loop exit
PB: predicated region body
PF: predicated region fallthrough
CT: control target
= control target key end

     0   :  { %s4742_s15 = smov 0   ;;  %s4744_s16 = smov 0   ;;  %s9245_s0 = inlined_call_operand.vmem [shape: f32[2,256,32], index: 0, kind: input, shape index: {}]   ;;  %s9246_s1 = inlined_call_operand.vmem [shape: f32[2,2,256,32], index: 1, kind: input, shape index: {}]   ;;  %s9247_s2 = inlined_call_operand.vmem [shape: f32[224,256], index: 2, kind: input, shape index: {}]   ;;  %s9248_s3 = inlined_call_operand.vmem [shape: f32[32,56], index: 3, kind: input, shape index: {}]   ;;  %s9249_s4 = inlined_call_operand.vmem [shape: f32[2,2,2,4,256], index: 4, kind: output, shape index: {}]  }
   0x1   :  { %s4746_s17 = smov 0   ;;  %s4748_s18 = smov 0  }
   0x2   :  { %s4750_s19 = smov 0   ;;  %s4752_s20 = smov 0  }
   0x3   :  { %s4754_s21 = smov 0  }
   0x4 LB: > { %s26_s22 = sadd.s32 1, %s4707_s19  ;;  %s33_s23 = sadd.s32 1, %s4711_s20  ;;  %s4715_s21 = sphi %s4754_s21, %s14_s21   ;;  %s4711_s20 = sphi %s4752_s20, %s10950_s20   ;;  %s4707_s19 = sphi %s4750_s19, %s10949_s19   ;;  %s4703_s18 = sphi %s4748_s18, %s10948_s18   ;;  %s4699_s17 = sphi %s4746_s17, %s10947_s17   ;;  %s4695_s16 = sphi %s4744_s16, %s10946_s16   ;;  %s4691_s15 = sphi %s4742_s15, %s10945_s15  }
   0x5   : > { %p27_p0 = scmp.ge.s32.totalorder %s26_s22, 2  ;;  %s4167_s24 = sadd.s32 4294967295, %s4715_s21  }
   0x6   : > { %p150_p1 = scmp.ne.s32.totalorder %s4695_s16, %s4691_s15  ;;  %p151_p2 = scmp.eq.s32.totalorder %s4167_s24, 3 }
   0x7   : > { %s10952_s22 = smov (%p27_p0, %s26_s22), 0  ;;  %s10954_s23 = smov (!%p27_p0, %s33_s23), %s4711_s20 }
   0x8   : > { %s136_s25 = ssub.s32 %s4707_s19, %s10952_s22  ;;  %p35_p3 = scmp.ge.s32.totalorder %s10954_s23, 2 }
   0x9   : > { %p4172_p4 = scmp.ge.s32.totalorder %s4715_s21, 1  ;;  %p4788_p5 = por %p151_p2, %p150_p1 }
   0xa   : > { %p203_p6 = scmp.lt.s32.totalorder %s4715_s21, 5  ;;  %s10956_s23 = smov (%p35_p3, %s10954_s23), 0 }
   0xb   : > { %s133_s27 = ssub.s32 %s4711_s20, %s10956_s23  ;;  %s140_s29 = sadd.s32 1, %s4695_s16 }
   0xc   : > { %p204_p7 = pnand %p4172_p4, %p203_p6  ;;  %s137_s28 = sor.u32 %s136_s25, %s133_s27 }
   0xd   : > { %p138_p8 = scmp.eq.s32.totalorder %s137_s28, 0 }
   0xe   : > { %207 = sbr.rel (%p204_p7) target bundleno = 2122 (0x84a), region = 36 }
   0xf   : > { %s4799_s30 = scalar_select %p138_p8, %s4695_s16, %s140_s29  }
  0x13   : > { %p245_p9 = scmp.lt.s32.totalorder %s4703_s18, 1  ;;  %p247_p10 = scmp.lt.s32.totalorder %s4699_s17, 1  ;;  %vm351_vm0 = vcmask 261120   ;;  %v255_v32 = vld [vmem:[%s9245_s0] sm:$0xff]  ;;  %v256_v33 = vld [vmem:[%s9245_s0 + $0x8] sm:$0xff]  ;;  %v257_v34 = vld [vmem:[%s9245_s0 + $0x10] sm:$0xff] }
  0x14   : > { %v258_v35 = vld [vmem:[%s9245_s0 + $0x18] sm:$0xff]  ;;  %v259_v36 = vld [vmem:[%s9245_s0 + $0x20] sm:$0xff]  ;;  %v260_v37 = vld [vmem:[%s9245_s0 + $0x28] sm:$0xff]  ;;  %s235_s25 = sand.u32 1, %s4691_s15   ;;  %s4483_s14 = sshll.u32 (%p4788_p5), %s4699_s17, 1 }
  0x15   : > { %s246_s5 = scalar_select %p245_p9, %s4703_s18, 1  ;;  %v261_v38 = vld [vmem:[%s9245_s0 + $0x30] sm:$0xff]  ;;  %v262_v39 = vld [vmem:[%s9245_s0 + $0x38] sm:$0xff]  ;;  %v263_v40 = vld [vmem:[%s9245_s0 + $0x40] sm:$0xff] }
  0x16   : > { %s248_s6 = scalar_select %p247_p10, %s4699_s17, 1  ;;  %v264_v41 = vld [vmem:[%s9245_s0 + $0x48] sm:$0xff]  ;;  %v265_v42 = vld [vmem:[%s9245_s0 + $0x50] sm:$0xff]  ;;  %v266_v43 = vld [vmem:[%s9245_s0 + $0x58] sm:$0xff] }
  0x17   : > { %s4175_s7 = sshll.u32 %s246_s5, 6  ;;  %v267_v44 = vld [vmem:[%s9245_s0 + $0x60] sm:$0xff]  ;;  %v268_v45 = vld [vmem:[%s9245_s0 + $0x68] sm:$0xff]  ;;  %v269_v46 = vld [vmem:[%s9245_s0 + $0x70] sm:$0xff]  ;;  %s4173_s27 = sshll.u32 %s235_s25, 4 }
  0x18   : > { %s4174_s8 = sshll.u32 %s248_s6, 5  ;;  %v270_v47 = vld [vmem:[%s9245_s0 + $0x78] sm:$0xff]  ;;  %v271_v50 = vld [vmem:[%s9245_s0 + $0x80] sm:$0xff]  ;;  %v272_v53 = vld [vmem:[%s9245_s0 + $0x88] sm:$0xff]  ;;  %s9033_s15 = scalar_lea.vmem [#allocation2], %s4173_s27 }
  0x19   : > { %s251_s9 = sadd.s32 %s4175_s7, %s4174_s8  ;;  %v273_v56 = vld [vmem:[%s9245_s0 + $0x90] sm:$0xff]  ;;  %v274_v59 = vld [vmem:[%s9245_s0 + $0x98] sm:$0xff]  ;;  %v275_v62 = vld [vmem:[%s9245_s0 + $0xa0] sm:$0xff]  ;;  %s4484_s24 = sshll.u32 (%p4788_p5), %s4703_s18, 3 }
  0x1a   : > { %s4176_s10 = sshll.u32 %s251_s9, 3  ;;  %s4033_s25 = sadd.s32 (%p4788_p5), %s4484_s24, %s4483_s14 }
  0x1b   : > { %s4808_s13 = scalar_lea.vmem %s9246_s1, %s4176_s10  ;;  %s4485_s27 = sshll.u32 (%p4788_p5), %s4033_s25, 2 }
  0x1c   : > { %v334_v0 = vld [vmem:[%s4808_s13 + $0x78] sm:$0xff]  ;;  %v333_v2 = vld [vmem:[%s4808_s13 + $0x70] sm:$0xff]  ;;  %v332_v4 = vld [vmem:[%s4808_s13 + $0x68] sm:$0xff]  ;;  %s4035_s5 = scalar_lea.vmem (%p4788_p5), %s9249_s4, %s4485_s27 }
  0x1d   : > { %v350_v1 = vld [vmem:[%s4808_s13 + $0xf8] sm:$0xff]  ;;  %4177 = vmatpush.xpose.msk.msra.mxu0 %vm351_vm0, %v334_v0  ;;  %v349_v3 = vld [vmem:[%s4808_s13 + $0xf0] sm:$0xff]  ;;  %v348_v5 = vld [vmem:[%s4808_s13 + $0xe8] sm:$0xff] }
  0x1e   : > { %4257 = vmatpush.xpose.msk.msra.mxu1 %vm351_vm0, %v350_v1  ;;  %v331_v6 = vld [vmem:[%s4808_s13 + $0x60] sm:$0xff]  ;;  %v330_v8 = vld [vmem:[%s4808_s13 + $0x58] sm:$0xff]  ;;  %v329_v10 = vld [vmem:[%s4808_s13 + $0x50] sm:$0xff] }
  0x1f   : > { %v347_v7 = vld [vmem:[%s4808_s13 + $0xe0] sm:$0xff]  ;;  %v346_v9 = vld [vmem:[%s4808_s13 + $0xd8] sm:$0xff]  ;;  %v345_v11 = vld [vmem:[%s4808_s13 + $0xd0] sm:$0xff] }
  0x20   : > { %v328_v12 = vld [vmem:[%s4808_s13 + $0x48] sm:$0xff]  ;;  %v327_v14 = vld [vmem:[%s4808_s13 + $0x40] sm:$0xff]  ;;  %v326_v16 = vld [vmem:[%s4808_s13 + $0x38] sm:$0xff] }
  0x21   : > { %4178 = vmatpush.xpose.msk.msra.mxu0 %vm351_vm0, %v333_v2  ;;  %v344_v13 = vld [vmem:[%s4808_s13 + $0xc8] sm:$0xff]  ;;  %v343_v15 = vld [vmem:[%s4808_s13 + $0xc0] sm:$0xff]  ;;  %v342_v17 = vld [vmem:[%s4808_s13 + $0xb8] sm:$0xff] }
  0x22   : > { %4258 = vmatpush.xpose.msk.msra.mxu1 %vm351_vm0, %v349_v3  ;;  %v325_v18 = vld [vmem:[%s4808_s13 + $0x30] sm:$0xff]  ;;  %v324_v20 = vld [vmem:[%s4808_s13 + $0x28] sm:$0xff]  ;;  %v323_v22 = vld [vmem:[%s4808_s13 + $0x20] sm:$0xff] }
  0x23   : > { %v341_v19 = vld [vmem:[%s4808_s13 + $0xb0] sm:$0xff]  ;;  %v340_v21 = vld [vmem:[%s4808_s13 + $0xa8] sm:$0xff]  ;;  %v339_v23 = vld [vmem:[%s4808_s13 + $0xa0] sm:$0xff] }
  0x24   : > { %v322_v24 = vld [vmem:[%s4808_s13 + $0x18] sm:$0xff]  ;;  %v321_v26 = vld [vmem:[%s4808_s13 + $0x10] sm:$0xff]  ;;  %v320_v28 = vld [vmem:[%s4808_s13 + $0x8] sm:$0xff] }
  0x25   : > { %4179 = vmatpush.xpose.msk.msra.mxu0 %vm351_vm0, %v332_v4  ;;  %v338_v25 = vld [vmem:[%s4808_s13 + $0x98] sm:$0xff]  ;;  %v337_v27 = vld [vmem:[%s4808_s13 + $0x90] sm:$0xff]  ;;  %v336_v29 = vld [vmem:[%s4808_s13 + $0x88] sm:$0xff] }
  0x26   : > { %4259 = vmatpush.xpose.msk.msra.mxu1 %vm351_vm0, %v348_v5  ;;  %v319_v30 = vld [vmem:[%s4808_s13] sm:$0xff]  ;;  %v276_v1 = vld [vmem:[%s9245_s0 + $0xa8] sm:$0xff]  ;;  %v277_v4 = vld [vmem:[%s9245_s0 + $0xb0] sm:$0xff] }
  0x27   : > { %v335_v31 = vld [vmem:[%s4808_s13 + $0x80] sm:$0xff] }
  0x29   : > { %4180 = vmatpush.xpose.msk.msra.mxu0 %vm351_vm0, %v331_v6 }
  0x2a   : > { %4260 = vmatpush.xpose.msk.msra.mxu1 %vm351_vm0, %v347_v7  ;;  %v278_v7 = vld [vmem:[%s9245_s0 + $0xb8] sm:$0xff] }
  0x2d   : > { %4181 = vmatpush.xpose.msk.msra.mxu0 %vm351_vm0, %v330_v8 }
  0x2e   : > { %4261 = vmatpush.xpose.msk.msra.mxu1 %vm351_vm0, %v346_v9 }
  0x31   : > { %4182 = vmatpush.xpose.msk.msra.mxu0 %vm351_vm0, %v329_v10  ;;  %v279_v10 = vld [vmem:[%s9245_s0 + $0xc0] sm:$0xff] }
  0x32   : > { %4262 = vmatpush.xpose.msk.msra.mxu1 %vm351_vm0, %v345_v11 }
  0x35   : > { %4183 = vmatpush.xpose.msk.msra.mxu0 %vm351_vm0, %v328_v12 }
  0x36   : > { %4263 = vmatpush.xpose.msk.msra.mxu1 %vm351_vm0, %v344_v13  ;;  %v280_v13 = vld [vmem:[%s9245_s0 + $0xc8] sm:$0xff] }
  0x39   : > { %4184 = vmatpush.xpose.msk.msra.mxu0 %vm351_vm0, %v327_v14 }
  0x3a   : > { %4264 = vmatpush.xpose.msk.msra.mxu1 %vm351_vm0, %v343_v15 }
  0x3d   : > { %4185 = vmatpush.xpose.msk.msra.mxu0 %vm351_vm0, %v326_v16  ;;  %v281_v16 = vld [vmem:[%s9245_s0 + $0xd0] sm:$0xff] }
  0x3e   : > { %4265 = vmatpush.xpose.msk.msra.mxu1 %vm351_vm0, %v342_v17 }
  0x41   : > { %4186 = vmatpush.xpose.msk.msra.mxu0 %vm351_vm0, %v325_v18 }
  0x42   : > { %4266 = vmatpush.xpose.msk.msra.mxu1 %vm351_vm0, %v341_v19  ;;  %v282_v19 = vld [vmem:[%s9245_s0 + $0xd8] sm:$0xff] }
  0x45   : > { %4187 = vmatpush.xpose.msk.msra.mxu0 %vm351_vm0, %v324_v20 }
  0x46   : > { %4267 = vmatpush.xpose.msk.msra.mxu1 %vm351_vm0, %v340_v21 }
  0x49   : > { %4188 = vmatpush.xpose.msk.msra.mxu0 %vm351_vm0, %v323_v22  ;;  %v283_v22 = vld [vmem:[%s9245_s0 + $0xe0] sm:$0xff] }
  0x4a   : > { %4268 = vmatpush.xpose.msk.msra.mxu1 %vm351_vm0, %v339_v23 }
  0x4d   : > { %4189 = vmatpush.xpose.msk.msra.mxu0 %vm351_vm0, %v322_v24 }
  0x4e   : > { %4269 = vmatpush.xpose.msk.msra.mxu1 %vm351_vm0, %v338_v25  ;;  %v284_v25 = vld [vmem:[%s9245_s0 + $0xe8] sm:$0xff] }
  0x51   : > { %4190 = vmatpush.xpose.msk.msra.mxu0 %vm351_vm0, %v321_v26 }
  0x52   : > { %4270 = vmatpush.xpose.msk.msra.mxu1 %vm351_vm0, %v337_v27 }
  0x55   : > { %4191 = vmatpush.xpose.msk.msra.mxu0 %vm351_vm0, %v320_v28  ;;  %v285_v28 = vld [vmem:[%s9245_s0 + $0xf0] sm:$0xff] }
  0x56   : > { %4271 = vmatpush.xpose.msk.msra.mxu1 %vm351_vm0, %v336_v29 }
  0x59   : > { %4192 = vmatpush.xpose.msk.msra.mxu0 %vm351_vm0, %v319_v30 }
  0x5a   : > { %4272 = vmatpush.xpose.msk.msra.mxu1 %vm351_vm0, %v335_v31 }
  0x5c   : > { %4193 = vmatmul.msk.f32.vlgmr.msra.gmra.mxu0 %vm351_vm0, %v255_v32 }
  0x5d   : > { %4273 = vmatmul.msk.f32.vlgmr.msra.gmra.mxu1 %vm351_vm0, %v255_v32 }
  0x64   : > { %4194 = vmatmul.msk.f32.gmra.mxu0 %vm351_vm0, %v256_v33 }
  0x65   : > { %4274 = vmatmul.msk.f32.gmra.mxu1 %vm351_vm0, %v256_v33 }
  0x6c   : > { %4195 = vmatmul.msk.f32.gmra.mxu0 %vm351_vm0, %v257_v34 }
  0x6d   : > { %4275 = vmatmul.msk.f32.gmra.mxu1 %vm351_vm0, %v257_v34  ;;  %v286_v34 = vld [vmem:[%s9245_s0 + $0xf8] sm:$0xff] }
  0x74   : > { %4196 = vmatmul.msk.f32.gmra.mxu0 %vm351_vm0, %v258_v35 }
  0x75   : > { %4276 = vmatmul.msk.f32.gmra.mxu1 %vm351_vm0, %v258_v35 }
  0x7c   : > { %4197 = vmatmul.msk.f32.gmra.mxu0 %vm351_vm0, %v259_v36 }
  0x7d   : > { %4277 = vmatmul.msk.f32.gmra.mxu1 %vm351_vm0, %v259_v36 }
  0x84   : > { %4198 = vmatmul.msk.f32.gmra.mxu0 %vm351_vm0, %v260_v37 }
  0x85   : > { %4278 = vmatmul.msk.f32.gmra.mxu1 %vm351_vm0, %v260_v37 }
  0x8c   : > { %4199 = vmatmul.msk.f32.gmra.mxu0 %vm351_vm0, %v261_v38 }
  0x8d   : > { %4279 = vmatmul.msk.f32.gmra.mxu1 %vm351_vm0, %v261_v38 }
  0x94   : > { %4200 = vmatmul.msk.f32.gmra.mxu0 %vm351_vm0, %v262_v39 }
  0x95   : > { %4280 = vmatmul.msk.f32.gmra.mxu1 %vm351_vm0, %v262_v39 }
  0x9c   : > { %4201 = vmatmul.msk.f32.gmra.mxu0 %vm351_vm0, %v263_v40 }
  0x9d   : > { %4281 = vmatmul.msk.f32.gmra.mxu1 %vm351_vm0, %v263_v40 }
  0xa4   : > { %4202 = vmatmul.msk.f32.gmra.mxu0 %vm351_vm0, %v264_v41 }
  0xa5   : > { %4282 = vmatmul.msk.f32.gmra.mxu1 %vm351_vm0, %v264_v41 }
  0xac   : > { %4203 = vmatmul.msk.f32.gmra.mxu0 %vm351_vm0, %v265_v42 }
  0xad   : > { %4283 = vmatmul.msk.f32.gmra.mxu1 %vm351_vm0, %v265_v42 }
  0xb4   : > { %4204 = vmatmul.msk.f32.gmra.mxu0 %vm351_vm0, %v266_v43 }
  0xb5   : > { %4284 = vmatmul.msk.f32.gmra.mxu1 %vm351_vm0, %v266_v43 }
  0xbc   : > { %4205 = vmatmul.msk.f32.gmra.mxu0 %vm351_vm0, %v267_v44 }
  0xbd   : > { %4285 = vmatmul.msk.f32.gmra.mxu1 %vm351_vm0, %v267_v44 }
  0xc4   : > { %4206 = vmatmul.msk.f32.gmra.mxu0 %vm351_vm0, %v268_v45 }
  0xc5   : > { %4286 = vmatmul.msk.f32.gmra.mxu1 %vm351_vm0, %v268_v45 }
  0xcc   : > { %4207 = vmatmul.msk.f32.gmra.mxu0 %vm351_vm0, %v269_v46 }
  0xcd   : > { %4287 = vmatmul.msk.f32.gmra.mxu1 %vm351_vm0, %v269_v46 }
  0xd4   : > { %4208 = vmatmul.msk.f32.gmra.mxu0 %vm351_vm0, %v270_v47 }
  0xd5   : > { %4288 = vmatmul.msk.f32.gmra.mxu1 %vm351_vm0, %v270_v47 }
  0xd9   : > { %v4954_v48 = vpop.f32.mrf.mxu0 }
  0xda   : > { %9902 = vst [vmem:[#allocation3_spill] sm:$0xff] %v4954_v48  ;;  %v4956_v49 = vpop.f32.mrf.mxu1  ;;  %1058 = vmax.xlane.f32.xlu2 %v4954_v48 }
  0xdb   : > { %9903 = vst [vmem:[#allocation4_spill] sm:$0xff] %v4956_v49  ;;  %1698 = vmax.xlane.f32.xlu1 %v4956_v49 }
  0xdc   : > { %4209 = vmatmul.msk.f32.gmra.mxu0 %vm351_vm0, %v271_v50 }
  0xdd   : > { %4289 = vmatmul.msk.f32.gmra.mxu1 %vm351_vm0, %v271_v50 }
  0xe1   : > { %v4965_v51 = vpop.f32.mrf.mxu0 }
  0xe2   : > { %9904 = vst [vmem:[#allocation5_spill] sm:$0xff] %v4965_v51  ;;  %v4967_v52 = vpop.f32.mrf.mxu1 }
  0xe3   : > { %9905 = vst [vmem:[#allocation6_spill] sm:$0xff] %v4967_v52  ;;  %1700 = vmax.xlane.f32.xlu0 %v4967_v52 }
  0xe4   : > { %4210 = vmatmul.msk.f32.gmra.mxu0 %vm351_vm0, %v272_v53 }
  0xe5   : > { %4290 = vmatmul.msk.f32.gmra.mxu1 %vm351_vm0, %v272_v53 }
  0xe9   : > { %v4975_v54 = vpop.f32.mrf.mxu0 }
  0xea   : > { %9906 = vst [vmem:[#allocation7_spill] sm:$0xff] %v4975_v54  ;;  %v4977_v55 = vpop.f32.mrf.mxu1 }
  0xeb   : > { %9907 = vst [vmem:[#allocation8_spill] sm:$0xff] %v4977_v55  ;;  %1702 = vmax.xlane.f32.xlu2 %v4977_v55  ;;  %1060 = vmax.xlane.f32.xlu0 %v4965_v51 }
  0xec   : > { %4211 = vmatmul.msk.f32.gmra.mxu0 %vm351_vm0, %v273_v56 }
  0xed   : > { %4291 = vmatmul.msk.f32.gmra.mxu1 %vm351_vm0, %v273_v56 }
  0xf1   : > { %v4986_v57 = vpop.f32.mrf.mxu0 }
  0xf2   : > { %9908 = vst [vmem:[#allocation9_spill] sm:$0xff] %v4986_v57  ;;  %v4988_v58 = vpop.f32.mrf.mxu1 }
  0xf3   : > { %9909 = vst [vmem:[#allocation10_spill] sm:$0xff] %v4988_v58  ;;  %1704 = vmax.xlane.f32.xlu1 %v4988_v58  ;;  %1062 = vmax.xlane.f32.xlu2 %v4975_v54 }
  0xf4   : > { %4212 = vmatmul.msk.f32.gmra.mxu0 %vm351_vm0, %v274_v59 }
  0xf5   : > { %4292 = vmatmul.msk.f32.gmra.mxu1 %vm351_vm0, %v274_v59 }
  0xf9   : > { %v4997_v60 = vpop.f32.mrf.mxu0 }
  0xfa   : > { %9910 = vst [vmem:[#allocation11_spill] sm:$0xff] %v4997_v60  ;;  %v4999_v61 = vpop.f32.mrf.mxu1 }
  0xfb   : > { %9911 = vst [vmem:[#allocation12_spill] sm:$0xff] %v4999_v61  ;;  %1706 = vmax.xlane.f32.xlu0 %v4999_v61  ;;  %1064 = vmax.xlane.f32.xlu1 %v4986_v57 }
  0xfc   : > { %4213 = vmatmul.msk.f32.gmra.mxu0 %vm351_vm0, %v275_v62 }
  0xfd   : > { %4293 = vmatmul.msk.f32.gmra.mxu1 %vm351_vm0, %v275_v62 }
 0x101   : > { %v5008_v63 = vpop.f32.mrf.mxu0 }
 0x102   : > { %9912 = vst [vmem:[#allocation13_spill] sm:$0xff] %v5008_v63  ;;  %v5010_v0 = vpop.f32.mrf.mxu1 }
 0x103   : > { %9913 = vst [vmem:[#allocation14_spill] sm:$0xff] %v5010_v0  ;;  %1708 = vmax.xlane.f32.xlu2 %v5010_v0  ;;  %1066 = vmax.xlane.f32.xlu0 %v4997_v60 }
 0x104   : > { %4214 = vmatmul.msk.f32.gmra.mxu0 %vm351_vm0, %v276_v1 }
 0x105   : > { %4294 = vmatmul.msk.f32.gmra.mxu1 %vm351_vm0, %v276_v1 }
 0x109   : > { %v5019_v2 = vpop.f32.mrf.mxu0 }
 0x10a   : > { %9914 = vst [vmem:[#allocation15_spill] sm:$0xff] %v5019_v2  ;;  %v5021_v3 = vpop.f32.mrf.mxu1 }
 0x10b   : > { %9915 = vst [vmem:[#allocation16_spill] sm:$0xff] %v5021_v3  ;;  %1710 = vmax.xlane.f32.xlu1 %v5021_v3  ;;  %1068 = vmax.xlane.f32.xlu2 %v5008_v63 }
 0x10c   : > { %4215 = vmatmul.msk.f32.gmra.mxu0 %vm351_vm0, %v277_v4 }
 0x10d   : > { %4295 = vmatmul.msk.f32.gmra.mxu1 %vm351_vm0, %v277_v4 }
 0x111   : > { %v5030_v5 = vpop.f32.mrf.mxu0 }
 0x112   : > { %9916 = vst [vmem:[#allocation17_spill] sm:$0xff] %v5030_v5  ;;  %v5032_v6 = vpop.f32.mrf.mxu1 }
 0x113   : > { %9917 = vst [vmem:[#allocation18_spill] sm:$0xff] %v5032_v6  ;;  %1712 = vmax.xlane.f32.xlu0 %v5032_v6  ;;  %1070 = vmax.xlane.f32.xlu1 %v5019_v2 }
 0x114   : > { %4216 = vmatmul.msk.f32.gmra.mxu0 %vm351_vm0, %v278_v7 }
 0x115   : > { %4296 = vmatmul.msk.f32.gmra.mxu1 %vm351_vm0, %v278_v7 }
 0x119   : > { %v5041_v8 = vpop.f32.mrf.mxu0 }
 0x11a   : > { %9918 = vst [vmem:[#allocation19_spill] sm:$0xff] %v5041_v8  ;;  %v5043_v9 = vpop.f32.mrf.mxu1 }
 0x11b   : > { %9919 = vst [vmem:[#allocation20_spill] sm:$0xff] %v5043_v9  ;;  %1714 = vmax.xlane.f32.xlu2 %v5043_v9  ;;  %1072 = vmax.xlane.f32.xlu0 %v5030_v5 }
 0x11c   : > { %4217 = vmatmul.msk.f32.gmra.mxu0 %vm351_vm0, %v279_v10 }
 0x11d   : > { %4297 = vmatmul.msk.f32.gmra.mxu1 %vm351_vm0, %v279_v10 }
 0x121   : > { %v5052_v11 = vpop.f32.mrf.mxu0 }
 0x122   : > { %9920 = vst [vmem:[#allocation21_spill] sm:$0xff] %v5052_v11  ;;  %v5054_v12 = vpop.f32.mrf.mxu1 }
 0x123   : > { %9921 = vst [vmem:[#allocation22_spill] sm:$0xff] %v5054_v12  ;;  %1716 = vmax.xlane.f32.xlu1 %v5054_v12  ;;  %1074 = vmax.xlane.f32.xlu2 %v5041_v8 }
 0x124   : > { %4218 = vmatmul.msk.f32.gmra.mxu0 %vm351_vm0, %v280_v13 }
 0x125   : > { %4298 = vmatmul.msk.f32.gmra.mxu1 %vm351_vm0, %v280_v13 }
 0x129   : > { %v5063_v14 = vpop.f32.mrf.mxu0 }
 0x12a   : > { %9922 = vst [vmem:[#allocation23_spill] sm:$0xff] %v5063_v14  ;;  %v5065_v15 = vpop.f32.mrf.mxu1 }
 0x12b   : > { %9923 = vst [vmem:[#allocation24_spill] sm:$0xff] %v5065_v15  ;;  %1718 = vmax.xlane.f32.xlu0 %v5065_v15  ;;  %1076 = vmax.xlane.f32.xlu1 %v5052_v11 }
 0x12c   : > { %4219 = vmatmul.msk.f32.gmra.mxu0 %vm351_vm0, %v281_v16 }
 0x12d   : > { %4299 = vmatmul.msk.f32.gmra.mxu1 %vm351_vm0, %v281_v16 }
 0x131   : > { %v5074_v17 = vpop.f32.mrf.mxu0 }
 0x132   : > { %9924 = vst [vmem:[#allocation25_spill] sm:$0xff] %v5074_v17  ;;  %v5076_v18 = vpop.f32.mrf.mxu1 }
 0x133   : > { %9925 = vst [vmem:[#allocation26_spill] sm:$0xff] %v5076_v18  ;;  %1720 = vmax.xlane.f32.xlu2 %v5076_v18  ;;  %1078 = vmax.xlane.f32.xlu0 %v5063_v14 }
 0x134   : > { %4220 = vmatmul.msk.f32.gmra.mxu0 %vm351_vm0, %v282_v19 }
 0x135   : > { %4300 = vmatmul.msk.f32.gmra.mxu1 %vm351_vm0, %v282_v19 }
 0x139   : > { %v5085_v20 = vpop.f32.mrf.mxu0 }
 0x13a   : > { %9926 = vst [vmem:[#allocation27_spill] sm:$0xff] %v5085_v20  ;;  %v5087_v21 = vpop.f32.mrf.mxu1 }
 0x13b   : > { %9927 = vst [vmem:[#allocation28_spill] sm:$0xff] %v5087_v21  ;;  %1722 = vmax.xlane.f32.xlu1 %v5087_v21  ;;  %1080 = vmax.xlane.f32.xlu2 %v5074_v17 }
 0x13c   : > { %4221 = vmatmul.msk.f32.gmra.mxu0 %vm351_vm0, %v283_v22 }
 0x13d   : > { %4301 = vmatmul.msk.f32.gmra.mxu1 %vm351_vm0, %v283_v22 }
 0x141   : > { %v5096_v23 = vpop.f32.mrf.mxu0 }
 0x142   : > { %9928 = vst [vmem:[#allocation29_spill] sm:$0xff] %v5096_v23  ;;  %v5098_v24 = vpop.f32.mrf.mxu1 }
 0x143   : > { %9929 = vst [vmem:[#allocation30_spill] sm:$0xff] %v5098_v24  ;;  %1724 = vmax.xlane.f32.xlu0 %v5098_v24  ;;  %1082 = vmax.xlane.f32.xlu1 %v5085_v20 }
 0x144   : > { %4222 = vmatmul.msk.f32.gmra.mxu0 %vm351_vm0, %v284_v25 }
 0x145   : > { %4302 = vmatmul.msk.f32.gmra.mxu1 %vm351_vm0, %v284_v25 }
 0x149   : > { %v5107_v26 = vpop.f32.mrf.mxu0 }
 0x14a   : > { %9930 = vst [vmem:[#allocation31_spill] sm:$0xff] %v5107_v26  ;;  %v5109_v27 = vpop.f32.mrf.mxu1  ;;  %1086 = vmax.xlane.f32.xlu2 %v5107_v26 }
 0x14b   : > { %9931 = vst [vmem:[#allocation32_spill] sm:$0xff] %v5109_v27  ;;  %1726 = vmax.xlane.f32.xlu1 %v5109_v27  ;;  %1084 = vmax.xlane.f32.xlu0 %v5096_v23 }
 0x14c   : > { %4223 = vmatmul.msk.f32.gmra.mxu0 %vm351_vm0, %v285_v28 }
 0x14d   : > { %4303 = vmatmul.msk.f32.gmra.mxu1 %vm351_vm0, %v285_v28  ;;  %v5121_v30 = vpop.xlane.xlu2 %1058 }
 0x14e   : > { %v5119_v29 = vpop.xlane.xlu1 %1698  ;;  %9933 = vst [vmem:[#allocation34_spill] sm:$0xff] %v5121_v30  ;;  %vm1186_vm1 = vcmp.ge.f32.partialorder %v4954_v48, %v5121_v30 }
 0x14f   : > { %9932 = vst [vmem:[#allocation33_spill] sm:$0xff] %v5119_v29  ;;  %vm1826_vm2 = vcmp.ge.f32.partialorder %v4956_v49, %v5119_v29  ;;  %v1250_v31 = vsel %vm1186_vm1, -inf, %v4954_v48 }
 0x150   : > { %v1890_v33 = vsel %vm1826_vm2, -inf, %v4956_v49 }
 0x151   : > { %v5138_v36 = vpop.f32.mrf.mxu0 }
 0x152   : > { %v5128_v32 = vpop.f32.mrf.mxu1  ;;  %1954 = vmax.xlane.f32.xlu2 %v1890_v33  ;;  %9936 = vst [vmem:[#allocation37_spill] sm:$0xff] %v5138_v36 }
 0x153   : > { %9934 = vst [vmem:[#allocation35_spill] sm:$0xff] %v5128_v32  ;;  %1314 = vmax.xlane.f32.xlu0 %v1250_v31 }
 0x154   : > { %4224 = vmatmul.msk.f32.gmra.mxu0 %vm351_vm0, %v286_v34 }
 0x155   : > { %4304 = vmatmul.msk.f32.gmra.mxu1 %vm351_vm0, %v286_v34 }
 0x156   : > { %v5136_v35 = vpop.xlane.xlu0 %1700 }
 0x157   : > { %9935 = vst [vmem:[#allocation36_spill] sm:$0xff] %v5136_v35  ;;  %vm1827_vm3 = vcmp.ge.f32.partialorder %v4967_v52, %v5136_v35 }
 0x158   : > { %v1891_v37 = vsel %vm1827_vm3, -inf, %v4967_v52 }
 0x159   : > { %1956 = vmax.xlane.f32.xlu1 %v1891_v37  ;;  %v5152_v41 = vpop.f32.mrf.mxu0 }
 0x15a   : > { %1088 = vmax.xlane.f32.xlu2 %v5138_v36  ;;  %v5145_v38 = vpop.f32.mrf.mxu1  ;;  %9939 = vst [vmem:[#allocation40_spill] sm:$0xff] %v5152_v41 }
 0x15b   : > { %1728 = vmax.xlane.f32.xlu0 %v5128_v32  ;;  %9937 = vst [vmem:[#allocation38_spill] sm:$0xff] %v5145_v38 }
 0x15e   : > { %v5147_v39 = vpop.xlane.xlu0 %1060  ;;  %v5154_v42 = vpop.xlane.xlu2 %1702 }
 0x15f   : > { %9938 = vst [vmem:[#allocation39_spill] sm:$0xff] %v5147_v39  ;;  %vm1187_vm4 = vcmp.ge.f32.partialorder %v4965_v51, %v5147_v39  ;;  %vm1828_vm5 = vcmp.ge.f32.partialorder %v4977_v55, %v5154_v42 }
 0x160   : > { %v1251_v40 = vsel %vm1187_vm4, -inf, %v4965_v51  ;;  %9940 = vst [vmem:[#allocation41_spill] sm:$0xff] %v5154_v42  ;;  %v1892_v45 = vsel %vm1828_vm5, -inf, %v4977_v55 }
 0x161   : > { %1316 = vmax.xlane.f32.xlu1 %v1251_v40  ;;  %v5173_v53 = vpop.f32.mrf.mxu0 }
 0x162   : > { %1730 = vmax.xlane.f32.xlu2 %v5145_v38  ;;  %v5160_v44 = vpop.f32.mrf.mxu1  ;;  %9945 = vst [vmem:[#allocation46_spill] sm:$0xff] %v5173_v53 }
 0x163   : > { %1090 = vmax.xlane.f32.xlu0 %v5152_v41  ;;  %9942 = vst [vmem:[#allocation43_spill] sm:$0xff] %v5160_v44 }
 0x166   : > { %v5158_v43 = vpop.xlane.xlu1 %1704  ;;  %v5169_v47 = vpop.xlane.xlu2 %1062 }
 0x167   : > { %9941 = vst [vmem:[#allocation42_spill] sm:$0xff] %v5158_v43  ;;  %vm1829_vm6 = vcmp.ge.f32.partialorder %v4988_v58, %v5158_v43  ;;  %vm1188_vm7 = vcmp.ge.f32.partialorder %v4975_v54, %v5169_v47 }
 0x168   : > { %v1893_v46 = vsel %vm1829_vm6, -inf, %v4988_v58  ;;  %9943 = vst [vmem:[#allocation44_spill] sm:$0xff] %v5169_v47  ;;  %v1252_v62 = vsel %vm1188_vm7, -inf, %v4975_v54 }
 0x169   : > { %1732 = vmax.xlane.f32.xlu1 %v5160_v44  ;;  %v5188_v4 = vpop.f32.mrf.mxu0 }
 0x16a   : > { %1960 = vmax.xlane.f32.xlu2 %v1893_v46  ;;  %v5175_v56 = vpop.f32.mrf.mxu1  ;;  %9948 = vst [vmem:[#allocation49_spill] sm:$0xff] %v5188_v4 }
 0x16b   : > { %1958 = vmax.xlane.f32.xlu0 %v1892_v45  ;;  %9946 = vst [vmem:[#allocation47_spill] sm:$0xff] %v5175_v56 }
 0x16e   : > { %v5171_v50 = vpop.xlane.xlu1 %1064  ;;  %v5179_v59 = vpop.xlane.xlu0 %1706 }
 0x16f   : > { %9944 = vst [vmem:[#allocation45_spill] sm:$0xff] %v5171_v50  ;;  %vm1189_vm8 = vcmp.ge.f32.partialorder %v4986_v57, %v5171_v50  ;;  %vm1830_vm9 = vcmp.ge.f32.partialorder %v4999_v61, %v5179_v59 }
 0x170   : > { %9947 = vst [vmem:[#allocation48_spill] sm:$0xff] %v5179_v59  ;;  %v1253_v1 = vsel %vm1189_vm8, -inf, %v4986_v57  ;;  %v1894_v7 = vsel %vm1830_vm9, -inf, %v4999_v61 }
 0x171   : > { %1092 = vmax.xlane.f32.xlu1 %v5173_v53  ;;  %v5200_v19 = vpop.f32.mrf.mxu0 }
 0x172   : > { %1320 = vmax.xlane.f32.xlu2 %v1253_v1  ;;  %v5191_v10 = vpop.f32.mrf.mxu1  ;;  %9951 = vst [vmem:[#allocation52_spill] sm:$0xff] %v5200_v19 }
 0x173   : > { %1318 = vmax.xlane.f32.xlu0 %v1252_v62  ;;  %9949 = vst [vmem:[#allocation50_spill] sm:$0xff] %v5191_v10 }
 0x176   : > { %v5193_v13 = vpop.xlane.xlu0 %1066  ;;  %v5202_v22 = vpop.xlane.xlu2 %1708 }
 0x177   : > { %9950 = vst [vmem:[#allocation51_spill] sm:$0xff] %v5193_v13  ;;  %vm1190_vm10 = vcmp.ge.f32.partialorder %v4997_v60, %v5193_v13  ;;  %vm1831_vm11 = vcmp.ge.f32.partialorder %v5010_v0, %v5202_v22 }
 0x178   : > { %v1254_v16 = vsel %vm1190_vm10, -inf, %v4997_v60  ;;  %9952 = vst [vmem:[#allocation53_spill] sm:$0xff] %v5202_v22  ;;  %v1895_v33 = vsel %vm1831_vm11, -inf, %v5010_v0 }
 0x179   : > { %1962 = vmax.xlane.f32.xlu1 %v1894_v7  ;;  %v5215_v31 = vpop.f32.mrf.mxu0 }
 0x17a   : > { %1736 = vmax.xlane.f32.xlu2 %v5191_v10  ;;  %v5208_v28 = vpop.f32.mrf.mxu1  ;;  %9955 = vst [vmem:[#allocation56_spill] sm:$0xff] %v5215_v31 }
 0x17b   : > { %1734 = vmax.xlane.f32.xlu0 %v5175_v56  ;;  %9954 = vst [vmem:[#allocation55_spill] sm:$0xff] %v5208_v28 }
 0x17e   : > { %v5204_v25 = vpop.xlane.xlu1 %1710  ;;  %v5219_v37 = vpop.xlane.xlu2 %1068 }
 0x17f   : > { %9953 = vst [vmem:[#allocation54_spill] sm:$0xff] %v5204_v25  ;;  %vm1832_vm12 = vcmp.ge.f32.partialorder %v5021_v3, %v5204_v25  ;;  %vm1191_vm13 = vcmp.ge.f32.partialorder %v5008_v63, %v5219_v37 }
 0x180   : > { %v1896_v34 = vsel %vm1832_vm12, -inf, %v5021_v3  ;;  %9956 = vst [vmem:[#allocation57_spill] sm:$0xff] %v5219_v37  ;;  %v1255_v1 = vsel %vm1191_vm13, -inf, %v5008_v63 }
 0x181   : > { %1322 = vmax.xlane.f32.xlu1 %v1254_v16  ;;  %v5232_v62 = vpop.f32.mrf.mxu0 }
 0x182   : > { %1096 = vmax.xlane.f32.xlu2 %v5200_v19  ;;  %v5223_v45 = vpop.f32.mrf.mxu1  ;;  %9960 = vst [vmem:[#allocation61_spill] sm:$0xff] %v5232_v62 }
 0x183   : > { %1094 = vmax.xlane.f32.xlu0 %v5188_v4  ;;  %9958 = vst [vmem:[#allocation59_spill] sm:$0xff] %v5223_v45 }
 0x186   : > { %v5221_v40 = vpop.xlane.xlu1 %1070  ;;  %v5227_v46 = vpop.xlane.xlu0 %1712 }
 0x187   : > { %9957 = vst [vmem:[#allocation58_spill] sm:$0xff] %v5221_v40  ;;  %vm1192_vm14 = vcmp.ge.f32.partialorder %v5019_v2, %v5221_v40  ;;  %vm1833_vm15 = vcmp.ge.f32.partialorder %v5032_v6, %v5227_v46 }
 0x188   : > { %9959 = vst [vmem:[#allocation60_spill] sm:$0xff] %v5227_v46  ;;  %v1256_v7 = vsel %vm1192_vm14, -inf, %v5019_v2  ;;  %v1897_v16 = vsel %vm1833_vm15, -inf, %v5032_v6 }
 0x189   : > { %1738 = vmax.xlane.f32.xlu1 %v5208_v28  ;;  %v5246_v29 = vpop.f32.mrf.mxu0 }
 0x18a   : > { %1966 = vmax.xlane.f32.xlu2 %v1896_v34  ;;  %9964 = vst [vmem:[#allocation65_spill] sm:$0xff] %v5246_v29 }
 0x18b   : > { %1964 = vmax.xlane.f32.xlu0 %v1895_v33  ;;  %v5239_v33 = vpop.f32.mrf.mxu1 }
 0x18c   : > { %9961 = vst [vmem:[#allocation62_spill] sm:$0xff] %v5239_v33 }
 0x18e   : > { %v5241_v34 = vpop.xlane.xlu0 %1072  ;;  %v5243_v35 = vpop.xlane.xlu2 %1714 }
 0x18f   : > { %9962 = vst [vmem:[#allocation63_spill] sm:$0xff] %v5241_v34  ;;  %vm1193_vm1 = vcmp.ge.f32.partialorder %v5030_v5, %v5241_v34  ;;  %vm1834_vm2 = vcmp.ge.f32.partialorder %v5043_v9, %v5243_v35 }
 0x190   : > { %9963 = vst [vmem:[#allocation64_spill] sm:$0xff] %v5243_v35 }
 0x191   : > { %1098 = vmax.xlane.f32.xlu1 %v5215_v31 }
 0x192   : > { %1326 = vmax.xlane.f32.xlu2 %v1256_v7  ;;  %v1257_v7 = vsel %vm1193_vm1, -inf, %v5030_v5 }
 0x193   : > { %1324 = vmax.xlane.f32.xlu0 %v1255_v1  ;;  %v5262_v42 = vpop.f32.mrf.mxu1 }
 0x194   : > { %9969 = vst [vmem:[#allocation70_spill] sm:$0xff] %v5262_v42 }
 0x196   : > { %v5251_v1 = vpop.xlane.xlu1 %1716  ;;  %v5260_v30 = vpop.xlane.xlu2 %1074 }
 0x197   : > { %9965 = vst [vmem:[#allocation66_spill] sm:$0xff] %v5251_v1  ;;  %vm1835_vm3 = vcmp.ge.f32.partialorder %v5054_v12, %v5251_v1  ;;  %vm1194_vm4 = vcmp.ge.f32.partialorder %v5041_v8, %v5260_v30 }
 0x198   : > { %9968 = vst [vmem:[#allocation69_spill] sm:$0xff] %v5260_v30  ;;  %v1899_v43 = vsel %vm1835_vm3, -inf, %v5054_v12  ;;  %v287_v30 = vld [vmem:[%s9245_s0 + $0x100] sm:$0xff] }
 0x199   : > { %1968 = vmax.xlane.f32.xlu1 %v1897_v16  ;;  %v5255_v16 = vpop.f32.mrf.mxu0  ;;  %4305 = vmatmul.msk.f32.gmra.mxu1 %vm351_vm0, %v287_v30 }
 0x19a   : > { %1742 = vmax.xlane.f32.xlu2 %v5239_v33  ;;  %9966 = vst [vmem:[#allocation67_spill] sm:$0xff] %v5255_v16  ;;  %4225 = vmatmul.msk.f32.gmra.mxu0 %vm351_vm0, %v287_v30  ;;  %v288_v30 = vld [vmem:[%s9245_s0 + $0x108] sm:$0xff] }
 0x19b   : > { %1740 = vmax.xlane.f32.xlu0 %v5223_v45  ;;  %v5279_v49 = vpop.f32.mrf.mxu1 }
 0x19c   : > { %9974 = vst [vmem:[#allocation75_spill] sm:$0xff] %v5279_v49 }
 0x19e   : > { %v5257_v39 = vpop.xlane.xlu0 %1718  ;;  %v5266_v47 = vpop.xlane.xlu1 %1076 }
 0x19f   : > { %9967 = vst [vmem:[#allocation68_spill] sm:$0xff] %v5257_v39  ;;  %vm1195_vm5 = vcmp.ge.f32.partialorder %v5052_v11, %v5266_v47  ;;  %vm1836_vm6 = vcmp.ge.f32.partialorder %v5065_v15, %v5257_v39 }
 0x1a0   : > { %9970 = vst [vmem:[#allocation71_spill] sm:$0xff] %v5266_v47  ;;  %v1900_v25 = vsel %vm1836_vm6, -inf, %v5065_v15 }
 0x1a1   : > { %1328 = vmax.xlane.f32.xlu1 %v1257_v7  ;;  %v1898_v7 = vsel %vm1834_vm2, -inf, %v5043_v9  ;;  %v5273_v50 = vpop.f32.mrf.mxu0  ;;  %4306 = vmatmul.msk.f32.gmra.mxu1 %vm351_vm0, %v288_v30 }
 0x1a2   : > { %1102 = vmax.xlane.f32.xlu2 %v5246_v29  ;;  %9971 = vst [vmem:[#allocation72_spill] sm:$0xff] %v5273_v50  ;;  %4226 = vmatmul.msk.f32.gmra.mxu0 %vm351_vm0, %v288_v30 }
 0x1a3   : > { %1100 = vmax.xlane.f32.xlu0 %v5232_v62  ;;  %v5299_v13 = vpop.f32.mrf.mxu1 }
 0x1a4   : > { %9979 = vst [vmem:[#allocation80_spill] sm:$0xff] %v5299_v13 }
 0x1a6   : > { %v5275_v51 = vpop.xlane.xlu2 %1720  ;;  %v5277_v48 = vpop.xlane.xlu0 %1078 }
 0x1a7   : > { %9972 = vst [vmem:[#allocation73_spill] sm:$0xff] %v5275_v51  ;;  %vm1196_vm7 = vcmp.ge.f32.partialorder %v5063_v14, %v5277_v48  ;;  %vm1837_vm8 = vcmp.ge.f32.partialorder %v5076_v18, %v5275_v51 }
 0x1a8   : > { %9973 = vst [vmem:[#allocation74_spill] sm:$0xff] %v5277_v48  ;;  %v1260_v57 = vsel %vm1196_vm7, -inf, %v5063_v14  ;;  %v1901_v34 = vsel %vm1837_vm8, -inf, %v5076_v18 }
 0x1a9   : > { %1744 = vmax.xlane.f32.xlu1 %v5262_v42  ;;  %v5292_v54 = vpop.f32.mrf.mxu0 }
 0x1aa   : > { %1972 = vmax.xlane.f32.xlu2 %v1899_v43  ;;  %v1259_v43 = vsel %vm1195_vm5, -inf, %v5052_v11  ;;  %9976 = vst [vmem:[#allocation77_spill] sm:$0xff] %v5292_v54 }
 0x1ab   : > { %1970 = vmax.xlane.f32.xlu0 %v1898_v7  ;;  %v1258_v7 = vsel %vm1194_vm4, -inf, %v5041_v8  ;;  %v5320_v40 = vpop.f32.mrf.mxu1 }
 0x1ac   : > { %9986 = vst [vmem:[#allocation87_spill] sm:$0xff] %v5320_v40 }
 0x1ae   : > { %v5283_v52 = vpop.xlane.xlu1 %1722  ;;  %v5296_v22 = vpop.xlane.xlu2 %1080 }
 0x1af   : > { %9975 = vst [vmem:[#allocation76_spill] sm:$0xff] %v5283_v52  ;;  %vm1838_vm9 = vcmp.ge.f32.partialorder %v5087_v21, %v5283_v52  ;;  %vm1197_vm10 = vcmp.ge.f32.partialorder %v5074_v17, %v5296_v22 }
 0x1b0   : > { %9978 = vst [vmem:[#allocation79_spill] sm:$0xff] %v5296_v22  ;;  %v1902_v39 = vsel %vm1838_vm9, -inf, %v5087_v21 }
 0x1b1   : > { %1104 = vmax.xlane.f32.xlu1 %v5255_v16  ;;  %v5311_v37 = vpop.f32.mrf.mxu0 }
 0x1b2   : > { %1332 = vmax.xlane.f32.xlu2 %v1259_v43  ;;  %9983 = vst [vmem:[#allocation84_spill] sm:$0xff] %v5311_v37 }
 0x1b3   : > { %1330 = vmax.xlane.f32.xlu0 %v1258_v7  ;;  %v5339_v51 = vpop.f32.mrf.mxu1 }
 0x1b4   : > { %9992 = vst [vmem:[#allocation93_spill] sm:$0xff] %v5339_v51 }
 0x1b6   : > { %v5294_v59 = vpop.xlane.xlu0 %1724  ;;  %v5301_v46 = vpop.xlane.xlu1 %1082 }
 0x1b7   : > { %9977 = vst [vmem:[#allocation78_spill] sm:$0xff] %v5294_v59  ;;  %vm1198_vm11 = vcmp.ge.f32.partialorder %v5085_v20, %v5301_v46  ;;  %vm1839_vm12 = vcmp.ge.f32.partialorder %v5098_v24, %v5294_v59 }
 0x1b8   : > { %9980 = vst [vmem:[#allocation81_spill] sm:$0xff] %v5301_v46 }
 0x1b9   : > { %1974 = vmax.xlane.f32.xlu1 %v1900_v25 }
 0x1ba   : > { %1748 = vmax.xlane.f32.xlu2 %v5299_v13 }
 0x1bb   : > { %1746 = vmax.xlane.f32.xlu0 %v5279_v49 }
 0x1bd   : > { %v5309_v43 = vpop.xlane.xlu2 %1086 }
 0x1be   : > { %v5307_v7 = vpop.xlane.xlu0 %1084  ;;  %9982 = vst [vmem:[#allocation83_spill] sm:$0xff] %v5309_v43  ;;  %v5315_v25 = vpop.xlane.xlu1 %1726  ;;  %vm1200_vm1 = vcmp.ge.f32.partialorder %v5107_v26, %v5309_v43 }
 0x1bf   : > { %9981 = vst [vmem:[#allocation82_spill] sm:$0xff] %v5307_v7  ;;  %vm1199_vm13 = vcmp.ge.f32.partialorder %v5096_v23, %v5307_v7  ;;  %vm1840_vm14 = vcmp.ge.f32.partialorder %v5109_v27, %v5315_v25 }
 0x1c0   : > { %9984 = vst [vmem:[#allocation85_spill] sm:$0xff] %v5315_v25  ;;  %v1263_v30 = vsel %vm1199_vm13, -inf, %v5096_v23 }
 0x1c1   : > { %1334 = vmax.xlane.f32.xlu1 %v1260_v57  ;;  %v5329_v57 = vpop.f32.mrf.mxu0 }
 0x1c2   : > { %1108 = vmax.xlane.f32.xlu2 %v5292_v54  ;;  %9988 = vst [vmem:[#allocation89_spill] sm:$0xff] %v5329_v57 }
 0x1c3   : > { %1106 = vmax.xlane.f32.xlu0 %v5273_v50 }
 0x1c5   : > { %v5322_v1 = vpop.xlane.xlu2 %1954 }
 0x1c6   : > { %v5318_v35 = vpop.xlane.xlu0 %1314  ;;  %9987 = vst [vmem:[#allocation88_spill] sm:$0xff] %v5322_v1 }
 0x1c7   : > { %9985 = vst [vmem:[#allocation86_spill] sm:$0xff] %v5318_v35 }
 0x1c9   : > { %1750 = vmax.xlane.f32.xlu1 %v5320_v40 }
 0x1ca   : > { %1978 = vmax.xlane.f32.xlu2 %v1902_v39  ;;  %v1261_v39 = vsel %vm1197_vm10, -inf, %v5074_v17 }
 0x1cb   : > { %1976 = vmax.xlane.f32.xlu0 %v1901_v34  ;;  %v1262_v34 = vsel %vm1198_vm11, -inf, %v5085_v20 }
 0x1cc   : > { %v5333_v35 = vpop.xlane.xlu1 %1956 }
 0x1cd   : > { %9989 = vst [vmem:[#allocation90_spill] sm:$0xff] %v5333_v35  ;;  %v5337_v1 = vpop.xlane.xlu2 %1088  ;;  %v5353_v35 = vpop.f32.mrf.mxu0 }
 0x1ce   : > { %v5335_v47 = vpop.xlane.xlu0 %1728  ;;  %9991 = vst [vmem:[#allocation92_spill] sm:$0xff] %v5337_v1  ;;  %vm1201_vm15 = vcmp.ge.f32.partialorder %v5138_v36, %v5337_v1 }
 0x1cf   : > { %9990 = vst [vmem:[#allocation91_spill] sm:$0xff] %v5335_v47  ;;  %vm1841_vm2 = vcmp.ge.f32.partialorder %v5128_v32, %v5335_v47 }
 0x1d0   : > { %9993 = vst [vmem:[#allocation94_spill] sm:$0xff] %v5353_v35 }
 0x1d1   : > { %1110 = vmax.xlane.f32.xlu1 %v5311_v37 }
 0x1d2   : > { %1338 = vmax.xlane.f32.xlu2 %v1262_v34  ;;  %v5369_v34 = vpop.f32.mrf.mxu1 }
 0x1d3   : > { %1336 = vmax.xlane.f32.xlu0 %v1261_v39  ;;  %v1903_v39 = vsel %vm1839_vm12, -inf, %v5098_v24  ;;  %9997 = vst [vmem:[#allocation98_spill] sm:$0xff] %v5369_v34 }
 0x1d4   : > { %v5355_v52 = vpop.xlane.xlu1 %1316 }
 0x1d5   : > { %9994 = vst [vmem:[#allocation95_spill] sm:$0xff] %v5355_v52  ;;  %v5361_v22 = vpop.xlane.xlu2 %1730  ;;  %v5377_v59 = vpop.f32.mrf.mxu0 }
 0x1d6   : > { %v5359_v48 = vpop.xlane.xlu0 %1090  ;;  %9996 = vst [vmem:[#allocation97_spill] sm:$0xff] %v5361_v22  ;;  %vm1842_vm4 = vcmp.ge.f32.partialorder %v5145_v38, %v5361_v22 }
 0x1d7   : > { %9995 = vst [vmem:[#allocation96_spill] sm:$0xff] %v5359_v48  ;;  %vm1202_vm6 = vcmp.ge.f32.partialorder %v5152_v41, %v5359_v48 }
 0x1d8   : > { %9999 = vst [vmem:[#allocation100_spill] sm:$0xff] %v5377_v59 }
 0x1d9   : > { %1980 = vmax.xlane.f32.xlu1 %v1903_v39  ;;  %v289_v39 = vld [vmem:[%s9245_s0 + $0x110] sm:$0xff] }
 0x1da   : > { %1754 = vmax.xlane.f32.xlu2 %v5369_v34  ;;  %4307 = vmatmul.msk.f32.gmra.mxu1 %vm351_vm0, %v289_v39 }
 0x1db   : > { %1752 = vmax.xlane.f32.xlu0 %v5339_v51  ;;  %4227 = vmatmul.msk.f32.gmra.mxu0 %vm351_vm0, %v289_v39  ;;  %v5395_v51 = vpop.f32.mrf.mxu1  ;;  %v1904_v39 = vsel %vm1840_vm14, -inf, %v5109_v27  ;;  %v292_v27 = vld [vmem:[%s9245_s0 + $0x128] sm:$0xff] }
 0x1dc   : > { %v5373_v52 = vpop.xlane.xlu1 %1732  ;;  %10004 = vst [vmem:[#allocation105_spill] sm:$0xff] %v5395_v51 }
 0x1dd   : > { %9998 = vst [vmem:[#allocation99_spill] sm:$0xff] %v5373_v52  ;;  %v5381_v20 = vpop.xlane.xlu2 %1960  ;;  %v5399_v17 = vpop.f32.mrf.mxu0  ;;  %vm1843_vm3 = vcmp.ge.f32.partialorder %v5160_v44, %v5373_v52 }
 0x1de   : > { %v5379_v46 = vpop.xlane.xlu0 %1958  ;;  %10001 = vst [vmem:[#allocation102_spill] sm:$0xff] %v5381_v20  ;;  %vm2085_vm9 = vcmp.ge.f32.partialorder %v4988_v58, %v5381_v20 }
 0x1df   : > { %10000 = vst [vmem:[#allocation101_spill] sm:$0xff] %v5379_v46  ;;  %vm2084_vm8 = vcmp.ge.f32.partialorder %v4977_v55, %v5379_v46 }
 0x1e0   : > { %10006 = vst [vmem:[#allocation107_spill] sm:$0xff] %v5399_v17 }
 0x1e1   : > { %1340 = vmax.xlane.f32.xlu1 %v1263_v30  ;;  %v290_v30 = vld [vmem:[%s9245_s0 + $0x118] sm:$0xff] }
 0x1e2   : > { %1114 = vmax.xlane.f32.xlu2 %v5353_v35  ;;  %4308 = vmatmul.msk.f32.gmra.mxu1 %vm351_vm0, %v290_v30  ;;  %v291_v35 = vld [vmem:[%s9245_s0 + $0x120] sm:$0xff] }
 0x1e3   : > { %1112 = vmax.xlane.f32.xlu0 %v5329_v57  ;;  %4228 = vmatmul.msk.f32.gmra.mxu0 %vm351_vm0, %v290_v30 }
 0x1e4   : > { %v5391_v7 = vpop.xlane.xlu1 %1092 }
 0x1e5   : > { %10002 = vst [vmem:[#allocation103_spill] sm:$0xff] %v5391_v7  ;;  %v5397_v23 = vpop.xlane.xlu2 %1320  ;;  %v5425_v30 = vpop.f32.mrf.mxu0  ;;  %vm1203_vm5 = vcmp.ge.f32.partialorder %v5173_v53, %v5391_v7 }
 0x1e6   : > { %v5393_v34 = vpop.xlane.xlu0 %1318  ;;  %10005 = vst [vmem:[#allocation106_spill] sm:$0xff] %v5397_v23 }
 0x1e7   : > { %10003 = vst [vmem:[#allocation104_spill] sm:$0xff] %v5393_v34  ;;  %v1265_v34 = vsel %vm1201_vm15, -inf, %v5138_v36 }
 0x1e8   : > { %10010 = vst [vmem:[#allocation111_spill] sm:$0xff] %v5425_v30 }
 0x1e9   : > { %1756 = vmax.xlane.f32.xlu1 %v5395_v51 }
 0x1ea   : > { %1344 = vmax.xlane.f32.xlu2 %v1265_v34  ;;  %4309 = vmatmul.msk.f32.gmra.mxu1 %vm351_vm0, %v291_v35  ;;  %v1264_v34 = vsel %vm1200_vm1, -inf, %v5107_v26  ;;  %v1905_v26 = vsel %vm1841_vm2, -inf, %v5128_v32 }
 0x1eb   : > { %1982 = vmax.xlane.f32.xlu0 %v1904_v39  ;;  %4229 = vmatmul.msk.f32.gmra.mxu0 %vm351_vm0, %v291_v35  ;;  %v1907_v35 = vsel %vm1843_vm3, -inf, %v5160_v44  ;;  %v1266_v44 = vsel %vm1202_vm6, -inf, %v5152_v41 }
 0x1ec   : > { %v5413_v23 = vpop.xlane.xlu1 %1962 }
 0x1ed   : > { %10007 = vst [vmem:[#allocation108_spill] sm:$0xff] %v5413_v23  ;;  %v5417_v1 = vpop.xlane.xlu2 %1736  ;;  %vm2086_vm7 = vcmp.ge.f32.partialorder %v4999_v61, %v5413_v23 }
 0x1ee   : > { %v5415_v25 = vpop.xlane.xlu0 %1734  ;;  %10009 = vst [vmem:[#allocation110_spill] sm:$0xff] %v5417_v1  ;;  %vm1845_vm12 = vcmp.ge.f32.partialorder %v5191_v10, %v5417_v1 }
 0x1ef   : > { %10008 = vst [vmem:[#allocation109_spill] sm:$0xff] %v5415_v25  ;;  %vm1844_vm11 = vcmp.ge.f32.partialorder %v5175_v56, %v5415_v25 }
 0x1f1   : > { %1116 = vmax.xlane.f32.xlu1 %v5377_v59 }
 0x1f2   : > { %1120 = vmax.xlane.f32.xlu2 %v5425_v30  ;;  %4310 = vmatmul.msk.f32.gmra.mxu1 %vm351_vm0, %v292_v27  ;;  %v5453_v30 = vpop.f32.mrf.mxu1 }
 0x1f3   : > { %1342 = vmax.xlane.f32.xlu0 %v1264_v34  ;;  %4230 = vmatmul.msk.f32.gmra.mxu0 %vm351_vm0, %v292_v27  ;;  %10015 = vst [vmem:[#allocation116_spill] sm:$0xff] %v5453_v30  ;;  %v1906_v27 = vsel %vm1842_vm4, -inf, %v5145_v38 }
 0x1f4   : > { %v5431_v39 = vpop.xlane.xlu1 %1322 }
 0x1f5   : > { %10011 = vst [vmem:[#allocation112_spill] sm:$0xff] %v5431_v39  ;;  %v5437_v36 = vpop.xlane.xlu2 %1096  ;;  %vm1446_vm10 = vcmp.ge.f32.partialorder %v4997_v60, %v5431_v39  ;;  %v10049_v39 = vld [vmem:[#allocation27_spill] sm:$0xff] }
 0x1f6   : > { %v5435_v43 = vpop.xlane.xlu0 %1094  ;;  %10013 = vst [vmem:[#allocation114_spill] sm:$0xff] %v5437_v36  ;;  %vm1205_vm15 = vcmp.ge.f32.partialorder %v5200_v19, %v5437_v36 }
 0x1f7   : > { %10012 = vst [vmem:[#allocation113_spill] sm:$0xff] %v5435_v43  ;;  %vm1204_vm14 = vcmp.ge.f32.partialorder %v5188_v4, %v5435_v43 }
 0x1f9   : > { %1984 = vmax.xlane.f32.xlu1 %v1905_v26  ;;  %v293_v26 = vld [vmem:[%s9245_s0 + $0x130] sm:$0xff] }
 0x1fa   : > { %1988 = vmax.xlane.f32.xlu2 %v1907_v35  ;;  %4311 = vmatmul.msk.f32.gmra.mxu1 %vm351_vm0, %v293_v26  ;;  %v1267_v35 = vsel %vm1203_vm5, -inf, %v5173_v53 }
 0x1fb   : > { %1118 = vmax.xlane.f32.xlu0 %v5399_v17  ;;  %4231 = vmatmul.msk.f32.gmra.mxu0 %vm351_vm0, %v293_v26  ;;  %v5478_v17 = vpop.f32.mrf.mxu1  ;;  %v294_v26 = vld [vmem:[%s9245_s0 + $0x138] sm:$0xff] }
 0x1fc   : > { %v5449_v34 = vpop.xlane.xlu1 %1738  ;;  %10019 = vst [vmem:[#allocation120_spill] sm:$0xff] %v5478_v17 }
 0x1fd   : > { %10014 = vst [vmem:[#allocation115_spill] sm:$0xff] %v5449_v34  ;;  %v5455_v32 = vpop.xlane.xlu2 %1966  ;;  %vm1846_vm13 = vcmp.ge.f32.partialorder %v5208_v28, %v5449_v34 }
 0x1fe   : > { %v5451_v47 = vpop.xlane.xlu0 %1964  ;;  %vm2088_vm3 = vcmp.ge.f32.partialorder %v5021_v3, %v5455_v32 }
 0x1ff   : > { %vm2087_vm2 = vcmp.ge.f32.partialorder %v5010_v0, %v5451_v47 }
 0x201   : > { %1758 = vmax.xlane.f32.xlu1 %v5453_v30 }
 0x202   : > { %1348 = vmax.xlane.f32.xlu2 %v1267_v35  ;;  %4312 = vmatmul.msk.f32.gmra.mxu1 %vm351_vm0, %v294_v26 }
 0x203   : > { %1986 = vmax.xlane.f32.xlu0 %v1906_v27  ;;  %4232 = vmatmul.msk.f32.gmra.mxu0 %vm351_vm0, %v294_v26  ;;  %v2150_v27 = vsel %vm2086_vm7, -inf, %v4999_v61  ;;  %v2148_v26 = vsel %vm2084_vm8, -inf, %v4977_v55  ;;  %v1510_v61 = vsel %vm1446_vm10, -inf, %v4997_v60 }
 0x204   : > { %v5469_v22 = vpop.xlane.xlu1 %1098 }
 0x205   : > { %10016 = vst [vmem:[#allocation117_spill] sm:$0xff] %v5469_v22  ;;  %v5475_v7 = vpop.xlane.xlu2 %1326  ;;  %vm1206_vm1 = vcmp.ge.f32.partialorder %v5215_v31, %v5469_v22 }
 0x206   : > { %v5473_v52 = vpop.xlane.xlu0 %1324  ;;  %10018 = vst [vmem:[#allocation119_spill] sm:$0xff] %v5475_v7  ;;  %vm1448_vm6 = vcmp.ge.f32.partialorder %v5019_v2, %v5475_v7 }
 0x207   : > { %10017 = vst [vmem:[#allocation118_spill] sm:$0xff] %v5473_v52  ;;  %vm1447_vm5 = vcmp.ge.f32.partialorder %v5008_v63, %v5473_v52 }
 0x209   : > { %1346 = vmax.xlane.f32.xlu1 %v1266_v44  ;;  %v295_v44 = vld [vmem:[%s9245_s0 + $0x140] sm:$0xff] }
 0x20a   : > { %2218 = vmax.xlane.f32.xlu2 %v2150_v27  ;;  %4313 = vmatmul.msk.f32.gmra.mxu1 %vm351_vm0, %v295_v44  ;;  %v2149_v27 = vsel %vm2085_vm9, -inf, %v4988_v58 }
 0x20b   : > { %1760 = vmax.xlane.f32.xlu0 %v5478_v17  ;;  %4233 = vmatmul.msk.f32.gmra.mxu0 %vm351_vm0, %v295_v44  ;;  %v296_v44 = vld [vmem:[%s9245_s0 + $0x148] sm:$0xff] }
 0x20c   : > { %v5489_v35 = vpop.xlane.xlu1 %1968 }
 0x20d   : > { %v5495_v41 = vpop.xlane.xlu2 %1742  ;;  %vm2089_vm4 = vcmp.ge.f32.partialorder %v5032_v6, %v5489_v35 }
 0x20e   : > { %v5493_v48 = vpop.xlane.xlu0 %1740  ;;  %10021 = vst [vmem:[#allocation122_spill] sm:$0xff] %v5495_v41  ;;  %vm1848_vm9 = vcmp.ge.f32.partialorder %v5239_v33, %v5495_v41 }
 0x20f   : > { %10020 = vst [vmem:[#allocation121_spill] sm:$0xff] %v5493_v48  ;;  %vm1847_vm8 = vcmp.ge.f32.partialorder %v5223_v45, %v5493_v48 }
 0x211   : > { %2214 = vmax.xlane.f32.xlu1 %v2148_v26  ;;  %v1908_v26 = vsel %vm1844_vm11, -inf, %v5175_v56 }
 0x212   : > { %1578 = vmax.xlane.f32.xlu2 %v1510_v61  ;;  %4314 = vmatmul.msk.f32.gmra.mxu1 %vm351_vm0, %v296_v44  ;;  %v1909_v61 = vsel %vm1845_vm12, -inf, %v5191_v10 }
 0x213   : > { %2216 = vmax.xlane.f32.xlu0 %v2149_v27  ;;  %4234 = vmatmul.msk.f32.gmra.mxu0 %vm351_vm0, %v296_v44  ;;  %v1910_v27 = vsel %vm1846_vm13, -inf, %v5208_v28  ;;  %v297_v44 = vld [vmem:[%s9245_s0 + $0x150] sm:$0xff] }
 0x214   : > { %v5509_v46 = vpop.xlane.xlu1 %1328 }
 0x215   : > { %v5515_v20 = vpop.xlane.xlu2 %1102  ;;  %vm1449_vm7 = vcmp.ge.f32.partialorder %v5030_v5, %v5509_v46 }
 0x216   : > { %v5513_v55 = vpop.xlane.xlu0 %1100  ;;  %10023 = vst [vmem:[#allocation124_spill] sm:$0xff] %v5515_v20  ;;  %vm1208_vm12 = vcmp.ge.f32.partialorder %v5246_v29, %v5515_v20 }
 0x217   : > { %10022 = vst [vmem:[#allocation123_spill] sm:$0xff] %v5513_v55  ;;  %vm1207_vm11 = vcmp.ge.f32.partialorder %v5232_v62, %v5513_v55 }
 0x219   : > { %1990 = vmax.xlane.f32.xlu1 %v1908_v26  ;;  %v1268_v26 = vsel %vm1204_vm14, -inf, %v5188_v4 }
 0x21a   : > { %1994 = vmax.xlane.f32.xlu2 %v1910_v27  ;;  %4315 = vmatmul.msk.f32.gmra.mxu1 %vm351_vm0, %v297_v44  ;;  %v1270_v27 = vsel %vm1206_vm1, -inf, %v5215_v31 }
 0x21b   : > { %1992 = vmax.xlane.f32.xlu0 %v1909_v61  ;;  %v1269_v61 = vsel %vm1205_vm15, -inf, %v5200_v19  ;;  %4235 = vmatmul.msk.f32.gmra.mxu0 %vm351_vm0, %v297_v44  ;;  %v298_v44 = vld [vmem:[%s9245_s0 + $0x158] sm:$0xff] }
 0x21c   : > { %v5529_v58 = vpop.xlane.xlu1 %1744 }
 0x21d   : > { %10024 = vst [vmem:[#allocation125_spill] sm:$0xff] %v5529_v58  ;;  %v5535_v1 = vpop.xlane.xlu2 %1972  ;;  %vm1849_vm10 = vcmp.ge.f32.partialorder %v5262_v42, %v5529_v58 }
 0x21e   : > { %v5533_v25 = vpop.xlane.xlu0 %1970  ;;  %vm2091_vm15 = vcmp.ge.f32.partialorder %v5054_v12, %v5535_v1 }
 0x21f   : > { %vm2090_vm14 = vcmp.ge.f32.partialorder %v5043_v9, %v5533_v25 }
 0x221   : > { %1350 = vmax.xlane.f32.xlu1 %v1268_v26  ;;  %v2151_v26 = vsel %vm2087_vm2, -inf, %v5010_v0 }
 0x222   : > { %1354 = vmax.xlane.f32.xlu2 %v1270_v27  ;;  %4316 = vmatmul.msk.f32.gmra.mxu1 %vm351_vm0, %v298_v44  ;;  %v2153_v27 = vsel %vm2089_vm4, -inf, %v5032_v6 }
 0x223   : > { %1352 = vmax.xlane.f32.xlu0 %v1269_v61  ;;  %v2152_v61 = vsel %vm2088_vm3, -inf, %v5021_v3  ;;  %4236 = vmatmul.msk.f32.gmra.mxu0 %vm351_vm0, %v298_v44  ;;  %v1511_v44 = vsel %vm1447_vm5, -inf, %v5008_v63 }
 0x224   : > { %v5549_v43 = vpop.xlane.xlu1 %1104 }
 0x225   : > { %10025 = vst [vmem:[#allocation126_spill] sm:$0xff] %v5549_v43  ;;  %v5555_v36 = vpop.xlane.xlu2 %1332  ;;  %vm1209_vm13 = vcmp.ge.f32.partialorder %v5255_v16, %v5549_v43 }
 0x226   : > { %v5553_v34 = vpop.xlane.xlu0 %1330  ;;  %vm1451_vm3 = vcmp.ge.f32.partialorder %v5052_v11, %v5555_v36 }
 0x227   : > { %vm1450_vm2 = vcmp.ge.f32.partialorder %v5041_v8, %v5553_v34 }
 0x229   : > { %2220 = vmax.xlane.f32.xlu1 %v2151_v26  ;;  %v299_v26 = vld [vmem:[%s9245_s0 + $0x160] sm:$0xff] }
 0x22a   : > { %2224 = vmax.xlane.f32.xlu2 %v2153_v27  ;;  %4317 = vmatmul.msk.f32.gmra.mxu1 %vm351_vm0, %v299_v26  ;;  %v1513_v27 = vsel %vm1449_vm7, -inf, %v5030_v5 }
 0x22b   : > { %2222 = vmax.xlane.f32.xlu0 %v2152_v61  ;;  %v1512_v61 = vsel %vm1448_vm6, -inf, %v5019_v2  ;;  %4237 = vmatmul.msk.f32.gmra.mxu0 %vm351_vm0, %v299_v26  ;;  %v300_v26 = vld [vmem:[%s9245_s0 + $0x168] sm:$0xff]  ;;  %v5705_v2 = vpop.f32.mrf.mxu0 }
 0x22c   : > { %v5569_v22 = vpop.xlane.xlu1 %1974  ;;  %10040 = vst [vmem:[#allocation141_spill] sm:$0xff] %v5705_v2 }
 0x22d   : > { %v5575_v53 = vpop.xlane.xlu2 %1748  ;;  %vm2092_vm1 = vcmp.ge.f32.partialorder %v5065_v15, %v5569_v22 }
 0x22e   : > { %v5573_v0 = vpop.xlane.xlu0 %1746  ;;  %10027 = vst [vmem:[#allocation128_spill] sm:$0xff] %v5575_v53  ;;  %vm1851_vm6 = vcmp.ge.f32.partialorder %v5299_v13, %v5575_v53 }
 0x22f   : > { %10026 = vst [vmem:[#allocation127_spill] sm:$0xff] %v5573_v0  ;;  %vm1850_vm5 = vcmp.ge.f32.partialorder %v5279_v49, %v5573_v0 }
 0x231   : > { %1580 = vmax.xlane.f32.xlu1 %v1511_v44  ;;  %v1911_v44 = vsel %vm1847_vm8, -inf, %v5223_v45 }
 0x232   : > { %1584 = vmax.xlane.f32.xlu2 %v1513_v27  ;;  %4318 = vmatmul.msk.f32.gmra.mxu1 %vm351_vm0, %v300_v26  ;;  %v1913_v27 = vsel %vm1849_vm10, -inf, %v5262_v42 }
 0x233   : > { %1582 = vmax.xlane.f32.xlu0 %v1512_v61  ;;  %v1912_v61 = vsel %vm1848_vm9, -inf, %v5239_v33  ;;  %4238 = vmatmul.msk.f32.gmra.mxu0 %vm351_vm0, %v300_v26  ;;  %v301_v26 = vld [vmem:[%s9245_s0 + $0x170] sm:$0xff] }
 0x234   : > { %v5589_v3 = vpop.xlane.xlu1 %1334 }
 0x235   : > { %v5595_v4 = vpop.xlane.xlu2 %1108  ;;  %vm1452_vm4 = vcmp.ge.f32.partialorder %v5063_v14, %v5589_v3 }
 0x236   : > { %v5593_v6 = vpop.xlane.xlu0 %1106  ;;  %10029 = vst [vmem:[#allocation130_spill] sm:$0xff] %v5595_v4  ;;  %vm1211_vm9 = vcmp.ge.f32.partialorder %v5292_v54, %v5595_v4 }
 0x237   : > { %10028 = vst [vmem:[#allocation129_spill] sm:$0xff] %v5593_v6  ;;  %vm1210_vm8 = vcmp.ge.f32.partialorder %v5273_v50, %v5593_v6 }
 0x239   : > { %1996 = vmax.xlane.f32.xlu1 %v1911_v44  ;;  %v1271_v44 = vsel %vm1207_vm11, -inf, %v5232_v62 }
 0x23a   : > { %2000 = vmax.xlane.f32.xlu2 %v1913_v27  ;;  %4319 = vmatmul.msk.f32.gmra.mxu1 %vm351_vm0, %v301_v26  ;;  %v1273_v27 = vsel %vm1209_vm13, -inf, %v5255_v16 }
 0x23b   : > { %1998 = vmax.xlane.f32.xlu0 %v1912_v61  ;;  %v1272_v61 = vsel %vm1208_vm12, -inf, %v5246_v29  ;;  %4239 = vmatmul.msk.f32.gmra.mxu0 %vm351_vm0, %v301_v26  ;;  %v2154_v26 = vsel %vm2090_vm14, -inf, %v5043_v9  ;;  %v5653_v9 = vpop.f32.mrf.mxu1 }
 0x23c   : > { %v5609_v48 = vpop.xlane.xlu1 %1750  ;;  %10032 = vst [vmem:[#allocation133_spill] sm:$0xff] %v5653_v9 }
 0x23d   : > { %10030 = vst [vmem:[#allocation131_spill] sm:$0xff] %v5609_v48  ;;  %v5615_v38 = vpop.xlane.xlu2 %1978  ;;  %vm1852_vm7 = vcmp.ge.f32.partialorder %v5320_v40, %v5609_v48 }
 0x23e   : > { %v5613_v41 = vpop.xlane.xlu0 %1976  ;;  %vm2094_vm12 = vcmp.ge.f32.partialorder %v5087_v21, %v5615_v38 }
 0x23f   : > { %vm2093_vm11 = vcmp.ge.f32.partialorder %v5076_v18, %v5613_v41 }
 0x241   : > { %1356 = vmax.xlane.f32.xlu1 %v1271_v44  ;;  %v302_v44 = vld [vmem:[%s9245_s0 + $0x178] sm:$0xff] }
 0x242   : > { %1360 = vmax.xlane.f32.xlu2 %v1273_v27  ;;  %4320 = vmatmul.msk.f32.gmra.mxu1 %vm351_vm0, %v302_v44  ;;  %v2156_v27 = vsel %vm2092_vm1, -inf, %v5065_v15 }
 0x243   : > { %1358 = vmax.xlane.f32.xlu0 %v1272_v61  ;;  %v2155_v61 = vsel %vm2091_vm15, -inf, %v5054_v12  ;;  %4240 = vmatmul.msk.f32.gmra.mxu0 %vm351_vm0, %v302_v44  ;;  %v1514_v44 = vsel %vm1450_vm2, -inf, %v5041_v8  ;;  %v1516_v12 = vsel %vm1452_vm4, -inf, %v5063_v14  ;;  %v5675_v9 = vpop.f32.mrf.mxu1  ;;  %v10057_v14 = vld [vmem:[#allocation98_spill] sm:$0xff] }
 0x244   : > { %v5629_v58 = vpop.xlane.xlu1 %1110  ;;  %10035 = vst [vmem:[#allocation136_spill] sm:$0xff] %v5675_v9  ;;  %v1916_v9 = vsel %vm1852_vm7, -inf, %v5320_v40 }
 0x245   : > { %10031 = vst [vmem:[#allocation132_spill] sm:$0xff] %v5629_v58  ;;  %v5635_v20 = vpop.xlane.xlu2 %1338  ;;  %vm1212_vm10 = vcmp.ge.f32.partialorder %v5311_v37, %v5629_v58  ;;  %v5729_v58 = vpop.f32.mrf.mxu0 }
 0x246   : > { %v5633_v55 = vpop.xlane.xlu0 %1336  ;;  %10044 = vst [vmem:[#allocation145_spill] sm:$0xff] %v5729_v58  ;;  %vm1454_vm15 = vcmp.ge.f32.partialorder %v10049_v39, %v5635_v20 }
 0x249   : > { %2226 = vmax.xlane.f32.xlu1 %v2154_v26 }
 0x24a   : > { %2230 = vmax.xlane.f32.xlu2 %v2156_v27  ;;  %v1515_v27 = vsel %vm1451_vm3, -inf, %v5052_v11 }
 0x24b   : > { %2228 = vmax.xlane.f32.xlu0 %v2155_v61  ;;  %v303_v61 = vld [vmem:[%s9245_s0 + $0x180] sm:$0xff] }
 0x24c   : > { %v5649_v43 = vpop.xlane.xlu1 %1980  ;;  %4321 = vmatmul.msk.f32.gmra.mxu1 %vm351_vm0, %v303_v61  ;;  %4241 = vmatmul.msk.f32.gmra.mxu0 %vm351_vm0, %v303_v61  ;;  %v1914_v61 = vsel %vm1850_vm5, -inf, %v5279_v49 }
 0x24d   : > { %v5657_v26 = vpop.xlane.xlu2 %1754  ;;  %vm2095_vm13 = vcmp.ge.f32.partialorder %v5098_v24, %v5649_v43 }
 0x24e   : > { %v5655_v60 = vpop.xlane.xlu0 %1752  ;;  %10034 = vst [vmem:[#allocation135_spill] sm:$0xff] %v5657_v26  ;;  %vm1854_vm3 = vcmp.ge.f32.partialorder %v10057_v14, %v5657_v26 }
 0x24f   : > { %10033 = vst [vmem:[#allocation134_spill] sm:$0xff] %v5655_v60 }
 0x251   : > { %1586 = vmax.xlane.f32.xlu1 %v1514_v44 }
 0x252   : > { %1590 = vmax.xlane.f32.xlu2 %v1516_v12  ;;  %v304_v12 = vld [vmem:[%s9245_s0 + $0x188] sm:$0xff] }
 0x253   : > { %1588 = vmax.xlane.f32.xlu0 %v1515_v27  ;;  %v1915_v27 = vsel %vm1851_vm6, -inf, %v5299_v13 }
 0x254   : > { %v5671_v15 = vpop.xlane.xlu1 %1340  ;;  %4322 = vmatmul.msk.f32.gmra.mxu1 %vm351_vm0, %v304_v12  ;;  %4242 = vmatmul.msk.f32.gmra.mxu0 %vm351_vm0, %v304_v12  ;;  %v1274_v12 = vsel %vm1210_vm8, -inf, %v5273_v50 }
 0x255   : > { %v5679_v44 = vpop.xlane.xlu2 %1114 }
 0x256   : > { %v5677_v63 = vpop.xlane.xlu0 %1112  ;;  %10037 = vst [vmem:[#allocation138_spill] sm:$0xff] %v5679_v44 }
 0x257   : > { %10036 = vst [vmem:[#allocation137_spill] sm:$0xff] %v5677_v63  ;;  %v5699_v48 = vpop.f32.mrf.mxu1  ;;  %vm1213_vm5 = vcmp.ge.f32.partialorder %v5329_v57, %v5677_v63 }
 0x258   : > { %10039 = vst [vmem:[#allocation140_spill] sm:$0xff] %v5699_v48  ;;  %v1276_v48 = vsel %vm1212_vm10, -inf, %v5311_v37 }
 0x259   : > { %2002 = vmax.xlane.f32.xlu1 %v1914_v61 }
 0x25a   : > { %2006 = vmax.xlane.f32.xlu2 %v1916_v9  ;;  %v305_v9 = vld [vmem:[%s9245_s0 + $0x190] sm:$0xff] }
 0x25b   : > { %2004 = vmax.xlane.f32.xlu0 %v1915_v27  ;;  %v1275_v27 = vsel %vm1211_vm9, -inf, %v5292_v54 }
 0x25c   : > { %v5693_v0 = vpop.xlane.xlu1 %1756  ;;  %4323 = vmatmul.msk.f32.gmra.mxu1 %vm351_vm0, %v305_v9  ;;  %4243 = vmatmul.msk.f32.gmra.mxu0 %vm351_vm0, %v305_v9  ;;  %v2157_v9 = vsel %vm2093_vm11, -inf, %v5076_v18  ;;  %v10045_v18 = vld [vmem:[#allocation25_spill] sm:$0xff] }
 0x25d   : > { %10038 = vst [vmem:[#allocation139_spill] sm:$0xff] %v5693_v0  ;;  %v5701_v61 = vpop.xlane.xlu2 %1344  ;;  %vm1453_vm14 = vcmp.ge.f32.partialorder %v10045_v18, %v5633_v55  ;;  %vm1855_vm4 = vcmp.ge.f32.partialorder %v5395_v51, %v5693_v0  ;;  %v10063_v0 = vld [vmem:[#allocation94_spill] sm:$0xff] }
 0x25e   : > { %v5697_v53 = vpop.xlane.xlu0 %1982  ;;  %vm1214_vm6 = vcmp.ge.f32.partialorder %v10063_v0, %v5679_v44  ;;  %v10066_v44 = vld [vmem:[#allocation32_spill] sm:$0xff] }
 0x25f   : > { %v5723_v4 = vpop.f32.mrf.mxu1  ;;  %vm2096_vm8 = vcmp.ge.f32.partialorder %v10066_v44, %v5697_v53 }
 0x260   : > { %10042 = vst [vmem:[#allocation143_spill] sm:$0xff] %v5723_v4  ;;  %v2159_v4 = vsel %vm2095_vm13, -inf, %v5098_v24  ;;  %v1518_v24 = vsel %vm1454_vm15, -inf, %v10049_v39 }
 0x261   : > { %1362 = vmax.xlane.f32.xlu1 %v1274_v12 }
 0x262   : > { %1366 = vmax.xlane.f32.xlu2 %v1276_v48  ;;  %v306_v48 = vld [vmem:[%s9245_s0 + $0x198] sm:$0xff] }
 0x263   : > { %1364 = vmax.xlane.f32.xlu0 %v1275_v27  ;;  %v2158_v27 = vsel %vm2094_vm12, -inf, %v5087_v21  ;;  %v5753_v21 = vpop.f32.mrf.mxu0 }
 0x264   : > { %v5717_v2 = vpop.xlane.xlu1 %1116  ;;  %4324 = vmatmul.msk.f32.gmra.mxu1 %vm351_vm0, %v306_v48  ;;  %4244 = vmatmul.msk.f32.gmra.mxu0 %vm351_vm0, %v306_v48  ;;  %10050 = vst [vmem:[#allocation27_spill] sm:$0xff] %v5753_v21  ;;  %v1517_v48 = vsel %vm1453_vm14, -inf, %v10045_v18 }
 0x265   : > { %10041 = vst [vmem:[#allocation142_spill] sm:$0xff] %v5717_v2  ;;  %v5725_v12 = vpop.xlane.xlu2 %1120  ;;  %vm1215_vm7 = vcmp.ge.f32.partialorder %v5377_v59, %v5717_v2 }
 0x266   : > { %v5721_v6 = vpop.xlane.xlu0 %1342  ;;  %10043 = vst [vmem:[#allocation144_spill] sm:$0xff] %v5725_v12  ;;  %v1279_v63 = vsel %vm1215_vm7, -inf, %v5377_v59 }
 0x267   : > { %v5747_v8 = vpop.f32.mrf.mxu1 }
 0x268   : > { %10047 = vst [vmem:[#allocation146_spill] sm:$0xff] %v5747_v8 }
 0x269   : > { %2232 = vmax.xlane.f32.xlu1 %v2157_v9 }
 0x26a   : > { %2236 = vmax.xlane.f32.xlu2 %v2159_v4  ;;  %v10051_v4 = vld [vmem:[#allocation29_spill] sm:$0xff] }
 0x26b   : > { %2234 = vmax.xlane.f32.xlu0 %v2158_v27  ;;  %vm1455_vm1 = vcmp.ge.f32.partialorder %v10051_v4, %v5671_v15  ;;  %v307_v27 = vld [vmem:[%s9245_s0 + $0x1a0] sm:$0xff]  ;;  %v5777_v7 = vpop.f32.mrf.mxu0 }
 0x26c   : > { %v5741_v58 = vpop.xlane.xlu1 %1984  ;;  %4325 = vmatmul.msk.f32.gmra.mxu1 %vm351_vm0, %v307_v27  ;;  %4245 = vmatmul.msk.f32.gmra.mxu0 %vm351_vm0, %v307_v27  ;;  %v1519_v8 = vsel %vm1455_vm1, -inf, %v10051_v4  ;;  %10058 = vst [vmem:[#allocation151_spill] sm:$0xff] %v5777_v7  ;;  %v1918_v27 = vsel %vm1854_vm3, -inf, %v10057_v14 }
 0x26d   : > { %v5749_v9 = vpop.xlane.xlu2 %1988 }
 0x26e   : > { %v5745_v5 = vpop.xlane.xlu0 %1118  ;;  %10048 = vst [vmem:[#allocation147_spill] sm:$0xff] %v5749_v9  ;;  %v10053_v9 = vld [vmem:[#allocation93_spill] sm:$0xff] }
 0x26f   : > { %10046 = vst [vmem:[#allocation25_spill] sm:$0xff] %v5745_v5  ;;  %vm1853_vm2 = vcmp.ge.f32.partialorder %v10053_v9, %v5655_v60  ;;  %v5771_v52 = vpop.f32.mrf.mxu1 }
 0x270   : > { %10055 = vst [vmem:[#allocation149_spill] sm:$0xff] %v5771_v52  ;;  %v1919_v52 = vsel %vm1855_vm4, -inf, %v5395_v51 }
 0x271   : > { %1592 = vmax.xlane.f32.xlu1 %v1517_v48 }
 0x272   : > { %1596 = vmax.xlane.f32.xlu2 %v1519_v8  ;;  %v308_v8 = vld [vmem:[%s9245_s0 + $0x1a8] sm:$0xff] }
 0x273   : > { %1594 = vmax.xlane.f32.xlu0 %v1518_v24  ;;  %v1917_v24 = vsel %vm1853_vm2, -inf, %v10053_v9 }
 0x274   : > { %v5765_v21 = vpop.xlane.xlu1 %1758  ;;  %4326 = vmatmul.msk.f32.gmra.mxu1 %vm351_vm0, %v308_v8  ;;  %4246 = vmatmul.msk.f32.gmra.mxu0 %vm351_vm0, %v308_v8  ;;  %v1277_v8 = vsel %vm1213_vm5, -inf, %v5329_v57 }
 0x275   : > { %10052 = vst [vmem:[#allocation29_spill] sm:$0xff] %v5765_v21  ;;  %v5773_v48 = vpop.xlane.xlu2 %1348  ;;  %vm1856_vm14 = vcmp.ge.f32.partialorder %v5453_v30, %v5765_v21 }
 0x276   : > { %v5769_v11 = vpop.xlane.xlu0 %1986  ;;  %10056 = vst [vmem:[#allocation150_spill] sm:$0xff] %v5773_v48  ;;  %v5801_v48 = vpop.f32.mrf.mxu0 }
 0x277   : > { %10054 = vst [vmem:[#allocation148_spill] sm:$0xff] %v5769_v11  ;;  %v5795_v26 = vpop.f32.mrf.mxu1 }
 0x278   : > { %10061 = vst [vmem:[#allocation154_spill] sm:$0xff] %v5795_v26 }
 0x279   : > { %2008 = vmax.xlane.f32.xlu1 %v1917_v24  ;;  %10064 = vst [vmem:[#allocation156_spill] sm:$0xff] %v5801_v48 }
 0x27a   : > { %2012 = vmax.xlane.f32.xlu2 %v1919_v52  ;;  %v309_v52 = vld [vmem:[%s9245_s0 + $0x1b0] sm:$0xff] }
 0x27b   : > { %2010 = vmax.xlane.f32.xlu0 %v1918_v27  ;;  %v1278_v27 = vsel %vm1214_vm6, -inf, %v10063_v0 }
 0x27c   : > { %v5789_v7 = vpop.xlane.xlu1 %1346  ;;  %4327 = vmatmul.msk.f32.gmra.mxu1 %vm351_vm0, %v309_v52  ;;  %4247 = vmatmul.msk.f32.gmra.mxu0 %vm351_vm0, %v309_v52  ;;  %v2160_v52 = vsel %vm2096_vm8, -inf, %v10066_v44  ;;  %v10074_v44 = vld [vmem:[#allocation31_spill] sm:$0xff] }
 0x27d   : > { %10059 = vst [vmem:[#allocation152_spill] sm:$0xff] %v5789_v7  ;;  %v5797_v24 = vpop.xlane.xlu2 %2218  ;;  %v10070_v7 = vld [vmem:[#allocation37_spill] sm:$0xff]  ;;  %vm1456_vm11 = vcmp.ge.f32.partialorder %v10074_v44, %v5721_v6 }
 0x27e   : > { %v5793_v60 = vpop.xlane.xlu0 %1760  ;;  %10062 = vst [vmem:[#allocation155_spill] sm:$0xff] %v5797_v24  ;;  %vm1457_vm9 = vcmp.ge.f32.partialorder %v10070_v7, %v5701_v61  ;;  %v5825_v11 = vpop.f32.mrf.mxu0  ;;  %v10078_v24 = vld [vmem:[#allocation111_spill] sm:$0xff] }
 0x27f   : > { %10060 = vst [vmem:[#allocation153_spill] sm:$0xff] %v5793_v60  ;;  %v5819_v26 = vpop.f32.mrf.mxu1  ;;  %vm1217_vm12 = vcmp.ge.f32.partialorder %v10078_v24, %v5725_v12  ;;  %vm1857_vm13 = vcmp.ge.f32.partialorder %v5478_v17, %v5793_v60 }
 0x280   : > { %10068 = vst [vmem:[#allocation159_spill] sm:$0xff] %v5819_v26 }
 0x281   : > { %1368 = vmax.xlane.f32.xlu1 %v1277_v8  ;;  %10071 = vst [vmem:[#allocation37_spill] sm:$0xff] %v5825_v11 }
 0x282   : > { %1372 = vmax.xlane.f32.xlu2 %v1279_v63  ;;  %v10072_v63 = vld [vmem:[#allocation35_spill] sm:$0xff] }
 0x283   : > { %1370 = vmax.xlane.f32.xlu0 %v1278_v27  ;;  %vm2097_vm10 = vcmp.ge.f32.partialorder %v10072_v63, %v5741_v58  ;;  %v310_v27 = vld [vmem:[%s9245_s0 + $0x1b8] sm:$0xff] }
 0x284   : > { %v5813_v48 = vpop.xlane.xlu1 %2214  ;;  %4328 = vmatmul.msk.f32.gmra.mxu1 %vm351_vm0, %v310_v27  ;;  %4248 = vmatmul.msk.f32.gmra.mxu0 %vm351_vm0, %v310_v27  ;;  %v1281_v27 = vsel %vm1217_vm12, -inf, %v10078_v24 }
 0x285   : > { %10065 = vst [vmem:[#allocation157_spill] sm:$0xff] %v5813_v48  ;;  %v5821_v8 = vpop.xlane.xlu2 %1578  ;;  %v1521_v48 = vsel %vm1457_vm9, -inf, %v10070_v7 }
 0x286   : > { %v5817_v2 = vpop.xlane.xlu0 %2216  ;;  %10069 = vst [vmem:[#allocation160_spill] sm:$0xff] %v5821_v8  ;;  %v5849_v23 = vpop.f32.mrf.mxu0 }
 0x287   : > { %10067 = vst [vmem:[#allocation158_spill] sm:$0xff] %v5817_v2  ;;  %v2161_v2 = vsel %vm2097_vm10, -inf, %v10072_v63  ;;  %v5843_v8 = vpop.f32.mrf.mxu1  ;;  %v1921_v63 = vsel %vm1857_vm13, -inf, %v5478_v17 }
 0x288   : > { %10076 = vst [vmem:[#allocation162_spill] sm:$0xff] %v5843_v8 }
 0x289   : > { %2238 = vmax.xlane.f32.xlu1 %v2160_v52  ;;  %10079 = vst [vmem:[#allocation111_spill] sm:$0xff] %v5849_v23 }
 0x28a   : > { %2240 = vmax.xlane.f32.xlu2 %v2161_v2  ;;  %v311_v2 = vld [vmem:[%s9245_s0 + $0x1c0] sm:$0xff] }
 0x28b   : > { %1600 = vmax.xlane.f32.xlu0 %v1521_v48  ;;  %v1520_v48 = vsel %vm1456_vm11, -inf, %v10074_v44 }
 0x28c   : > { %v5837_v11 = vpop.xlane.xlu1 %1990  ;;  %4329 = vmatmul.msk.f32.gmra.mxu1 %vm351_vm0, %v311_v2  ;;  %4249 = vmatmul.msk.f32.gmra.mxu0 %vm351_vm0, %v311_v2  ;;  %v1920_v2 = vsel %vm1856_vm14, -inf, %v5453_v30 }
 0x28d   : > { %10073 = vst [vmem:[#allocation161_spill] sm:$0xff] %v5837_v11  ;;  %v5845_v52 = vpop.xlane.xlu2 %1994  ;;  %vm2100_vm1 = vcmp.ge.f32.partialorder %v5175_v56, %v5837_v11 }
 0x28e   : > { %v5841_v26 = vpop.xlane.xlu0 %1992  ;;  %10077 = vst [vmem:[#allocation163_spill] sm:$0xff] %v5845_v52  ;;  %vm2102_vm15 = vcmp.ge.f32.partialorder %v5208_v28, %v5845_v52  ;;  %v5873_v8 = vpop.f32.mrf.mxu0  ;;  %v2164_v52 = vsel %vm2100_vm1, -inf, %v5175_v56 }
 0x28f   : > { %10075 = vst [vmem:[#allocation31_spill] sm:$0xff] %v5841_v26  ;;  %v5867_v12 = vpop.f32.mrf.mxu1  ;;  %vm2101_vm4 = vcmp.ge.f32.partialorder %v5191_v10, %v5841_v26 }
 0x290   : > { %10081 = vst [vmem:[#allocation165_spill] sm:$0xff] %v5867_v12 }
 0x291   : > { %1598 = vmax.xlane.f32.xlu1 %v1520_v48  ;;  %10083 = vst [vmem:[#allocation167_spill] sm:$0xff] %v5873_v8  ;;  %v10084_v8 = vld [vmem:[#allocation107_spill] sm:$0xff] }
 0x292   : > { %2016 = vmax.xlane.f32.xlu2 %v1921_v63  ;;  %v312_v63 = vld [vmem:[%s9245_s0 + $0x1c8] sm:$0xff]  ;;  %vm1216_vm2 = vcmp.ge.f32.partialorder %v10084_v8, %v5745_v5 }
 0x293   : > { %1376 = vmax.xlane.f32.xlu0 %v1281_v27  ;;  %v2166_v27 = vsel %vm2102_vm15, -inf, %v5208_v28 }
 0x294   : > { %v5861_v23 = vpop.xlane.xlu1 %1350  ;;  %4330 = vmatmul.msk.f32.gmra.mxu1 %vm351_vm0, %v312_v63  ;;  %4250 = vmatmul.msk.f32.gmra.mxu0 %vm351_vm0, %v312_v63  ;;  %v1280_v63 = vsel %vm1216_vm2, -inf, %v10084_v8  ;;  %v10132_v8 = vld [vmem:[#allocation85_spill] sm:$0xff] }
 0x295   : > { %10080 = vst [vmem:[#allocation164_spill] sm:$0xff] %v5861_v23  ;;  %v5869_v48 = vpop.xlane.xlu2 %1354 }
 0x296   : > { %v5865_v60 = vpop.xlane.xlu0 %1352  ;;  %10082 = vst [vmem:[#allocation166_spill] sm:$0xff] %v5869_v48  ;;  %vm1462_vm3 = vcmp.ge.f32.partialorder %v5215_v31, %v5869_v48  ;;  %v5897_v28 = vpop.f32.mrf.mxu0 }
 0x297   : > { %v5891_v12 = vpop.f32.mrf.mxu1  ;;  %10086 = vst [vmem:[#allocation169_spill] sm:$0xff] %v5897_v28 }
 0x298   : > { %10085 = vst [vmem:[#allocation168_spill] sm:$0xff] %v5891_v12 }
 0x299   : > { %2014 = vmax.xlane.f32.xlu1 %v1920_v2 }
 0x29a   : > { %2246 = vmax.xlane.f32.xlu2 %v2164_v52  ;;  %v313_v52 = vld [vmem:[%s9245_s0 + $0x1d0] sm:$0xff] }
 0x29b   : > { %2250 = vmax.xlane.f32.xlu0 %v2166_v27  ;;  %v1526_v27 = vsel %vm1462_vm3, -inf, %v5215_v31 }
 0x29c   : > { %v5885_v21 = vpop.xlane.xlu1 %2220  ;;  %4331 = vmatmul.msk.f32.gmra.mxu1 %vm351_vm0, %v313_v52  ;;  %4251 = vmatmul.msk.f32.gmra.mxu0 %vm351_vm0, %v313_v52  ;;  %v314_v52 = vld [vmem:[%s9245_s0 + $0x1d8] sm:$0xff] }
 0x29d   : > { %v5893_v2 = vpop.xlane.xlu2 %2224 }
 0x29e   : > { %v5889_v11 = vpop.xlane.xlu0 %2222  ;;  %v5916_v12 = vpop.f32.mrf.mxu0 }
 0x29f   : > { %v5912_v28 = vpop.f32.mrf.mxu1  ;;  %10090 = vst [vmem:[#allocation173_spill] sm:$0xff] %v5916_v12 }
 0x2a0   : > { %10089 = vst [vmem:[#allocation172_spill] sm:$0xff] %v5912_v28 }
 0x2a1   : > { %1374 = vmax.xlane.f32.xlu1 %v1280_v63  ;;  %v2165_v63 = vsel %vm2101_vm4, -inf, %v5191_v10 }
 0x2a3   : > { %1610 = vmax.xlane.f32.xlu0 %v1526_v27 }
 0x2a4   : > { %v5906_v56 = vpop.xlane.xlu1 %1580  ;;  %4332 = vmatmul.msk.f32.gmra.mxu1 %vm351_vm0, %v314_v52  ;;  %4252 = vmatmul.msk.f32.gmra.mxu0 %vm351_vm0, %v314_v52 }
 0x2a5   : > { %10087 = vst [vmem:[#allocation170_spill] sm:$0xff] %v5906_v56  ;;  %v5914_v5 = vpop.xlane.xlu2 %1584 }
 0x2a6   : > { %v5910_v48 = vpop.xlane.xlu0 %1582 }
 0x2a7   : > { %10088 = vst [vmem:[#allocation171_spill] sm:$0xff] %v5910_v48  ;;  %v5931_v12 = vpop.f32.mrf.mxu1 }
 0x2a8   : > { %10093 = vst [vmem:[#allocation176_spill] sm:$0xff] %v5931_v12 }
 0x2a9   : > { %2248 = vmax.xlane.f32.xlu1 %v2165_v63  ;;  %v5937_v63 = vpop.f32.mrf.mxu0 }
 0x2aa   : > { %10095 = vst [vmem:[#allocation178_spill] sm:$0xff] %v5937_v63 }
 0x2ac   : > { %v5924_v27 = vpop.xlane.xlu1 %1996 }
 0x2ad   : > { %10091 = vst [vmem:[#allocation174_spill] sm:$0xff] %v5924_v27  ;;  %vm2103_vm5 = vcmp.ge.f32.partialorder %v5223_v45, %v5924_v27  ;;  %v5933_v10 = vpop.xlane.xlu2 %2000  ;;  %v315_v27 = vld [vmem:[%s9245_s0 + $0x1e0] sm:$0xff] }
 0x2ae   : > { %v5928_v31 = vpop.xlane.xlu0 %1998  ;;  %v2167_v26 = vsel %vm2103_vm5, -inf, %v5223_v45  ;;  %10094 = vst [vmem:[#allocation177_spill] sm:$0xff] %v5933_v10  ;;  %vm2105_vm7 = vcmp.ge.f32.partialorder %v5262_v42, %v5933_v10  ;;  %4333 = vmatmul.msk.f32.gmra.mxu1 %vm351_vm0, %v315_v27  ;;  %4253 = vmatmul.msk.f32.gmra.mxu0 %vm351_vm0, %v315_v27 }
 0x2af   : > { %10092 = vst [vmem:[#allocation175_spill] sm:$0xff] %v5928_v31  ;;  %2252 = vmax.xlane.f32.xlu2 %v2167_v26  ;;  %vm2104_vm6 = vcmp.ge.f32.partialorder %v5239_v33, %v5928_v31  ;;  %v2169_v45 = vsel %vm2105_vm7, -inf, %v5262_v42  ;;  %v5955_v10 = vpop.f32.mrf.mxu1 }
 0x2b0   : > { %v2168_v52 = vsel %vm2104_vm6, -inf, %v5239_v33  ;;  %2256 = vmax.xlane.f32.xlu0 %v2169_v45  ;;  %10098 = vst [vmem:[#allocation181_spill] sm:$0xff] %v5955_v10 }
 0x2b1   : > { %2254 = vmax.xlane.f32.xlu1 %v2168_v52  ;;  %v5961_v45 = vpop.f32.mrf.mxu0 }
 0x2b2   : > { %10100 = vst [vmem:[#allocation183_spill] sm:$0xff] %v5961_v45 }
 0x2b4   : > { %v5948_v26 = vpop.xlane.xlu1 %1356 }
 0x2b5   : > { %10096 = vst [vmem:[#allocation179_spill] sm:$0xff] %v5948_v26  ;;  %vm1463_vm8 = vcmp.ge.f32.partialorder %v5232_v62, %v5948_v26  ;;  %v5957_v63 = vpop.xlane.xlu2 %1360 }
 0x2b6   : > { %v5952_v33 = vpop.xlane.xlu0 %1358  ;;  %v1527_v31 = vsel %vm1463_vm8, -inf, %v5232_v62  ;;  %10099 = vst [vmem:[#allocation182_spill] sm:$0xff] %v5957_v63  ;;  %vm1465_vm10 = vcmp.ge.f32.partialorder %v5255_v16, %v5957_v63 }
 0x2b7   : > { %10097 = vst [vmem:[#allocation180_spill] sm:$0xff] %v5952_v33  ;;  %1612 = vmax.xlane.f32.xlu2 %v1527_v31  ;;  %vm1464_vm9 = vcmp.ge.f32.partialorder %v5246_v29, %v5952_v33  ;;  %v1529_v52 = vsel %vm1465_vm10, -inf, %v5255_v16  ;;  %v5975_v33 = vpop.f32.mrf.mxu1 }
 0x2b8   : > { %v1528_v27 = vsel %vm1464_vm9, -inf, %v5246_v29  ;;  %1616 = vmax.xlane.f32.xlu0 %v1529_v52  ;;  %10102 = vst [vmem:[#allocation185_spill] sm:$0xff] %v5975_v33 }
 0x2b9   : > { %1614 = vmax.xlane.f32.xlu1 %v1528_v27  ;;  %v5973_v31 = vpop.f32.mrf.mxu0 }
 0x2ba   : > { %10101 = vst [vmem:[#allocation184_spill] sm:$0xff] %v5973_v31 }
 0x2bc   : > { %v5967_v42 = vpop.xlane.xlu1 %2226 }
 0x2bd   : > { %v5971_v26 = vpop.xlane.xlu2 %2230 }
 0x2be   : > { %v5969_v62 = vpop.xlane.xlu0 %2228 }
 0x2bf   : > { %v5985_v16 = vpop.f32.mrf.mxu1 }
 0x2c0   : > { %10104 = vst [vmem:[#allocation187_spill] sm:$0xff] %v5985_v16 }
 0x2c1   : > { %v5983_v27 = vpop.f32.mrf.mxu0 }
 0x2c2   : > { %10103 = vst [vmem:[#allocation186_spill] sm:$0xff] %v5983_v27 }
 0x2c4   : > { %v5977_v45 = vpop.xlane.xlu1 %1586 }
 0x2c5   : > { %v5981_v28 = vpop.xlane.xlu2 %1590 }
 0x2c6   : > { %v5979_v29 = vpop.xlane.xlu0 %1588 }
 0x2c9   : > { %v6001_v27 = vpop.f32.mrf.mxu0 }
 0x2ca   : > { %10108 = vst [vmem:[#allocation191_spill] sm:$0xff] %v6001_v27 }
 0x2cc   : > { %v5987_v52 = vpop.xlane.xlu1 %2002 }
 0x2cd   : > { %10105 = vst [vmem:[#allocation188_spill] sm:$0xff] %v5987_v52  ;;  %vm2106_vm11 = vcmp.ge.f32.partialorder %v5279_v49, %v5987_v52  ;;  %v5994_v33 = vpop.xlane.xlu2 %2006 }
 0x2ce   : > { %v5991_v63 = vpop.xlane.xlu0 %2004  ;;  %v2170_v31 = vsel %vm2106_vm11, -inf, %v5279_v49  ;;  %10107 = vst [vmem:[#allocation190_spill] sm:$0xff] %v5994_v33  ;;  %vm2108_vm13 = vcmp.ge.f32.partialorder %v5320_v40, %v5994_v33  ;;  %v6006_v49 = vpop.f32.mrf.mxu1 }
 0x2cf   : > { %10106 = vst [vmem:[#allocation189_spill] sm:$0xff] %v5991_v63  ;;  %2258 = vmax.xlane.f32.xlu2 %v2170_v31  ;;  %vm2107_vm12 = vcmp.ge.f32.partialorder %v5299_v13, %v5991_v63  ;;  %v2172_v52 = vsel %vm2108_vm13, -inf, %v5320_v40  ;;  %vm1461_vm13 = vcmp.ge.f32.partialorder %v5200_v19, %v5865_v60 }
 0x2d0   : > { %v2171_v10 = vsel %vm2107_vm12, -inf, %v5299_v13  ;;  %2262 = vmax.xlane.f32.xlu0 %v2172_v52  ;;  %10110 = vst [vmem:[#allocation193_spill] sm:$0xff] %v6006_v49 }
 0x2d1   : > { %2260 = vmax.xlane.f32.xlu1 %v2171_v10  ;;  %v6021_v49 = vpop.f32.mrf.mxu0 }
 0x2d2   : > { %10113 = vst [vmem:[#allocation196_spill] sm:$0xff] %v6021_v49 }
 0x2d4   : > { %v6004_v12 = vpop.xlane.xlu1 %1362 }
 0x2d5   : > { %10109 = vst [vmem:[#allocation192_spill] sm:$0xff] %v6004_v12  ;;  %vm1466_vm14 = vcmp.ge.f32.partialorder %v5273_v50, %v6004_v12  ;;  %v6013_v63 = vpop.xlane.xlu2 %1366 }
 0x2d6   : > { %v6010_v31 = vpop.xlane.xlu0 %1364  ;;  %v1530_v13 = vsel %vm1466_vm14, -inf, %v5273_v50  ;;  %10112 = vst [vmem:[#allocation195_spill] sm:$0xff] %v6013_v63  ;;  %vm1468_vm1 = vcmp.ge.f32.partialorder %v5311_v37, %v6013_v63  ;;  %v6023_v50 = vpop.f32.mrf.mxu1 }
 0x2d7   : > { %10111 = vst [vmem:[#allocation194_spill] sm:$0xff] %v6010_v31  ;;  %1618 = vmax.xlane.f32.xlu2 %v1530_v13  ;;  %vm1467_vm15 = vcmp.ge.f32.partialorder %v5292_v54, %v6010_v31  ;;  %v1532_v52 = vsel %vm1468_vm1, -inf, %v5311_v37 }
 0x2d8   : > { %v1531_v10 = vsel %vm1467_vm15, -inf, %v5292_v54  ;;  %1622 = vmax.xlane.f32.xlu0 %v1532_v52  ;;  %10114 = vst [vmem:[#allocation197_spill] sm:$0xff] %v6023_v50 }
 0x2d9   : > { %1620 = vmax.xlane.f32.xlu1 %v1531_v10  ;;  %v6027_v27 = vpop.f32.mrf.mxu0 }
 0x2da   : > { %10115 = vst [vmem:[#allocation198_spill] sm:$0xff] %v6027_v27 }
 0x2dc   : > { %v2233_v40 = vpop.xlane.xlu1 %2232 }
 0x2dd   : > { %v2237_v33 = vpop.xlane.xlu2 %2236 }
 0x2de   : > { %v2235_v12 = vpop.xlane.xlu0 %2234  ;;  %v6031_v16 = vpop.f32.mrf.mxu1 }
 0x2df   : > { %10116 = vst [vmem:[#allocation199_spill] sm:$0xff] %v6031_v16 }
 0x2e1   : > { %v6040_v50 = vpop.f32.mrf.mxu0 }
 0x2e2   : > { %10119 = vst [vmem:[#allocation202_spill] sm:$0xff] %v6040_v50 }
 0x2e4   : > { %v6025_v13 = vpop.xlane.xlu1 %1592 }
 0x2e5   : > { %v1597_v54 = vpop.xlane.xlu2 %1596 }
 0x2e6   : > { %v6029_v31 = vpop.xlane.xlu0 %1594 }
 0x2ec   : > { %v6033_v10 = vpop.xlane.xlu1 %2008 }
 0x2ed   : > { %10117 = vst [vmem:[#allocation200_spill] sm:$0xff] %v6033_v10  ;;  %vm2109_vm2 = vcmp.ge.f32.partialorder %v10053_v9, %v6033_v10  ;;  %v6042_v63 = vpop.xlane.xlu2 %2012  ;;  %v6050_v10 = vpop.f32.mrf.mxu1 }
 0x2ee   : > { %v6037_v52 = vpop.xlane.xlu0 %2010  ;;  %v2173_v37 = vsel %vm2109_vm2, -inf, %v10053_v9  ;;  %10120 = vst [vmem:[#allocation203_spill] sm:$0xff] %v6042_v63  ;;  %vm2111_vm4 = vcmp.ge.f32.partialorder %v5395_v51, %v6042_v63 }
 0x2ef   : > { %10118 = vst [vmem:[#allocation201_spill] sm:$0xff] %v6037_v52  ;;  %2264 = vmax.xlane.f32.xlu2 %v2173_v37  ;;  %vm2110_vm3 = vcmp.ge.f32.partialorder %v10057_v14, %v6037_v52  ;;  %v2175_v16 = vsel %vm2111_vm4, -inf, %v5395_v51 }
 0x2f0   : > { %v2174_v27 = vsel %vm2110_vm3, -inf, %v10057_v14  ;;  %2268 = vmax.xlane.f32.xlu0 %v2175_v16  ;;  %10121 = vst [vmem:[#allocation204_spill] sm:$0xff] %v6050_v10  ;;  %v6066_v16 = vpop.f32.mrf.mxu0 }
 0x2f1   : > { %2266 = vmax.xlane.f32.xlu1 %v2174_v27  ;;  %10125 = vst [vmem:[#allocation208_spill] sm:$0xff] %v6066_v16 }
 0x2f4   : > { %v6052_v9 = vpop.xlane.xlu1 %1368 }
 0x2f5   : > { %10122 = vst [vmem:[#allocation205_spill] sm:$0xff] %v6052_v9  ;;  %vm1469_vm5 = vcmp.ge.f32.partialorder %v5329_v57, %v6052_v9  ;;  %v6059_v52 = vpop.xlane.xlu2 %1372  ;;  %v6069_v10 = vpop.f32.mrf.mxu1  ;;  %v10128_v9 = vld [vmem:[#allocation82_spill] sm:$0xff] }
 0x2f6   : > { %v6056_v37 = vpop.xlane.xlu0 %1370  ;;  %v1533_v50 = vsel %vm1469_vm5, -inf, %v5329_v57  ;;  %10124 = vst [vmem:[#allocation207_spill] sm:$0xff] %v6059_v52  ;;  %vm1471_vm7 = vcmp.ge.f32.partialorder %v5377_v59, %v6059_v52  ;;  %v10127_v57 = vld [vmem:[#allocation83_spill] sm:$0xff] }
 0x2f7   : > { %10123 = vst [vmem:[#allocation206_spill] sm:$0xff] %v6056_v37  ;;  %1624 = vmax.xlane.f32.xlu2 %v1533_v50  ;;  %vm1470_vm6 = vcmp.ge.f32.partialorder %v10063_v0, %v6056_v37  ;;  %v1535_v14 = vsel %vm1471_vm7, -inf, %v5377_v59  ;;  %v2352_v50 = vmin.f32 %v10127_v57, %v5697_v53  ;;  %v2351_v37 = vmin.f32 %v10128_v9, %v5649_v43  ;;  %v10131_v59 = vld [vmem:[#allocation91_spill] sm:$0xff]  ;;  %v10134_v9 = vld [vmem:[#allocation78_spill] sm:$0xff] }
 0x2f8   : > { %v1534_v27 = vsel %vm1470_vm6, -inf, %v10063_v0  ;;  %1628 = vmax.xlane.f32.xlu0 %v1535_v14  ;;  %10126 = vst [vmem:[#allocation209_spill] sm:$0xff] %v6069_v10  ;;  %v10129_v0 = vld [vmem:[#allocation92_spill] sm:$0xff]  ;;  %v2481_v14 = vmin.f32 %v5701_v61, %v10131_v59  ;;  %v2480_v53 = vmin.f32 %v5721_v6, %v10132_v8  ;;  %v10133_v57 = vld [vmem:[#allocation79_spill] sm:$0xff] }
 0x2f9   : > { %1626 = vmax.xlane.f32.xlu1 %v1534_v27  ;;  %v2353_v63 = vmin.f32 %v10129_v0, %v5741_v58  ;;  %v10130_v27 = vld [vmem:[#allocation81_spill] sm:$0xff]  ;;  %v2415_v56 = vmax.f32 %v2237_v33, %v2351_v37  ;;  %v2349_v43 = vmin.f32 %v10133_v57, %v5613_v41  ;;  %v2479_v58 = vmin.f32 %v5671_v15, %v10134_v9  ;;  %v10137_v59 = vld [vmem:[#allocation76_spill] sm:$0xff]  ;;  %v10140_v15 = vld [vmem:[#allocation71_spill] sm:$0xff] }
 0x2fa   : > { %v2350_v16 = vmin.f32 %v10130_v27, %v5615_v38  ;;  %v10136_v38 = vld [vmem:[#allocation74_spill] sm:$0xff]  ;;  %v10139_v41 = vld [vmem:[#allocation69_spill] sm:$0xff] }
 0x2fb   : > { %v2348_v27 = vmin.f32 %v10136_v38, %v5569_v22  ;;  %v2413_v33 = vmax.f32 %v2233_v40, %v2349_v43  ;;  %v2543_v61 = vmax.f32 %v2415_v56, %v2479_v58  ;;  %v10145_v40 = vld [vmem:[#allocation68_spill] sm:$0xff] }
 0x2fc   : > { %v2239_v51 = vpop.xlane.xlu1 %2238  ;;  %v2414_v0 = vmax.f32 %v2235_v12, %v2350_v16  ;;  %v2347_v12 = vmin.f32 %v10140_v15, %v5535_v1  ;;  %v2476_v1 = vmin.f32 %v5589_v3, %v10145_v40  ;;  %v10147_v3 = vld [vmem:[#allocation63_spill] sm:$0xff]  ;;  %v10151_v58 = vld [vmem:[#allocation64_spill] sm:$0xff] }
 0x2fd   : > { %v2416_v52 = vmax.f32 %v2239_v51, %v2352_v50  ;;  %v2241_v23 = vpop.xlane.xlu2 %2240  ;;  %v6087_v50 = vpop.f32.mrf.mxu0  ;;  %v2412_v22 = vmax.f32 %v5971_v26, %v2348_v27  ;;  %v10157_v27 = vld [vmem:[#allocation60_spill] sm:$0xff] }
 0x2fe   : > { %v1601_v49 = vpop.xlane.xlu0 %1600  ;;  %v2417_v10 = vmax.f32 %v2241_v23, %v2353_v63  ;;  %10135 = vst [vmem:[#allocation83_spill] sm:$0xff] %v6087_v50  ;;  %v2478_v23 = vmin.f32 %v5635_v20, %v10137_v59  ;;  %v2346_v63 = vmin.f32 %v10139_v41, %v5533_v25  ;;  %v6104_v20 = vmax.f32 %v2543_v61, %v1597_v54  ;;  %v10160_v61 = vld [vmem:[#allocation51_spill] sm:$0xff] }
 0x2ff   : > { %v2544_v48 = vmax.f32 %v2416_v52, %v2480_v53  ;;  %v2411_v25 = vmax.f32 %v5969_v62, %v2347_v12  ;;  %v2345_v62 = vmin.f32 %v10147_v3, %v5489_v35  ;;  %v10150_v35 = vld [vmem:[#allocation58_spill] sm:$0xff]  ;;  %v2473_v59 = vmin.f32 %v5509_v46, %v10157_v27  ;;  %v10162_v41 = vld [vmem:[#allocation119_spill] sm:$0xff] }
 0x300   : > { %v2545_v51 = vmax.f32 %v2417_v10, %v2481_v14  ;;  %v10141_v10 = vld [vmem:[#allocation73_spill] sm:$0xff]  ;;  %v2542_v52 = vmax.f32 %v2414_v0, %v2478_v23  ;;  %10143 = vst [vmem:[#allocation81_spill] sm:$0xff] %v6104_v20  ;;  %v2410_v57 = vmax.f32 %v5967_v42, %v2346_v63  ;;  %vm2684_vm12 = vcmp.ge.f32.partialorder %v10051_v4, %v6104_v20  ;;  %v10152_v42 = vld [vmem:[#allocation106_spill] sm:$0xff]  ;;  %v10164_v12 = vld [vmem:[#allocation23_spill] sm:$0xff] }
 0x301   : > { %v2477_v37 = vmin.f32 %v5633_v55, %v10141_v10  ;;  %v2344_v9 = vmin.f32 %v10150_v35, %v5455_v32  ;;  %v10161_v46 = vld [vmem:[#allocation54_spill] sm:$0xff]  ;;  %v10178_v35 = vld [vmem:[#allocation7_spill] sm:$0xff] }
 0x302   : > { %v6093_v8 = vmax.f32 %v2545_v51, %v1601_v49  ;;  %v6110_v49 = vpop.f32.mrf.mxu1 }
 0x303   : > { %10144 = vst [vmem:[#allocation91_spill] sm:$0xff] %v6110_v49  ;;  %v2541_v54 = vmax.f32 %v2413_v33, %v2477_v37  ;;  %v2408_v23 = vmax.f32 %v5889_v11, %v2344_v9  ;;  %v2472_v11 = vmin.f32 %v10162_v41, %v10161_v46  ;;  %v10166_v37 = vld [vmem:[#allocation53_spill] sm:$0xff]  ;;  %v10179_v9 = vld [vmem:[#allocation147_spill] sm:$0xff]  ;;  %v10190_v46 = vld [vmem:[#allocation90_spill] sm:$0xff] }
 0x304   : > { %v1599_v6 = vpop.xlane.xlu1 %1598  ;;  %10138 = vst [vmem:[#allocation82_spill] sm:$0xff] %v6093_v8  ;;  %vm2688_vm8 = vcmp.ge.f32.partialorder %v10070_v7, %v6093_v8  ;;  %v10191_v41 = vld [vmem:[#allocation6_spill] sm:$0xff]  ;;  %v10238_v8 = vld [vmem:[#allocation45_spill] sm:$0xff] }
 0x305   : > { %v6101_v16 = vmax.f32 %v2544_v48, %v1599_v6  ;;  %4337 = vmatpush.msk.msra.mxu2 %vm2688_vm8, %v10070_v7  ;;  %v6116_v55 = vpop.xlane.xlu2 %2016  ;;  %v6123_v48 = vmax.f32 %v2542_v52, %v6029_v31  ;;  %v10148_v7 = vld [vmem:[#allocation66_spill] sm:$0xff]  ;;  %v2540_v31 = vmax.f32 %v2412_v22, %v2476_v1  ;;  %v6136_v43 = vmax.f32 %v2541_v54, %v6025_v13  ;;  %v6157_v32 = vpop.f32.mrf.mxu0  ;;  %v10168_v52 = vld [vmem:[#allocation155_spill] sm:$0xff]  ;;  %v10171_v54 = vld [vmem:[#allocation48_spill] sm:$0xff] }
 0x306   : > { %v6106_v56 = vpop.xlane.xlu0 %1376  ;;  %vm2113_vm11 = vcmp.ge.f32.partialorder %v5478_v17, %v6116_v55  ;;  %v2475_v14 = vmin.f32 %v5555_v36, %v10148_v7  ;;  %v2474_v36 = vmin.f32 %v5553_v34, %v10151_v58  ;;  %v2409_v13 = vmax.f32 %v5893_v2, %v2345_v62  ;;  %10155 = vst [vmem:[#allocation74_spill] sm:$0xff] %v6157_v32  ;;  %v10156_v34 = vld [vmem:[#allocation57_spill] sm:$0xff]  ;;  %v10167_v22 = vld [vmem:[#allocation118_spill] sm:$0xff]  ;;  %v10173_v7 = vld [vmem:[#allocation171_spill] sm:$0xff] }
 0x307   : > { %10142 = vst [vmem:[#allocation92_spill] sm:$0xff] %v6101_v16  ;;  %vm2686_vm9 = vcmp.ge.f32.partialorder %v10074_v44, %v6101_v16  ;;  %vm1473_vm10 = vcmp.ge.f32.partialorder %v10078_v24, %v6106_v56  ;;  %v2177_v53 = vsel %vm2113_vm11, -inf, %v5478_v17  ;;  %v6151_v51 = vmax.f32 %v2540_v31, %v5981_v28  ;;  %v10177_v31 = vld [vmem:[#allocation104_spill] sm:$0xff]  ;;  %v10180_v58 = vld [vmem:[#allocation43_spill] sm:$0xff]  ;;  %v10237_v16 = vld [vmem:[#allocation102_spill] sm:$0xff] }
 0x308   : > { %10146 = vst [vmem:[#allocation85_spill] sm:$0xff] %v6123_v48  ;;  %v1537_v26 = vsel %vm1473_vm10, -inf, %v10078_v24  ;;  %4338 = vmatpush.msk.msra.mxu2 %vm2686_vm9, %v10074_v44  ;;  %2272 = vmax.xlane.f32.xlu0 %v2177_v53  ;;  %v10153_v44 = vld [vmem:[#allocation9_spill] sm:$0xff]  ;;  %v2539_v0 = vmax.f32 %v2411_v25, %v2475_v14  ;;  %vm2682_vm15 = vcmp.ge.f32.partialorder %v10049_v39, %v6123_v48  ;;  %v10234_v17 = vld [vmem:[#allocation159_spill] sm:$0xff] }
 0x309   : > { %1632 = vmax.xlane.f32.xlu1 %v1537_v26  ;;  %10149 = vst [vmem:[#allocation79_spill] sm:$0xff] %v6136_v43  ;;  %vm1445_vm14 = vcmp.ge.f32.partialorder %v10153_v44, %v10152_v42  ;;  %v2538_v28 = vmax.f32 %v2410_v57, %v2474_v36  ;;  %vm2680_vm2 = vcmp.ge.f32.partialorder %v10045_v18, %v6136_v43  ;;  %v10170_v25 = vld [vmem:[#allocation21_spill] sm:$0xff]  ;;  %v10172_v26 = vld [vmem:[#allocation112_spill] sm:$0xff]  ;;  %v10175_v57 = vld [vmem:[#allocation19_spill] sm:$0xff] }
 0x30a   : > { %4339 = vmatpush.msk.msra.mxu2 %vm2684_vm12, %v10051_v4  ;;  %10154 = vst [vmem:[#allocation78_spill] sm:$0xff] %v6151_v51  ;;  %v2343_v4 = vmin.f32 %v10156_v34, %v5451_v47  ;;  %v6168_v2 = vmax.f32 %v2539_v0, %v5979_v29  ;;  %v10159_v47 = vld [vmem:[#allocation108_spill] sm:$0xff]  ;;  %v1525_v29 = vsel %vm1461_vm13, -inf, %v5200_v19  ;;  %v2537_v63 = vmax.f32 %v2409_v13, %v2473_v59  ;;  %v6188_v10 = vpop.f32.mrf.mxu1  ;;  %v10181_v13 = vld [vmem:[#allocation170_spill] sm:$0xff]  ;;  %v10183_v34 = vld [vmem:[#allocation17_spill] sm:$0xff] }
 0x30b   : > { %v2342_v6 = vmin.f32 %v10160_v61, %v10159_v47  ;;  %v6184_v15 = vmax.f32 %v2538_v28, %v5977_v45  ;;  %vm2678_vm3 = vcmp.ge.f32.partialorder %v10164_v12, %v6151_v51  ;;  %10165 = vst [vmem:[#allocation71_spill] sm:$0xff] %v6188_v10  ;;  %v2536_v45 = vmax.f32 %v2408_v23, %v2472_v11  ;;  %v10185_v59 = vld [vmem:[#allocation160_spill] sm:$0xff]  ;;  %v10187_v28 = vld [vmem:[#allocation15_spill] sm:$0xff]  ;;  %v10188_v61 = vld [vmem:[#allocation13_spill] sm:$0xff] }
 0x30c   : > { %v6153_v38 = vpop.xlane.xlu1 %2014  ;;  %4340 = vmatpush.msk.msra.mxu2 %vm2682_vm15, %v10049_v39  ;;  %10158 = vst [vmem:[#allocation76_spill] sm:$0xff] %v6168_v2  ;;  %v2407_v39 = vmax.f32 %v5885_v21, %v2343_v4  ;;  %v1509_v21 = vsel %vm1445_vm14, -inf, %v10153_v44  ;;  %v6199_v1 = vmax.f32 %v2537_v63, %v5914_v5  ;;  %vm2676_vm4 = vcmp.ge.f32.partialorder %v10170_v25, %v6168_v2  ;;  %v10176_v5 = vld [vmem:[#allocation107_spill] sm:$0xff]  ;;  %v10231_v51 = vld [vmem:[#allocation178_spill] sm:$0xff] }
 0x30d   : > { %vm2112_vm1 = vcmp.ge.f32.partialorder %v5453_v30, %v6153_v38  ;;  %10163 = vst [vmem:[#allocation69_spill] sm:$0xff] %v6184_v15  ;;  %v2406_v40 = vmax.f32 %v10168_v52, %v2342_v6  ;;  %v2470_v3 = vmin.f32 %v10172_v26, %v10171_v54  ;;  %v6207_v14 = vmax.f32 %v2536_v45, %v10173_v7  ;;  %v6226_v27 = vpop.f32.mrf.mxu0  ;;  %v10192_v11 = vld [vmem:[#allocation11_spill] sm:$0xff]  ;;  %v10198_v52 = vld [vmem:[#allocation164_spill] sm:$0xff] }
 0x30e   : > { %v2176_v33 = vsel %vm2112_vm1, -inf, %v5453_v30  ;;  %4341 = vmatpush.msk.msra.mxu2 %vm2680_vm2, %v10045_v18  ;;  %v2471_v18 = vmin.f32 %v10167_v22, %v10166_v37  ;;  %10169 = vst [vmem:[#allocation73_spill] sm:$0xff] %v6199_v1  ;;  %vm2674_vm5 = vcmp.ge.f32.partialorder %v10175_v57, %v6184_v15  ;;  %vm1444_vm7 = vcmp.ge.f32.partialorder %v10178_v35, %v10177_v31  ;;  %v10196_v37 = vld [vmem:[#allocation4_spill] sm:$0xff]  ;;  %v10202_v54 = vld [vmem:[#allocation3_spill] sm:$0xff] }
 0x30f   : > { %2270 = vmax.xlane.f32.xlu2 %v2176_v33  ;;  %10174 = vst [vmem:[#allocation68_spill] sm:$0xff] %v6207_v14  ;;  %vm2099_vm8 = vcmp.ge.f32.partialorder %v10180_v58, %v10179_v9  ;;  %v2534_v36 = vmax.f32 %v2406_v40, %v2470_v3  ;;  %vm2672_vm9 = vcmp.ge.f32.partialorder %v10183_v34, %v6199_v1  ;;  %v1508_v33 = vsel %vm1444_vm7, -inf, %v10178_v35  ;;  %v10199_v40 = vld [vmem:[#allocation49_spill] sm:$0xff]  ;;  %v10203_v3 = vld [vmem:[#allocation150_spill] sm:$0xff]  ;;  %v10228_v1 = vld [vmem:[#allocation172_spill] sm:$0xff] }
 0x310   : > { %4342 = vmatpush.msk.msra.mxu2 %vm2678_vm3, %v10164_v12  ;;  %1576 = vmax.xlane.f32.xlu0 %v1509_v21  ;;  %v2535_v62 = vmax.f32 %v2407_v39, %v2471_v18  ;;  %10184 = vst [vmem:[#allocation66_spill] sm:$0xff] %v6226_v27  ;;  %vm2670_vm10 = vcmp.ge.f32.partialorder %v10187_v28, %v6207_v14  ;;  %v2163_v47 = vsel %vm2099_vm8, -inf, %v10180_v58  ;;  %v10194_v39 = vld [vmem:[#allocation38_spill] sm:$0xff]  ;;  %v10195_v12 = vld [vmem:[#allocation88_spill] sm:$0xff]  ;;  %v10232_v30 = vld [vmem:[#allocation183_spill] sm:$0xff] }
 0x311   : > { %1608 = vmax.xlane.f32.xlu1 %v1525_v29  ;;  %v6230_v23 = vmax.f32 %v2534_v36, %v10185_v59  ;;  %vm2083_vm12 = vcmp.ge.f32.partialorder %v10191_v41, %v10190_v46  ;;  %v10193_v29 = vld [vmem:[#allocation148_spill] sm:$0xff]  ;;  %vm2082_vm15 = vcmp.ge.f32.partialorder %v10196_v37, %v10195_v12  ;;  %vm1460_vm1 = vcmp.ge.f32.partialorder %v10199_v40, %v10198_v52 }
 0x312   : > { %4343 = vmatpush.msk.msra.mxu2 %vm2676_vm4, %v10170_v25  ;;  %v6221_v0 = vmax.f32 %v2535_v62, %v10181_v13  ;;  %v6239_v6 = vpop.f32.mrf.mxu1  ;;  %vm2098_vm14 = vcmp.ge.f32.partialorder %v10194_v39, %v10193_v29  ;;  %v2147_v63 = vsel %vm2083_vm12, -inf, %v10191_v41  ;;  %v2146_v21 = vsel %vm2082_vm15, -inf, %v10196_v37  ;;  %v10201_v25 = vld [vmem:[#allocation86_spill] sm:$0xff]  ;;  %v10206_v13 = vld [vmem:[#allocation95_spill] sm:$0xff]  ;;  %v6308_v37 = vpop.xlane.xlu2 %2246 }
 0x313   : > { %10186 = vst [vmem:[#allocation58_spill] sm:$0xff] %v6230_v23  ;;  %vm2666_vm13 = vcmp.ge.f32.partialorder %v10192_v11, %v6230_v23  ;;  %v2162_v22 = vsel %vm2098_vm14, -inf, %v10194_v39  ;;  %vm1442_vm2 = vcmp.ge.f32.partialorder %v10202_v54, %v10201_v25  ;;  %v1524_v26 = vsel %vm1460_vm1, -inf, %v10199_v40  ;;  %v10204_v62 = vld [vmem:[#allocation46_spill] sm:$0xff]  ;;  %v10219_v39 = vld [vmem:[#allocation184_spill] sm:$0xff]  ;;  %v10241_v40 = vld [vmem:[#allocation111_spill] sm:$0xff] }
 0x314   : > { %v6209_v53 = vpop.xlane.xlu1 %1374  ;;  %4344 = vmatpush.msk.msra.mxu2 %vm2674_vm5, %v10175_v57  ;;  %10182 = vst [vmem:[#allocation63_spill] sm:$0xff] %v6221_v0  ;;  %vm2668_vm11 = vcmp.ge.f32.partialorder %v10188_v61, %v6221_v0  ;;  %vm1459_vm3 = vcmp.ge.f32.partialorder %v10204_v62, %v10203_v3  ;;  %v1506_v7 = vsel %vm1442_vm2, -inf, %v10202_v54 }
 0x315   : > { %vm1472_vm6 = vcmp.ge.f32.partialorder %v10176_v5, %v6209_v53  ;;  %10189 = vst [vmem:[#allocation64_spill] sm:$0xff] %v6239_v6  ;;  %v6253_v18 = vpop.f32.mrf.mxu0  ;;  %v1523_v57 = vsel %vm1459_vm3, -inf, %v10204_v62  ;;  %v10239_v62 = vld [vmem:[#allocation153_spill] sm:$0xff] }
 0x316   : > { %v1536_v4 = vsel %vm1472_vm6, -inf, %v10176_v5  ;;  %4345 = vmatpush.msk.msra.mxu2 %vm2672_vm9, %v10183_v34  ;;  %10197 = vst [vmem:[#allocation106_spill] sm:$0xff] %v6253_v18  ;;  %v10207_v34 = vld [vmem:[#allocation5_spill] sm:$0xff] }
 0x317   : > { %1630 = vmax.xlane.f32.xlu2 %v1536_v4  ;;  %vm1443_vm4 = vcmp.ge.f32.partialorder %v10207_v34, %v10206_v13  ;;  %v316_v4 = vld [vmem:[%s9245_s0 + $0x1e8] sm:$0xff] }
 0x318   : > { %4346 = vmatpush.msk.msra.mxu2 %vm2670_vm10, %v10187_v28  ;;  %2244 = vmax.xlane.f32.xlu0 %v2163_v47  ;;  %v1507_v59 = vsel %vm1443_vm4, -inf, %v10207_v34  ;;  %v10210_v47 = vld [vmem:[#allocation187_spill] sm:$0xff] }
 0x319   : > { %1574 = vmax.xlane.f32.xlu1 %v1508_v33  ;;  %4334 = vmatmul.msk.f32.gmra.mxu1 %vm351_vm0, %v316_v4  ;;  %v10209_v33 = vld [vmem:[#allocation196_spill] sm:$0xff] }
 0x31a   : > { %4347 = vmatpush.msk.msra.mxu2 %vm2668_vm11, %v10188_v61  ;;  %v6258_v45 = vpop.f32.mrf.mxu1  ;;  %4254 = vmatmul.msk.f32.gmra.mxu0 %vm351_vm0, %v316_v4  ;;  %v10211_v61 = vld [vmem:[#allocation152_spill] sm:$0xff]  ;;  %v317_v4 = vld [vmem:[%s9245_s0 + $0x1f0] sm:$0xff] }
 0x31b   : > { %10200 = vst [vmem:[#allocation9_spill] sm:$0xff] %v6258_v45 }
 0x31c   : > { %4348 = vmatpush.msk.msra.mxu2 %vm2666_vm13, %v10192_v11  ;;  %v10212_v11 = vld [vmem:[#allocation40_spill] sm:$0xff] }
 0x31d   : > { %v6267_v36 = vpop.f32.mrf.mxu0  ;;  %vm1458_vm5 = vcmp.ge.f32.partialorder %v10212_v11, %v10211_v61 }
 0x31e   : > { %10205 = vst [vmem:[#allocation57_spill] sm:$0xff] %v6267_v36 }
 0x31f   : > { %2212 = vmax.xlane.f32.xlu2 %v2147_v63 }
 0x320   : > { %2210 = vmax.xlane.f32.xlu0 %v2146_v21  ;;  %v1522_v21 = vsel %vm1458_vm5, -inf, %v10212_v11  ;;  %v10235_v11 = vld [vmem:[#allocation162_spill] sm:$0xff] }
 0x321   : > { %2242 = vmax.xlane.f32.xlu1 %v2162_v22  ;;  %v6285_v22 = vpop.xlane.xlu0 %2250  ;;  %4335 = vmatmul.msk.f32.gmra.mxu1 %vm351_vm0, %v317_v4 }
 0x322   : > { %v6277_v28 = vpop.f32.mrf.mxu1  ;;  %4255 = vmatmul.msk.f32.gmra.mxu0 %vm351_vm0, %v317_v4  ;;  %v10222_v4 = vld [vmem:[#allocation191_spill] sm:$0xff] }
 0x323   : > { %10208 = vst [vmem:[#allocation60_spill] sm:$0xff] %v6277_v28 }
 0x325   : > { %v6283_v63 = vpop.f32.mrf.mxu0 }
 0x326   : > { %10213 = vst [vmem:[#allocation108_spill] sm:$0xff] %v6283_v63 }
 0x327   : > { %1606 = vmax.xlane.f32.xlu2 %v1524_v26 }
 0x328   : > { %1604 = vmax.xlane.f32.xlu0 %v1523_v57  ;;  %v10216_v57 = vld [vmem:[#allocation181_spill] sm:$0xff] }
 0x329   : > { %1570 = vmax.xlane.f32.xlu1 %v1506_v7  ;;  %v10215_v7 = vld [vmem:[#allocation176_spill] sm:$0xff] }
 0x32a   : > { %v6288_v26 = vpop.f32.mrf.mxu1 }
 0x32b   : > { %10214 = vst [vmem:[#allocation51_spill] sm:$0xff] %v6288_v26 }
 0x32f   : > { %1572 = vmax.xlane.f32.xlu2 %v1507_v59  ;;  %v6297_v59 = vpop.xlane.xlu1 %2248 }
 0x330   : > { %1792 = vmax.xlane.f32.xlu0 %v10210_v47  ;;  %v6301_v47 = vpop.xlane.xlu0 %1610 }
 0x331   : > { %1152 = vmax.xlane.f32.xlu1 %v10209_v33  ;;  %v6299_v33 = vpop.f32.mrf.mxu0 }
 0x332   : > { %10217 = vst [vmem:[#allocation54_spill] sm:$0xff] %v6299_v33  ;;  %v6306_v58 = vpop.f32.mrf.mxu1 }
 0x333   : > { %10221 = vst [vmem:[#allocation119_spill] sm:$0xff] %v6306_v58 }
 0x337   : > { %1602 = vmax.xlane.f32.xlu2 %v1522_v21  ;;  %v10218_v21 = vld [vmem:[#allocation185_spill] sm:$0xff]  ;;  %v6310_v41 = vpop.xlane.xlu1 %2254 }
 0x338   : > { %1788 = vmax.xlane.f32.xlu0 %v10216_v57  ;;  %v6312_v50 = vpop.xlane.xlu0 %2256 }
 0x339   : > { %1786 = vmax.xlane.f32.xlu1 %v10215_v7  ;;  %v10220_v7 = vld [vmem:[#allocation186_spill] sm:$0xff]  ;;  %v6315_v23 = vpop.f32.mrf.mxu0 }
 0x33a   : > { %10223 = vst [vmem:[#allocation23_spill] sm:$0xff] %v6315_v23 }
 0x33f   : > { %1790 = vmax.xlane.f32.xlu2 %v10218_v21  ;;  %v6324_v21 = vpop.f32.mrf.mxu1 }
 0x340   : > { %1148 = vmax.xlane.f32.xlu0 %v10220_v7  ;;  %v6322_v7 = vpop.xlane.xlu2 %2252  ;;  %10224 = vst [vmem:[#allocation53_spill] sm:$0xff] %v6324_v21  ;;  %v6331_v57 = vpop.xlane.xlu0 %1616 }
 0x341   : > { %1146 = vmax.xlane.f32.xlu1 %v10219_v39  ;;  %v318_v39 = vld [vmem:[%s9245_s0 + $0x1f8] sm:$0xff]  ;;  %v6335_v0 = vpop.f32.mrf.mxu0 }
 0x342   : > { %4336 = vmatmul.msk.f32.gmra.mxu1 %vm351_vm0, %v318_v39  ;;  %4256 = vmatmul.msk.f32.gmra.mxu0 %vm351_vm0, %v318_v39  ;;  %10227 = vst [vmem:[#allocation118_spill] sm:$0xff] %v6335_v0 }
 0x347   : > { %1150 = vmax.xlane.f32.xlu2 %v10222_v4  ;;  %v6329_v4 = vpop.xlane.xlu1 %1614 }
 0x348   : > { %1816 = vmax.xlane.f32.xlu0 %v6306_v58  ;;  %v10226_v58 = vld [vmem:[#allocation168_spill] sm:$0xff]  ;;  %v6337_v14 = vpop.xlane.xlu2 %1612  ;;  %v6342_v2 = vpop.xlane.xlu0 %2262 }
 0x349   : > { %1814 = vmax.xlane.f32.xlu1 %v6288_v26  ;;  %v10225_v26 = vld [vmem:[#allocation165_spill] sm:$0xff]  ;;  %v6346_v39 = vpop.f32.mrf.mxu0 }
 0x34a   : > { %10229 = vst [vmem:[#allocation155_spill] sm:$0xff] %v6346_v39 }
 0x34f   : > { %1818 = vmax.xlane.f32.xlu2 %v6324_v21  ;;  %v6340_v15 = vpop.xlane.xlu1 %2260 }
 0x350   : > { %1782 = vmax.xlane.f32.xlu0 %v10226_v58  ;;  %v6348_v21 = vpop.xlane.xlu2 %2258 }
 0x351   : > { %1780 = vmax.xlane.f32.xlu1 %v10225_v26  ;;  %v10230_v26 = vld [vmem:[#allocation173_spill] sm:$0xff] }
 0x357   : > { %1784 = vmax.xlane.f32.xlu2 %v10228_v1  ;;  %v6352_v58 = vpop.xlane.xlu1 %1620  ;;  %v6355_v1 = vpop.xlane.xlu0 %1622 }
 0x358   : > { %1176 = vmax.xlane.f32.xlu0 %v6335_v0  ;;  %v6358_v43 = vpop.xlane.xlu2 %1618 }
 0x359   : > { %1174 = vmax.xlane.f32.xlu1 %v6315_v23 }
 0x35f   : > { %1178 = vmax.xlane.f32.xlu2 %v6346_v39 }
 0x360   : > { %1142 = vmax.xlane.f32.xlu0 %v10231_v51 }
 0x361   : > { %1140 = vmax.xlane.f32.xlu1 %v10230_v26  ;;  %v10233_v26 = vld [vmem:[#allocation154_spill] sm:$0xff] }
 0x362   : > { %v2265_v39 = vpop.xlane.xlu2 %2264 }
 0x363   : > { %v2269_v0 = vpop.xlane.xlu0 %2268 }
 0x364   : > { %v2267_v23 = vpop.xlane.xlu1 %2266 }
 0x367   : > { %1144 = vmax.xlane.f32.xlu2 %v10232_v30 }
 0x368   : > { %1810 = vmax.xlane.f32.xlu0 %v6258_v45 }
 0x369   : > { %1808 = vmax.xlane.f32.xlu1 %v6239_v6  ;;  %v10236_v6 = vld [vmem:[#allocation144_spill] sm:$0xff] }
 0x36a   : > { %v6367_v30 = vpop.xlane.xlu2 %1624  ;;  %v2369_v45 = vmin.f32 %v10236_v6, %v6116_v55  ;;  %v10243_v55 = vld [vmem:[#allocation167_spill] sm:$0xff] }
 0x36b   : > { %v1629_v48 = vpop.xlane.xlu0 %1628 }
 0x36c   : > { %v1627_v51 = vpop.xlane.xlu1 %1626 }
 0x36f   : > { %1812 = vmax.xlane.f32.xlu2 %v6277_v28 }
 0x370   : > { %1776 = vmax.xlane.f32.xlu0 %v10234_v17  ;;  %v2497_v17 = vmin.f32 %v6106_v56, %v10239_v62  ;;  %v10247_v56 = vld [vmem:[#allocation25_spill] sm:$0xff] }
 0x371   : > { %1774 = vmax.xlane.f32.xlu1 %v10233_v26  ;;  %v2341_v26 = vmin.f32 %v10238_v8, %v10237_v16  ;;  %v10245_v8 = vld [vmem:[#allocation203_spill] sm:$0xff]  ;;  %v10246_v16 = vld [vmem:[#allocation142_spill] sm:$0xff]  ;;  %v10248_v62 = vld [vmem:[#allocation101_spill] sm:$0xff] }
 0x372   : > { %v2367_v29 = vmin.f32 %v10246_v16, %v10245_v8  ;;  %v10252_v16 = vld [vmem:[#allocation157_spill] sm:$0xff] }
 0x377   : > { %1778 = vmax.xlane.f32.xlu2 %v10235_v11  ;;  %v10240_v11 = vld [vmem:[#allocation158_spill] sm:$0xff] }
 0x378   : > { %1170 = vmax.xlane.f32.xlu0 %v6283_v63  ;;  %v10242_v63 = vld [vmem:[#allocation42_spill] sm:$0xff] }
 0x379   : > { %1168 = vmax.xlane.f32.xlu1 %v6267_v36  ;;  %v2405_v36 = vmax.f32 %v10240_v11, %v2341_v26  ;;  %v2469_v34 = vmin.f32 %v10152_v42, %v10242_v63  ;;  %v10251_v63 = vld [vmem:[#allocation138_spill] sm:$0xff] }
 0x37b   : > { %v2273_v28 = vpop.xlane.xlu0 %2272  ;;  %v2533_v42 = vmax.f32 %v2405_v36, %v2469_v34 }
 0x37c   : > { %v1633_v20 = vpop.xlane.xlu1 %1632  ;;  %v2433_v54 = vmax.f32 %v2273_v28, %v2369_v45  ;;  %v2368_v45 = vmin.f32 %v10247_v56, %v6153_v38  ;;  %v10249_v28 = vld [vmem:[#allocation44_spill] sm:$0xff] }
 0x37d   : > { %v2340_v11 = vmin.f32 %v10249_v28, %v10248_v62  ;;  %v10253_v56 = vld [vmem:[#allocation200_spill] sm:$0xff]  ;;  %v10254_v62 = vld [vmem:[#allocation137_spill] sm:$0xff] }
 0x37e   : > { %v2561_v61 = vmax.f32 %v2433_v54, %v2497_v17  ;;  %v10250_v54 = vld [vmem:[#allocation201_spill] sm:$0xff]  ;;  %v2365_v28 = vmin.f32 %v10254_v62, %v10253_v56 }
 0x37f   : > { %1172 = vmax.xlane.f32.xlu2 %v6299_v33  ;;  %v2366_v26 = vmin.f32 %v10251_v63, %v10250_v54  ;;  %v2404_v33 = vmax.f32 %v10252_v16, %v2340_v11  ;;  %v10258_v54 = vld [vmem:[#allocation169_spill] sm:$0xff]  ;;  %v10262_v11 = vld [vmem:[#allocation135_spill] sm:$0xff] }
 0x380   : > { %1136 = vmax.xlane.f32.xlu0 %v10243_v55  ;;  %v6382_v19 = vmax.f32 %v2561_v61, %v1633_v20  ;;  %v2431_v20 = vmax.f32 %v2269_v0, %v2367_v29  ;;  %v10256_v55 = vld [vmem:[#allocation207_spill] sm:$0xff]  ;;  %v10259_v0 = vld [vmem:[#allocation41_spill] sm:$0xff]  ;;  %v10260_v29 = vld [vmem:[#allocation190_spill] sm:$0xff] }
 0x381   : > { %1134 = vmax.xlane.f32.xlu1 %v10241_v40  ;;  %v10255_v40 = vld [vmem:[#allocation139_spill] sm:$0xff]  ;;  %v2430_v34 = vmax.f32 %v2267_v23, %v2366_v26  ;;  %v10265_v23 = vld [vmem:[#allocation189_spill] sm:$0xff] }
 0x382   : > { %v2271_v6 = vpop.xlane.xlu2 %2270  ;;  %10244 = vst [vmem:[#allocation21_spill] sm:$0xff] %v6382_v19  ;;  %vm2720_vm0 = vcmp.ge.f32.partialorder %v10078_v24, %v6382_v19  ;;  %v2495_v18 = vmin.f32 %v10256_v55, %v10255_v40  ;;  %v10257_v19 = vld [vmem:[#allocation29_spill] sm:$0xff]  ;;  %v10266_v55 = vld [vmem:[#allocation130_spill] sm:$0xff] }
 0x383   : > { %v2432_v61 = vmax.f32 %v2271_v6, %v2368_v45  ;;  %4353 = vmatpush.msk.msra.mxu3 %vm2720_vm0, %v10078_v24  ;;  %v1577_v8 = vpop.xlane.xlu0 %1576  ;;  %v2496_v36 = vmin.f32 %v6209_v53, %v10257_v19  ;;  %v2468_v24 = vmin.f32 %v10177_v31, %v10259_v0  ;;  %v10261_v6 = vld [vmem:[#allocation132_spill] sm:$0xff]  ;;  %v10264_v19 = vld [vmem:[#allocation209_spill] sm:$0xff]  ;;  %v2363_v26 = vmin.f32 %v10266_v55, %v10265_v23  ;;  %v10267_v31 = vld [vmem:[#allocation134_spill] sm:$0xff] }
 0x384   : > { %v6390_v17 = vpop.xlane.xlu1 %1608  ;;  %v6398_v38 = vmax.f32 %v2533_v42, %v1577_v8  ;;  %v2364_v45 = vmin.f32 %v10261_v6, %v10260_v29  ;;  %v10263_v42 = vld [vmem:[#allocation206_spill] sm:$0xff]  ;;  %v2429_v8 = vmax.f32 %v2265_v39, %v2365_v28  ;;  %v2559_v40 = vmax.f32 %v2431_v20, %v2495_v18  ;;  %v10268_v16 = vld [vmem:[#allocation205_spill] sm:$0xff]  ;;  %v10271_v28 = vld [vmem:[#allocation131_spill] sm:$0xff] }
 0x385   : > { %v2494_v63 = vmin.f32 %v10263_v42, %v10262_v11  ;;  %v2560_v53 = vmax.f32 %v2432_v61, %v2496_v36  ;;  %v2493_v56 = vmin.f32 %v10268_v16, %v10267_v31  ;;  %v2532_v0 = vmax.f32 %v2404_v33, %v2468_v24  ;;  %v10270_v20 = vld [vmem:[#allocation129_spill] sm:$0xff]  ;;  %v10272_v36 = vld [vmem:[#allocation195_spill] sm:$0xff]  ;;  %v10279_v16 = vld [vmem:[#allocation124_spill] sm:$0xff] }
 0x386   : > { %vm2664_vm6 = vcmp.ge.f32.partialorder %v10153_v44, %v6398_v38  ;;  %v2428_v29 = vmax.f32 %v6342_v2, %v2364_v45  ;;  %v6423_v39 = vmax.f32 %v2559_v40, %v1629_v48  ;;  %v2492_v11 = vmin.f32 %v10272_v36, %v10271_v28  ;;  %v10273_v48 = vld [vmem:[#allocation177_spill] sm:$0xff]  ;;  %v10275_v45 = vld [vmem:[#allocation128_spill] sm:$0xff] }
 0x387   : > { %1138 = vmax.xlane.f32.xlu2 %v10258_v54  ;;  %4349 = vmatpush.msk.msra.mxu2 %vm2664_vm6, %v10153_v44  ;;  %v2558_v6 = vmax.f32 %v2430_v34, %v2494_v63  ;;  %v10269_v44 = vld [vmem:[#allocation188_spill] sm:$0xff]  ;;  %v2427_v42 = vmax.f32 %v6340_v15, %v2363_v26  ;;  %v2557_v55 = vmax.f32 %v2429_v8, %v2493_v56  ;;  %v10274_v34 = vld [vmem:[#allocation126_spill] sm:$0xff]  ;;  %v10278_v26 = vld [vmem:[#allocation175_spill] sm:$0xff] }
 0x388   : > { %1804 = vmax.xlane.f32.xlu0 %v6110_v49  ;;  %v2362_v61 = vmin.f32 %v10270_v20, %v10269_v44  ;;  %v2361_v24 = vmin.f32 %v10274_v34, %v10273_v48  ;;  %v10276_v63 = vld [vmem:[#allocation194_spill] sm:$0xff]  ;;  %v2556_v15 = vmax.f32 %v2428_v29, %v2492_v11  ;;  %v10277_v8 = vld [vmem:[#allocation100_spill] sm:$0xff]  ;;  %v2360_v56 = vmin.f32 %v10279_v16, %v10278_v26  ;;  %v10286_v36 = vld [vmem:[#allocation125_spill] sm:$0xff] }
 0x389   : > { %1802 = vmax.xlane.f32.xlu1 %v10264_v19  ;;  %v6432_v31 = vmax.f32 %v2558_v6, %v1627_v51  ;;  %v2491_v40 = vmin.f32 %v10276_v63, %v10275_v45  ;;  %v6447_v51 = vmax.f32 %v2557_v55, %v6367_v30  ;;  %vm2716_vm9 = vcmp.ge.f32.partialorder %v10277_v8, %v6423_v39  ;;  %v10282_v6 = vld [vmem:[#allocation143_spill] sm:$0xff]  ;;  %v10283_v44 = vld [vmem:[#allocation94_spill] sm:$0xff]  ;;  %v10289_v48 = vld [vmem:[#allocation89_spill] sm:$0xff] }
 0x38a   : > { %v1631_v62 = vpop.xlane.xlu2 %1630  ;;  %v2425_v30 = vmax.f32 %v6312_v50, %v2361_v24  ;;  %v6462_v29 = vmax.f32 %v2556_v15, %v6355_v1  ;;  %v10284_v20 = vld [vmem:[#allocation174_spill] sm:$0xff]  ;;  %v10290_v34 = vld [vmem:[#allocation163_spill] sm:$0xff]  ;;  %v10291_v24 = vld [vmem:[#allocation117_spill] sm:$0xff] }
 0x38b   : > { %v6425_v18 = vmax.f32 %v2560_v53, %v1631_v62  ;;  %v6436_v2 = vpop.xlane.xlu0 %2244  ;;  %v2426_v53 = vmax.f32 %v6348_v21, %v2362_v61  ;;  %v10280_v62 = vld [vmem:[#allocation127_spill] sm:$0xff]  ;;  %vm2714_vm10 = vcmp.ge.f32.partialorder %v10283_v44, %v6432_v31  ;;  %v10287_v11 = vld [vmem:[#allocation182_spill] sm:$0xff]  ;;  %vm2712_vm11 = vcmp.ge.f32.partialorder %v10289_v48, %v6447_v51  ;;  %v10294_v16 = vld [vmem:[#allocation84_spill] sm:$0xff] }
 0x38c   : > { %v1575_v23 = vpop.xlane.xlu1 %1574  ;;  %v10285_v61 = vld [vmem:[#allocation123_spill] sm:$0xff]  ;;  %v2358_v45 = vmin.f32 %v10291_v24, %v10290_v34  ;;  %v10292_v63 = vld [vmem:[#allocation122_spill] sm:$0xff]  ;;  %vm2710_vm12 = vcmp.ge.f32.partialorder %v10294_v16, %v6462_v29 }
 0x38d   : > { %v6434_v33 = vmax.f32 %v2532_v0, %v1575_v23  ;;  %vm2718_vm7 = vcmp.ge.f32.partialorder %v10176_v5, %v6425_v18  ;;  %v10281_v0 = vld [vmem:[#allocation192_spill] sm:$0xff]  ;;  %v2359_v28 = vmin.f32 %v10285_v61, %v10284_v20  ;;  %v2489_v23 = vmin.f32 %v10287_v11, %v10286_v36  ;;  %v10302_v11 = vld [vmem:[#allocation115_spill] sm:$0xff] }
 0x38e   : > { %4354 = vmatpush.msk.msra.mxu3 %vm2718_vm7, %v10176_v5  ;;  %v2490_v21 = vmin.f32 %v10281_v0, %v10280_v62  ;;  %v2555_v5 = vmax.f32 %v2427_v42, %v2491_v40  ;;  %v2424_v42 = vmax.f32 %v6310_v41, %v2360_v56  ;;  %v10293_v40 = vld [vmem:[#allocation180_spill] sm:$0xff]  ;;  %v10295_v56 = vld [vmem:[#allocation31_spill] sm:$0xff]  ;;  %v10296_v62 = vld [vmem:[#allocation114_spill] sm:$0xff] }
 0x38f   : > { %1806 = vmax.xlane.f32.xlu2 %v6188_v10  ;;  %vm2662_vm8 = vcmp.ge.f32.partialorder %v10178_v35, %v6434_v33  ;;  %v2488_v15 = vmin.f32 %v10293_v40, %v10292_v63  ;;  %v2423_v26 = vmax.f32 %v6322_v7, %v2359_v28  ;;  %v2553_v41 = vmax.f32 %v2425_v30, %v2489_v23  ;;  %v10300_v30 = vld [vmem:[#allocation77_spill] sm:$0xff]  ;;  %v10301_v28 = vld [vmem:[#allocation34_spill] sm:$0xff] }
 0x390   : > { %4350 = vmatpush.msk.msra.mxu2 %vm2662_vm8, %v10178_v35  ;;  %4355 = vmatpush.msk.msra.mxu3 %vm2716_vm9, %v10277_v8  ;;  %v10288_v35 = vld [vmem:[#allocation146_spill] sm:$0xff]  ;;  %v2554_v1 = vmax.f32 %v2426_v53, %v2490_v21  ;;  %v6475_v55 = vmax.f32 %v2555_v5, %v6352_v58  ;;  %v2357_v0 = vmin.f32 %v10296_v62, %v10295_v56  ;;  %v10297_v5 = vld [vmem:[#allocation121_spill] sm:$0xff]  ;;  %v10310_v62 = vld [vmem:[#allocation67_spill] sm:$0xff] }
 0x391   : > { %1768 = vmax.xlane.f32.xlu1 %v10282_v6  ;;  %1770 = vmax.xlane.f32.xlu0 %v10288_v35  ;;  %v2422_v21 = vmax.f32 %v6285_v22, %v2358_v45  ;;  %v2552_v61 = vmax.f32 %v2424_v42, %v2488_v15  ;;  %v6499_v7 = vmax.f32 %v2553_v41, %v6331_v57  ;;  %v10303_v23 = vld [vmem:[#allocation166_spill] sm:$0xff]  ;;  %v10305_v42 = vld [vmem:[#allocation113_spill] sm:$0xff]  ;;  %v10306_v45 = vld [vmem:[#allocation72_spill] sm:$0xff] }
 0x392   : > { %4356 = vmatpush.msk.msra.mxu3 %vm2714_vm10, %v10283_v44  ;;  %v2213_v50 = vpop.xlane.xlu2 %2212  ;;  %v6488_v53 = vmax.f32 %v2554_v1, %v6358_v43  ;;  %v10298_v44 = vld [vmem:[#allocation179_spill] sm:$0xff]  ;;  %v10299_v43 = vld [vmem:[#allocation149_spill] sm:$0xff]  ;;  %vm2708_vm13 = vcmp.ge.f32.partialorder %v10300_v30, %v6475_v55  ;;  %v2338_v36 = vmin.f32 %v10301_v28, %v10195_v12  ;;  %v2486_v22 = vmin.f32 %v10303_v23, %v10302_v11  ;;  %v10308_v40 = vld [vmem:[#allocation110_spill] sm:$0xff] }
 0x393   : > { %v2211_v58 = vpop.xlane.xlu0 %2210  ;;  %v2487_v20 = vmin.f32 %v10298_v44, %v10297_v5  ;;  %v2421_v1 = vmax.f32 %v6297_v59, %v2357_v0  ;;  %v6513_v24 = vmax.f32 %v2552_v61, %v6329_v4  ;;  %v10307_v12 = vld [vmem:[#allocation39_spill] sm:$0xff]  ;;  %v2485_v59 = vmin.f32 %v5865_v60, %v10308_v40  ;;  %v10313_v61 = vld [vmem:[#allocation33_spill] sm:$0xff]  ;;  %v10314_v28 = vld [vmem:[#allocation36_spill] sm:$0xff] }
 0x394   : > { %v6483_v8 = vpop.xlane.xlu1 %2242  ;;  %4357 = vmatpush.msk.msra.mxu3 %vm2712_vm11, %v10289_v48  ;;  %v10304_v48 = vld [vmem:[#allocation161_spill] sm:$0xff]  ;;  %vm2706_vm14 = vcmp.ge.f32.partialorder %v10306_v45, %v6488_v53  ;;  %v2339_v63 = vmin.f32 %v10307_v12, %v10190_v46  ;;  %v2550_v15 = vmax.f32 %v2422_v21, %v2486_v22  ;;  %v10309_v4 = vld [vmem:[#allocation103_spill] sm:$0xff]  ;;  %vm2704_vm15 = vcmp.ge.f32.partialorder %v10310_v62, %v6499_v7  ;;  %v10323_v40 = vld [vmem:[#allocation52_spill] sm:$0xff] }
 0x395   : > { %v2356_v34 = vmin.f32 %v10305_v42, %v10304_v48  ;;  %v2551_v57 = vmax.f32 %v2423_v26, %v2487_v20  ;;  %v2355_v41 = vmin.f32 %v10309_v4, %v10179_v9  ;;  %v10311_v46 = vld [vmem:[#allocation109_spill] sm:$0xff]  ;;  %v2549_v21 = vmax.f32 %v2421_v1, %v2485_v59  ;;  %v10319_v1 = vld [vmem:[#allocation151_spill] sm:$0xff]  ;;  %v10321_v48 = vld [vmem:[#allocation96_spill] sm:$0xff] }
 0x396   : > { %4358 = vmatpush.msk.msra.mxu3 %vm2710_vm12, %v10294_v16  ;;  %v2484_v60 = vmin.f32 %v10198_v52, %v10311_v46  ;;  %v6535_v0 = vmax.f32 %v2550_v15, %v6301_v47  ;;  %v2403_v44 = vmax.f32 %v2213_v50, %v2339_v63  ;;  %v2467_v52 = vmin.f32 %v10206_v13, %v10314_v28  ;;  %v10315_v47 = vld [vmem:[#allocation99_spill] sm:$0xff]  ;;  %v10316_v50 = vld [vmem:[#allocation106_spill] sm:$0xff]  ;;  %v10326_v4 = vld [vmem:[#allocation5_spill] sm:$0xff] }
 0x397   : > { %1772 = vmax.xlane.f32.xlu2 %v10299_v43  ;;  %v2420_v16 = vmax.f32 %v6308_v37, %v2356_v34  ;;  %v6528_v56 = vmax.f32 %v2551_v57, %v6337_v14  ;;  %v2419_v9 = vmax.f32 %v6436_v2, %v2355_v41  ;;  %v2402_v37 = vmax.f32 %v2211_v58, %v2338_v36  ;;  %v10312_v14 = vld [vmem:[#allocation65_spill] sm:$0xff]  ;;  %v10322_v34 = vld [vmem:[#allocation156_spill] sm:$0xff] }
 0x398   : > { %4359 = vmatpush.msk.msra.mxu3 %vm2708_vm13, %v10300_v30  ;;  %vm2702_vm1 = vcmp.ge.f32.partialorder %v10312_v14, %v6513_v24  ;;  %v2466_v30 = vmin.f32 %v10201_v25, %v10313_v61  ;;  %v2483_v11 = vmin.f32 %v10203_v3, %v10315_v47  ;;  %v6549_v23 = vmax.f32 %v2549_v21, %v6390_v17  ;;  %v10317_v58 = vld [vmem:[#allocation61_spill] sm:$0xff]  ;;  %v10318_v25 = vld [vmem:[#allocation56_spill] sm:$0xff]  ;;  %v10331_v21 = vld [vmem:[#allocation3_spill] sm:$0xff] }
 0x399   : > { %1162 = vmax.xlane.f32.xlu1 %v6157_v32  ;;  %1164 = vmax.xlane.f32.xlu0 %v6226_v27  ;;  %v2548_v2 = vmax.f32 %v2420_v16, %v2484_v60  ;;  %vm2700_vm2 = vcmp.ge.f32.partialorder %v10317_v58, %v6528_v56  ;;  %vm2698_vm3 = vcmp.ge.f32.partialorder %v10318_v25, %v6535_v0  ;;  %v10320_v17 = vld [vmem:[#allocation148_spill] sm:$0xff]  ;;  %v10327_v41 = vld [vmem:[#allocation49_spill] sm:$0xff] }
 0x39a   : > { %4360 = vmatpush.msk.msra.mxu3 %vm2706_vm14, %v10306_v45  ;;  %v1607_v26 = vpop.xlane.xlu2 %1606  ;;  %v2530_v36 = vmax.f32 %v2402_v37, %v2466_v30  ;;  %v2547_v22 = vmax.f32 %v2419_v9, %v2483_v11  ;;  %v2531_v3 = vmax.f32 %v2403_v44, %v2467_v52  ;;  %v2354_v42 = vmin.f32 %v10321_v48, %v10320_v17  ;;  %v10328_v16 = vld [vmem:[#allocation97_spill] sm:$0xff]  ;;  %v10333_v9 = vld [vmem:[#allocation82_spill] sm:$0xff]  ;;  %v10334_v44 = vld [vmem:[#allocation35_spill] sm:$0xff] }
 0x39b   : > { %v1605_v20 = vpop.xlane.xlu0 %1604  ;;  %v6557_v13 = vmax.f32 %v2548_v2, %v1607_v26  ;;  %vm2696_vm4 = vcmp.ge.f32.partialorder %v10323_v40, %v6549_v23  ;;  %v10330_v60 = vld [vmem:[#allocation37_spill] sm:$0xff]  ;;  %vm2689_vm8 = vcmp.ge.f32.partialorder %v10334_v44, %v10333_v9  ;;  %v10337_v30 = vld [vmem:[#allocation92_spill] sm:$0xff]  ;;  %v10341_v2 = vld [vmem:[#allocation30_spill] sm:$0xff] }
 0x39c   : > { %v1571_v5 = vpop.xlane.xlu1 %1570  ;;  %4361 = vmatpush.msk.msra.mxu3 %vm2704_vm15, %v10310_v62  ;;  %v6566_v12 = vmax.f32 %v2547_v22, %v1605_v20  ;;  %v2418_v15 = vmax.f32 %v6483_v8, %v2354_v42  ;;  %v10329_v62 = vld [vmem:[#allocation152_spill] sm:$0xff]  ;;  %v10332_v8 = vld [vmem:[#allocation46_spill] sm:$0xff]  ;;  %v10335_v37 = vld [vmem:[#allocation197_spill] sm:$0xff] }
 0x39d   : > { %v6564_v45 = vmax.f32 %v2530_v36, %v1571_v5  ;;  %vm2694_vm0 = vcmp.ge.f32.partialorder %v10327_v41, %v6557_v13  ;;  %v2482_v46 = vmin.f32 %v10329_v62, %v10328_v16  ;;  %v2914_v5 = vld [vmem:[%s9247_s2] sm:$0xff]  ;;  %v10338_v28 = vld [vmem:[#allocation32_spill] sm:$0xff]  ;;  %v10340_v11 = vld [vmem:[#allocation81_spill] sm:$0xff] }
 0x39e   : > { %4362 = vmatpush.msk.msra.mxu3 %vm2702_vm1, %v10312_v14  ;;  %vm2692_vm7 = vcmp.ge.f32.partialorder %v10332_v8, %v6566_v12  ;;  %v10336_v14 = vld [vmem:[#allocation199_spill] sm:$0xff]  ;;  %vm2687_vm9 = vcmp.ge.f32.partialorder %v10338_v28, %v10337_v30  ;;  %vm2685_vm10 = vcmp.ge.f32.partialorder %v10341_v2, %v10340_v11  ;;  %v10343_v36 = vld [vmem:[#allocation40_spill] sm:$0xff]  ;;  %v10344_v22 = vld [vmem:[#allocation85_spill] sm:$0xff] }
 0x39f   : > { %1166 = vmax.xlane.f32.xlu2 %v10316_v50  ;;  %vm2658_vm6 = vcmp.ge.f32.partialorder %v10331_v21, %v6564_v45  ;;  %v2546_v20 = vmax.f32 %v2418_v15, %v2482_v46  ;;  %v10346_v17 = vld [vmem:[#allocation21_spill] sm:$0xff]  ;;  %v10347_v48 = vld [vmem:[#allocation120_spill] sm:$0xff]  ;;  %v10355_v46 = vld [vmem:[#allocation78_spill] sm:$0xff] }
 0x3a0   : > { %4363 = vmatpush.msk.msra.mxu3 %vm2700_vm2, %v10317_v58  ;;  %v2915_v58 = vld [vmem:[%s9247_s2 + $0x8] sm:$0xff]  ;;  %vm2721_vm13 = vcmp.ge.f32.partialorder %v10347_v48, %v10346_v17  ;;  %v10360_v9 = vld [vmem:[#allocation22_spill] sm:$0xff] }
 0x3a1   : > { %1128 = vmax.xlane.f32.xlu1 %v10319_v1  ;;  %1130 = vmax.xlane.f32.xlu0 %v10322_v34  ;;  %v10348_v42 = vld [vmem:[#allocation204_spill] sm:$0xff] }
 0x3a2   : > { %4364 = vmatpush.msk.msra.mxu3 %vm2698_vm3, %v10318_v25  ;;  %v1573_v57 = vpop.xlane.xlu2 %1572  ;;  %v10351_v15 = vld [vmem:[#allocation116_spill] sm:$0xff] }
 0x3a3   : > { %v6568_v63 = vmax.f32 %v2531_v3, %v1573_v57  ;;  %v6576_v26 = vpop.xlane.xlu0 %1792  ;;  %v10345_v3 = vld [vmem:[#allocation28_spill] sm:$0xff]  ;;  %v10349_v57 = vld [vmem:[#allocation79_spill] sm:$0xff]  ;;  %vm2719_vm15 = vcmp.ge.f32.partialorder %v10351_v15, %v6425_v18 }
 0x3a4   : > { %4365 = vmatpush.msk.msra.mxu3 %vm2696_vm4, %v10323_v40  ;;  %v6573_v59 = vpop.xlane.xlu1 %1152  ;;  %10325 = vst [vmem:[#allocation112_spill] sm:$0xff] %v6576_v26  ;;  %vm2683_vm12 = vcmp.ge.f32.partialorder %v10345_v3, %v10344_v22  ;;  %v10350_v40 = vld [vmem:[#allocation26_spill] sm:$0xff]  ;;  %v10353_v16 = vld [vmem:[#allocation136_spill] sm:$0xff]  ;;  %v6677_v22 = vld [vmem:[%s9247_s2 + $0x20] sm:$0xff] }
 0x3a5   : > { %10324 = vst [vmem:[#allocation48_spill] sm:$0xff] %v6573_v59  ;;  %vm2660_vm5 = vcmp.ge.f32.partialorder %v10326_v4, %v6568_v63  ;;  %vm2681_vm14 = vcmp.ge.f32.partialorder %v10350_v40, %v10349_v57  ;;  %v10365_v30 = vld [vmem:[#allocation20_spill] sm:$0xff] }
 0x3a6   : > { %4351 = vmatpush.msk.msra.mxu2 %vm2660_vm5, %v10326_v4  ;;  %4366 = vmatpush.msk.msra.mxu3 %vm2694_vm0, %v10327_v41  ;;  %v10352_v4 = vld [vmem:[#allocation133_spill] sm:$0xff]  ;;  %v10367_v11 = vld [vmem:[#allocation140_spill] sm:$0xff]  ;;  %10372 = vst [vmem:[#allocation170_spill] sm:$0xff] %v6677_v22 }
 0x3a7   : > { %1132 = vmax.xlane.f32.xlu2 %v10330_v60  ;;  %v2916_v41 = vld [vmem:[%s9247_s2 + $0x10] sm:$0xff]  ;;  %v10375_v17 = vld [vmem:[#allocation68_spill] sm:$0xff] }
 0x3a8   : > { %4352 = vmatpush.msk.msra.mxu2 %vm2658_vm6, %v10331_v21  ;;  %4367 = vmatpush.msk.msra.mxu3 %vm2692_vm7, %v10332_v8  ;;  %v10356_v21 = vld [vmem:[#allocation24_spill] sm:$0xff]  ;;  %v10357_v8 = vld [vmem:[#allocation105_spill] sm:$0xff] }
 0x3a9   : > { %1796 = vmax.xlane.f32.xlu1 %v10335_v37  ;;  %1798 = vmax.xlane.f32.xlu0 %v10336_v14  ;;  %vm2679_vm1 = vcmp.ge.f32.partialorder %v10356_v21, %v10355_v46  ;;  %vm2717_vm2 = vcmp.ge.f32.partialorder %v10357_v8, %v6423_v39  ;;  %v10364_v39 = vld [vmem:[#allocation69_spill] sm:$0xff] }
 0x3aa   : > { %4369 = vmatpush.msk.msrb.mxu2 %vm2689_vm8, %v10334_v44  ;;  %v1603_v61 = vpop.xlane.xlu2 %1602  ;;  %v6652_v44 = vld [vmem:[%s9247_s2 + $0x18] sm:$0xff]  ;;  %vm2675_vm5 = vcmp.ge.f32.partialorder %v10365_v30, %v10364_v39 }
 0x3ab   : > { %2990 = vmatmul.f32.vlgmr.msra.gmra.mxu2 %v2914_v5  ;;  %v6603_v52 = vmax.f32 %v2546_v20, %v1603_v61  ;;  %v6613_v25 = vpop.xlane.xlu0 %1788  ;;  %v10359_v5 = vld [vmem:[#allocation76_spill] sm:$0xff]  ;;  %10361 = vst [vmem:[#allocation7_spill] sm:$0xff] %v6652_v44  ;;  %v10363_v61 = vld [vmem:[#allocation98_spill] sm:$0xff] }
 0x3ac   : > { %4370 = vmatpush.msk.msrb.mxu2 %vm2687_vm9, %v10338_v28  ;;  %v6606_v47 = vpop.xlane.xlu1 %1786  ;;  %10342 = vst [vmem:[#allocation19_spill] sm:$0xff] %v6613_v25  ;;  %vm2677_vm3 = vcmp.ge.f32.partialorder %v10360_v9, %v10359_v5  ;;  %vm2715_vm4 = vcmp.ge.f32.partialorder %v10363_v61, %v6432_v31  ;;  %v10366_v28 = vld [vmem:[#allocation93_spill] sm:$0xff]  ;;  %v10370_v31 = vld [vmem:[#allocation87_spill] sm:$0xff]  ;;  %v10386_v5 = vld [vmem:[#allocation12_spill] sm:$0xff] }
 0x3ad   : > { %10339 = vst [vmem:[#allocation171_spill] sm:$0xff] %v6606_v47  ;;  %vm2690_vm11 = vcmp.ge.f32.partialorder %v10343_v36, %v6603_v52  ;;  %vm2713_vm0 = vcmp.ge.f32.partialorder %v10366_v28, %v6447_v51  ;;  %vm2711_vm7 = vcmp.ge.f32.partialorder %v10370_v31, %v6462_v29  ;;  %v10373_v51 = vld [vmem:[#allocation208_spill] sm:$0xff] }
 0x3ae   : > { %4371 = vmatpush.msk.msrb.mxu2 %vm2685_vm10, %v10341_v2  ;;  %4368 = vmatpush.msk.msra.mxu3 %vm2690_vm11, %v10343_v36  ;;  %v10368_v2 = vld [vmem:[#allocation73_spill] sm:$0xff]  ;;  %v10371_v36 = vld [vmem:[#allocation202_spill] sm:$0xff]  ;;  %v10377_v29 = vld [vmem:[#allocation80_spill] sm:$0xff] }
 0x3af   : > { %3091 = vmatmul.f32.vlgmr.msra.gmra.mxu3 %v2915_v58  ;;  %1800 = vmax.xlane.f32.xlu2 %v10348_v42  ;;  %v10369_v58 = vld [vmem:[#allocation18_spill] sm:$0xff]  ;;  %vm2709_vm9 = vcmp.ge.f32.partialorder %v10377_v29, %v6475_v55  ;;  %v10383_v55 = vld [vmem:[#allocation75_spill] sm:$0xff] }
 0x3b0   : > { %4372 = vmatpush.msk.msrb.mxu2 %vm2683_vm12, %v10345_v3  ;;  %4385 = vmatpush.msk.msrb.mxu3 %vm2721_vm13, %v10347_v48  ;;  %vm2673_vm6 = vcmp.ge.f32.partialorder %v10369_v58, %v10368_v2  ;;  %v10376_v48 = vld [vmem:[#allocation16_spill] sm:$0xff]  ;;  %vm2707_vm11 = vcmp.ge.f32.partialorder %v10383_v55, %v6488_v53  ;;  %v10389_v53 = vld [vmem:[#allocation10_spill] sm:$0xff] }
 0x3b1   : > { %1762 = vmax.xlane.f32.xlu1 %v10352_v4  ;;  %1764 = vmax.xlane.f32.xlu0 %v10353_v16  ;;  %vm2671_vm8 = vcmp.ge.f32.partialorder %v10376_v48, %v10375_v17  ;;  %v6744_v17 = vld [vmem:[%s9247_s2 + $0x38] sm:$0xff] }
 0x3b2   : > { %4373 = vmatpush.msk.msrb.mxu2 %vm2681_vm14, %v10350_v40  ;;  %4386 = vmatpush.msk.msrb.mxu3 %vm2719_vm15, %v10351_v15  ;;  %v6637_v62 = vpop.xlane.xlu2 %1790  ;;  %v10379_v40 = vld [vmem:[#allocation63_spill] sm:$0xff]  ;;  %v10380_v15 = vld [vmem:[#allocation14_spill] sm:$0xff]  ;;  %vm2665_vm15 = vcmp.ge.f32.partialorder %v10389_v53, %v6398_v38  ;;  %v10394_v38 = vld [vmem:[#allocation8_spill] sm:$0xff]  ;;  %10398 = vst [vmem:[#allocation164_spill] sm:$0xff] %v6744_v17 }
 0x3b3   : > { %10354 = vst [vmem:[#allocation107_spill] sm:$0xff] %v6637_v62  ;;  %2993 = vmatmul.f32.gmra.mxu2 %v2916_v41  ;;  %v6654_v20 = vpop.xlane.xlu0 %1148  ;;  %vm2669_vm10 = vcmp.ge.f32.partialorder %v10380_v15, %v10379_v40  ;;  %v6697_v41 = vld [vmem:[%s9247_s2 + $0x28] sm:$0xff]  ;;  %v10404_v40 = vld [vmem:[#allocation27_spill] sm:$0xff] }
 0x3b4   : > { %4374 = vmatpush.msk.msrb.mxu2 %vm2679_vm1, %v10356_v21  ;;  %4387 = vmatpush.msk.msrb.mxu3 %vm2717_vm2, %v10357_v8  ;;  %v6645_v18 = vpop.xlane.xlu1 %1146  ;;  %10362 = vst [vmem:[#allocation147_spill] sm:$0xff] %v6654_v20  ;;  %v10384_v21 = vld [vmem:[#allocation181_spill] sm:$0xff]  ;;  %v10385_v8 = vld [vmem:[#allocation58_spill] sm:$0xff]  ;;  %vm2663_vm2 = vcmp.ge.f32.partialorder %v10394_v38, %v6434_v33 }
 0x3b5   : > { %10358 = vst [vmem:[#allocation104_spill] sm:$0xff] %v6645_v18  ;;  %vm1871_vm12 = vcmp.ge.f32.partialorder %v10384_v21, %v6613_v25  ;;  %vm2667_vm13 = vcmp.ge.f32.partialorder %v10386_v5, %v10385_v8 }
 0x3b6   : > { %4375 = vmatpush.msk.msrb.mxu2 %vm2677_vm3, %v10360_v9  ;;  %4388 = vmatpush.msk.msrb.mxu3 %vm2715_vm4, %v10363_v61  ;;  %10381 = vst [vmem:[#allocation15_spill] sm:$0xff] %v6697_v41  ;;  %v10387_v9 = vld [vmem:[#allocation70_spill] sm:$0xff]  ;;  %v10388_v61 = vld [vmem:[#allocation83_spill] sm:$0xff]  ;;  %v1935_v39 = vsel %vm1871_vm12, -inf, %v10384_v21 }
 0x3b7   : > { %3094 = vmatmul.f32.gmra.mxu3 %v6652_v44  ;;  %1766 = vmax.xlane.f32.xlu2 %v10367_v11  ;;  %vm2705_vm14 = vcmp.ge.f32.partialorder %v10387_v9, %v6499_v7  ;;  %v10392_v7 = vld [vmem:[#allocation145_spill] sm:$0xff] }
 0x3b8   : > { %4376 = vmatpush.msk.msrb.mxu2 %vm2675_vm5, %v10365_v30  ;;  %4389 = vmatpush.msk.msrb.mxu3 %vm2713_vm0, %v10366_v28  ;;  %v10390_v30 = vld [vmem:[#allocation62_spill] sm:$0xff]  ;;  %v6724_v28 = vld [vmem:[%s9247_s2 + $0x30] sm:$0xff] }
 0x3b9   : > { %1156 = vmax.xlane.f32.xlu1 %v10371_v36  ;;  %1158 = vmax.xlane.f32.xlu0 %v10373_v51  ;;  %vm2703_vm1 = vcmp.ge.f32.partialorder %v10390_v30, %v6513_v24  ;;  %10391 = vst [vmem:[#allocation90_spill] sm:$0xff] %v6724_v28 }
 0x3ba   : > { %4377 = vmatpush.msk.msrb.mxu2 %vm2673_vm6, %v10369_v58  ;;  %4390 = vmatpush.msk.msrb.mxu3 %vm2711_vm7, %v10370_v31  ;;  %v6681_v3 = vpop.xlane.xlu2 %1150  ;;  %v10395_v58 = vld [vmem:[#allocation59_spill] sm:$0xff]  ;;  %v10397_v31 = vld [vmem:[#allocation6_spill] sm:$0xff] }
 0x3bb   : > { %10374 = vst [vmem:[#allocation17_spill] sm:$0xff] %v6681_v3  ;;  %2996 = vmatmul.f32.gmra.mxu2 %v6677_v22  ;;  %v6699_v46 = vpop.xlane.xlu0 %1816  ;;  %vm2701_vm3 = vcmp.ge.f32.partialorder %v10395_v58, %v6528_v56  ;;  %vm2661_vm4 = vcmp.ge.f32.partialorder %v10397_v31, %v6568_v63  ;;  %v10400_v56 = vld [vmem:[#allocation55_spill] sm:$0xff]  ;;  %v6754_v63 = vpop.f32.mrf.mxu1 }
 0x3bc   : > { %4378 = vmatpush.msk.msrb.mxu2 %vm2671_vm8, %v10376_v48  ;;  %4391 = vmatpush.msk.msrb.mxu3 %vm2709_vm9, %v10377_v29  ;;  %v6689_v57 = vpop.xlane.xlu1 %1814  ;;  %10382 = vst [vmem:[#allocation13_spill] sm:$0xff] %v6699_v46  ;;  %vm2699_vm5 = vcmp.ge.f32.partialorder %v10400_v56, %v6535_v0  ;;  %v10401_v48 = vld [vmem:[#allocation4_spill] sm:$0xff]  ;;  %v10403_v29 = vld [vmem:[#allocation50_spill] sm:$0xff]  ;;  %v10405_v0 = vld [vmem:[#allocation47_spill] sm:$0xff] }
 0x3bd   : > { %10378 = vst [vmem:[#allocation160_spill] sm:$0xff] %v6689_v57  ;;  %vm2659_vm0 = vcmp.ge.f32.partialorder %v10401_v48, %v6564_v45  ;;  %vm2697_vm6 = vcmp.ge.f32.partialorder %v10403_v29, %v6549_v23  ;;  %vm2695_vm7 = vcmp.ge.f32.partialorder %v10405_v0, %v6557_v13  ;;  %v6768_v45 = vld [vmem:[%s9247_s2 + $0x40] sm:$0xff]  ;;  %v6783_v13 = vld [vmem:[%s9247_s2 + $0x48] sm:$0xff] }
 0x3be   : > { %4379 = vmatpush.msk.msrb.mxu2 %vm2669_vm10, %v10380_v15  ;;  %4392 = vmatpush.msk.msrb.mxu3 %vm2707_vm11, %v10383_v55  ;;  %10402 = vst [vmem:[#allocation150_spill] sm:$0xff] %v6754_v63  ;;  %v10407_v15 = vld [vmem:[#allocation198_spill] sm:$0xff]  ;;  %v10409_v23 = vld [vmem:[#allocation43_spill] sm:$0xff] }
 0x3bf   : > { %3097 = vmatmul.f32.gmra.mxu3 %v6697_v41  ;;  %1160 = vmax.xlane.f32.xlu2 %v10388_v61  ;;  %10406 = vst [vmem:[#allocation95_spill] sm:$0xff] %v6768_v45  ;;  %vm2693_vm8 = vcmp.ge.f32.partialorder %v10409_v23, %v6566_v12  ;;  %v10415_v12 = vld [vmem:[#allocation185_spill] sm:$0xff] }
 0x3c0   : > { %4380 = vmatpush.msk.msrb.mxu2 %vm2667_vm13, %v10386_v5  ;;  %4393 = vmatpush.msk.msrb.mxu3 %vm2705_vm14, %v10387_v9  ;;  %10411 = vst [vmem:[#allocation45_spill] sm:$0xff] %v6783_v13  ;;  %v10413_v9 = vld [vmem:[#allocation38_spill] sm:$0xff]  ;;  %vm1872_vm10 = vcmp.ge.f32.partialorder %v10415_v12, %v6637_v62 }
 0x3c1   : > { %2044 = vmax.xlane.f32.xlu1 %v1935_v39  ;;  %1124 = vmax.xlane.f32.xlu0 %v10392_v7  ;;  %vm2691_vm9 = vcmp.ge.f32.partialorder %v10413_v9, %v6603_v52  ;;  %v10416_v39 = vld [vmem:[#allocation193_spill] sm:$0xff] }
 0x3c2   : > { %4381 = vmatpush.msk.msrb.mxu2 %vm2665_vm15, %v10389_v53  ;;  %4394 = vmatpush.msk.msrb.mxu3 %vm2703_vm1, %v10390_v30  ;;  %v6728_v2 = vpop.xlane.xlu2 %1818  ;;  %v6790_v53 = vpop.f32.mrf.mxu0  ;;  %v1936_v30 = vsel %vm1872_vm10, -inf, %v10415_v12 }
 0x3c3   : > { %10393 = vst [vmem:[#allocation11_spill] sm:$0xff] %v6728_v2  ;;  %2999 = vmatmul.f32.gmra.mxu2 %v6724_v28  ;;  %v6746_v33 = vpop.xlane.xlu0 %1782  ;;  %v10440_v28 = vld [vmem:[#allocation191_spill] sm:$0xff] }
 0x3c4   : > { %4382 = vmatpush.msk.msrb.mxu2 %vm2663_vm2, %v10394_v38  ;;  %4395 = vmatpush.msk.msrb.mxu3 %vm2701_vm3, %v10395_v58  ;;  %v6736_v24 = vpop.xlane.xlu1 %1780  ;;  %10399 = vst [vmem:[#allocation86_spill] sm:$0xff] %v6746_v33  ;;  %v6801_v38 = vld [vmem:[%s9247_s2 + $0x50] sm:$0xff]  ;;  %vm1232_vm15 = vcmp.ge.f32.partialorder %v10440_v28, %v6681_v3  ;;  %v10445_v3 = vld [vmem:[#allocation184_spill] sm:$0xff] }
 0x3c5   : > { %10396 = vst [vmem:[#allocation88_spill] sm:$0xff] %v6736_v24  ;;  %vm1230_vm1 = vcmp.ge.f32.partialorder %v10445_v3, %v6645_v18  ;;  %v6907_v18 = vld [vmem:[%s9247_s2 + $0x90] sm:$0xff] }
 0x3c6   : > { %4383 = vmatpush.msk.msrb.mxu2 %vm2661_vm4, %v10397_v31  ;;  %4396 = vmatpush.msk.msrb.mxu3 %vm2699_vm5, %v10400_v56  ;;  %10414 = vst [vmem:[#allocation158_spill] sm:$0xff] %v6790_v53  ;;  %v6811_v31 = vld [vmem:[%s9247_s2 + $0x58] sm:$0xff] }
 0x3c7   : > { %3100 = vmatmul.f32.gmra.mxu3 %v6744_v17  ;;  %1126 = vmax.xlane.f32.xlu2 %v10404_v40  ;;  %10417 = vst [vmem:[#allocation42_spill] sm:$0xff] %v6801_v38 }
 0x3c8   : > { %4384 = vmatpush.msk.msrb.mxu2 %vm2659_vm0, %v10401_v48  ;;  %4397 = vmatpush.msk.msrb.mxu3 %vm2697_vm6, %v10403_v29  ;;  %10420 = vst [vmem:[#allocation25_spill] sm:$0xff] %v6811_v31  ;;  %v10422_v48 = vld [vmem:[#allocation187_spill] sm:$0xff]  ;;  %v6818_v29 = vpop.f32.mrf.mxu1 }
 0x3c9   : > { %1820 = vmax.xlane.f32.xlu1 %v6754_v63  ;;  %1154 = vmax.xlane.f32.xlu0 %v10407_v15  ;;  %vm1873_vm11 = vcmp.ge.f32.partialorder %v10422_v48, %v6576_v26  ;;  %10423 = vst [vmem:[#allocation44_spill] sm:$0xff] %v6818_v29  ;;  %v6836_v26 = vld [vmem:[%s9247_s2 + $0x68] sm:$0xff] }
 0x3ca   : > { %4398 = vmatpush.msk.msrb.mxu3 %vm2695_vm7, %v10405_v0  ;;  %v6772_v55 = vpop.xlane.xlu2 %1784  ;;  %v10424_v0 = vld [vmem:[#allocation141_spill] sm:$0xff]  ;;  %10428 = vst [vmem:[#allocation200_spill] sm:$0xff] %v6836_v26 }
 0x3cb   : > { %10408 = vst [vmem:[#allocation144_spill] sm:$0xff] %v6772_v55  ;;  %3002 = vmatmul.f32.gmra.mxu2 %v6768_v45  ;;  %v6785_v5 = vpop.xlane.xlu0 %1176  ;;  %v6852_v45 = vld [vmem:[%s9247_s2 + $0x70] sm:$0xff] }
 0x3cc   : > { %4399 = vmatpush.msk.msrb.mxu3 %vm2693_vm8, %v10409_v23  ;;  %v6777_v8 = vpop.xlane.xlu1 %1174  ;;  %10412 = vst [vmem:[#allocation153_spill] sm:$0xff] %v6785_v5  ;;  %v1937_v23 = vsel %vm1873_vm11, -inf, %v10422_v48 }
 0x3cd   : > { %10410 = vst [vmem:[#allocation102_spill] sm:$0xff] %v6777_v8 }
 0x3ce   : > { %4400 = vmatpush.msk.msrb.mxu3 %vm2691_vm9, %v10413_v9  ;;  %v6825_v9 = vld [vmem:[%s9247_s2 + $0x60] sm:$0xff]  ;;  %10433 = vst [vmem:[#allocation207_spill] sm:$0xff] %v6852_v45 }
 0x3cf   : > { %3103 = vmatmul.f32.gmra.mxu3 %v6783_v13  ;;  %1794 = vmax.xlane.f32.xlu2 %v10416_v39  ;;  %10425 = vst [vmem:[#allocation201_spill] sm:$0xff] %v6825_v9  ;;  %v6846_v13 = vpop.f32.mrf.mxu0 }
 0x3d0   : > { %10432 = vst [vmem:[#allocation139_spill] sm:$0xff] %v6846_v13  ;;  %v6869_v17 = vpop.f32.mrf.mxu1 }
 0x3d1   : > { %1180 = vmax.xlane.f32.xlu1 %v6790_v53  ;;  %2046 = vmax.xlane.f32.xlu0 %v1936_v30  ;;  %10439 = vst [vmem:[#allocation135_spill] sm:$0xff] %v6869_v17 }
 0x3d2   : > { %v6803_v52 = vpop.xlane.xlu2 %1178  ;;  %10449 = vst [vmem:[#allocation188_spill] sm:$0xff] %v6907_v18 }
 0x3d3   : > { %10418 = vst [vmem:[#allocation203_spill] sm:$0xff] %v6803_v52  ;;  %3005 = vmatmul.f32.gmra.mxu2 %v6801_v38  ;;  %v6813_v56 = vpop.xlane.xlu0 %1142 }
 0x3d4   : > { %v6805_v58 = vpop.xlane.xlu1 %1140  ;;  %10421 = vst [vmem:[#allocation101_spill] sm:$0xff] %v6813_v56 }
 0x3d5   : > { %10419 = vst [vmem:[#allocation142_spill] sm:$0xff] %v6805_v58 }
 0x3d7   : > { %3106 = vmatmul.f32.gmra.mxu3 %v6811_v31  ;;  %1122 = vmax.xlane.f32.xlu2 %v10424_v0  ;;  %v10431_v31 = vld [vmem:[#allocation186_spill] sm:$0xff] }
 0x3d8   : > { %vm1231_vm13 = vcmp.ge.f32.partialorder %v10431_v31, %v6654_v20 }
 0x3d9   : > { %2048 = vmax.xlane.f32.xlu1 %v1937_v23  ;;  %1822 = vmax.xlane.f32.xlu0 %v6818_v29  ;;  %v10429_v23 = vld [vmem:[#allocation196_spill] sm:$0xff] }
 0x3da   : > { %v6828_v30 = vpop.xlane.xlu2 %1144  ;;  %vm1233_vm12 = vcmp.ge.f32.partialorder %v10429_v23, %v6573_v59 }
 0x3db   : > { %10426 = vst [vmem:[#allocation138_spill] sm:$0xff] %v6828_v30  ;;  %3008 = vmatmul.f32.gmra.mxu2 %v6825_v9  ;;  %v6840_v62 = vpop.xlane.xlu0 %1810  ;;  %v1297_v38 = vsel %vm1233_vm12, -inf, %v10429_v23  ;;  %v1295_v9 = vsel %vm1231_vm13, -inf, %v10431_v31 }
 0x3dc   : > { %v6830_v25 = vpop.xlane.xlu1 %1808  ;;  %10430 = vst [vmem:[#allocation137_spill] sm:$0xff] %v6840_v62 }
 0x3dd   : > { %10427 = vst [vmem:[#allocation157_spill] sm:$0xff] %v6830_v25 }
 0x3df   : > { %3109 = vmatmul.f32.gmra.mxu3 %v6836_v26  ;;  %1408 = vmax.xlane.f32.xlu2 %v1297_v38  ;;  %v6863_v38 = vld [vmem:[%s9247_s2 + $0x78] sm:$0xff] }
 0x3e0   : > { %10436 = vst [vmem:[#allocation190_spill] sm:$0xff] %v6863_v38 }
 0x3e1   : > { %1404 = vmax.xlane.f32.xlu1 %v1295_v9  ;;  %1182 = vmax.xlane.f32.xlu0 %v6846_v13  ;;  %v10437_v9 = vld [vmem:[#allocation176_spill] sm:$0xff] }
 0x3e2   : > { %v6855_v59 = vpop.xlane.xlu2 %1812  ;;  %vm1870_vm14 = vcmp.ge.f32.partialorder %v10437_v9, %v6606_v47  ;;  %v6880_v47 = vld [vmem:[%s9247_s2 + $0x80] sm:$0xff] }
 0x3e3   : > { %10434 = vst [vmem:[#allocation29_spill] sm:$0xff] %v6855_v59  ;;  %3011 = vmatmul.f32.gmra.mxu2 %v6852_v45  ;;  %v6867_v26 = vpop.xlane.xlu0 %1776  ;;  %v1934_v41 = vsel %vm1870_vm14, -inf, %v10437_v9  ;;  %v1296_v45 = vsel %vm1232_vm15, -inf, %v10440_v28  ;;  %v10447_v9 = vld [vmem:[#allocation168_spill] sm:$0xff] }
 0x3e4   : > { %v6857_v20 = vpop.xlane.xlu1 %1774  ;;  %10438 = vst [vmem:[#allocation132_spill] sm:$0xff] %v6867_v26  ;;  %vm1868_vm2 = vcmp.ge.f32.partialorder %v10447_v9, %v6746_v33 }
 0x3e5   : > { %10435 = vst [vmem:[#allocation41_spill] sm:$0xff] %v6857_v20  ;;  %v1932_v44 = vsel %vm1868_vm2, -inf, %v10447_v9 }
 0x3e6   : > { %10441 = vst [vmem:[#allocation206_spill] sm:$0xff] %v6880_v47 }
 0x3e7   : > { %3112 = vmatmul.f32.gmra.mxu3 %v6863_v38  ;;  %2042 = vmax.xlane.f32.xlu2 %v1934_v41  ;;  %v6890_v41 = vld [vmem:[%s9247_s2 + $0x88] sm:$0xff] }
 0x3e8   : > { %10444 = vst [vmem:[#allocation134_spill] sm:$0xff] %v6890_v41 }
 0x3e9   : > { %1824 = vmax.xlane.f32.xlu1 %v6869_v17  ;;  %1406 = vmax.xlane.f32.xlu0 %v1296_v45  ;;  %v10448_v45 = vld [vmem:[#allocation172_spill] sm:$0xff] }
 0x3ea   : > { %v6882_v22 = vpop.xlane.xlu2 %1778  ;;  %vm1869_vm3 = vcmp.ge.f32.partialorder %v10448_v45, %v6772_v55  ;;  %v6921_v55 = vpop.f32.mrf.mxu0 }
 0x3eb   : > { %10442 = vst [vmem:[#allocation189_spill] sm:$0xff] %v6882_v22  ;;  %3014 = vmatmul.f32.gmra.mxu2 %v6880_v47  ;;  %v6894_v38 = vpop.xlane.xlu0 %1170  ;;  %v1294_v47 = vsel %vm1230_vm1, -inf, %v10445_v3  ;;  %v1933_v21 = vsel %vm1869_vm3, -inf, %v10448_v45  ;;  %v6934_v3 = vld [vmem:[%s9247_s2 + $0xa0] sm:$0xff] }
 0x3ec   : > { %v6884_v31 = vpop.xlane.xlu1 %1168  ;;  %10446 = vst [vmem:[#allocation205_spill] sm:$0xff] %v6894_v38 }
 0x3ed   : > { %10443 = vst [vmem:[#allocation130_spill] sm:$0xff] %v6884_v31 }
 0x3ee   : > { %10454 = vst [vmem:[#allocation126_spill] sm:$0xff] %v6921_v55 }
 0x3ef   : > { %3115 = vmatmul.f32.gmra.mxu3 %v6890_v41  ;;  %1402 = vmax.xlane.f32.xlu2 %v1294_v47  ;;  %v6917_v47 = vld [vmem:[%s9247_s2 + $0x98] sm:$0xff]  ;;  %10457 = vst [vmem:[#allocation128_spill] sm:$0xff] %v6934_v3 }
 0x3f0   : > { %10452 = vst [vmem:[#allocation195_spill] sm:$0xff] %v6917_v47  ;;  %v10455_v41 = vld [vmem:[#allocation178_spill] sm:$0xff] }
 0x3f1   : > { %2038 = vmax.xlane.f32.xlu1 %v1932_v44  ;;  %2040 = vmax.xlane.f32.xlu0 %v1933_v21  ;;  %vm1228_vm4 = vcmp.ge.f32.partialorder %v10455_v41, %v6813_v56  ;;  %v10456_v21 = vld [vmem:[#allocation183_spill] sm:$0xff] }
 0x3f2   : > { %v6909_v33 = vpop.xlane.xlu2 %1172  ;;  %vm1229_vm5 = vcmp.ge.f32.partialorder %v10456_v21, %v6828_v30  ;;  %v6944_v30 = vld [vmem:[%s9247_s2 + $0xa8] sm:$0xff] }
 0x3f3   : > { %10450 = vst [vmem:[#allocation129_spill] sm:$0xff] %v6909_v33  ;;  %3017 = vmatmul.f32.gmra.mxu2 %v6907_v18  ;;  %v6919_v44 = vpop.xlane.xlu0 %1136  ;;  %v1292_v18 = vsel %vm1228_vm4, -inf, %v10455_v41  ;;  %v1293_v9 = vsel %vm1229_vm5, -inf, %v10456_v21  ;;  %v10463_v41 = vld [vmem:[#allocation159_spill] sm:$0xff] }
 0x3f4   : > { %v6911_v23 = vpop.xlane.xlu1 %1134  ;;  %10453 = vst [vmem:[#allocation177_spill] sm:$0xff] %v6919_v44  ;;  %vm1865_vm6 = vcmp.ge.f32.partialorder %v10463_v41, %v6867_v26 }
 0x3f5   : > { %10451 = vst [vmem:[#allocation131_spill] sm:$0xff] %v6911_v23  ;;  %v1929_v21 = vsel %vm1865_vm6, -inf, %v10463_v41 }
 0x3f6   : > { %10460 = vst [vmem:[#allocation175_spill] sm:$0xff] %v6944_v30 }
 0x3f7   : > { %3118 = vmatmul.f32.gmra.mxu3 %v6917_v47  ;;  %1184 = vmax.xlane.f32.xlu2 %v6921_v55 }
 0x3f9   : > { %1398 = vmax.xlane.f32.xlu1 %v1292_v18  ;;  %1400 = vmax.xlane.f32.xlu0 %v1293_v9  ;;  %v10461_v18 = vld [vmem:[#allocation165_spill] sm:$0xff]  ;;  %v10464_v9 = vld [vmem:[#allocation162_spill] sm:$0xff] }
 0x3fa   : > { %v6936_v45 = vpop.xlane.xlu2 %1138  ;;  %vm1867_vm0 = vcmp.ge.f32.partialorder %v10461_v18, %v6736_v24  ;;  %vm1866_vm7 = vcmp.ge.f32.partialorder %v10464_v9, %v6882_v22  ;;  %v6961_v24 = vld [vmem:[%s9247_s2 + $0xb0] sm:$0xff] }
 0x3fb   : > { %10458 = vst [vmem:[#allocation194_spill] sm:$0xff] %v6936_v45  ;;  %3020 = vmatmul.f32.gmra.mxu2 %v6934_v3  ;;  %v6948_v47 = vpop.xlane.xlu0 %1804  ;;  %v1931_v3 = vsel %vm1867_vm0, -inf, %v10461_v18  ;;  %v1930_v28 = vsel %vm1866_vm7, -inf, %v10464_v9  ;;  %vm1226_vm10 = vcmp.ge.f32.partialorder %v10258_v54, %v6936_v45 }
 0x3fc   : > { %v6938_v56 = vpop.xlane.xlu1 %1802  ;;  %10462 = vst [vmem:[#allocation124_spill] sm:$0xff] %v6948_v47  ;;  %v1290_v41 = vsel %vm1226_vm10, -inf, %v10258_v54  ;;  %vm1879_vm12 = vcmp.ge.f32.partialorder %v6110_v49, %v6948_v47 }
 0x3fd   : > { %10459 = vst [vmem:[#allocation100_spill] sm:$0xff] %v6938_v56  ;;  %vm1878_vm2 = vcmp.ge.f32.partialorder %v10264_v19, %v6938_v56  ;;  %v2944_v56 = vld [vmem:[%s9247_s2 + $0xf0] sm:$0xff] }
 0x3fe   : > { %10465 = vst [vmem:[#allocation127_spill] sm:$0xff] %v6961_v24 }
 0x3ff   : > { %3121 = vmatmul.f32.gmra.mxu3 %v6944_v30  ;;  %2036 = vmax.xlane.f32.xlu2 %v1931_v3  ;;  %v6971_v3 = vld [vmem:[%s9247_s2 + $0xb8] sm:$0xff]  ;;  %v10471_v30 = vld [vmem:[#allocation167_spill] sm:$0xff] }
 0x400   : > { %10468 = vst [vmem:[#allocation174_spill] sm:$0xff] %v6971_v3  ;;  %vm1225_vm9 = vcmp.ge.f32.partialorder %v10471_v30, %v6919_v44 }
 0x401   : > { %2032 = vmax.xlane.f32.xlu1 %v1929_v21  ;;  %2034 = vmax.xlane.f32.xlu0 %v1930_v28  ;;  %v10469_v21 = vld [vmem:[#allocation173_spill] sm:$0xff] }
 0x402   : > { %v6963_v26 = vpop.xlane.xlu2 %1806  ;;  %vm1227_vm8 = vcmp.ge.f32.partialorder %v10469_v21, %v6805_v58  ;;  %v6988_v58 = vld [vmem:[%s9247_s2 + $0xc0] sm:$0xff] }
 0x403   : > { %10466 = vst [vmem:[#allocation192_spill] sm:$0xff] %v6963_v26  ;;  %3023 = vmatmul.f32.gmra.mxu2 %v6961_v24  ;;  %v1291_v28 = vsel %vm1227_vm8, -inf, %v10469_v21  ;;  %v1289_v24 = vsel %vm1225_vm9, -inf, %v10471_v30  ;;  %vm1880_vm1 = vcmp.ge.f32.partialorder %v6188_v10, %v6963_v26  ;;  %v10489_v26 = vld [vmem:[#allocation9_spill] sm:$0xff] }
 0x404   : > { %v6965_v48 = vpop.xlane.xlu1 %1768  ;;  %v6975_v22 = vpop.xlane.xlu0 %1770  ;;  %10472 = vst [vmem:[#allocation125_spill] sm:$0xff] %v6988_v58  ;;  %vm1882_vm3 = vcmp.ge.f32.partialorder %v10489_v26, %v6840_v62 }
 0x405   : > { %10467 = vst [vmem:[#allocation94_spill] sm:$0xff] %v6965_v48  ;;  %vm1862_vm15 = vcmp.ge.f32.partialorder %v10288_v35, %v6975_v22  ;;  %vm1861_vm10 = vcmp.ge.f32.partialorder %v10282_v6, %v6965_v48  ;;  %v2950_v48 = vld [vmem:[%s9247_s2 + $0x120] sm:$0xff] }
 0x406   : > { %10470 = vst [vmem:[#allocation123_spill] sm:$0xff] %v6975_v22 }
 0x407   : > { %3124 = vmatmul.f32.gmra.mxu3 %v6971_v3  ;;  %1396 = vmax.xlane.f32.xlu2 %v1291_v28  ;;  %v6998_v28 = vld [vmem:[%s9247_s2 + $0xc8] sm:$0xff] }
 0x408   : > { %10475 = vst [vmem:[#allocation163_spill] sm:$0xff] %v6998_v28 }
 0x409   : > { %1392 = vmax.xlane.f32.xlu1 %v1289_v24  ;;  %1394 = vmax.xlane.f32.xlu0 %v1290_v41  ;;  %v10476_v24 = vld [vmem:[#allocation154_spill] sm:$0xff] }
 0x40a   : > { %v6990_v44 = vpop.xlane.xlu2 %1772  ;;  %vm1864_vm11 = vcmp.ge.f32.partialorder %v10476_v24, %v6857_v20  ;;  %v7015_v20 = vld [vmem:[%s9247_s2 + $0xd0] sm:$0xff] }
 0x40b   : > { %10473 = vst [vmem:[#allocation182_spill] sm:$0xff] %v6990_v44  ;;  %3026 = vmatmul.f32.gmra.mxu2 %v6988_v58  ;;  %vm1863_vm13 = vcmp.ge.f32.partialorder %v10299_v43, %v6990_v44  ;;  %v1928_v41 = vsel %vm1864_vm11, -inf, %v10476_v24  ;;  %v1943_v58 = vsel %vm1879_vm12, -inf, %v6110_v49  ;;  %v1944_v49 = vsel %vm1880_vm1, -inf, %v6188_v10 }
 0x40c   : > { %v6992_v9 = vpop.xlane.xlu1 %1162  ;;  %v7002_v45 = vpop.xlane.xlu0 %1164  ;;  %v1927_v30 = vsel %vm1863_vm13, -inf, %v10299_v43  ;;  %10478 = vst [vmem:[#allocation122_spill] sm:$0xff] %v7015_v20 }
 0x40d   : > { %10474 = vst [vmem:[#allocation89_spill] sm:$0xff] %v6992_v9  ;;  %vm1239_vm8 = vcmp.ge.f32.partialorder %v6226_v27, %v7002_v45 }
 0x40e   : > { %10477 = vst [vmem:[#allocation117_spill] sm:$0xff] %v7002_v45 }
 0x40f   : > { %3127 = vmatmul.f32.gmra.mxu3 %v6998_v28  ;;  %2030 = vmax.xlane.f32.xlu2 %v1928_v41  ;;  %v7025_v41 = vld [vmem:[%s9247_s2 + $0xd8] sm:$0xff] }
 0x410   : > { %10481 = vst [vmem:[#allocation31_spill] sm:$0xff] %v7025_v41 }
 0x411   : > { %2060 = vmax.xlane.f32.xlu1 %v1943_v58  ;;  %2028 = vmax.xlane.f32.xlu0 %v1927_v30  ;;  %v10482_v58 = vld [vmem:[#allocation111_spill] sm:$0xff] }
 0x412   : > { %v7017_v47 = vpop.xlane.xlu2 %1166  ;;  %vm1224_vm14 = vcmp.ge.f32.partialorder %v10482_v58, %v6911_v23  ;;  %v7042_v23 = vld [vmem:[%s9247_s2 + $0xe0] sm:$0xff] }
 0x413   : > { %10479 = vst [vmem:[#allocation180_spill] sm:$0xff] %v7017_v47  ;;  %3029 = vmatmul.f32.gmra.mxu2 %v7015_v20  ;;  %v1288_v30 = vsel %vm1224_vm14, -inf, %v10482_v58  ;;  %v1926_v20 = vsel %vm1862_vm15, -inf, %v10288_v35  ;;  %vm1240_vm4 = vcmp.ge.f32.partialorder %v10316_v50, %v7017_v47  ;;  %v2945_v47 = vld [vmem:[%s9247_s2 + $0xf8] sm:$0xff] }
 0x414   : > { %v7019_v3 = vpop.xlane.xlu1 %1128  ;;  %v7029_v44 = vpop.xlane.xlu0 %1130  ;;  %10484 = vst [vmem:[#allocation121_spill] sm:$0xff] %v7042_v23  ;;  %v1304_v35 = vsel %vm1240_vm4, -inf, %v10316_v50  ;;  %vm1238_vm4 = vcmp.ge.f32.partialorder %v6157_v32, %v6992_v9  ;;  %v2956_v9 = vld [vmem:[%s9247_s2 + $0x150] sm:$0xff] }
 0x415   : > { %10480 = vst [vmem:[#allocation84_spill] sm:$0xff] %v7019_v3 }
 0x416   : > { %10483 = vst [vmem:[#allocation114_spill] sm:$0xff] %v7029_v44 }
 0x417   : > { %3130 = vmatmul.f32.gmra.mxu3 %v7025_v41  ;;  %1390 = vmax.xlane.f32.xlu2 %v1288_v30  ;;  %v7052_v30 = vld [vmem:[%s9247_s2 + $0xe8] sm:$0xff] }
 0x418   : > { %10487 = vst [vmem:[#allocation34_spill] sm:$0xff] %v7052_v30 }
 0x419   : > { %2026 = vmax.xlane.f32.xlu1 %v1926_v20  ;;  %2062 = vmax.xlane.f32.xlu0 %v1944_v49  ;;  %v1942_v49 = vsel %vm1878_vm2, -inf, %v10264_v19  ;;  %v10494_v19 = vld [vmem:[#allocation108_spill] sm:$0xff]  ;;  %vm1222_vm2 = vcmp.ge.f32.partialorder %v10322_v34, %v7029_v44 }
 0x41a   : > { %v7044_v22 = vpop.xlane.xlu2 %1132  ;;  %vm1242_vm0 = vcmp.ge.f32.partialorder %v10494_v19, %v6894_v38 }
 0x41b   : > { %10485 = vst [vmem:[#allocation179_spill] sm:$0xff] %v7044_v22  ;;  %3032 = vmatmul.f32.gmra.mxu2 %v7042_v23  ;;  %v1946_v23 = vsel %vm1882_vm3, -inf, %v10489_v26  ;;  %vm1223_vm12 = vcmp.ge.f32.partialorder %v10330_v60, %v7044_v22 }
 0x41c   : > { %v7046_v43 = vpop.xlane.xlu1 %1796  ;;  %v7056_v20 = vpop.xlane.xlu0 %1798 }
 0x41d   : > { %10486 = vst [vmem:[#allocation77_spill] sm:$0xff] %v7046_v43 }
 0x41e   : > { %10488 = vst [vmem:[#allocation115_spill] sm:$0xff] %v7056_v20 }
 0x41f   : > { %3133 = vmatmul.f32.gmra.mxu3 %v7052_v30  ;;  %2058 = vmax.xlane.f32.xlu2 %v1942_v49  ;;  %v10492_v49 = vld [vmem:[#allocation64_spill] sm:$0xff] }
 0x420   : > { %vm1881_vm5 = vcmp.ge.f32.partialorder %v10492_v49, %v6830_v25  ;;  %v10495_v30 = vld [vmem:[#allocation60_spill] sm:$0xff]  ;;  %v2946_v25 = vld [vmem:[%s9247_s2 + $0x100] sm:$0xff] }
 0x421   : > { %2066 = vmax.xlane.f32.xlu1 %v1946_v23  ;;  %1422 = vmax.xlane.f32.xlu0 %v1304_v35  ;;  %vm1883_vm6 = vcmp.ge.f32.partialorder %v10495_v30, %v6855_v59  ;;  %v1945_v35 = vsel %vm1881_vm5, -inf, %v10492_v49 }
 0x422   : > { %v7069_v58 = vpop.xlane.xlu2 %1800  ;;  %v1947_v50 = vsel %vm1883_vm6, -inf, %v10495_v30 }
 0x423   : > { %10490 = vst [vmem:[#allocation166_spill] sm:$0xff] %v7069_v58  ;;  %3035 = vmatmul.f32.gmra.mxu2 %v2944_v56  ;;  %v1306_v56 = vsel %vm1242_vm0, -inf, %v10494_v19  ;;  %vm1877_vm0 = vcmp.ge.f32.partialorder %v10348_v42, %v7069_v58  ;;  %v2958_v58 = vld [vmem:[%s9247_s2 + $0x160] sm:$0xff] }
 0x424   : > { %v7071_v62 = vpop.xlane.xlu1 %1762  ;;  %v7078_v23 = vpop.xlane.xlu0 %1764 }
 0x425   : > { %10491 = vst [vmem:[#allocation161_spill] sm:$0xff] %v7071_v62 }
 0x426   : > { %10493 = vst [vmem:[#allocation113_spill] sm:$0xff] %v7078_v23 }
 0x427   : > { %3136 = vmatmul.f32.gmra.mxu3 %v2945_v47  ;;  %2064 = vmax.xlane.f32.xlu2 %v1945_v35  ;;  %v2947_v47 = vld [vmem:[%s9247_s2 + $0x108] sm:$0xff]  ;;  %v10498_v35 = vld [vmem:[#allocation57_spill] sm:$0xff] }
 0x428   : > { %vm1241_vm7 = vcmp.ge.f32.partialorder %v10498_v35, %v6884_v31  ;;  %v2948_v31 = vld [vmem:[%s9247_s2 + $0x110] sm:$0xff] }
 0x429   : > { %1426 = vmax.xlane.f32.xlu1 %v1306_v56  ;;  %2068 = vmax.xlane.f32.xlu0 %v1947_v50  ;;  %v10500_v50 = vld [vmem:[#allocation54_spill] sm:$0xff]  ;;  %v1305_v28 = vsel %vm1241_vm7, -inf, %v10498_v35 }
 0x42a   : > { %v7090_v41 = vpop.xlane.xlu2 %1766  ;;  %vm1243_vm9 = vcmp.ge.f32.partialorder %v10500_v50, %v6909_v33 }
 0x42b   : > { %10496 = vst [vmem:[#allocation72_spill] sm:$0xff] %v7090_v41  ;;  %3038 = vmatmul.f32.gmra.mxu2 %v2946_v25  ;;  %v1303_v25 = vsel %vm1239_vm8, -inf, %v6226_v27  ;;  %v1307_v24 = vsel %vm1243_vm9, -inf, %v10500_v50  ;;  %vm1860_vm7 = vcmp.ge.f32.partialorder %v10367_v11, %v7090_v41 }
 0x42c   : > { %v7092_v38 = vpop.xlane.xlu1 %1156  ;;  %v7099_v56 = vpop.xlane.xlu0 %1158 }
 0x42d   : > { %10497 = vst [vmem:[#allocation39_spill] sm:$0xff] %v7092_v38 }
 0x42e   : > { %10499 = vst [vmem:[#allocation110_spill] sm:$0xff] %v7099_v56  ;;  %v2991_v59 = vpop.f32.mrf.mxu2 }
 0x42f   : > { %3139 = vmatmul.f32.gmra.mxu3 %v2947_v47  ;;  %1424 = vmax.xlane.f32.xlu2 %v1305_v28  ;;  %v2949_v28 = vld [vmem:[%s9247_s2 + $0x118] sm:$0xff] }
 0x431   : > { %1420 = vmax.xlane.f32.xlu1 %v1303_v25  ;;  %1428 = vmax.xlane.f32.xlu0 %v1307_v24  ;;  %v10504_v25 = vld [vmem:[#allocation119_spill] sm:$0xff]  ;;  %v1287_v24 = vsel %vm1223_vm12, -inf, %v10330_v60  ;;  %vm1859_vm12 = vcmp.ge.f32.partialorder %v10353_v16, %v7078_v23 }
 0x432   : > { %v3092_v10 = vpop.f32.mrf.mxu3  ;;  %v7113_v19 = vpop.xlane.xlu2 %1160  ;;  %vm1885_vm11 = vcmp.ge.f32.partialorder %v10504_v25, %v6699_v46 }
 0x433   : > { %v7111_v45 = vadd.f32 %v3092_v10, %v2991_v59  ;;  %10501 = vst [vmem:[#allocation103_spill] sm:$0xff] %v7113_v19  ;;  %3041 = vmatmul.f32.gmra.mxu2 %v2948_v31  ;;  %v1925_v10 = vsel %vm1861_vm10, -inf, %v10282_v6  ;;  %v1949_v31 = vsel %vm1885_vm11, -inf, %v10504_v25  ;;  %v10509_v6 = vld [vmem:[#allocation118_spill] sm:$0xff]  ;;  %vm1876_vm10 = vcmp.ge.f32.partialorder %v10336_v14, %v7056_v20 }
 0x434   : > { %v7115_v33 = vpop.xlane.xlu1 %2044  ;;  %v7122_v47 = vpop.xlane.xlu0 %1124  ;;  %vm1245_vm14 = vcmp.ge.f32.partialorder %v10509_v6, %v6785_v5  ;;  %vm1221_vm11 = vcmp.ge.f32.partialorder %v10319_v1, %v7019_v3 }
 0x435   : > { %10502 = vst [vmem:[#allocation67_spill] sm:$0xff] %v7115_v33 }
 0x436   : > { %10503 = vst [vmem:[#allocation109_spill] sm:$0xff] %v7122_v47  ;;  %v2994_v59 = vpop.f32.mrf.mxu2 }
 0x437   : > { %3142 = vmatmul.f32.gmra.mxu3 %v2949_v28  ;;  %2024 = vmax.xlane.f32.xlu2 %v1925_v10  ;;  %v2951_v10 = vld [vmem:[%s9247_s2 + $0x128] sm:$0xff] }
 0x439   : > { %2072 = vmax.xlane.f32.xlu1 %v1949_v31  ;;  %1388 = vmax.xlane.f32.xlu0 %v1287_v24  ;;  %v10507_v31 = vld [vmem:[#allocation51_spill] sm:$0xff] }
 0x43a   : > { %v3095_v27 = vpop.f32.mrf.mxu3  ;;  %v7136_v35 = vpop.xlane.xlu2 %1126  ;;  %vm1884_vm13 = vcmp.ge.f32.partialorder %v10507_v31, %v6689_v57  ;;  %v2952_v57 = vld [vmem:[%s9247_s2 + $0x130] sm:$0xff] }
 0x43b   : > { %v7134_v46 = vadd.f32 %v3095_v27, %v2994_v59  ;;  %10505 = vst [vmem:[#allocation65_spill] sm:$0xff] %v7136_v35  ;;  %3044 = vmatmul.f32.gmra.mxu2 %v2950_v48  ;;  %v10510_v27 = vld [vmem:[#allocation53_spill] sm:$0xff]  ;;  %v1948_v59 = vsel %vm1884_vm13, -inf, %v10507_v31  ;;  %v1309_v48 = vsel %vm1245_vm14, -inf, %v10509_v6 }
 0x43c   : > { %v7138_v28 = vpop.xlane.xlu1 %1820  ;;  %v7145_v22 = vpop.xlane.xlu0 %1154  ;;  %vm1886_vm15 = vcmp.ge.f32.partialorder %v10510_v27, %v6728_v2 }
 0x43d   : > { %10506 = vst [vmem:[#allocation33_spill] sm:$0xff] %v7138_v28  ;;  %v1950_v60 = vsel %vm1886_vm15, -inf, %v10510_v27  ;;  %vm1887_vm6 = vcmp.ge.f32.partialorder %v6754_v63, %v7138_v28  ;;  %vm1236_vm15 = vcmp.ge.f32.partialorder %v10373_v51, %v7099_v56  ;;  %v2964_v56 = vld [vmem:[%s9247_s2 + $0x190] sm:$0xff] }
 0x43e   : > { %10508 = vst [vmem:[#allocation36_spill] sm:$0xff] %v7145_v22  ;;  %v2997_v24 = vpop.f32.mrf.mxu2 }
 0x43f   : > { %3145 = vmatmul.f32.gmra.mxu3 %v2951_v10  ;;  %2070 = vmax.xlane.f32.xlu2 %v1948_v59  ;;  %v2953_v59 = vld [vmem:[%s9247_s2 + $0x138] sm:$0xff] }
 0x441   : > { %1432 = vmax.xlane.f32.xlu1 %v1309_v48  ;;  %2074 = vmax.xlane.f32.xlu0 %v1950_v60  ;;  %v10513_v48 = vld [vmem:[#allocation23_spill] sm:$0xff] }
 0x442   : > { %v3098_v49 = vpop.f32.mrf.mxu3  ;;  %v7159_v54 = vpop.xlane.xlu2 %1794  ;;  %vm1244_vm1 = vcmp.ge.f32.partialorder %v10513_v48, %v6777_v8  ;;  %v10514_v60 = vld [vmem:[#allocation155_spill] sm:$0xff] }
 0x443   : > { %v7157_v5 = vadd.f32 %v3098_v49, %v2997_v24  ;;  %10511 = vst [vmem:[#allocation99_spill] sm:$0xff] %v7159_v54  ;;  %3047 = vmatmul.f32.gmra.mxu2 %v2952_v57  ;;  %vm1246_vm3 = vcmp.ge.f32.partialorder %v10514_v60, %v6803_v52  ;;  %v1308_v49 = vsel %vm1244_vm1, -inf, %v10513_v48  ;;  %v1286_v57 = vsel %vm1222_vm2, -inf, %v10322_v34  ;;  %v2954_v8 = vld [vmem:[%s9247_s2 + $0x140] sm:$0xff] }
 0x444   : > { %v7161_v10 = vpop.xlane.xlu1 %1180  ;;  %v7168_v2 = vpop.xlane.xlu0 %2046  ;;  %v1310_v50 = vsel %vm1246_vm3, -inf, %v10514_v60  ;;  %vm1237_vm1 = vcmp.ge.f32.partialorder %v10388_v61, %v7113_v19  ;;  %vm1875_vm2 = vcmp.ge.f32.partialorder %v10335_v37, %v7046_v43  ;;  %vm1219_vm3 = vcmp.ge.f32.partialorder %v10392_v7, %v7122_v47  ;;  %v2966_v47 = vld [vmem:[%s9247_s2 + $0x1a0] sm:$0xff] }
 0x445   : > { %10512 = vst [vmem:[#allocation61_spill] sm:$0xff] %v7161_v10  ;;  %vm1247_vm9 = vcmp.ge.f32.partialorder %v6790_v53, %v7161_v10 }
 0x446   : > { %v3000_v24 = vpop.f32.mrf.mxu2 }
 0x447   : > { %3148 = vmatmul.f32.gmra.mxu3 %v2953_v59  ;;  %1430 = vmax.xlane.f32.xlu2 %v1308_v49  ;;  %v2955_v49 = vld [vmem:[%s9247_s2 + $0x148] sm:$0xff] }
 0x449   : > { %1386 = vmax.xlane.f32.xlu1 %v1286_v57  ;;  %1434 = vmax.xlane.f32.xlu0 %v1310_v50 }
 0x44a   : > { %v3101_v6 = vpop.f32.mrf.mxu3  ;;  %v7182_v21 = vpop.xlane.xlu2 %1122 }
 0x44b   : > { %v7180_v44 = vadd.f32 %v3101_v6, %v3000_v24  ;;  %10515 = vst [vmem:[#allocation56_spill] sm:$0xff] %v7182_v21  ;;  %3050 = vmatmul.f32.gmra.mxu2 %v2954_v8  ;;  %v1302_v6 = vsel %vm1238_vm4, -inf, %v6157_v32  ;;  %v1941_v24 = vsel %vm1877_vm0, -inf, %v10348_v42  ;;  %vm1220_vm4 = vcmp.ge.f32.partialorder %v10404_v40, %v7136_v35 }
 0x44c   : > { %v7184_v59 = vpop.xlane.xlu1 %2048  ;;  %v7191_v57 = vpop.xlane.xlu0 %1822  ;;  %vm1234_vm0 = vcmp.ge.f32.partialorder %v10407_v15, %v7145_v22  ;;  %v2968_v22 = vld [vmem:[%s9247_s2 + $0x1b0] sm:$0xff] }
 0x44d   : > { %10516 = vst [vmem:[#allocation148_spill] sm:$0xff] %v7191_v57  ;;  %vm1888_vm5 = vcmp.ge.f32.partialorder %v6818_v29, %v7191_v57 }
 0x44e   : > { %v1952_v8 = vsel %vm1888_vm5, -inf, %v6818_v29  ;;  %v3003_v50 = vpop.f32.mrf.mxu2  ;;  %vm1858_vm5 = vcmp.ge.f32.partialorder %v10352_v4, %v7071_v62 }
 0x44f   : > { %3151 = vmatmul.f32.gmra.mxu3 %v2955_v49  ;;  %1418 = vmax.xlane.f32.xlu2 %v1302_v6  ;;  %v2957_v6 = vld [vmem:[%s9247_s2 + $0x158] sm:$0xff] }
 0x451   : > { %2078 = vmax.xlane.f32.xlu1 %v1952_v8  ;;  %2056 = vmax.xlane.f32.xlu0 %v1941_v24 }
 0x452   : > { %v3104_v52 = vpop.f32.mrf.mxu3  ;;  %v7205_v34 = vpop.xlane.xlu2 %1408 }
 0x453   : > { %v7203_v57 = vadd.f32 %v3104_v52, %v3003_v50  ;;  %3053 = vmatmul.f32.gmra.mxu2 %v2956_v9  ;;  %v1951_v52 = vsel %vm1887_vm6, -inf, %v6754_v63  ;;  %v1924_v9 = vsel %vm1860_vm7, -inf, %v10367_v11  ;;  %vm1874_vm6 = vcmp.ge.f32.partialorder %v10416_v39, %v7159_v54 }
 0x454   : > { %v7209_v49 = vpop.xlane.xlu1 %1404  ;;  %v7214_v8 = vpop.xlane.xlu0 %1182  ;;  %vm1235_vm7 = vcmp.ge.f32.partialorder %v10371_v36, %v7092_v38 }
 0x455   : > { %10517 = vst [vmem:[#allocation96_spill] sm:$0xff] %v7209_v49  ;;  %vm1248_vm8 = vcmp.ge.f32.partialorder %v6846_v13, %v7214_v8 }
 0x456   : > { %10518 = vst [vmem:[#allocation52_spill] sm:$0xff] %v7214_v8  ;;  %v1312_v50 = vsel %vm1248_vm8, -inf, %v6846_v13  ;;  %v3006_v24 = vpop.f32.mrf.mxu2  ;;  %vm2128_vm8 = vcmp.ge.f32.partialorder %v10415_v12, %v7168_v2 }
 0x457   : > { %3154 = vmatmul.f32.gmra.mxu3 %v2957_v6  ;;  %2076 = vmax.xlane.f32.xlu2 %v1951_v52  ;;  %v2959_v52 = vld [vmem:[%s9247_s2 + $0x168] sm:$0xff] }
 0x459   : > { %1438 = vmax.xlane.f32.xlu1 %v1312_v50  ;;  %2022 = vmax.xlane.f32.xlu0 %v1924_v9  ;;  %v1940_v9 = vsel %vm1876_vm10, -inf, %v10336_v14 }
 0x45a   : > { %v3107_v28 = vpop.f32.mrf.mxu3  ;;  %v7228_v32 = vpop.xlane.xlu2 %2042 }
 0x45b   : > { %v7226_v41 = vadd.f32 %v3107_v28, %v3006_v24  ;;  %10519 = vst [vmem:[#allocation5_spill] sm:$0xff] %v7228_v32  ;;  %3056 = vmatmul.f32.gmra.mxu2 %v2958_v58  ;;  %v1311_v28 = vsel %vm1247_vm9, -inf, %v6790_v53  ;;  %v2960_v58 = vld [vmem:[%s9247_s2 + $0x170] sm:$0xff]  ;;  %vm1218_vm9 = vcmp.ge.f32.partialorder %v10424_v0, %v7182_v21  ;;  %v4577_v21 = vld [vmem:[%s9247_s2 + $0x8] sm:$0xff] }
 0x45c   : > { %v7232_v6 = vpop.xlane.xlu1 %1824  ;;  %v7239_v50 = vpop.xlane.xlu0 %1406 }
 0x45d   : > { %10520 = vst [vmem:[#allocation49_spill] sm:$0xff] %v7232_v6  ;;  %vm1889_vm13 = vcmp.ge.f32.partialorder %v6869_v17, %v7232_v6 }
 0x45e   : > { %v3009_v24 = vpop.f32.mrf.mxu2  ;;  %v1953_v23 = vsel %vm1889_vm13, -inf, %v6869_v17 }
 0x45f   : > { %3157 = vmatmul.f32.gmra.mxu3 %v2959_v52  ;;  %1436 = vmax.xlane.f32.xlu2 %v1311_v28  ;;  %v2961_v52 = vld [vmem:[%s9247_s2 + $0x178] sm:$0xff] }
 0x461   : > { %2054 = vmax.xlane.f32.xlu1 %v1940_v9  ;;  %v1923_v9 = vsel %vm1859_vm12, -inf, %v10353_v16 }
 0x462   : > { %v3110_v8 = vpop.f32.mrf.mxu3  ;;  %v7248_v11 = vpop.xlane.xlu2 %1402 }
 0x463   : > { %v7246_v10 = vadd.f32 %v3110_v8, %v3009_v24  ;;  %10521 = vst [vmem:[#allocation97_spill] sm:$0xff] %v7248_v11  ;;  %3059 = vmatmul.f32.gmra.mxu2 %v2960_v58  ;;  %v1285_v8 = vsel %vm1221_vm11, -inf, %v10319_v1  ;;  %v2962_v58 = vld [vmem:[%s9247_s2 + $0x180] sm:$0xff] }
 0x464   : > { %v7250_v20 = vpop.xlane.xlu1 %2038  ;;  %v7259_v28 = vpop.xlane.xlu0 %2040 }
 0x465   : > { %10522 = vst [vmem:[#allocation152_spill] sm:$0xff] %v7250_v20 }
 0x466   : > { %10523 = vst [vmem:[#allocation3_spill] sm:$0xff] %v7259_v28  ;;  %v3012_v24 = vpop.f32.mrf.mxu2 }
 0x467   : > { %3160 = vmatmul.f32.gmra.mxu3 %v2961_v52  ;;  %1384 = vmax.xlane.f32.xlu2 %v1285_v8  ;;  %v2963_v8 = vld [vmem:[%s9247_s2 + $0x188] sm:$0xff] }
 0x469   : > { %2020 = vmax.xlane.f32.xlu1 %v1923_v9 }
 0x46a   : > { %v3113_v14 = vpop.f32.mrf.mxu3  ;;  %v7268_v3 = vpop.xlane.xlu2 %1184 }
 0x46b   : > { %v7266_v42 = vadd.f32 %v3113_v14, %v3012_v24  ;;  %10524 = vst [vmem:[#allocation46_spill] sm:$0xff] %v7268_v3  ;;  %vm1249_vm14 = vcmp.ge.f32.partialorder %v6921_v55, %v7268_v3  ;;  %3062 = vmatmul.f32.gmra.mxu2 %v2962_v58  ;;  %v1300_v58 = vsel %vm1236_vm15, -inf, %v10373_v51 }
 0x46c   : > { %v7274_v52 = vpop.xlane.xlu1 %1398  ;;  %v7283_v24 = vpop.xlane.xlu0 %1400  ;;  %v1313_v9 = vsel %vm1249_vm14, -inf, %v6921_v55 }
 0x46d   : > { %10525 = vst [vmem:[#allocation82_spill] sm:$0xff] %v7274_v52  ;;  %1440 = vmax.xlane.f32.xlu0 %v1313_v9 }
 0x46e   : > { %10526 = vst [vmem:[#allocation35_spill] sm:$0xff] %v7283_v24  ;;  %v3015_v6 = vpop.f32.mrf.mxu2 }
 0x46f   : > { %3163 = vmatmul.f32.gmra.mxu3 %v2963_v8  ;;  %2080 = vmax.xlane.f32.xlu2 %v1953_v23  ;;  %v2965_v23 = vld [vmem:[%s9247_s2 + $0x198] sm:$0xff] }
 0x471   : > { %1414 = vmax.xlane.f32.xlu1 %v1300_v58  ;;  %v1939_v58 = vsel %vm1875_vm2, -inf, %v10335_v37  ;;  %v10535_v37 = vld [vmem:[#allocation196_spill] sm:$0xff] }
 0x472   : > { %v3116_v14 = vpop.f32.mrf.mxu3  ;;  %v7295_v16 = vpop.xlane.xlu2 %2036  ;;  %vm1489_vm12 = vcmp.ge.f32.partialorder %v10535_v37, %v7205_v34 }
 0x473   : > { %v7293_v3 = vadd.f32 %v3116_v14, %v3015_v6  ;;  %10527 = vst [vmem:[#allocation92_spill] sm:$0xff] %v7295_v16  ;;  %3065 = vmatmul.f32.gmra.mxu2 %v2964_v56  ;;  %v1301_v14 = vsel %vm1237_vm1, -inf, %v10388_v61  ;;  %v1283_v56 = vsel %vm1219_vm3, -inf, %v10392_v7 }
 0x474   : > { %v7299_v8 = vpop.xlane.xlu1 %2032  ;;  %v7308_v6 = vpop.xlane.xlu0 %2034 }
 0x475   : > { %10528 = vst [vmem:[#allocation32_spill] sm:$0xff] %v7299_v8  ;;  %1416 = vmax.xlane.f32.xlu0 %v1301_v14  ;;  %v2967_v14 = vld [vmem:[%s9247_s2 + $0x1a8] sm:$0xff] }
 0x476   : > { %v3018_v43 = vpop.f32.mrf.mxu2 }
 0x477   : > { %3166 = vmatmul.f32.gmra.mxu3 %v2965_v23  ;;  %2052 = vmax.xlane.f32.xlu2 %v1939_v58 }
 0x479   : > { %1380 = vmax.xlane.f32.xlu1 %v1283_v56  ;;  %v1922_v56 = vsel %vm1858_vm5, -inf, %v10352_v4  ;;  %v10532_v4 = vld [vmem:[#allocation187_spill] sm:$0xff] }
 0x47a   : > { %v3119_v9 = vpop.f32.mrf.mxu3  ;;  %v7320_v51 = vpop.xlane.xlu2 %1396  ;;  %vm2129_vm10 = vcmp.ge.f32.partialorder %v10532_v4, %v7184_v59 }
 0x47b   : > { %v7318_v19 = vadd.f32 %v3119_v9, %v3018_v43  ;;  %3068 = vmatmul.f32.gmra.mxu2 %v2966_v47  ;;  %v1284_v9 = vsel %vm1220_vm4, -inf, %v10404_v40  ;;  %v1298_v47 = vsel %vm1234_vm0, -inf, %v10407_v15  ;;  %vm2123_vm0 = vcmp.ge.f32.partialorder %v10461_v18, %v7295_v16 }
 0x47c   : > { %v7324_v23 = vpop.xlane.xlu1 %1392  ;;  %v7333_v43 = vpop.xlane.xlu0 %1394 }
 0x47d   : > { %1382 = vmax.xlane.f32.xlu0 %v1284_v9  ;;  %v2969_v9 = vld [vmem:[%s9247_s2 + $0x1b8] sm:$0xff] }
 0x47e   : > { %v3021_v62 = vpop.f32.mrf.mxu2 }
 0x47f   : > { %3169 = vmatmul.f32.gmra.mxu3 %v2967_v14  ;;  %2018 = vmax.xlane.f32.xlu2 %v1922_v56 }
 0x481   : > { %1410 = vmax.xlane.f32.xlu1 %v1298_v47  ;;  %v1299_v47 = vsel %vm1235_vm7, -inf, %v10371_v36  ;;  %v2193_v36 = vsel %vm2129_vm10, -inf, %v10532_v4 }
 0x482   : > { %v3122_v58 = vpop.f32.mrf.mxu3  ;;  %v7345_v7 = vpop.xlane.xlu2 %2030 }
 0x483   : > { %v7343_v35 = vadd.f32 %v3122_v58, %v3021_v62  ;;  %3071 = vmatmul.f32.gmra.mxu2 %v2968_v22  ;;  %v1938_v58 = vsel %vm1874_vm6, -inf, %v10416_v39  ;;  %v2192_v22 = vsel %vm2128_vm8, -inf, %v10415_v12 }
 0x484   : > { %v7349_v14 = vpop.xlane.xlu1 %2060  ;;  %v7358_v62 = vpop.xlane.xlu0 %2028 }
 0x485   : > { %10529 = vst [vmem:[#allocation81_spill] sm:$0xff] %v7349_v14  ;;  %2050 = vmax.xlane.f32.xlu0 %v1938_v58 }
 0x486   : > { %10530 = vst [vmem:[#allocation30_spill] sm:$0xff] %v7358_v62  ;;  %v3024_v54 = vpop.f32.mrf.mxu2 }
 0x487   : > { %3172 = vmatmul.f32.gmra.mxu3 %v2969_v9  ;;  %1412 = vmax.xlane.f32.xlu2 %v1299_v47  ;;  %v4576_v9 = vld [vmem:[%s9247_s2] sm:$0xff] }
 0x488   : > { %v10534_v47 = vld [vmem:[#allocation191_spill] sm:$0xff] }
 0x489   : > { %2302 = vmax.xlane.f32.xlu1 %v2192_v22  ;;  %vm1488_vm11 = vcmp.ge.f32.partialorder %v10534_v47, %v7239_v50 }
 0x48a   : > { %v3125_v38 = vpop.f32.mrf.mxu3  ;;  %v7367_v56 = vpop.xlane.xlu2 %1390 }
 0x48b   : > { %v7365_v15 = vadd.f32 %v3125_v38, %v3024_v54  ;;  %10531 = vst [vmem:[#allocation40_spill] sm:$0xff] %v7367_v56  ;;  %3192 = vmatmul.f32.vlgmr.msrb.gmra.mxu2 %v4576_v9  ;;  %v1282_v38 = vsel %vm1218_vm9, -inf, %v10424_v0  ;;  %v1552_v9 = vsel %vm1488_vm11, -inf, %v10534_v47  ;;  %v10541_v47 = vld [vmem:[#allocation7_spill] sm:$0xff] }
 0x48c   : > { %v7371_v58 = vpop.xlane.xlu1 %2026  ;;  %v7380_v54 = vpop.xlane.xlu0 %2062 }
 0x48d   : > { %10533 = vst [vmem:[#allocation85_spill] sm:$0xff] %v7371_v58  ;;  %1378 = vmax.xlane.f32.xlu0 %v1282_v38  ;;  %v10537_v38 = vld [vmem:[#allocation181_spill] sm:$0xff] }
 0x48e   : > { %v3027_v39 = vpop.f32.mrf.mxu2  ;;  %vm2127_vm13 = vcmp.ge.f32.partialorder %v10537_v38, %v7115_v33 }
 0x48f   : > { %3293 = vmatmul.f32.vlgmr.msrb.gmra.mxu3 %v4577_v21  ;;  %2304 = vmax.xlane.f32.xlu2 %v2193_v36  ;;  %v4578_v36 = vld [vmem:[%s9247_s2 + $0x10] sm:$0xff]  ;;  %v10539_v21 = vld [vmem:[#allocation172_spill] sm:$0xff]  ;;  %v2191_v61 = vsel %vm2127_vm13, -inf, %v10537_v38 }
 0x490   : > { %vm2125_vm14 = vcmp.ge.f32.partialorder %v10539_v21, %v7259_v28 }
 0x491   : > { %1662 = vmax.xlane.f32.xlu1 %v1552_v9  ;;  %v2189_v4 = vsel %vm2125_vm14, -inf, %v10539_v21 }
 0x492   : > { %v3128_v22 = vpop.f32.mrf.mxu3  ;;  %v7392_v0 = vpop.xlane.xlu2 %2058 }
 0x493   : > { %v7390_v40 = vadd.f32 %v3128_v22, %v3027_v39  ;;  %3195 = vmatmul.f32.gmra.mxu2 %v4578_v36  ;;  %v1553_v22 = vsel %vm1489_vm12, -inf, %v10535_v37  ;;  %v10542_v36 = vld [vmem:[#allocation176_spill] sm:$0xff]  ;;  %v10544_v37 = vld [vmem:[#allocation186_spill] sm:$0xff] }
 0x494   : > { %v7396_v1 = vpop.xlane.xlu1 %2066  ;;  %v7405_v39 = vpop.xlane.xlu0 %1422  ;;  %vm2126_vm15 = vcmp.ge.f32.partialorder %v10542_v36, %v7228_v32  ;;  %vm1487_vm1 = vcmp.ge.f32.partialorder %v10544_v37, %v7209_v49 }
 0x495   : > { %10536 = vst [vmem:[#allocation28_spill] sm:$0xff] %v7390_v40  ;;  %1664 = vmax.xlane.f32.xlu0 %v1553_v22  ;;  %v1551_v38 = vsel %vm1487_vm1, -inf, %v10544_v37  ;;  %vm2138_vm8 = vcmp.ge.f32.partialorder %v10489_v26, %v7396_v1 }
 0x496   : > { %10538 = vst [vmem:[#allocation21_spill] sm:$0xff] %v7396_v1  ;;  %v3030_v12 = vpop.f32.mrf.mxu2 }
 0x497   : > { %10540 = vst [vmem:[#allocation120_spill] sm:$0xff] %v7405_v39  ;;  %3296 = vmatmul.f32.gmra.mxu3 %v10541_v47  ;;  %2300 = vmax.xlane.f32.xlu2 %v2191_v61  ;;  %v10545_v47 = vld [vmem:[#allocation170_spill] sm:$0xff]  ;;  %v10546_v61 = vld [vmem:[#allocation183_spill] sm:$0xff] }
 0x498   : > { %vm1485_vm2 = vcmp.ge.f32.partialorder %v10546_v61, %v7283_v24 }
 0x499   : > { %2296 = vmax.xlane.f32.xlu1 %v2189_v4  ;;  %v1549_v49 = vsel %vm1485_vm2, -inf, %v10546_v61  ;;  %v10552_v61 = vld [vmem:[#allocation164_spill] sm:$0xff] }
 0x49a   : > { %v3131_v28 = vpop.f32.mrf.mxu3  ;;  %v7415_v9 = vpop.xlane.xlu2 %2064 }
 0x49b   : > { %v7413_v33 = vadd.f32 %v3131_v28, %v3030_v12  ;;  %10543 = vst [vmem:[#allocation79_spill] sm:$0xff] %v7415_v9  ;;  %3198 = vmatmul.f32.gmra.mxu2 %v10545_v47  ;;  %v2190_v12 = vsel %vm2126_vm15, -inf, %v10542_v36  ;;  %v10548_v28 = vld [vmem:[#allocation15_spill] sm:$0xff]  ;;  %v10549_v47 = vld [vmem:[#allocation184_spill] sm:$0xff] }
 0x49c   : > { %v7419_v22 = vpop.xlane.xlu1 %1426  ;;  %v7426_v21 = vpop.xlane.xlu0 %2068  ;;  %vm1486_vm3 = vcmp.ge.f32.partialorder %v10549_v47, %v7248_v11  ;;  %v10550_v36 = vld [vmem:[#allocation168_spill] sm:$0xff] }
 0x49d   : > { %10547 = vst [vmem:[#allocation26_spill] sm:$0xff] %v7426_v21  ;;  %2298 = vmax.xlane.f32.xlu0 %v2190_v12  ;;  %vm2124_vm4 = vcmp.ge.f32.partialorder %v10550_v36, %v7250_v20  ;;  %vm2139_vm5 = vcmp.ge.f32.partialorder %v10495_v30, %v7426_v21 }
 0x49e   : > { %v3033_v32 = vpop.f32.mrf.mxu2  ;;  %v2203_v37 = vsel %vm2139_vm5, -inf, %v10495_v30 }
 0x49f   : > { %3299 = vmatmul.f32.gmra.mxu3 %v10548_v28  ;;  %1660 = vmax.xlane.f32.xlu2 %v1551_v38  ;;  %v10551_v28 = vld [vmem:[#allocation90_spill] sm:$0xff] }
 0x4a1   : > { %1656 = vmax.xlane.f32.xlu1 %v1549_v49  ;;  %v1550_v49 = vsel %vm1486_vm3, -inf, %v10549_v47  ;;  %v10553_v47 = vld [vmem:[#allocation178_spill] sm:$0xff] }
 0x4a2   : > { %v3134_v24 = vpop.f32.mrf.mxu3  ;;  %v7436_v4 = vpop.xlane.xlu2 %1424  ;;  %vm1484_vm6 = vcmp.ge.f32.partialorder %v10553_v47, %v7274_v52 }
 0x4a3   : > { %v7434_v40 = vadd.f32 %v3134_v24, %v3033_v32  ;;  %3201 = vmatmul.f32.gmra.mxu2 %v10551_v28  ;;  %v2188_v32 = vsel %vm2124_vm4, -inf, %v10550_v36  ;;  %v10557_v36 = vld [vmem:[#allocation45_spill] sm:$0xff] }
 0x4a4   : > { %v7440_v12 = vpop.xlane.xlu1 %1420  ;;  %v7445_v38 = vpop.xlane.xlu0 %1428 }
 0x4a5   : > { %1658 = vmax.xlane.f32.xlu0 %v1550_v49 }
 0x4a6   : > { %v3036_v24 = vpop.f32.mrf.mxu2 }
 0x4a7   : > { %3302 = vmatmul.f32.gmra.mxu3 %v10552_v61  ;;  %2294 = vmax.xlane.f32.xlu2 %v2188_v32  ;;  %v10555_v61 = vld [vmem:[#allocation95_spill] sm:$0xff]  ;;  %v10556_v32 = vld [vmem:[#allocation162_spill] sm:$0xff] }
 0x4a8   : > { %vm2122_vm7 = vcmp.ge.f32.partialorder %v10556_v32, %v7308_v6 }
 0x4a9   : > { %2324 = vmax.xlane.f32.xlu1 %v2203_v37  ;;  %v2187_v37 = vsel %vm2123_vm0, -inf, %v10461_v18  ;;  %v2186_v16 = vsel %vm2122_vm7, -inf, %v10556_v32 }
 0x4aa   : > { %v3137_v28 = vpop.f32.mrf.mxu3  ;;  %v7455_v21 = vpop.xlane.xlu2 %2024 }
 0x4ab   : > { %v7453_v20 = vadd.f32 %v3137_v28, %v3036_v24  ;;  %3204 = vmatmul.f32.gmra.mxu2 %v10555_v61  ;;  %v1548_v24 = vsel %vm1484_vm6, -inf, %v10553_v47 }
 0x4ac   : > { %v7459_v49 = vpop.xlane.xlu1 %2072  ;;  %v7464_v30 = vpop.xlane.xlu0 %1388 }
 0x4ad   : > { %10554 = vst [vmem:[#allocation116_spill] sm:$0xff] %v7459_v49  ;;  %2292 = vmax.xlane.f32.xlu0 %v2187_v37  ;;  %vm2141_vm11 = vcmp.ge.f32.partialorder %v10504_v25, %v7459_v49 }
 0x4ae   : > { %v3039_v28 = vpop.f32.mrf.mxu2 }
 0x4af   : > { %3305 = vmatmul.f32.gmra.mxu3 %v10557_v36  ;;  %1654 = vmax.xlane.f32.xlu2 %v1548_v24  ;;  %v10560_v36 = vld [vmem:[#allocation42_spill] sm:$0xff] }
 0x4b1   : > { %2290 = vmax.xlane.f32.xlu1 %v2186_v16  ;;  %v10562_v16 = vld [vmem:[#allocation25_spill] sm:$0xff] }
 0x4b2   : > { %v3140_v52 = vpop.f32.mrf.mxu3  ;;  %v7472_v61 = vpop.xlane.xlu2 %2070 }
 0x4b3   : > { %v7470_v11 = vadd.f32 %v3140_v52, %v3039_v28  ;;  %10558 = vst [vmem:[#allocation78_spill] sm:$0xff] %v7472_v61  ;;  %vm2140_vm9 = vcmp.ge.f32.partialorder %v10507_v31, %v7472_v61  ;;  %3207 = vmatmul.f32.gmra.mxu2 %v10560_v36  ;;  %v2202_v52 = vsel %vm2138_vm8, -inf, %v10489_v26 }
 0x4b4   : > { %v7478_v37 = vpop.xlane.xlu1 %1432  ;;  %v7481_v18 = vpop.xlane.xlu0 %2074  ;;  %v2204_v24 = vsel %vm2140_vm9, -inf, %v10507_v31 }
 0x4b5   : > { %10559 = vst [vmem:[#allocation24_spill] sm:$0xff] %v7478_v37  ;;  %vm2142_vm10 = vcmp.ge.f32.partialorder %v10510_v27, %v7481_v18  ;;  %2326 = vmax.xlane.f32.xlu0 %v2204_v24 }
 0x4b6   : > { %10561 = vst [vmem:[#allocation105_spill] sm:$0xff] %v7481_v18  ;;  %v3042_v28 = vpop.f32.mrf.mxu2  ;;  %v2206_v32 = vsel %vm2142_vm10, -inf, %v10510_v27  ;;  %v10567_v27 = vld [vmem:[#allocation173_spill] sm:$0xff] }
 0x4b7   : > { %3308 = vmatmul.f32.gmra.mxu3 %v10562_v16  ;;  %2322 = vmax.xlane.f32.xlu2 %v2202_v52  ;;  %v10564_v16 = vld [vmem:[#allocation201_spill] sm:$0xff]  ;;  %vm1483_vm14 = vcmp.ge.f32.partialorder %v10567_v27, %v7320_v51 }
 0x4b9   : > { %2330 = vmax.xlane.f32.xlu1 %v2206_v32  ;;  %v2205_v32 = vsel %vm2141_vm11, -inf, %v10504_v25 }
 0x4ba   : > { %v3143_v1 = vpop.f32.mrf.mxu3  ;;  %v7491_v36 = vpop.xlane.xlu2 %1430 }
 0x4bb   : > { %v7489_v47 = vadd.f32 %v3143_v1, %v3042_v28  ;;  %10563 = vst [vmem:[#allocation76_spill] sm:$0xff] %v7491_v36  ;;  %vm1500_vm12 = vcmp.ge.f32.partialorder %v10513_v48, %v7491_v36  ;;  %3210 = vmatmul.f32.gmra.mxu2 %v10564_v16  ;;  %v10566_v1 = vld [vmem:[#allocation200_spill] sm:$0xff] }
 0x4bc   : > { %v7497_v24 = vpop.xlane.xlu1 %1386  ;;  %v7500_v26 = vpop.xlane.xlu0 %1434  ;;  %v1564_v52 = vsel %vm1500_vm12, -inf, %v10513_v48 }
 0x4bd   : > { %10565 = vst [vmem:[#allocation22_spill] sm:$0xff] %v7500_v26  ;;  %vm1502_vm13 = vcmp.ge.f32.partialorder %v10514_v60, %v7500_v26  ;;  %1686 = vmax.xlane.f32.xlu0 %v1564_v52  ;;  %v10568_v26 = vld [vmem:[#allocation118_spill] sm:$0xff] }
 0x4be   : > { %v3045_v28 = vpop.f32.mrf.mxu2  ;;  %v1566_v31 = vsel %vm1502_vm13, -inf, %v10514_v60  ;;  %vm1501_vm15 = vcmp.ge.f32.partialorder %v10568_v26, %v7478_v37  ;;  %v10572_v60 = vld [vmem:[#allocation190_spill] sm:$0xff] }
 0x4bf   : > { %3311 = vmatmul.f32.gmra.mxu3 %v10566_v1  ;;  %2328 = vmax.xlane.f32.xlu2 %v2205_v32  ;;  %v10570_v1 = vld [vmem:[#allocation207_spill] sm:$0xff]  ;;  %v10571_v32 = vld [vmem:[#allocation54_spill] sm:$0xff] }
 0x4c0   : > { %vm1499_vm1 = vcmp.ge.f32.partialorder %v10571_v32, %v7445_v38 }
 0x4c1   : > { %1690 = vmax.xlane.f32.xlu1 %v1566_v31  ;;  %v1547_v31 = vsel %vm1483_vm14, -inf, %v10567_v27  ;;  %v1563_v25 = vsel %vm1499_vm1, -inf, %v10571_v32 }
 0x4c2   : > { %v3146_v16 = vpop.f32.mrf.mxu3  ;;  %v7512_v48 = vpop.xlane.xlu2 %1418 }
 0x4c3   : > { %v7510_v49 = vadd.f32 %v3146_v16, %v3045_v28  ;;  %3213 = vmatmul.f32.gmra.mxu2 %v10570_v1  ;;  %v1565_v28 = vsel %vm1501_vm15, -inf, %v10568_v26  ;;  %v10574_v1 = vld [vmem:[#allocation159_spill] sm:$0xff] }
 0x4c4   : > { %v7516_v52 = vpop.xlane.xlu1 %2078  ;;  %vm2121_vm2 = vcmp.ge.f32.partialorder %v10574_v1, %v7299_v8 }
 0x4c5   : > { %10569 = vst [vmem:[#allocation98_spill] sm:$0xff] %v7516_v52  ;;  %1652 = vmax.xlane.f32.xlu0 %v1547_v31  ;;  %v2185_v32 = vsel %vm2121_vm2, -inf, %v10574_v1  ;;  %vm2144_vm5 = vcmp.ge.f32.partialorder %v6818_v29, %v7516_v52  ;;  %v10583_v52 = vld [vmem:[#allocation64_spill] sm:$0xff] }
 0x4c6   : > { %v3048_v16 = vpop.f32.mrf.mxu2  ;;  %vm2137_vm6 = vcmp.ge.f32.partialorder %v10583_v52, %v7415_v9 }
 0x4c7   : > { %3314 = vmatmul.f32.gmra.mxu3 %v10572_v60  ;;  %1688 = vmax.xlane.f32.xlu2 %v1565_v28  ;;  %v10576_v60 = vld [vmem:[#allocation206_spill] sm:$0xff]  ;;  %v10577_v28 = vld [vmem:[#allocation169_spill] sm:$0xff] }
 0x4c8   : > { %vm1482_vm4 = vcmp.ge.f32.partialorder %v10577_v28, %v7333_v43 }
 0x4c9   : > { %1684 = vmax.xlane.f32.xlu1 %v1563_v25  ;;  %v1546_v8 = vsel %vm1482_vm4, -inf, %v10577_v28 }
 0x4ca   : > { %v3149_v37 = vpop.f32.mrf.mxu3  ;;  %v7527_v36 = vpop.xlane.xlu2 %2076 }
 0x4cb   : > { %v7525_v18 = vadd.f32 %v3149_v37, %v3048_v16  ;;  %10573 = vst [vmem:[#allocation69_spill] sm:$0xff] %v7527_v36  ;;  %vm2143_vm3 = vcmp.ge.f32.partialorder %v6754_v63, %v7527_v36  ;;  %3216 = vmatmul.f32.gmra.mxu2 %v10576_v60  ;;  %v7539_v37 = vpop.xlane.xlu0 %2056  ;;  %v10579_v16 = vld [vmem:[#allocation134_spill] sm:$0xff] }
 0x4cc   : > { %v7533_v31 = vpop.xlane.xlu1 %1438  ;;  %v2207_v25 = vsel %vm2143_vm3, -inf, %v6754_v63  ;;  %10578 = vst [vmem:[#allocation93_spill] sm:$0xff] %v7539_v37 }
 0x4cd   : > { %10575 = vst [vmem:[#allocation20_spill] sm:$0xff] %v7533_v31  ;;  %2332 = vmax.xlane.f32.xlu0 %v2207_v25  ;;  %vm1504_vm7 = vcmp.ge.f32.partialorder %v6846_v13, %v7533_v31 }
 0x4ce   : > { %v7543_v26 = vpop.f32.mrf.mxu2 }
 0x4cf   : > { %3317 = vmatmul.f32.gmra.mxu3 %v10579_v16  ;;  %2288 = vmax.xlane.f32.xlu2 %v2185_v32  ;;  %v10581_v16 = vld [vmem:[#allocation188_spill] sm:$0xff]  ;;  %v10582_v32 = vld [vmem:[#allocation195_spill] sm:$0xff] }
 0x4d1   : > { %1650 = vmax.xlane.f32.xlu1 %v1546_v8  ;;  %v2208_v8 = vsel %vm2144_vm5, -inf, %v6818_v29  ;;  %v1568_v29 = vsel %vm1504_vm7, -inf, %v6846_v13  ;;  %v10590_v13 = vmax.f32 %v7134_v46, %v7293_v3 }
 0x4d2   : > { %v7546_v36 = vpop.f32.mrf.mxu3  ;;  %v7548_v60 = vpop.xlane.xlu2 %1436 }
 0x4d3   : > { %10580 = vst [vmem:[#allocation73_spill] sm:$0xff] %v7548_v60  ;;  %vm1503_vm0 = vcmp.ge.f32.partialorder %v6790_v53, %v7548_v60  ;;  %3219 = vmatmul.f32.gmra.mxu2 %v10581_v16  ;;  %v7560_v28 = vpop.xlane.xlu0 %2022 }
 0x4d4   : > { %v7554_v25 = vpop.xlane.xlu1 %2054  ;;  %v1567_v1 = vsel %vm1503_vm0, -inf, %v6790_v53  ;;  %v10585_v53 = vld [vmem:[#allocation175_spill] sm:$0xff] }
 0x4d5   : > { %1692 = vmax.xlane.f32.xlu0 %v1567_v1  ;;  %v10584_v1 = vld [vmem:[#allocation128_spill] sm:$0xff] }
 0x4d6   : > { %v3054_v63 = vpop.f32.mrf.mxu2 }
 0x4d7   : > { %3320 = vmatmul.f32.gmra.mxu3 %v10582_v32  ;;  %2334 = vmax.xlane.f32.xlu2 %v2208_v8  ;;  %v2201_v8 = vsel %vm2137_vm6, -inf, %v10583_v52  ;;  %v10593_v52 = vld [vmem:[#allocation167_spill] sm:$0xff] }
 0x4d8   : > { %vm1481_vm13 = vcmp.ge.f32.partialorder %v10593_v52, %v7324_v23 }
 0x4da   : > { %v3155_v27 = vpop.f32.mrf.mxu3  ;;  %v7564_v61 = vpop.xlane.xlu2 %1384 }
 0x4db   : > { %v3156_v60 = vadd.f32 %v3155_v27, %v3054_v63  ;;  %3222 = vmatmul.f32.gmra.mxu2 %v10584_v1  ;;  %v10586_v63 = vmax.f32 %v7111_v45, %v7266_v42 }
 0x4dc   : > { %v7568_v16 = vpop.xlane.xlu1 %2020 }
 0x4dd   : > { %v3392_v32 = vmax.f32 %v7434_v40, %v3156_v60  ;;  %2320 = vmax.xlane.f32.xlu0 %v2201_v8  ;;  %v10587_v8 = vld [vmem:[#allocation108_spill] sm:$0xff] }
 0x4de   : > { %v3057_v9 = vpop.f32.mrf.mxu2  ;;  %vm1498_vm9 = vcmp.ge.f32.partialorder %v10587_v8, %v7419_v22 }
 0x4df   : > { %3323 = vmatmul.f32.gmra.mxu3 %v10585_v53  ;;  %v7578_v27 = vmax.f32 %v10586_v63, %v3392_v32  ;;  %1694 = vmax.xlane.f32.xlu2 %v1568_v29  ;;  %v10588_v29 = vld [vmem:[#allocation127_spill] sm:$0xff]  ;;  %v1562_v63 = vsel %vm1498_vm9, -inf, %v10587_v8 }
 0x4e0   : > { %v7580_v31 = vpop.xlane.xlu0 %1440 }
 0x4e1   : > { %vm1505_vm8 = vcmp.ge.f32.partialorder %v6921_v55, %v7580_v31 }
 0x4e2   : > { %v3158_v40 = vpop.f32.mrf.mxu3  ;;  %v7584_v1 = vpop.xlane.xlu2 %2080  ;;  %v1569_v53 = vsel %vm1505_vm8, -inf, %v6921_v55 }
 0x4e3   : > { %v3159_v60 = vadd.f32 %v3158_v40, %v3057_v9  ;;  %vm2145_vm10 = vcmp.ge.f32.partialorder %v6869_v17, %v7584_v1  ;;  %1696 = vmax.xlane.f32.xlu1 %v1569_v53  ;;  %3225 = vmatmul.f32.gmra.mxu2 %v10588_v29  ;;  %v10589_v9 = vld [vmem:[#allocation174_spill] sm:$0xff]  ;;  %v10591_v53 = vld [vmem:[#allocation71_spill] sm:$0xff] }
 0x4e4   : > { %v7591_v42 = vpop.xlane.xlu1 %1414  ;;  %v2209_v32 = vsel %vm2145_vm10, -inf, %v6869_v17  ;;  %vm2136_vm11 = vcmp.ge.f32.partialorder %v10591_v53, %v7380_v54 }
 0x4e5   : > { %v3394_v45 = vmax.f32 %v7453_v20, %v3159_v60  ;;  %2336 = vmax.xlane.f32.xlu0 %v2209_v32  ;;  %v10592_v20 = vld [vmem:[#allocation154_spill] sm:$0xff]  ;;  %v2200_v8 = vsel %vm2136_vm11, -inf, %v10591_v53  ;;  %v10596_v53 = vmax.f32 %v7157_v5, %v7318_v19 }
 0x4e6   : > { %v3060_v40 = vpop.f32.mrf.mxu2  ;;  %vm2120_vm12 = vcmp.ge.f32.partialorder %v10592_v20, %v7345_v7  ;;  %v10600_v5 = vld [vmem:[#allocation122_spill] sm:$0xff] }
 0x4e7   : > { %3326 = vmatmul.f32.gmra.mxu3 %v10589_v9  ;;  %v7601_v55 = vmax.f32 %v10590_v13, %v3394_v45  ;;  %1682 = vmax.xlane.f32.xlu2 %v1562_v63  ;;  %v10594_v13 = vld [vmem:[#allocation125_spill] sm:$0xff]  ;;  %v2184_v45 = vsel %vm2120_vm12, -inf, %v10592_v20  ;;  %v10595_v63 = vld [vmem:[#allocation163_spill] sm:$0xff] }
 0x4e8   : > { %v7605_v29 = vpop.xlane.xlu0 %1416 }
 0x4ea   : > { %v3161_v60 = vpop.f32.mrf.mxu3  ;;  %v7609_v9 = vpop.xlane.xlu2 %2052 }
 0x4eb   : > { %v3162_v32 = vadd.f32 %v3161_v60, %v3060_v40  ;;  %2318 = vmax.xlane.f32.xlu1 %v2200_v8  ;;  %3228 = vmatmul.f32.gmra.mxu2 %v10594_v13  ;;  %v1545_v40 = vsel %vm1481_vm13, -inf, %v10593_v52  ;;  %v10597_v8 = vld [vmem:[#allocation149_spill] sm:$0xff]  ;;  %v10599_v52 = vld [vmem:[#allocation91_spill] sm:$0xff] }
 0x4ec   : > { %v7614_v46 = vpop.xlane.xlu1 %1380  ;;  %vm2119_vm14 = vcmp.ge.f32.partialorder %v10597_v8, %v7358_v62  ;;  %vm2135_vm1 = vcmp.ge.f32.partialorder %v10599_v52, %v7349_v14 }
 0x4ed   : > { %v3396_v3 = vmax.f32 %v7470_v11, %v3162_v32  ;;  %2286 = vmax.xlane.f32.xlu0 %v2184_v45  ;;  %v10598_v11 = vld [vmem:[#allocation57_spill] sm:$0xff]  ;;  %v2183_v20 = vsel %vm2119_vm14, -inf, %v10597_v8  ;;  %v10602_v8 = vmax.f32 %v7180_v44, %v7343_v35  ;;  %v10606_v35 = vld [vmem:[#allocation146_spill] sm:$0xff] }
 0x4ee   : > { %v3063_v60 = vpop.f32.mrf.mxu2  ;;  %vm1497_vm15 = vcmp.ge.f32.partialorder %v10598_v11, %v7436_v4  ;;  %vm2118_vm4 = vcmp.ge.f32.partialorder %v10606_v35, %v7371_v58 }
 0x4ef   : > { %3329 = vmatmul.f32.gmra.mxu3 %v10595_v63  ;;  %v7624_v17 = vmax.f32 %v10596_v53, %v3396_v3  ;;  %1648 = vmax.xlane.f32.xlu2 %v1545_v40  ;;  %v1561_v3 = vsel %vm1497_vm15, -inf, %v10598_v11  ;;  %v10601_v40 = vld [vmem:[#allocation31_spill] sm:$0xff] }
 0x4f0   : > { %v7628_v13 = vpop.xlane.xlu0 %1382 }
 0x4f2   : > { %v3164_v32 = vpop.f32.mrf.mxu3  ;;  %v7632_v63 = vpop.xlane.xlu2 %2018 }
 0x4f3   : > { %v3165_v45 = vadd.f32 %v3164_v32, %v3063_v60  ;;  %2284 = vmax.xlane.f32.xlu1 %v2183_v20  ;;  %3231 = vmatmul.f32.gmra.mxu2 %v10600_v5  ;;  %v2199_v60 = vsel %vm2135_vm1, -inf, %v10599_v52  ;;  %v10603_v20 = vld [vmem:[#allocation106_spill] sm:$0xff] }
 0x4f4   : > { %v7637_v19 = vpop.xlane.xlu1 %1410  ;;  %vm1496_vm2 = vcmp.ge.f32.partialorder %v10603_v20, %v7405_v39 }
 0x4f5   : > { %v3398_v53 = vmax.f32 %v7489_v47, %v3165_v45  ;;  %1680 = vmax.xlane.f32.xlu0 %v1561_v3  ;;  %v10604_v47 = vld [vmem:[#allocation111_spill] sm:$0xff]  ;;  %v10605_v3 = vld [vmem:[#allocation17_spill] sm:$0xff]  ;;  %v1560_v44 = vsel %vm1496_vm2, -inf, %v10603_v20 }
 0x4f6   : > { %v3066_v32 = vpop.f32.mrf.mxu2  ;;  %vm1480_vm3 = vcmp.ge.f32.partialorder %v10604_v47, %v7367_v56 }
 0x4f7   : > { %3332 = vmatmul.f32.gmra.mxu3 %v10601_v40  ;;  %v7647_v62 = vmax.f32 %v10602_v8, %v3398_v53  ;;  %2316 = vmax.xlane.f32.xlu2 %v2199_v60  ;;  %v2384_v40 = vmin.f32 %v10605_v3, %v7168_v2  ;;  %v10607_v53 = vld [vmem:[#allocation121_spill] sm:$0xff]  ;;  %v10608_v60 = vld [vmem:[#allocation107_spill] sm:$0xff]  ;;  %v1544_v2 = vsel %vm1480_vm3, -inf, %v10604_v47 }
 0x4f8   : > { %v7651_v5 = vpop.xlane.xlu0 %2050  ;;  %v2512_v14 = vmin.f32 %v7239_v50, %v10608_v60 }
 0x4fa   : > { %v3167_v45 = vpop.f32.mrf.mxu3  ;;  %v7657_v52 = vpop.xlane.xlu2 %1412 }
 0x4fb   : > { %v3168_v11 = vadd.f32 %v3167_v45, %v3066_v32  ;;  %1678 = vmax.xlane.f32.xlu1 %v1560_v44  ;;  %3234 = vmatmul.f32.gmra.mxu2 %v10607_v53  ;;  %v10609_v32 = vld [vmem:[#allocation34_spill] sm:$0xff]  ;;  %v2182_v45 = vsel %vm2118_vm4, -inf, %v10606_v35  ;;  %v10610_v44 = vmax.f32 %v7203_v57, %v7365_v15  ;;  %v10611_v53 = vld [vmem:[#allocation37_spill] sm:$0xff]  ;;  %v10614_v15 = vld [vmem:[#allocation112_spill] sm:$0xff] }
 0x4fc   : > { %v2303_v8 = vpop.xlane.xlu1 %2302  ;;  %vm1479_vm5 = vcmp.ge.f32.partialorder %v10611_v53, %v7464_v30  ;;  %v2513_v57 = vmin.f32 %v7205_v34, %v10614_v15  ;;  %v4580_v34 = vld [vmem:[%s9247_s2 + $0xf8] sm:$0xff]  ;;  %v10618_v15 = vld [vmem:[#allocation204_spill] sm:$0xff] }
 0x4fd   : > { %v3400_v56 = vmax.f32 %v7510_v49, %v3168_v11  ;;  %v2448_v39 = vmax.f32 %v2303_v8, %v2384_v40  ;;  %1646 = vmax.xlane.f32.xlu0 %v1544_v2  ;;  %v10612_v49 = vld [vmem:[#allocation48_spill] sm:$0xff]  ;;  %v10613_v40 = vld [vmem:[#allocation209_spill] sm:$0xff]  ;;  %vm2133_vm7 = vcmp.ge.f32.partialorder %v10618_v15, %v7539_v37 }
 0x4fe   : > { %v3069_v3 = vpop.f32.mrf.mxu2  ;;  %v2385_v11 = vmin.f32 %v10612_v49, %v7184_v59  ;;  %vm2134_vm0 = vcmp.ge.f32.partialorder %v10613_v40, %v7392_v0  ;;  %v4579_v59 = vld [vmem:[%s9247_s2 + $0xf0] sm:$0xff] }
 0x4ff   : > { %3335 = vmatmul.f32.gmra.mxu3 %v10609_v32  ;;  %v2576_v20 = vmax.f32 %v2448_v39, %v2512_v14  ;;  %v7672_v58 = vmax.f32 %v10610_v44, %v3400_v56  ;;  %2282 = vmax.xlane.f32.xlu2 %v2182_v45  ;;  %v1543_v39 = vsel %vm1479_vm5, -inf, %v10611_v53  ;;  %v10615_v56 = vld [vmem:[#allocation66_spill] sm:$0xff] }
 0x500   : > { %v7676_v50 = vpop.xlane.xlu0 %1378  ;;  %vm1495_vm6 = vcmp.ge.f32.partialorder %v10615_v56, %v7440_v12 }
 0x501   : > { %v1559_v49 = vsel %vm1495_vm6, -inf, %v10615_v56 }
 0x502   : > { %v3170_v8 = vpop.f32.mrf.mxu3  ;;  %v2305_v14 = vpop.xlane.xlu2 %2304 }
 0x503   : > { %v3171_v60 = vadd.f32 %v3170_v8, %v3069_v3  ;;  %v2449_v2 = vmax.f32 %v2305_v14, %v2385_v11  ;;  %1644 = vmax.xlane.f32.xlu1 %v1543_v39  ;;  %3237 = vmatmul.f32.gmra.mxu2 %v4579_v59  ;;  %v2198_v3 = vsel %vm2134_vm0, -inf, %v10613_v40  ;;  %v10616_v8 = vld [vmem:[#allocation28_spill] sm:$0xff] }
 0x504   : > { %v1663_v32 = vpop.xlane.xlu1 %1662  ;;  %v10617_v14 = vmax.f32 %v7226_v41, %v10616_v8  ;;  %v10627_v8 = vld [vmem:[#allocation138_spill] sm:$0xff] }
 0x505   : > { %v3402_v45 = vmax.f32 %v7525_v18, %v3171_v60  ;;  %2314 = vmax.xlane.f32.xlu0 %v2198_v3  ;;  %v2577_v44 = vmax.f32 %v2449_v2, %v2513_v57  ;;  %v10619_v18 = vld [vmem:[#allocation67_spill] sm:$0xff]  ;;  %v10622_v3 = vld [vmem:[#allocation96_spill] sm:$0xff]  ;;  %v7707_v56 = vmax.f32 %v2576_v20, %v1663_v32 }
 0x506   : > { %v3072_v11 = vpop.f32.mrf.mxu2  ;;  %v10620_v60 = vld [vmem:[#allocation147_spill] sm:$0xff] }
 0x507   : > { %3338 = vmatmul.f32.gmra.mxu3 %v4580_v34  ;;  %v3416_v39 = vmax.f32 %v10617_v14, %v3402_v45  ;;  %1676 = vmax.xlane.f32.xlu2 %v1559_v49  ;;  %v2383_v59 = vmin.f32 %v10620_v60, %v10619_v18  ;;  %v10621_v2 = vld [vmem:[#allocation19_spill] sm:$0xff]  ;;  %10624 = vst [vmem:[#allocation18_spill] sm:$0xff] %v7707_v56  ;;  %v2197_v60 = vsel %vm2133_vm7, -inf, %v10618_v15 }
 0x508   : > { %v1665_v57 = vpop.xlane.xlu0 %1664  ;;  %v2511_v40 = vmin.f32 %v10622_v3, %v10621_v2  ;;  %v10623_v34 = vld [vmem:[#allocation143_spill] sm:$0xff]  ;;  %v3153_v49 = vadd.f32 %v7546_v36, %v7543_v26  ;;  %v10628_v2 = vld [vmem:[#allocation156_spill] sm:$0xff] }
 0x509   : > { %vm2117_vm8 = vcmp.ge.f32.partialorder %v10623_v34, %v7455_v21  ;;  %v7709_v35 = vmax.f32 %v2577_v44, %v1665_v57  ;;  %v10626_v45 = vld [vmem:[#allocation3_spill] sm:$0xff]  ;;  %vm1478_vm9 = vcmp.ge.f32.partialorder %v10628_v2, %v7497_v24  ;;  %v10630_v57 = vld [vmem:[#allocation144_spill] sm:$0xff] }
 0x50a   : > { %v3173_v41 = vpop.f32.mrf.mxu3  ;;  %v2381_v14 = vmin.f32 %v10627_v8, %v10626_v45  ;;  %v2301_v18 = vpop.xlane.xlu2 %2300  ;;  %v10629_v32 = vld [vmem:[#allocation187_spill] sm:$0xff]  ;;  %v10632_v45 = vld [vmem:[#allocation185_spill] sm:$0xff] }
 0x50b   : > { %10625 = vst [vmem:[#allocation87_spill] sm:$0xff] %v7709_v35  ;;  %v3174_v37 = vadd.f32 %v3173_v41, %v3072_v11  ;;  %v2447_v3 = vmax.f32 %v2301_v18, %v2383_v59  ;;  %2312 = vmax.xlane.f32.xlu1 %v2197_v60  ;;  %vm2753_vm10 = vcmp.ge.f32.partialorder %v10629_v32, %v7709_v35  ;;  %v4581_v44 = vld [vmem:[%s9247_s2 + $0x100] sm:$0xff]  ;;  %v2181_v59 = vsel %vm2117_vm8, -inf, %v10623_v34 }
 0x50c   : > { %v2297_v20 = vpop.xlane.xlu1 %2296  ;;  %3240 = vmatmul.f32.gmra.mxu2 %v4581_v44  ;;  %v10631_v26 = vld [vmem:[#allocation35_spill] sm:$0xff]  ;;  %4441 = vmatpush.msk.msrb.mxu0 %vm2753_vm10, %v10629_v32  ;;  %vm2751_vm11 = vcmp.ge.f32.partialorder %v10632_v45, %v7707_v56  ;;  %v10633_v18 = vmax.f32 %v7246_v10, %v7413_v33  ;;  %v10635_v33 = vld [vmem:[#allocation104_spill] sm:$0xff] }
 0x50d   : > { %v2509_v36 = vmin.f32 %v10631_v26, %v10630_v57  ;;  %v3404_v11 = vmax.f32 %v3153_v49, %v3174_v37  ;;  %v2445_v41 = vmax.f32 %v2297_v20, %v2381_v14  ;;  %2280 = vmax.xlane.f32.xlu0 %v2181_v59  ;;  %v2575_v8 = vmax.f32 %v2447_v3, %v2511_v40  ;;  %v4582_v14 = vld [vmem:[%s9247_s2 + $0x108] sm:$0xff]  ;;  %v10634_v3 = vld [vmem:[#allocation5_spill] sm:$0xff]  ;;  %v10637_v57 = vld [vmem:[#allocation171_spill] sm:$0xff] }
 0x50e   : > { %4442 = vmatpush.msk.msrb.mxu0 %vm2751_vm11, %v10632_v45  ;;  %v1542_v49 = vsel %vm1478_vm9, -inf, %v10628_v2  ;;  %v3193_v40 = vpop.f32.mrf.mxu2  ;;  %v2382_v10 = vmin.f32 %v10635_v33, %v10634_v3  ;;  %v10636_v20 = vld [vmem:[#allocation140_spill] sm:$0xff]  ;;  %v10638_v26 = vld [vmem:[#allocation97_spill] sm:$0xff]  ;;  %v10639_v59 = vld [vmem:[#allocation74_spill] sm:$0xff] }
 0x50f   : > { %v3418_v37 = vmax.f32 %v10633_v18, %v3404_v11  ;;  %3341 = vmatmul.f32.gmra.mxu3 %v4582_v14  ;;  %v2573_v60 = vmax.f32 %v2445_v41, %v2509_v36  ;;  %vm2116_vm12 = vcmp.ge.f32.partialorder %v10636_v20, %v7560_v28  ;;  %1642 = vmax.xlane.f32.xlu2 %v1542_v49  ;;  %v10641_v3 = vld [vmem:[#allocation199_spill] sm:$0xff]  ;;  %v4583_v33 = vld [vmem:[%s9247_s2 + $0x110] sm:$0xff] }
 0x510   : > { %v2299_v44 = vpop.xlane.xlu0 %2298  ;;  %v2510_v11 = vmin.f32 %v10638_v26, %v10637_v57  ;;  %vm1494_vm13 = vcmp.ge.f32.partialorder %v10639_v59, %v7512_v48  ;;  %v2180_v41 = vsel %vm2116_vm12, -inf, %v10636_v20  ;;  %vm2132_vm14 = vcmp.ge.f32.partialorder %v10641_v3, %v7554_v25 }
 0x511   : > { %3442 = vmatpush.msra.mxu2 %v3418_v37  ;;  %v2446_v18 = vmax.f32 %v2299_v44, %v2382_v10  ;;  %v2196_v44 = vsel %vm2132_vm14, -inf, %v10641_v3 }
 0x512   : > { %v3294_v14 = vpop.f32.mrf.mxu3  ;;  %v1661_v36 = vpop.xlane.xlu2 %1660 }
 0x513   : > { %v7757_v45 = vadd.f32 %v3294_v14, %v3193_v40  ;;  %3443 = vmatpush.msra.mxu2 %v3416_v39  ;;  %v7762_v49 = vmax.f32 %v2575_v8, %v1661_v36  ;;  %2278 = vmax.xlane.f32.xlu1 %v2180_v41  ;;  %v2574_v10 = vmax.f32 %v2446_v18, %v2510_v11  ;;  %v1558_v40 = vsel %vm1494_vm13, -inf, %v10639_v59  ;;  %v10643_v39 = vld [vmem:[#allocation181_spill] sm:$0xff]  ;;  %v4584_v8 = vld [vmem:[%s9247_s2 + $0x118] sm:$0xff]  ;;  %v10645_v11 = vld [vmem:[#allocation152_spill] sm:$0xff] }
 0x514   : > { %v1657_v37 = vpop.xlane.xlu1 %1656  ;;  %3243 = vmatmul.f32.gmra.mxu2 %v4583_v33  ;;  %v10646_v18 = vld [vmem:[#allocation101_spill] sm:$0xff]  ;;  %v10647_v36 = vld [vmem:[#allocation151_spill] sm:$0xff]  ;;  %v10651_v59 = vld [vmem:[#allocation82_spill] sm:$0xff] }
 0x515   : > { %10640 = vst [vmem:[#allocation68_spill] sm:$0xff] %v7757_v45  ;;  %3444 = vmatpush.msra.mxu2 %v7672_v58  ;;  %1674 = vmax.xlane.f32.xlu0 %v1558_v40  ;;  %vm2749_vm15 = vcmp.ge.f32.partialorder %v10643_v39, %v7762_v49  ;;  %v10644_v58 = vld [vmem:[#allocation83_spill] sm:$0xff]  ;;  %v2380_v14 = vmin.f32 %v10646_v18, %v10645_v11  ;;  %v10655_v18 = vld [vmem:[#allocation136_spill] sm:$0xff] }
 0x516   : > { %10642 = vst [vmem:[#allocation16_spill] sm:$0xff] %v7762_v49  ;;  %4443 = vmatpush.msk.msrb.mxu0 %vm2749_vm15, %v10643_v39  ;;  %v3196_v57 = vpop.f32.mrf.mxu2  ;;  %vm1493_vm1 = vcmp.ge.f32.partialorder %v10644_v58, %v7605_v29  ;;  %vm1477_vm2 = vcmp.ge.f32.partialorder %v10647_v36, %v7564_v61  ;;  %v7786_v41 = vmax.f32 %v2573_v60, %v1657_v37  ;;  %v10652_v39 = vld [vmem:[#allocation26_spill] sm:$0xff]  ;;  %v10656_v37 = vld [vmem:[#allocation176_spill] sm:$0xff] }
 0x517   : > { %3344 = vmatmul.f32.gmra.mxu3 %v4584_v8  ;;  %3445 = vmatpush.msra.mxu2 %v7647_v62  ;;  %v10650_v8 = vld [vmem:[#allocation86_spill] sm:$0xff]  ;;  %v10653_v62 = vld [vmem:[#allocation129_spill] sm:$0xff]  ;;  %v1557_v11 = vsel %vm1493_vm1, -inf, %v10644_v58  ;;  %vm2115_vm3 = vcmp.ge.f32.partialorder %v10655_v18, %v7568_v16 }
 0x518   : > { %2310 = vmax.xlane.f32.xlu2 %v2196_v44  ;;  %v1659_v26 = vpop.xlane.xlu0 %1658  ;;  %10648 = vst [vmem:[#allocation80_spill] sm:$0xff] %v7786_v41  ;;  %v2508_v45 = vmin.f32 %v10651_v59, %v10650_v8  ;;  %v2395_v44 = vmin.f32 %v10653_v62, %v10652_v39  ;;  %v10657_v59 = vld [vmem:[#allocation29_spill] sm:$0xff]  ;;  %v10661_v62 = vld [vmem:[#allocation142_spill] sm:$0xff] }
 0x519   : > { %v7788_v33 = vmax.f32 %v2574_v10, %v1659_v26  ;;  %3446 = vmatpush.msra.mxu2 %v7624_v17  ;;  %v2523_v10 = vmin.f32 %v7445_v38, %v10657_v59  ;;  %v10659_v38 = vld [vmem:[#allocation172_spill] sm:$0xff] }
 0x51a   : > { %v3297_v40 = vpop.f32.mrf.mxu3  ;;  %v2295_v3 = vpop.xlane.xlu2 %2294  ;;  %vm2745_vm0 = vcmp.ge.f32.partialorder %v10659_v38, %v7786_v41  ;;  %v10664_v59 = vld [vmem:[#allocation88_spill] sm:$0xff] }
 0x51b   : > { %10649 = vst [vmem:[#allocation63_spill] sm:$0xff] %v7788_v33  ;;  %v7795_v32 = vadd.f32 %v3297_v40, %v3196_v57  ;;  %v2444_v60 = vmax.f32 %v2295_v3, %v2380_v14  ;;  %3447 = vmatpush.msra.mxu2 %v7601_v55  ;;  %1672 = vmax.xlane.f32.xlu1 %v1557_v11  ;;  %v1541_v3 = vsel %vm1477_vm2, -inf, %v10647_v36  ;;  %v4585_v55 = vld [vmem:[%s9247_s2 + $0x120] sm:$0xff]  ;;  %v10658_v57 = vld [vmem:[#allocation196_spill] sm:$0xff]  ;;  %v2179_v14 = vsel %vm2115_vm3, -inf, %v10655_v18 }
 0x51c   : > { %v2325_v17 = vpop.xlane.xlu1 %2324  ;;  %vm2747_vm4 = vcmp.ge.f32.partialorder %v10656_v37, %v7788_v33  ;;  %3246 = vmatmul.f32.gmra.mxu2 %v4585_v55  ;;  %vm2752_vm5 = vcmp.ge.f32.partialorder %v10658_v57, %v7709_v35  ;;  %v10663_v11 = vld [vmem:[#allocation191_spill] sm:$0xff] }
 0x51d   : > { %10654 = vst [vmem:[#allocation14_spill] sm:$0xff] %v7795_v32  ;;  %v2459_v39 = vmax.f32 %v2325_v17, %v2395_v44  ;;  %4444 = vmatpush.msk.msrb.mxu0 %vm2747_vm4, %v10656_v37  ;;  %3448 = vmatpush.msra.mxu2 %v7578_v27  ;;  %v2572_v26 = vmax.f32 %v2444_v60, %v2508_v45  ;;  %v10660_v27 = vld [vmem:[#allocation92_spill] sm:$0xff]  ;;  %v10662_v45 = vld [vmem:[#allocation27_spill] sm:$0xff]  ;;  %v10683_v32 = vld [vmem:[#allocation133_spill] sm:$0xff] }
 0x51e   : > { %1640 = vmax.xlane.f32.xlu0 %v1541_v3  ;;  %v3199_v40 = vpop.f32.mrf.mxu2  ;;  %v2379_v44 = vmin.f32 %v10661_v62, %v10660_v27  ;;  %vm1476_vm6 = vcmp.ge.f32.partialorder %v10662_v45, %v7628_v13  ;;  %vm2750_vm7 = vcmp.ge.f32.partialorder %v10663_v11, %v7707_v56  ;;  %v4586_v60 = vld [vmem:[%s9247_s2 + $0x128] sm:$0xff]  ;;  %v10666_v3 = vld [vmem:[#allocation186_spill] sm:$0xff] }
 0x51f   : > { %4409 = vmatpush.msk.msrb.mxu2 %vm2752_vm5, %v10658_v57  ;;  %4445 = vmatpush.msk.msrb.mxu0 %vm2745_vm0, %v10659_v38  ;;  %v7830_v8 = vmax.f32 %v2459_v39, %v2523_v10  ;;  %v2507_v10 = vmin.f32 %v7320_v51, %v10664_v59  ;;  %v10665_v39 = vld [vmem:[#allocation197_spill] sm:$0xff]  ;;  %vm2748_vm9 = vcmp.ge.f32.partialorder %v10666_v3, %v7762_v49  ;;  %v10667_v27 = vld [vmem:[#allocation194_spill] sm:$0xff]  ;;  %v1540_v51 = vsel %vm1476_vm6, -inf, %v10662_v45 }
 0x520   : > { %3347 = vmatmul.f32.gmra.mxu3 %v4586_v60  ;;  %2276 = vmax.xlane.f32.xlu2 %v2179_v14  ;;  %v2293_v17 = vpop.xlane.xlu0 %2292  ;;  %vm2131_vm8 = vcmp.ge.f32.partialorder %v10665_v39, %v7609_v9  ;;  %v2378_v62 = vmin.f32 %v10667_v27, %v7308_v6  ;;  %v10670_v60 = vld [vmem:[#allocation184_spill] sm:$0xff]  ;;  %v10673_v27 = vld [vmem:[#allocation183_spill] sm:$0xff]  ;;  %vm2114_vm5 = vcmp.ge.f32.partialorder %v10683_v32, %v7632_v63 }
 0x521   : > { %4410 = vmatpush.msk.msrb.mxu2 %vm2750_vm7, %v10663_v11  ;;  %v2443_v55 = vmax.f32 %v2293_v17, %v2379_v44  ;;  %v10669_v11 = vld [vmem:[#allocation208_spill] sm:$0xff]  ;;  %vm2746_vm13 = vcmp.ge.f32.partialorder %v10670_v60, %v7788_v33  ;;  %v10672_v17 = vld [vmem:[#allocation189_spill] sm:$0xff]  ;;  %vm2744_vm14 = vcmp.ge.f32.partialorder %v10673_v27, %v7786_v41  ;;  %v10685_v41 = vld [vmem:[#allocation203_spill] sm:$0xff] }
 0x522   : > { %v3300_v57 = vpop.f32.mrf.mxu3  ;;  %v1655_v14 = vpop.xlane.xlu2 %1654  ;;  %vm1492_vm12 = vcmp.ge.f32.partialorder %v10669_v11, %v7591_v42  ;;  %v2506_v59 = vmin.f32 %v7333_v43, %v10672_v17  ;;  %v10678_v17 = vld [vmem:[#allocation178_spill] sm:$0xff] }
 0x523   : > { %v7850_v58 = vadd.f32 %v3300_v57, %v3199_v40  ;;  %4411 = vmatpush.msk.msrb.mxu2 %vm2748_vm9, %v10666_v3  ;;  %v7861_v44 = vmax.f32 %v2572_v26, %v1655_v14  ;;  %1638 = vmax.xlane.f32.xlu1 %v1540_v51  ;;  %v7863_v40 = vmax.f32 %v2443_v55, %v2507_v10  ;;  %v2195_v57 = vsel %vm2131_vm8, -inf, %v10665_v39  ;;  %v10674_v26 = vld [vmem:[#allocation168_spill] sm:$0xff]  ;;  %v4587_v10 = vld [vmem:[%s9247_s2 + $0x130] sm:$0xff]  ;;  %v10675_v14 = vld [vmem:[#allocation78_spill] sm:$0xff] }
 0x524   : > { %v2291_v6 = vpop.xlane.xlu1 %2290  ;;  %3249 = vmatmul.f32.gmra.mxu2 %v4587_v10  ;;  %v1556_v43 = vsel %vm1492_vm12, -inf, %v10669_v11  ;;  %v10676_v51 = vld [vmem:[#allocation102_spill] sm:$0xff]  ;;  %v10681_v11 = vld [vmem:[#allocation160_spill] sm:$0xff] }
 0x525   : > { %10668 = vst [vmem:[#allocation75_spill] sm:$0xff] %v7850_v58  ;;  %v2442_v3 = vmax.f32 %v2291_v6, %v2378_v62  ;;  %4412 = vmatpush.msk.msrb.mxu2 %vm2746_vm13, %v10670_v60  ;;  %vm2743_vm1 = vcmp.ge.f32.partialorder %v10674_v26, %v7861_v44  ;;  %v2396_v60 = vmin.f32 %v10676_v51, %v10675_v14  ;;  %v10677_v6 = vld [vmem:[#allocation193_spill] sm:$0xff]  ;;  %v10682_v14 = vld [vmem:[#allocation76_spill] sm:$0xff] }
 0x526   : > { %10671 = vst [vmem:[#allocation58_spill] sm:$0xff] %v7861_v44  ;;  %2308 = vmax.xlane.f32.xlu0 %v2195_v57  ;;  %4446 = vmatpush.msk.msrb.mxu0 %vm2743_vm1, %v10674_v26  ;;  %v3202_v55 = vpop.f32.mrf.mxu2  ;;  %vm2130_vm2 = vcmp.ge.f32.partialorder %v10677_v6, %v7651_v5  ;;  %vm2742_vm3 = vcmp.ge.f32.partialorder %v10678_v17, %v7861_v44  ;;  %v4588_v57 = vld [vmem:[%s9247_s2 + $0x138] sm:$0xff]  ;;  %v10684_v26 = vld [vmem:[#allocation105_spill] sm:$0xff]  ;;  %v10719_v39 = vld [vmem:[#allocation132_spill] sm:$0xff] }
 0x527   : > { %4413 = vmatpush.msk.msrb.mxu2 %vm2744_vm14, %v10673_v27  ;;  %v7888_v62 = vmax.f32 %v2442_v3, %v2506_v59  ;;  %v10679_v59 = vld [vmem:[#allocation21_spill] sm:$0xff]  ;;  %v2524_v51 = vmin.f32 %v10682_v14, %v10681_v11  ;;  %v2398_v38 = vmin.f32 %v10685_v41, %v10684_v26  ;;  %v7923_v26 = vld [vmem:[%s9247_s2 + $0x140] sm:$0xff] }
 0x528   : > { %3350 = vmatmul.f32.gmra.mxu3 %v4588_v57  ;;  %1670 = vmax.xlane.f32.xlu2 %v1556_v43  ;;  %v2327_v27 = vpop.xlane.xlu0 %2326  ;;  %v10680_v3 = vld [vmem:[#allocation205_spill] sm:$0xff]  ;;  %v2194_v57 = vsel %vm2130_vm2, -inf, %v10677_v6  ;;  %10691 = vst [vmem:[#allocation70_spill] sm:$0xff] %v7923_v26 }
 0x529   : > { %4414 = vmatpush.msk.msrb.mxu2 %vm2742_vm3, %v10678_v17  ;;  %v2394_v10 = vmin.f32 %v10680_v3, %v10679_v59  ;;  %v2460_v58 = vmax.f32 %v2327_v27, %v2396_v60  ;;  %v10687_v17 = vld [vmem:[#allocation137_spill] sm:$0xff]  ;;  %v10689_v60 = vld [vmem:[#allocation11_spill] sm:$0xff]  ;;  %v10690_v27 = vld [vmem:[#allocation22_spill] sm:$0xff] }
 0x52a   : > { %v3303_v44 = vpop.f32.mrf.mxu3  ;;  %v2323_v43 = vpop.xlane.xlu2 %2322  ;;  %v2522_v37 = vmin.f32 %v7419_v22, %v10687_v17  ;;  %v10688_v59 = vld [vmem:[#allocation145_spill] sm:$0xff]  ;;  %v2526_v49 = vmin.f32 %v10690_v27, %v10689_v60 }
 0x52b   : > { %v7908_v33 = vadd.f32 %v3303_v44, %v3202_v55  ;;  %vm1475_vm6 = vcmp.ge.f32.partialorder %v10688_v59, %v7614_v46  ;;  %v2458_v11 = vmax.f32 %v2323_v43, %v2394_v10  ;;  %2306 = vmax.xlane.f32.xlu1 %v2194_v57  ;;  %v7915_v14 = vmax.f32 %v2460_v58, %v2524_v51  ;;  %v7938_v51 = vld [vmem:[%s9247_s2 + $0x148] sm:$0xff]  ;;  %v10696_v57 = vld [vmem:[#allocation153_spill] sm:$0xff] }
 0x52c   : > { %v2331_v3 = vpop.xlane.xlu1 %2330  ;;  %v2178_v44 = vsel %vm2114_vm5, -inf, %v10683_v32  ;;  %3252 = vmatmul.f32.gmra.mxu2 %v7923_v26  ;;  %v1539_v55 = vsel %vm1475_vm6, -inf, %v10688_v59  ;;  %10694 = vst [vmem:[#allocation62_spill] sm:$0xff] %v7938_v51  ;;  %v10699_v27 = vld [vmem:[#allocation13_spill] sm:$0xff]  ;;  %v10701_v26 = vld [vmem:[#allocation198_spill] sm:$0xff] }
 0x52d   : > { %10686 = vst [vmem:[#allocation12_spill] sm:$0xff] %v7908_v33  ;;  %v2462_v41 = vmax.f32 %v2331_v3, %v2398_v38  ;;  %v7926_v22 = vmax.f32 %v2458_v11, %v2522_v37  ;;  %v10693_v38 = vld [vmem:[#allocation141_spill] sm:$0xff]  ;;  %v10695_v37 = vld [vmem:[#allocation116_spill] sm:$0xff]  ;;  %v10697_v11 = vld [vmem:[#allocation202_spill] sm:$0xff]  ;;  %vm1490_vm9 = vcmp.ge.f32.partialorder %v10701_v26, %v7637_v19 }
 0x52e   : > { %2274 = vmax.xlane.f32.xlu0 %v2178_v44  ;;  %v7929_v58 = vpop.f32.mrf.mxu2  ;;  %vm1474_vm7 = vcmp.ge.f32.partialorder %v10693_v38, %v7676_v50  ;;  %v2397_v17 = vmin.f32 %v10696_v57, %v10695_v37  ;;  %vm1491_vm8 = vcmp.ge.f32.partialorder %v10697_v11, %v7657_v52  ;;  %v7960_v57 = vld [vmem:[%s9247_s2 + $0x150] sm:$0xff] }
 0x52f   : > { %10692 = vst [vmem:[#allocation10_spill] sm:$0xff] %v7929_v58  ;;  %v7931_v10 = vmax.f32 %v2462_v41, %v2526_v49  ;;  %v1538_v60 = vsel %vm1474_vm7, -inf, %v10693_v38  ;;  %v10700_v41 = vld [vmem:[#allocation24_spill] sm:$0xff]  ;;  %v1555_v37 = vsel %vm1491_vm8, -inf, %v10697_v11 }
 0x530   : > { %3353 = vmatmul.f32.gmra.mxu3 %v7938_v51  ;;  %1636 = vmax.xlane.f32.xlu2 %v1539_v55  ;;  %v7941_v43 = vpop.xlane.xlu0 %1686  ;;  %v2525_v44 = vmin.f32 %v10700_v41, %v10699_v27  ;;  %10702 = vst [vmem:[#allocation59_spill] sm:$0xff] %v7960_v57  ;;  %v1554_v27 = vsel %vm1490_vm9, -inf, %v10701_v26  ;;  %v10708_v26 = vld [vmem:[#allocation165_spill] sm:$0xff]  ;;  %v10714_v58 = vld [vmem:[#allocation32_spill] sm:$0xff] }
 0x532   : > { %v7947_v49 = vpop.f32.mrf.mxu3  ;;  %v2329_v3 = vpop.xlane.xlu2 %2328 }
 0x533   : > { %10698 = vst [vmem:[#allocation8_spill] sm:$0xff] %v7947_v49  ;;  %v2461_v55 = vmax.f32 %v2329_v3, %v2397_v17  ;;  %1634 = vmax.xlane.f32.xlu1 %v1538_v60  ;;  %v7971_v17 = vld [vmem:[%s9247_s2 + $0x158] sm:$0xff] }
 0x534   : > { %v7954_v51 = vpop.xlane.xlu1 %1690  ;;  %3255 = vmatmul.f32.gmra.mxu2 %v7960_v57  ;;  %10704 = vst [vmem:[#allocation55_spill] sm:$0xff] %v7971_v17 }
 0x535   : > { %v7963_v33 = vmax.f32 %v2461_v55, %v2525_v44  ;;  %v10707_v55 = vld [vmem:[#allocation173_spill] sm:$0xff] }
 0x536   : > { %1668 = vmax.xlane.f32.xlu0 %v1555_v37  ;;  %v7966_v41 = vpop.f32.mrf.mxu2 }
 0x537   : > { %10703 = vst [vmem:[#allocation6_spill] sm:$0xff] %v7966_v41 }
 0x538   : > { %3356 = vmatmul.f32.gmra.mxu3 %v7971_v17  ;;  %1666 = vmax.xlane.f32.xlu2 %v1554_v27  ;;  %v1653_v3 = vpop.xlane.xlu0 %1652  ;;  %v10712_v17 = vld [vmem:[#allocation61_spill] sm:$0xff] }
 0x539   : > { %v7975_v60 = vmax.f32 %v7863_v40, %v1653_v3  ;;  %v7995_v40 = vld [vmem:[%s9247_s2 + $0x160] sm:$0xff]  ;;  %v10711_v3 = vld [vmem:[#allocation69_spill] sm:$0xff] }
 0x53a   : > { %v7977_v37 = vpop.f32.mrf.mxu3  ;;  %v7979_v44 = vpop.xlane.xlu2 %1688  ;;  %10709 = vst [vmem:[#allocation47_spill] sm:$0xff] %v7995_v40  ;;  %v2399_v11 = vmin.f32 %v10712_v17, %v10711_v3  ;;  %v2505_v17 = vmin.f32 %v7324_v23, %v10719_v39  ;;  %v10722_v23 = vld [vmem:[#allocation162_spill] sm:$0xff] }
 0x53b   : > { %10705 = vst [vmem:[#allocation4_spill] sm:$0xff] %v7975_v60  ;;  %vm2740_vm12 = vcmp.ge.f32.partialorder %v10707_v55, %v7975_v60  ;;  %vm2741_vm13 = vcmp.ge.f32.partialorder %v10708_v26, %v7975_v60  ;;  %v10716_v60 = vld [vmem:[#allocation33_spill] sm:$0xff] }
 0x53c   : > { %10706 = vst [vmem:[#allocation50_spill] sm:$0xff] %v7977_v37  ;;  %v7983_v57 = vpop.xlane.xlu1 %1684  ;;  %4415 = vmatpush.msk.msrb.mxu2 %vm2740_vm12, %v10707_v55  ;;  %4447 = vmatpush.msk.msrb.mxu0 %vm2741_vm13, %v10708_v26  ;;  %v8005_v55 = vld [vmem:[%s9247_s2 + $0x168] sm:$0xff]  ;;  %v10715_v37 = vld [vmem:[#allocation177_spill] sm:$0xff] }
 0x53d   : > { %3258 = vmatmul.f32.gmra.mxu2 %v7995_v40  ;;  %10713 = vst [vmem:[#allocation38_spill] sm:$0xff] %v8005_v55  ;;  %v2377_v41 = vmin.f32 %v10715_v37, %v10714_v58  ;;  %v10717_v26 = vld [vmem:[#allocation73_spill] sm:$0xff] }
 0x53e   : > { %v7998_v27 = vpop.f32.mrf.mxu2  ;;  %v2527_v6 = vmin.f32 %v10717_v26, %v10716_v60  ;;  %v8022_v58 = vld [vmem:[%s9247_s2 + $0x170] sm:$0xff] }
 0x53f   : > { %10710 = vst [vmem:[#allocation43_spill] sm:$0xff] %v7998_v27 }
 0x540   : > { %3359 = vmatmul.f32.gmra.mxu3 %v8005_v55  ;;  %v2333_v49 = vpop.xlane.xlu0 %2332  ;;  %10720 = vst [vmem:[#allocation170_spill] sm:$0xff] %v8022_v58  ;;  %v10732_v55 = vld [vmem:[#allocation79_spill] sm:$0xff] }
 0x541   : > { %v2463_v40 = vmax.f32 %v2333_v49, %v2399_v11  ;;  %v10721_v11 = vld [vmem:[#allocation169_spill] sm:$0xff]  ;;  %v10726_v49 = vld [vmem:[#allocation52_spill] sm:$0xff] }
 0x542   : > { %v8012_v56 = vpop.f32.mrf.mxu3  ;;  %v2289_v27 = vpop.xlane.xlu2 %2288 }
 0x543   : > { %10718 = vst [vmem:[#allocation7_spill] sm:$0xff] %v8012_v56  ;;  %v2441_v3 = vmax.f32 %v2289_v27, %v2377_v41  ;;  %v2591_v32 = vmax.f32 %v2463_v40, %v2527_v6  ;;  %v10725_v6 = vld [vmem:[#allocation98_spill] sm:$0xff]  ;;  %v10728_v40 = vld [vmem:[#allocation148_spill] sm:$0xff] }
 0x544   : > { %v1651_v35 = vpop.xlane.xlu1 %1650  ;;  %v2400_v41 = vmin.f32 %v10726_v49, %v10725_v6  ;;  %v10729_v27 = vld [vmem:[#allocation20_spill] sm:$0xff] }
 0x545   : > { %v8017_v38 = vmax.f32 %v7888_v62, %v1651_v35  ;;  %3261 = vmatmul.f32.gmra.mxu2 %v8022_v58  ;;  %v8025_v26 = vmax.f32 %v2441_v3, %v2505_v17  ;;  %v8036_v35 = vld [vmem:[%s9247_s2 + $0x178] sm:$0xff]  ;;  %v2528_v17 = vmin.f32 %v10729_v27, %v10728_v40  ;;  %v8063_v49 = vld [vmem:[%s9247_s2 + $0x188] sm:$0xff] }
 0x546   : > { %v8031_v39 = vpop.f32.mrf.mxu2  ;;  %10724 = vst [vmem:[#allocation90_spill] sm:$0xff] %v8036_v35 }
 0x547   : > { %vm2738_vm14 = vcmp.ge.f32.partialorder %v10721_v11, %v8017_v38  ;;  %vm2739_vm2 = vcmp.ge.f32.partialorder %v10722_v23, %v8017_v38  ;;  %10723 = vst [vmem:[#allocation15_spill] sm:$0xff] %v8031_v39  ;;  %v10733_v39 = vld [vmem:[#allocation130_spill] sm:$0xff]  ;;  %v8515_v38 = vld [vmem:[%s9247_s2 + $0x28] sm:$0xff] }
 0x548   : > { %3362 = vmatmul.f32.gmra.mxu3 %v8036_v35  ;;  %4416 = vmatpush.msk.msrb.mxu2 %vm2738_vm14, %v10721_v11  ;;  %v1693_v62 = vpop.xlane.xlu0 %1692  ;;  %v8053_v11 = vld [vmem:[%s9247_s2 + $0x180] sm:$0xff]  ;;  %v2393_v6 = vmin.f32 %v10733_v39, %v10732_v55  ;;  %10734 = vst [vmem:[#allocation42_spill] sm:$0xff] %v8063_v49  ;;  %v8075_v55 = vld [vmem:[%s9247_s2 + $0x190] sm:$0xff] }
 0x549   : > { %4448 = vmatpush.msk.msrb.mxu0 %vm2739_vm2, %v10722_v23  ;;  %10730 = vst [vmem:[#allocation95_spill] sm:$0xff] %v8053_v11 }
 0x54a   : > { %v8046_v60 = vpop.f32.mrf.mxu3  ;;  %v2335_v37 = vpop.xlane.xlu2 %2334  ;;  %10737 = vst [vmem:[#allocation201_spill] sm:$0xff] %v8075_v55 }
 0x54b   : > { %10727 = vst [vmem:[#allocation164_spill] sm:$0xff] %v8046_v60  ;;  %v2464_v3 = vmax.f32 %v2335_v37, %v2400_v41  ;;  %v10735_v37 = vld [vmem:[#allocation157_spill] sm:$0xff] }
 0x54c   : > { %v2521_v40 = vmin.f32 %v7436_v4, %v10735_v37  ;;  %v8085_v4 = vld [vmem:[%s9247_s2 + $0x198] sm:$0xff]  ;;  %10826 = vst [vmem:[#allocation17_spill] sm:$0xff] %v8515_v38 }
 0x54d   : > { %3264 = vmatmul.f32.gmra.mxu2 %v8053_v11  ;;  %v2592_v35 = vmax.f32 %v2464_v3, %v2528_v17  ;;  %10740 = vst [vmem:[#allocation207_spill] sm:$0xff] %v8085_v4 }
 0x54e   : > { %v8056_v58 = vpop.f32.mrf.mxu2 }
 0x54f   : > { %10731 = vst [vmem:[#allocation45_spill] sm:$0xff] %v8056_v58 }
 0x550   : > { %3365 = vmatmul.f32.gmra.mxu3 %v8063_v49  ;;  %v2321_v41 = vpop.xlane.xlu0 %2320  ;;  %v10739_v49 = vld [vmem:[#allocation46_spill] sm:$0xff] }
 0x551   : > { %v2457_v27 = vmax.f32 %v2321_v41, %v2393_v6  ;;  %v2401_v58 = vmin.f32 %v10739_v49, %v7584_v1  ;;  %v10741_v41 = vld [vmem:[#allocation49_spill] sm:$0xff]  ;;  %v8099_v49 = vld [vmem:[%s9247_s2 + $0x1a0] sm:$0xff] }
 0x552   : > { %v8068_v60 = vpop.f32.mrf.mxu3  ;;  %v1695_v17 = vpop.xlane.xlu2 %1694  ;;  %v2529_v37 = vmin.f32 %v7580_v31, %v10741_v41  ;;  %10743 = vst [vmem:[#allocation190_spill] sm:$0xff] %v8099_v49  ;;  %v10744_v31 = vld [vmem:[#allocation131_spill] sm:$0xff] }
 0x553   : > { %10736 = vst [vmem:[#allocation25_spill] sm:$0xff] %v8068_v60  ;;  %v8070_v3 = vmax.f32 %v2457_v27, %v2521_v40  ;;  %v8094_v1 = vmax.f32 %v2592_v35, %v1695_v17  ;;  %v8110_v35 = vmax.f32 %v2591_v32, %v1693_v62  ;;  %v4602_v17 = vld [vmem:[%s9247_s2 + $0x1a8] sm:$0xff] }
 0x555   : > { %3267 = vmatmul.f32.gmra.mxu2 %v8075_v55 }
 0x556   : > { %v1697_v39 = vpop.xlane.xlu1 %1696  ;;  %v8078_v11 = vpop.f32.mrf.mxu2 }
 0x557   : > { %10738 = vst [vmem:[#allocation200_spill] sm:$0xff] %v8078_v11  ;;  %v10742_v11 = vld [vmem:[#allocation180_spill] sm:$0xff] }
 0x558   : > { %3368 = vmatmul.f32.gmra.mxu3 %v8085_v4  ;;  %v2337_v6 = vpop.xlane.xlu0 %2336  ;;  %v2392_v56 = vmin.f32 %v10742_v11, %v7380_v54 }
 0x559   : > { %v2465_v40 = vmax.f32 %v2337_v6, %v2401_v58  ;;  %v2376_v58 = vmin.f32 %v10744_v31, %v7345_v7  ;;  %v10749_v31 = vld [vmem:[#allocation40_spill] sm:$0xff] }
 0x55a   : > { %v8090_v27 = vpop.f32.mrf.mxu3  ;;  %v1683_v55 = vpop.xlane.xlu2 %1682 }
 0x55b   : > { %v2593_v60 = vmax.f32 %v2465_v40, %v2529_v37  ;;  %v10745_v37 = vld [vmem:[#allocation192_spill] sm:$0xff] }
 0x55c   : > { %v10746_v40 = vld [vmem:[#allocation120_spill] sm:$0xff] }
 0x55d   : > { %3270 = vmatmul.f32.gmra.mxu2 %v8099_v49  ;;  %v8102_v4 = vmax.f32 %v2593_v60, %v1697_v39  ;;  %v2520_v54 = vmin.f32 %v10746_v40, %v10745_v37  ;;  %v10747_v60 = vld [vmem:[#allocation135_spill] sm:$0xff]  ;;  %v10748_v39 = vld [vmem:[#allocation41_spill] sm:$0xff]  ;;  %v8129_v40 = vmax.f32 %v7931_v10, %v7954_v51  ;;  %v10754_v10 = vld [vmem:[#allocation30_spill] sm:$0xff] }
 0x55e   : > { %v2319_v6 = vpop.xlane.xlu1 %2318  ;;  %v8106_v41 = vpop.f32.mrf.mxu2  ;;  %v2504_v37 = vmin.f32 %v10749_v31, %v10748_v39  ;;  %v10755_v51 = vld [vmem:[#allocation179_spill] sm:$0xff]  ;;  %v8157_v31 = vld [vmem:[%s9247_s2 + $0x1b0] sm:$0xff] }
 0x55f   : > { %v2456_v11 = vmax.f32 %v2319_v6, %v2392_v56  ;;  %vm9876_vm3 = vcmp.ge.f32.partialorder %v10747_v60, %v8102_v4  ;;  %v10750_v56 = vld [vmem:[#allocation44_spill] sm:$0xff]  ;;  %10751 = vst [vmem:[#allocation206_spill] sm:$0xff] %v8129_v40  ;;  %v10756_v39 = vld [vmem:[#allocation167_spill] sm:$0xff] }
 0x560   : > { %3371 = vmatmul.f32.gmra.mxu3 %v4602_v17  ;;  %4457 = vmatpush.msk.msrb.mxu1 %vm9876_vm3, %v10747_v60  ;;  %v2287_v7 = vpop.xlane.xlu0 %2286  ;;  %vm9875_vm5 = vcmp.ge.f32.partialorder %v10750_v56, %v8094_v1  ;;  %10758 = vst [vmem:[#allocation188_spill] sm:$0xff] %v8157_v31 }
 0x561   : > { %v2440_v32 = vmax.f32 %v2287_v7, %v2376_v58  ;;  %v2584_v6 = vmax.f32 %v2456_v11, %v2520_v54  ;;  %v10752_v58 = vld [vmem:[#allocation150_spill] sm:$0xff]  ;;  %v8142_v54 = vmax.f32 %v7963_v33, %v7979_v44  ;;  %v2375_v11 = vmin.f32 %v10755_v51, %v10754_v10 }
 0x562   : > { %v8123_v62 = vpop.f32.mrf.mxu3  ;;  %4458 = vmatpush.msk.msrb.mxu1 %vm9875_vm5, %v10750_v56  ;;  %v1649_v17 = vpop.xlane.xlu2 %1648  ;;  %vm9873_vm6 = vcmp.ge.f32.partialorder %v10752_v58, %v8110_v35  ;;  %v8162_v33 = vmax.f32 %v7915_v14, %v7941_v43  ;;  %v4604_v14 = vld [vmem:[%s9247_s2 + $0x1b8] sm:$0xff]  ;;  %v8184_v43 = vmax.f32 %v7830_v8, %v7983_v57  ;;  %v10767_v8 = vld [vmem:[#allocation51_spill] sm:$0xff] }
 0x563   : > { %v8136_v49 = vmax.f32 %v8025_v26, %v1649_v17  ;;  %v2568_v7 = vmax.f32 %v2440_v32, %v2504_v37  ;;  %10753 = vst [vmem:[#allocation134_spill] sm:$0xff] %v8142_v54  ;;  %v10757_v26 = vld [vmem:[#allocation159_spill] sm:$0xff]  ;;  %v10760_v37 = vld [vmem:[#allocation53_spill] sm:$0xff]  ;;  %v10761_v17 = vld [vmem:[#allocation182_spill] sm:$0xff] }
 0x564   : > { %4459 = vmatpush.msk.msrb.mxu1 %vm9873_vm6, %v10752_v58  ;;  %10759 = vst [vmem:[#allocation195_spill] sm:$0xff] %v8162_v33  ;;  %vm9854_vm9 = vcmp.ge.f32.partialorder %v10760_v37, %v8129_v40  ;;  %v2503_v10 = vmin.f32 %v7464_v30, %v10761_v17  ;;  %v10764_v30 = vld [vmem:[#allocation81_spill] sm:$0xff]  ;;  %vm9842_vm14 = vcmp.ge.f32.partialorder %v10767_v8, %v8162_v33  ;;  %v10768_v58 = vld [vmem:[#allocation124_spill] sm:$0xff]  ;;  %vm9878_vm6 = vcmask 457728  }
 0x565   : > { %vm2736_vm7 = vcmp.ge.f32.partialorder %v10756_v39, %v8136_v49  ;;  %vm2737_vm8 = vcmp.ge.f32.partialorder %v10757_v26, %v8136_v49  ;;  %3273 = vmatmul.f32.gmra.mxu2 %v8157_v31  ;;  %10762 = vst [vmem:[#allocation128_spill] sm:$0xff] %v8184_v43  ;;  %v10763_v31 = vld [vmem:[#allocation119_spill] sm:$0xff]  ;;  %v2519_v56 = vmin.f32 %v7440_v12, %v10768_v58  ;;  %v10771_v12 = vld [vmem:[#allocation9_spill] sm:$0xff] }
 0x566   : > { %v2285_v44 = vpop.xlane.xlu1 %2284  ;;  %4417 = vmatpush.msk.msrb.mxu2 %vm2736_vm7, %v10756_v39  ;;  %4449 = vmatpush.msk.msrb.mxu0 %vm2737_vm8, %v10757_v26  ;;  %v8171_v32 = vpop.f32.mrf.mxu2  ;;  %vm9841_vm12 = vcmp.ge.f32.partialorder %v10763_v31, %v8142_v54  ;;  %v10789_v54 = vld [vmem:[#allocation65_spill] sm:$0xff] }
 0x567   : > { %v2439_v51 = vmax.f32 %v2285_v44, %v2375_v11  ;;  %4460 = vmatpush.msk.msrb.mxu1 %vm9854_vm9, %v10760_v37  ;;  %v10765_v11 = vld [vmem:[#allocation117_spill] sm:$0xff]  ;;  %v2372_v40 = vmin.f32 %v10789_v54, %v7560_v28 }
 0x568   : > { %3374 = vmatmul.f32.gmra.mxu3 %v4604_v14  ;;  %v1681_v39 = vpop.xlane.xlu0 %1680  ;;  %v2391_v44 = vmin.f32 %v10765_v11, %v10764_v30  ;;  %v8197_v14 = vmax.f32 %v7926_v22, %v1683_v55 }
 0x569   : > { %4461 = vmatpush.msk.msrb.mxu1 %vm9841_vm12, %v10763_v31  ;;  %v2567_v37 = vmax.f32 %v2439_v51, %v2503_v10  ;;  %v8208_v11 = vmax.f32 %v8070_v3, %v1681_v39  ;;  %v10770_v10 = vld [vmem:[#allocation60_spill] sm:$0xff] }
 0x56a   : > { %v8194_v17 = vpop.f32.mrf.mxu3  ;;  %10766 = vst [vmem:[#allocation175_spill] sm:$0xff] %v8197_v14  ;;  %v2317_v57 = vpop.xlane.xlu2 %2316  ;;  %vm9843_vm7 = vcmp.ge.f32.partialorder %v10770_v10, %v8184_v43  ;;  %vm9847_vm12 = vcmp.ge.f32.partialorder %v10771_v12, %v8197_v14  ;;  %v10773_v39 = vld [vmem:[#allocation64_spill] sm:$0xff] }
 0x56b   : > { %4462 = vmatpush.msk.msrb.mxu1 %vm9842_vm14, %v10767_v8  ;;  %v2455_v30 = vmax.f32 %v2317_v57, %v2391_v44  ;;  %10769 = vst [vmem:[#allocation127_spill] sm:$0xff] %v8208_v11  ;;  %vm9848_vm14 = vcmp.ge.f32.partialorder %v10773_v39, %v8208_v11  ;;  %v10774_v44 = vld [vmem:[#allocation85_spill] sm:$0xff]  ;;  %v10775_v57 = vld [vmem:[#allocation114_spill] sm:$0xff] }
 0x56d   : > { %4463 = vmatpush.msk.msrb.mxu1 %vm9843_vm7, %v10770_v10  ;;  %v2583_v22 = vmax.f32 %v2455_v30, %v2519_v56  ;;  %v2374_v56 = vmin.f32 %v10775_v57, %v10774_v44  ;;  %v10777_v10 = vld [vmem:[#allocation123_spill] sm:$0xff]  ;;  %v10779_v57 = vld [vmem:[#allocation89_spill] sm:$0xff] }
 0x56e   : > { %v1679_v55 = vpop.xlane.xlu1 %1678  ;;  %v8218_v58 = vpop.f32.mrf.mxu2  ;;  %v2502_v8 = vmin.f32 %v7497_v24, %v10777_v10 }
 0x56f   : > { %v8220_v51 = vmax.f32 %v2584_v6, %v1679_v55  ;;  %4464 = vmatpush.msk.msrb.mxu1 %vm9847_vm12, %v10771_v12  ;;  %v10776_v55 = vld [vmem:[#allocation71_spill] sm:$0xff] }
 0x570   : > { %v1647_v3 = vpop.xlane.xlu0 %1646 }
 0x571   : > { %10772 = vst [vmem:[#allocation174_spill] sm:$0xff] %v8220_v51  ;;  %v8230_v30 = vmax.f32 %v2568_v7, %v1647_v3  ;;  %4465 = vmatpush.msk.msrb.mxu1 %vm9848_vm14, %v10773_v39  ;;  %vm9853_vm7 = vcmp.ge.f32.partialorder %v10776_v55, %v8220_v51  ;;  %v10778_v3 = vld [vmem:[#allocation154_spill] sm:$0xff]  ;;  %v2390_v39 = vmin.f32 %v10779_v57, %v7392_v0 }
 0x572   : > { %v8236_v6 = vpop.f32.mrf.mxu3  ;;  %v2283_v12 = vpop.xlane.xlu2 %2282 }
 0x573   : > { %vm2734_vm12 = vcmp.ge.f32.partialorder %v10604_v47, %v8230_v30  ;;  %4466 = vmatpush.msk.msrb.mxu1 %vm9853_vm7, %v10776_v55  ;;  %v2438_v7 = vmax.f32 %v2283_v12, %v2374_v56  ;;  %vm2735_vm14 = vcmp.ge.f32.partialorder %v10778_v3, %v8230_v30  ;;  %v10780_v56 = vld [vmem:[#allocation100_spill] sm:$0xff] }
 0x574   : > { %4418 = vmatpush.msk.msrb.mxu2 %vm2734_vm12, %v10604_v47  ;;  %4450 = vmatpush.msk.msrb.mxu0 %vm2735_vm14, %v10778_v3  ;;  %v2518_v55 = vmin.f32 %v7512_v48, %v10780_v56  ;;  %v10786_v56 = vld [vmem:[#allocation84_spill] sm:$0xff] }
 0x575   : > { %v2566_v24 = vmax.f32 %v2438_v7, %v2502_v8  ;;  %v10781_v8 = vld [vmem:[#allocation149_spill] sm:$0xff]  ;;  %v2373_v51 = vmin.f32 %v10786_v56, %v7455_v21  ;;  %v10790_v21 = vld [vmem:[#allocation146_spill] sm:$0xff] }
 0x576   : > { %v1645_v10 = vpop.xlane.xlu1 %1644  ;;  %v8255_v44 = vpop.f32.mrf.mxu2  ;;  %v10783_v7 = vld [vmem:[#allocation93_spill] sm:$0xff] }
 0x577   : > { %v8259_v31 = vmax.f32 %v2567_v37, %v1645_v10  ;;  %v10784_v10 = vld [vmem:[#allocation103_spill] sm:$0xff] }
 0x578   : > { %v2315_v12 = vpop.xlane.xlu0 %2314  ;;  %v2389_v57 = vmin.f32 %v10784_v10, %v10783_v7  ;;  %v10788_v7 = vld [vmem:[#allocation94_spill] sm:$0xff] }
 0x579   : > { %vm2732_vm12 = vcmp.ge.f32.partialorder %v10611_v53, %v8259_v31  ;;  %v2454_v47 = vmax.f32 %v2315_v12, %v2390_v39  ;;  %vm2733_vm7 = vcmp.ge.f32.partialorder %v10781_v8, %v8259_v31  ;;  %v10785_v39 = vld [vmem:[#allocation91_spill] sm:$0xff]  ;;  %v2501_v10 = vmin.f32 %v7564_v61, %v10788_v7 }
 0x57a   : > { %v8265_v60 = vpop.f32.mrf.mxu3  ;;  %4419 = vmatpush.msk.msrb.mxu2 %vm2732_vm12, %v10611_v53  ;;  %4451 = vmatpush.msk.msrb.mxu0 %vm2733_vm7, %v10781_v8  ;;  %v1677_v0 = vpop.xlane.xlu2 %1676 }
 0x57b   : > { %v8274_v37 = vmax.f32 %v2583_v22, %v1677_v0  ;;  %v2582_v48 = vmax.f32 %v2454_v47, %v2518_v55  ;;  %v10787_v22 = vld [vmem:[#allocation166_spill] sm:$0xff] }
 0x57c   : > { %v2517_v55 = vmin.f32 %v7605_v29, %v10787_v22  ;;  %v10793_v22 = vld [vmem:[#allocation115_spill] sm:$0xff] }
 0x57d   : > { %10782 = vst [vmem:[#allocation125_spill] sm:$0xff] %v8274_v37  ;;  %vm9872_vm9 = vcmp.ge.f32.partialorder %v10785_v39, %v8274_v37 }
 0x57e   : > { %v2313_v12 = vpop.xlane.xlu1 %2312  ;;  %4467 = vmatpush.msk.msrb.mxu1 %vm9872_vm9, %v10785_v39  ;;  %v8284_v53 = vpop.f32.mrf.mxu2 }
 0x57f   : > { %v2453_v47 = vmax.f32 %v2313_v12, %v2389_v57 }
 0x580   : > { %v2281_v0 = vpop.xlane.xlu0 %2280 }
 0x581   : > { %v2437_v11 = vmax.f32 %v2281_v0, %v2373_v51  ;;  %v2581_v43 = vmax.f32 %v2453_v47, %v2517_v55  ;;  %v10792_v51 = vld [vmem:[#allocation110_spill] sm:$0xff]  ;;  %v2516_v55 = vmin.f32 %v7591_v42, %v10793_v22  ;;  %v10794_v0 = vld [vmem:[#allocation209_spill] sm:$0xff] }
 0x582   : > { %v8292_v14 = vpop.f32.mrf.mxu3  ;;  %v1643_v33 = vpop.xlane.xlu2 %1642 }
 0x583   : > { %v8294_v37 = vmax.f32 %v2566_v24, %v1643_v33  ;;  %v2565_v39 = vmax.f32 %v2437_v11, %v2501_v10  ;;  %v10791_v33 = vld [vmem:[#allocation72_spill] sm:$0xff]  ;;  %v2388_v24 = vmin.f32 %v10792_v51, %v7554_v25  ;;  %v10795_v10 = vld [vmem:[#allocation109_spill] sm:$0xff] }
 0x584   : > { %v2500_v11 = vmin.f32 %v7628_v13, %v10791_v33  ;;  %v8324_v13 = vld [vmem:[%s9248_s3] sm:$0xff] }
 0x585   : > { %vm2730_vm12 = vcmp.ge.f32.partialorder %v10628_v2, %v8294_v37  ;;  %vm2731_vm9 = vcmp.ge.f32.partialorder %v10790_v21, %v8294_v37  ;;  %4401 = vmatmul.msk.f32.vlgmr.msra.gmra.mxu2 %vm9878_vm6, %v8324_v13 }
 0x586   : > { %v2279_v29 = vpop.xlane.xlu1 %2278  ;;  %4420 = vmatpush.msk.msrb.mxu2 %vm2730_vm12, %v10628_v2  ;;  %4452 = vmatpush.msk.msrb.mxu0 %vm2731_vm9, %v10790_v21  ;;  %v8307_v61 = vpop.f32.mrf.mxu2 }
 0x587   : > { %v2436_v28 = vmax.f32 %v2279_v29, %v2372_v40  ;;  %v2371_v29 = vmin.f32 %v10795_v10, %v7568_v16  ;;  %v10799_v10 = vld [vmem:[#allocation36_spill] sm:$0xff] }
 0x588   : > { %v1675_v54 = vpop.xlane.xlu0 %1674 }
 0x589   : > { %v8313_v57 = vmax.f32 %v2582_v48, %v1675_v54  ;;  %v2564_v2 = vmax.f32 %v2436_v28, %v2500_v11  ;;  %v10796_v54 = vld [vmem:[#allocation113_spill] sm:$0xff] }
 0x58a   : > { %v8315_v12 = vpop.f32.mrf.mxu3 }
 0x58b   : > { %v2311_v56 = vpop.xlane.xlu2 %2310  ;;  %vm9874_vm12 = vcmp.ge.f32.partialorder %v10794_v0, %v8313_v57 }
 0x58c   : > { %v2452_v47 = vmax.f32 %v2311_v56, %v2388_v24  ;;  %4468 = vmatpush.msk.msrb.mxu1 %vm9874_vm12, %v10794_v0  ;;  %v10840_v0 = vld [vmem:[#allocation7_spill] sm:$0xff] }
 0x58e   : > { %v2580_v25 = vmax.f32 %v2452_v47, %v2516_v55  ;;  %v1673_v42 = vpop.xlane.xlu1 %1672  ;;  %v10798_v47 = vld [vmem:[#allocation77_spill] sm:$0xff] }
 0x58f   : > { %v8332_v40 = vpop.f32.mrf.mxu2  ;;  %v8334_v48 = vmax.f32 %v2581_v43, %v1673_v42  ;;  %v2499_v43 = vmin.f32 %v7614_v46, %v10796_v54  ;;  %v10797_v46 = vld [vmem:[#allocation39_spill] sm:$0xff]  ;;  %v2515_v42 = vmin.f32 %v7657_v52, %v10798_v47 }
 0x590   : > { %v2387_v56 = vmin.f32 %v10797_v46, %v7609_v9 }
 0x591   : > { %v1641_v7 = vpop.xlane.xlu0 %1640  ;;  %vm9877_vm12 = vcmp.ge.f32.partialorder %v10618_v15, %v8334_v48 }
 0x592   : > { %v8338_v33 = vmax.f32 %v2565_v39, %v1641_v7  ;;  %v8340_v11 = vpop.f32.mrf.mxu3  ;;  %4469 = vmatpush.msk.msrb.mxu1 %vm9877_vm12, %v10618_v15  ;;  %v10839_v15 = vld [vmem:[#allocation43_spill] sm:$0xff] }
 0x593   : > { %v2277_v28 = vpop.xlane.xlu2 %2276 }
 0x594   : > { %vm2728_vm5 = vcmp.ge.f32.partialorder %v10647_v36, %v8338_v33  ;;  %v2435_v16 = vmax.f32 %v2277_v28, %v2371_v29  ;;  %vm9882_vm3 = vcmp.ge.f32.partialorder %v10623_v34, %v8338_v33  ;;  %v2386_v29 = vmin.f32 %v10799_v10, %v7651_v5  ;;  %v10800_v28 = vld [vmem:[#allocation199_spill] sm:$0xff]  ;;  %v10803_v5 = vld [vmem:[#allocation161_spill] sm:$0xff] }
 0x595   : > { %4421 = vmatpush.msk.msrb.mxu2 %vm2728_vm5, %v10647_v36  ;;  %4453 = vmatpush.msk.msrb.mxu0 %vm9882_vm3, %v10623_v34 }
 0x596   : > { %v2563_v39 = vmax.f32 %v2435_v16, %v2499_v43  ;;  %v1639_v51 = vpop.xlane.xlu1 %1638  ;;  %v10802_v16 = vld [vmem:[#allocation99_spill] sm:$0xff] }
 0x597   : > { %v8359_v24 = vpop.f32.mrf.mxu2  ;;  %v8363_v22 = vmax.f32 %v2564_v2, %v1639_v51 }
 0x599   : > { %v2309_v55 = vpop.xlane.xlu0 %2308  ;;  %vm2726_vm5 = vcmp.ge.f32.partialorder %v10662_v45, %v8363_v22  ;;  %vm9881_vm12 = vcmp.ge.f32.partialorder %v10636_v20, %v8363_v22 }
 0x59a   : > { %v2451_v36 = vmax.f32 %v2309_v55, %v2387_v56  ;;  %v8369_v7 = vpop.f32.mrf.mxu3  ;;  %4422 = vmatpush.msk.msrb.mxu2 %vm2726_vm5, %v10662_v45  ;;  %4454 = vmatpush.msk.msrb.mxu0 %vm9881_vm12, %v10636_v20  ;;  %v10801_v45 = vld [vmem:[#allocation56_spill] sm:$0xff]  ;;  %v2498_v55 = vmin.f32 %v7676_v50, %v10803_v5 }
 0x59b   : > { %v1671_v9 = vpop.xlane.xlu2 %1670  ;;  %v2370_v43 = vmin.f32 %v10801_v45, %v7632_v63  ;;  %v10821_v5 = vld [vmem:[#allocation168_spill] sm:$0xff] }
 0x59c   : > { %v8378_v2 = vmax.f32 %v2580_v25, %v1671_v9  ;;  %v2579_v52 = vmax.f32 %v2451_v36, %v2515_v42  ;;  %v2514_v25 = vmin.f32 %v7637_v19, %v10802_v16 }
 0x59e   : > { %vm9880_vm6 = vcmp.ge.f32.partialorder %v10800_v28, %v8378_v2  ;;  %v2307_v54 = vpop.xlane.xlu1 %2306 }
 0x59f   : > { %4470 = vmatpush.msk.msrb.mxu1 %vm9880_vm6, %v10800_v28  ;;  %v2450_v51 = vmax.f32 %v2307_v54, %v2386_v29  ;;  %v8392_v46 = vpop.f32.mrf.mxu2  ;;  %v10804_v54 = vld [vmem:[#allocation141_spill] sm:$0xff] }
 0x5a1   : > { %v2275_v56 = vpop.xlane.xlu0 %2274  ;;  %v2578_v42 = vmax.f32 %v2450_v51, %v2514_v25  ;;  %v8431_v51 = vld [vmem:[%s9247_s2] sm:$0xff] }
 0x5a2   : > { %v2434_v47 = vmax.f32 %v2275_v56, %v2370_v43  ;;  %v10811_v56 = vld [vmem:[#allocation185_spill] sm:$0xff] }
 0x5a3   : > { %v8396_v36 = vpop.f32.mrf.mxu3  ;;  %v1637_v9 = vpop.xlane.xlu2 %1636 }
 0x5a4   : > { %v2627_v10 = vmax.f32 %v2563_v39, %v1637_v9  ;;  %v2562_v28 = vmax.f32 %v2434_v47, %v2498_v55  ;;  %v10806_v39 = vld [vmem:[#allocation133_spill] sm:$0xff]  ;;  %v8451_v9 = vld [vmem:[%s9247_s2 + $0x8] sm:$0xff] }
 0x5a5   : > { %v10813_v55 = vld [vmem:[#allocation193_spill] sm:$0xff]  ;;  %10816 = vst [vmem:[#allocation31_spill] sm:$0xff] %v8451_v9 }
 0x5a6   : > { %vm2724_vm5 = vcmp.ge.f32.partialorder %v10688_v59, %v2627_v10  ;;  %vm2725_vm6 = vcmp.ge.f32.partialorder %v10655_v18, %v2627_v10  ;;  %v1635_v63 = vpop.xlane.xlu1 %1634  ;;  %v10814_v47 = vld [vmem:[#allocation181_spill] sm:$0xff] }
 0x5a7   : > { %4423 = vmatpush.msk.msrb.mxu2 %vm2724_vm5, %v10688_v59  ;;  %4455 = vmatpush.msk.msrb.mxu0 %vm2725_vm6, %v10655_v18  ;;  %v2626_v19 = vmax.f32 %v2562_v28, %v1635_v63  ;;  %v8404_v29 = vpop.f32.mrf.mxu2  ;;  %v10808_v28 = vld [vmem:[#allocation187_spill] sm:$0xff] }
 0x5a9   : > { %v1669_v50 = vpop.xlane.xlu0 %1668  ;;  %vm2722_vm12 = vcmp.ge.f32.partialorder %v10804_v54, %v2626_v19  ;;  %vm2723_vm3 = vcmp.ge.f32.partialorder %v10806_v39, %v2626_v19 }
 0x5aa   : > { %v8407_v45 = vmax.f32 %v2579_v52, %v1669_v50  ;;  %4424 = vmatpush.msk.msrb.mxu2 %vm2722_vm12, %v10804_v54  ;;  %4456 = vmatpush.msk.msrb.mxu0 %vm2723_vm3, %v10806_v39  ;;  %v10810_v52 = vld [vmem:[#allocation197_spill] sm:$0xff]  ;;  %v10817_v50 = vld [vmem:[#allocation176_spill] sm:$0xff]  ;;  %v8483_v54 = vld [vmem:[%s9247_s2 + $0x18] sm:$0xff] }
 0x5ab   : > { %v8410_v43 = vpop.f32.mrf.mxu3  ;;  %v1667_v59 = vpop.xlane.xlu2 %1666  ;;  %3722 = vmatmul.f32.vlgmr.msrb.gmra.mxu0 %v8431_v51  ;;  %10825 = vst [vmem:[#allocation111_spill] sm:$0xff] %v8483_v54 }
 0x5ac   : > { %10805 = vst [vmem:[#allocation163_spill] sm:$0xff] %v8407_v45  ;;  %v8416_v16 = vmax.f32 %v2578_v42, %v1667_v59  ;;  %4488 = vmatpush.msk.msra.mxu2 %vm2753_vm10, %v10808_v28  ;;  %vm2757_vm5 = vcmp.ge.f32.partialorder %v10810_v52, %v8407_v45  ;;  %v10819_v28 = vld [vmem:[#allocation172_spill] sm:$0xff]  ;;  %v10823_v42 = vld [vmem:[#allocation165_spill] sm:$0xff]  ;;  %v10841_v45 = vld [vmem:[#allocation6_spill] sm:$0xff] }
 0x5ad   : > { %4471 = vmatpush.msk.msrb.mxu1 %vm2757_vm5, %v10810_v52 }
 0x5ae   : > { %10807 = vst [vmem:[#allocation122_spill] sm:$0xff] %v8416_v16  ;;  %4489 = vmatpush.msk.msra.mxu2 %vm2751_vm11, %v10811_v56  ;;  %vm2755_vm10 = vcmp.ge.f32.partialorder %v10813_v55, %v8416_v16  ;;  %v8469_v56 = vld [vmem:[%s9247_s2 + $0x10] sm:$0xff]  ;;  %vm10827_vm11 = vcmp.ge.f32.partialorder %v10623_v34, %v8338_v33 }
 0x5af   : > { %4472 = vmatpush.msk.msrb.mxu1 %vm2755_vm10, %v10813_v55  ;;  %v8454_v63 = vpop.f32.mrf.mxu2  ;;  %v8580_v33 = vld [vmem:[%s9248_s3 + $0x10] sm:$0xff]  ;;  %v8619_v55 = vld [vmem:[%s9247_s2 + $0x78] sm:$0xff] }
 0x5b0   : > { %4490 = vmatpush.msk.msra.mxu2 %vm2749_vm15, %v10814_v47  ;;  %3823 = vmatmul.f32.vlgmr.msrb.gmra.mxu1 %v8451_v9  ;;  %vm10828_vm15 = vcmp.ge.f32.partialorder %v10636_v20, %v8363_v22  ;;  %v8587_v22 = vld [vmem:[%s9247_s2 + $0x58] sm:$0xff]  ;;  %10838 = vst [vmem:[#allocation28_spill] sm:$0xff] %v8619_v55 }
 0x5b1   : > { %10833 = vst [vmem:[#allocation34_spill] sm:$0xff] %v8587_v22  ;;  %v8599_v47 = vld [vmem:[%s9248_s3 + $0x18] sm:$0xff] }
 0x5b2   : > { %4491 = vmatpush.msk.msra.mxu2 %vm2747_vm4, %v10817_v50  ;;  %vm10830_vm4 = vcmask 457728  }
 0x5b3   : > { %v8460_v59 = vpop.f32.mrf.mxu3  ;;  %3725 = vmatmul.f32.gmra.mxu0 %v8469_v56 }
 0x5b4   : > { %4492 = vmatpush.msk.msra.mxu2 %vm2745_vm0, %v10819_v28  ;;  %vm10832_vm0 = vmmov %vm10830_vm4 }
 0x5b6   : > { %4493 = vmatpush.msk.msra.mxu2 %vm2743_vm1, %v10821_v5  ;;  %v8501_v5 = vld [vmem:[%s9247_s2 + $0x20] sm:$0xff]  ;;  %vm10835_vm1 = vmmov %vm10832_vm0 }
 0x5b7   : > { %v8486_v28 = vpop.f32.mrf.mxu2 }
 0x5b8   : > { %4494 = vmatpush.msk.msra.mxu2 %vm2741_vm13, %v10823_v42  ;;  %3826 = vmatmul.f32.gmra.mxu1 %v8483_v54  ;;  %v8606_v42 = vld [vmem:[%s9247_s2 + $0x68] sm:$0xff]  ;;  %v3331_v54 = vadd.f32 %v8236_v6, %v8218_v58  ;;  %v3349_v58 = vadd.f32 %v8396_v36, %v8392_v46 }
 0x5b9   : > { %10836 = vst [vmem:[#allocation48_spill] sm:$0xff] %v8606_v42  ;;  %v8654_v46 = vld [vmem:[%s9247_s2 + $0x88] sm:$0xff] }
 0x5ba   : > { %4495 = vmatpush.msk.msra.mxu2 %vm2739_vm2, %v10722_v23  ;;  %v10845_v36 = vld [vmem:[#allocation200_spill] sm:$0xff] }
 0x5bb   : > { %v8492_v25 = vpop.f32.mrf.mxu3  ;;  %3728 = vmatmul.f32.gmra.mxu0 %v8501_v5 }
 0x5bc   : > { %4496 = vmatpush.msk.msra.mxu2 %vm2737_vm8, %v10757_v26  ;;  %v8533_v26 = vld [vmem:[%s9247_s2 + $0x30] sm:$0xff] }
 0x5be   : > { %4497 = vmatpush.msk.msra.mxu2 %vm2735_vm14, %v10778_v3  ;;  %v8568_v3 = vld [vmem:[%s9247_s2 + $0x48] sm:$0xff] }
 0x5bf   : > { %10831 = vst [vmem:[#allocation107_spill] sm:$0xff] %v8568_v3 }
 0x5c0   : > { %4498 = vmatpush.msk.msra.mxu2 %vm2733_vm7, %v10781_v8  ;;  %3829 = vmatmul.f32.gmra.mxu1 %v8515_v38  ;;  %v8518_v23 = vpop.f32.mrf.mxu2  ;;  %v3313_v38 = vadd.f32 %v10840_v0, %v10839_v15  ;;  %v8639_v15 = vld [vmem:[%s9247_s2 + $0x80] sm:$0xff]  ;;  %vm10864_vm7 = vmmov %vm10832_vm0 }
 0x5c2   : > { %4499 = vmatpush.msk.msra.mxu2 %vm2731_vm9, %v10790_v21  ;;  %v8574_v21 = vld [vmem:[%s9247_s2 + $0x50] sm:$0xff] }
 0x5c3   : > { %v8524_v49 = vpop.f32.mrf.mxu3  ;;  %3731 = vmatmul.f32.gmra.mxu0 %v8533_v26 }
 0x5c4   : > { %4500 = vmatpush.msk.msra.mxu2 %vm10827_vm11, %v10623_v34  ;;  %v8546_v34 = vld [vmem:[%s9247_s2 + $0x38] sm:$0xff] }
 0x5c5   : > { %10829 = vst [vmem:[#allocation121_spill] sm:$0xff] %v8546_v34 }
 0x5c6   : > { %4501 = vmatpush.msk.msra.mxu2 %vm10828_vm15, %v10636_v20  ;;  %v8555_v20 = vld [vmem:[%s9247_s2 + $0x40] sm:$0xff] }
 0x5c8   : > { %4502 = vmatpush.msk.msra.mxu2 %vm2725_vm6, %v10655_v18  ;;  %3832 = vmatmul.f32.gmra.mxu1 %v8546_v34  ;;  %v3262_v31 = vpop.f32.mrf.mxu2  ;;  %v8561_v18 = vld [vmem:[%s9248_s3 + $0x8] sm:$0xff] }
 0x5c9   : > { %4402 = vmatmul.msk.f32.gmra.mxu2 %vm10830_vm4, %v8561_v18 }
 0x5ca   : > { %4503 = vmatpush.msk.msra.mxu2 %vm2723_vm3, %v10806_v39  ;;  %v8593_v39 = vld [vmem:[%s9247_s2 + $0x60] sm:$0xff]  ;;  %vm10856_vm3 = vmmov %vm10832_vm0 }
 0x5cb   : > { %v3363_v30 = vpop.f32.mrf.mxu3  ;;  %3734 = vmatmul.f32.gmra.mxu0 %v8555_v20  ;;  %10834 = vst [vmem:[#allocation37_spill] sm:$0xff] %v8593_v39 }
 0x5d0   : > { %3835 = vmatmul.f32.gmra.mxu1 %v8568_v3  ;;  %v3265_v8 = vpop.f32.mrf.mxu2  ;;  %v8612_v3 = vld [vmem:[%s9247_s2 + $0x70] sm:$0xff] }
 0x5d1   : > { %4403 = vmatmul.msk.f32.gmra.mxu2 %vm10832_vm0, %v8580_v33  ;;  %10837 = vst [vmem:[#allocation112_spill] sm:$0xff] %v8612_v3 }
 0x5d3   : > { %v3366_v37 = vpop.f32.mrf.mxu3  ;;  %3737 = vmatmul.f32.gmra.mxu0 %v8574_v21 }
 0x5d4   : > { %v3367_v6 = vadd.f32 %v3366_v37, %v3265_v8  ;;  %v10850_v37 = vld [vmem:[#allocation164_spill] sm:$0xff] }
 0x5d8   : > { %3838 = vmatmul.f32.gmra.mxu1 %v8587_v22  ;;  %v3268_v10 = vpop.f32.mrf.mxu2 }
 0x5d9   : > { %4404 = vmatmul.msk.f32.gmra.mxu2 %vm10835_vm1, %v8599_v47 }
 0x5db   : > { %v3369_v19 = vpop.f32.mrf.mxu3  ;;  %3740 = vmatmul.f32.gmra.mxu0 %v8593_v39  ;;  %v10842_v39 = vld [vmem:[#allocation50_spill] sm:$0xff] }
 0x5dc   : > { %v3370_v16 = vadd.f32 %v3369_v19, %v3268_v10  ;;  %v10851_v10 = vld [vmem:[#allocation75_spill] sm:$0xff] }
 0x5e0   : > { %3841 = vmatmul.f32.gmra.mxu1 %v8606_v42  ;;  %v3271_v50 = vpop.f32.mrf.mxu2  ;;  %v3334_v42 = vadd.f32 %v8265_v60, %v8255_v44  ;;  %v3310_v60 = vadd.f32 %v10842_v39, %v10841_v45  ;;  %v3328_v44 = vadd.f32 %v8194_v17, %v8171_v32  ;;  %v3325_v32 = vadd.f32 %v8123_v62, %v8106_v41 }
 0x5e1   : > { %3520 = vmatmul.f32.vlgmr.msrb.gmra.mxu2 %v8431_v51  ;;  %v3352_v51 = vadd.f32 %v8410_v43, %v8404_v29  ;;  %v10843_v43 = vld [vmem:[#allocation10_spill] sm:$0xff]  ;;  %v3343_v62 = vadd.f32 %v8340_v11, %v8332_v40  ;;  %v10849_v11 = vld [vmem:[#allocation15_spill] sm:$0xff] }
 0x5e2   : > { %v3389_v17 = vmax.f32 %v3310_v60, %v3331_v54  ;;  %v10847_v54 = vld [vmem:[#allocation25_spill] sm:$0xff]  ;;  %v10853_v60 = vld [vmem:[#allocation68_spill] sm:$0xff] }
 0x5e3   : > { %v3372_v22 = vpop.f32.mrf.mxu3  ;;  %3743 = vmatmul.f32.gmra.mxu0 %v8612_v3  ;;  %v3355_v3 = vadd.f32 %v8460_v59, %v8454_v63  ;;  %v3364_v63 = vadd.f32 %v3363_v30, %v3262_v31  ;;  %v3401_v59 = vmax.f32 %v3349_v58, %v3370_v16  ;;  %v10848_v31 = vld [vmem:[#allocation12_spill] sm:$0xff]  ;;  %v10855_v58 = vld [vmem:[#allocation139_spill] sm:$0xff] }
 0x5e4   : > { %v3373_v34 = vadd.f32 %v3372_v22, %v3271_v50  ;;  %v3391_v22 = vmax.f32 %v3313_v38, %v3334_v42  ;;  %v3385_v30 = vmax.f32 %v10848_v31, %v3325_v32  ;;  %vm2782_vm2 = vcmp.ge.f32.partialorder %v10855_v58, %v8094_v1  ;;  %v10863_v32 = vld [vmem:[#allocation23_spill] sm:$0xff]  ;;  %v10879_v31 = vld [vmem:[#allocation37_spill] sm:$0xff] }
 0x5e5   : > { %v3397_v8 = vmax.f32 %v3343_v62, %v3364_v63  ;;  %v10866_v63 = vld [vmem:[#allocation54_spill] sm:$0xff] }
 0x5e6   : > { %v3403_v0 = vmax.f32 %v3352_v51, %v3373_v34  ;;  %v8686_v51 = vld [vmem:[%s9247_s2 + $0x98] sm:$0xff] }
 0x5e7   : > { %v10872_v62 = vld [vmem:[#allocation106_spill] sm:$0xff] }
 0x5e8   : > { %3844 = vmatmul.f32.gmra.mxu1 %v8619_v55  ;;  %v3274_v52 = vpop.f32.mrf.mxu2  ;;  %v3417_v16 = vmax.f32 %v3389_v17, %v3403_v0  ;;  %v10857_v0 = vld [vmem:[#allocation158_spill] sm:$0xff] }
 0x5e9   : > { %3523 = vmatmul.f32.gmra.mxu2 %v8469_v56  ;;  %v10846_v56 = vld [vmem:[#allocation45_spill] sm:$0xff]  ;;  %vm2780_vm6 = vcmp.ge.f32.partialorder %v10857_v0, %v8110_v35  ;;  %v8735_v17 = vld [vmem:[%s9247_s2 + $0xb8] sm:$0xff] }
 0x5ea   : > { %v3319_v34 = vadd.f32 %v10847_v54, %v10846_v56  ;;  %v10875_v56 = vld [vmem:[#allocation74_spill] sm:$0xff]  ;;  %v10876_v54 = vld [vmem:[#allocation83_spill] sm:$0xff] }
 0x5eb   : > { %v3375_v9 = vpop.f32.mrf.mxu3  ;;  %3746 = vmatmul.f32.gmra.mxu0 %v8639_v15 }
 0x5ec   : > { %v3376_v55 = vadd.f32 %v3375_v9, %v3274_v52  ;;  %v10844_v52 = vld [vmem:[#allocation8_spill] sm:$0xff]  ;;  %v3346_v9 = vadd.f32 %v8369_v7, %v8359_v24  ;;  %v3361_v24 = vadd.f32 %v8524_v49, %v8518_v23  ;;  %v3316_v23 = vadd.f32 %v10850_v37, %v10849_v11  ;;  %v8675_v49 = vld [vmem:[%s9247_s2 + $0x90] sm:$0xff]  ;;  %v8801_v11 = vld [vmem:[%s9247_s2 + $0xe0] sm:$0xff] }
 0x5ed   : > { %v3307_v45 = vadd.f32 %v10844_v52, %v10843_v43  ;;  %v10859_v43 = vld [vmem:[#allocation155_spill] sm:$0xff]  ;;  %v10861_v52 = vld [vmem:[#allocation118_spill] sm:$0xff] }
 0x5ee   : > { %v3405_v29 = vmax.f32 %v3355_v3, %v3376_v55  ;;  %v3322_v55 = vadd.f32 %v8090_v27, %v10845_v36  ;;  %v3399_v7 = vmax.f32 %v3346_v9, %v3367_v6  ;;  %v3340_v3 = vadd.f32 %v8315_v12, %v8307_v61  ;;  %v8708_v6 = vld [vmem:[%s9247_s2 + $0xa8] sm:$0xff]  ;;  %v10869_v36 = vld [vmem:[#allocation127_spill] sm:$0xff] }
 0x5ef   : > { %v3387_v41 = vmax.f32 %v3307_v45, %v3328_v44  ;;  %v3358_v27 = vadd.f32 %v8492_v25, %v8486_v28  ;;  %v3337_v61 = vadd.f32 %v8292_v14, %v8284_v53  ;;  %v10852_v25 = vld [vmem:[#allocation14_spill] sm:$0xff]  ;;  %v3379_v44 = vmax.f32 %v10853_v60, %v3316_v23  ;;  %v10862_v45 = vld [vmem:[#allocation195_spill] sm:$0xff]  ;;  %v10865_v9 = vld [vmem:[#allocation128_spill] sm:$0xff] }
 0x5f0   : > { %v3419_v38 = vmax.f32 %v3391_v22, %v3405_v29  ;;  %3847 = vmatmul.f32.gmra.mxu1 %v8654_v46  ;;  %v3383_v19 = vmax.f32 %v10851_v10, %v3322_v55  ;;  %v3395_v12 = vmax.f32 %v3340_v3, %v3361_v24  ;;  %v3413_v28 = vmax.f32 %v3385_v30, %v3399_v7  ;;  %v8693_v22 = vld [vmem:[%s9247_s2 + $0xa0] sm:$0xff]  ;;  %v10858_v29 = vld [vmem:[#allocation206_spill] sm:$0xff]  ;;  %v10870_v55 = vld [vmem:[#allocation57_spill] sm:$0xff] }
 0x5f1   : > { %v3415_v40 = vmax.f32 %v3387_v41, %v3401_v59  ;;  %v3381_v39 = vmax.f32 %v10852_v25, %v3319_v34  ;;  %v3393_v42 = vmax.f32 %v3337_v61, %v3358_v27  ;;  %3526 = vmatmul.f32.gmra.mxu2 %v8501_v5  ;;  %v10854_v5 = vld [vmem:[#allocation126_spill] sm:$0xff]  ;;  %vm2778_vm8 = vcmp.ge.f32.partialorder %v10859_v43, %v10858_v29  ;;  %v10867_v59 = vld [vmem:[#allocation175_spill] sm:$0xff]  ;;  %v8762_v24 = vld [vmem:[%s9247_s2 + $0xc8] sm:$0xff] }
 0x5f2   : > { %3471 = vmatpush.msra.mxu3 %v3419_v38  ;;  %v3411_v50 = vmax.f32 %v3383_v19, %v3397_v8  ;;  %vm2784_vm13 = vcmp.ge.f32.partialorder %v10854_v5, %v8102_v4  ;;  %vm2774_vm14 = vcmp.ge.f32.partialorder %v10863_v32, %v10862_v45  ;;  %vm2772_vm12 = vcmp.ge.f32.partialorder %v10866_v63, %v10865_v9  ;;  %v10868_v38 = vld [vmem:[#allocation108_spill] sm:$0xff]  ;;  %v10871_v41 = vld [vmem:[#allocation174_spill] sm:$0xff]  ;;  %v10873_v7 = vld [vmem:[#allocation125_spill] sm:$0xff] }
 0x5f3   : > { %3749 = vmatmul.f32.gmra.mxu0 %v8675_v49  ;;  %v3409_v14 = vmax.f32 %v3381_v39, %v3395_v12  ;;  %v3407_v53 = vmax.f32 %v3379_v44, %v3393_v42  ;;  %vm2770_vm11 = vcmp.ge.f32.partialorder %v10868_v38, %v10867_v59  ;;  %vm2768_vm15 = vcmp.ge.f32.partialorder %v10870_v55, %v10869_v36  ;;  %v10877_v34 = vld [vmem:[#allocation208_spill] sm:$0xff]  ;;  %v8789_v30 = vld [vmem:[%s9247_s2 + $0xd8] sm:$0xff]  ;;  %v10880_v3 = vld [vmem:[#allocation163_spill] sm:$0xff] }
 0x5f4   : > { %3472 = vmatpush.msra.mxu3 %v3417_v16  ;;  %vm2766_vm4 = vcmp.ge.f32.partialorder %v10872_v62, %v10871_v41  ;;  %v10874_v16 = vld [vmem:[#allocation66_spill] sm:$0xff]  ;;  %v10884_v37 = vld [vmem:[#allocation135_spill] sm:$0xff]  ;;  %v10886_v23 = vld [vmem:[#allocation44_spill] sm:$0xff] }
 0x5f5   : > { %vm2764_vm1 = vcmp.ge.f32.partialorder %v10874_v16, %v10873_v7  ;;  %v10881_v27 = vld [vmem:[#allocation202_spill] sm:$0xff]  ;;  %v10888_v10 = vld [vmem:[#allocation112_spill] sm:$0xff]  ;;  %v10889_v19 = vld [vmem:[#allocation31_spill] sm:$0xff] }
 0x5f6   : > { %3473 = vmatpush.msra.mxu3 %v3415_v40  ;;  %v10882_v8 = vld [vmem:[#allocation122_spill] sm:$0xff]  ;;  %v8817_v61 = vld [vmem:[%s9247_s2 + $0xe8] sm:$0xff]  ;;  %v10896_v25 = vld [vmem:[#allocation51_spill] sm:$0xff] }
 0x5f7   : > { %v10883_v40 = vld [vmem:[#allocation198_spill] sm:$0xff]  ;;  %v10899_v42 = vld [vmem:[#allocation60_spill] sm:$0xff]  ;;  %v10901_v60 = vld [vmem:[#allocation9_spill] sm:$0xff] }
 0x5f8   : > { %3474 = vmatpush.msra.mxu3 %v3413_v28  ;;  %3850 = vmatmul.f32.gmra.mxu1 %v8686_v51  ;;  %v10890_v12 = vld [vmem:[#allocation150_spill] sm:$0xff]  ;;  %v10894_v28 = vld [vmem:[#allocation119_spill] sm:$0xff] }
 0x5f9   : > { %3529 = vmatmul.f32.gmra.mxu2 %v8533_v26  ;;  %v10860_v26 = vld [vmem:[#allocation134_spill] sm:$0xff]  ;;  %v4637_v44 = vld [vmem:[%s9247_s2 + $0x100] sm:$0xff] }
 0x5fa   : > { %3475 = vmatpush.msra.mxu3 %v3411_v50  ;;  %vm2776_vm9 = vcmp.ge.f32.partialorder %v10861_v52, %v10860_v26  ;;  %v8847_v39 = vld [vmem:[%s9247_s2 + $0xf8] sm:$0xff] }
 0x5fb   : > { %3752 = vmatmul.f32.gmra.mxu0 %v8693_v22 }
 0x5fc   : > { %3476 = vmatpush.msra.mxu3 %v3409_v14  ;;  %v10903_v14 = vld [vmem:[#allocation64_spill] sm:$0xff] }
 0x5fe   : > { %3477 = vmatpush.msra.mxu3 %v3407_v53  ;;  %v10905_v53 = vld [vmem:[#allocation71_spill] sm:$0xff] }
 0x5ff   : > { %4405 = vmatmul.msk.f32.vlgmr.msra.gmra.mxu3 %vm10856_vm3, %v8324_v13  ;;  %v8720_v13 = vld [vmem:[%s9247_s2 + $0xb0] sm:$0xff]  ;;  %vm2758_vm3 = vcmp.ge.f32.partialorder %v10877_v34, %v8378_v2 }
 0x600   : > { %4425 = vmatpush.msk.msrb.mxu3 %vm2784_vm13, %v10854_v5  ;;  %3853 = vmatmul.f32.gmra.mxu1 %v8708_v6  ;;  %vm2762_vm13 = vcmp.ge.f32.partialorder %v10875_v56, %v8313_v57  ;;  %v10907_v5 = vld [vmem:[#allocation17_spill] sm:$0xff] }
 0x601   : > { %3532 = vmatmul.f32.gmra.mxu2 %v8555_v20  ;;  %v8747_v20 = vld [vmem:[%s9247_s2 + $0xc0] sm:$0xff] }
 0x602   : > { %4426 = vmatpush.msk.msrb.mxu3 %vm2782_vm2, %v10855_v58  ;;  %vm2760_vm2 = vcmp.ge.f32.partialorder %v10876_v54, %v8334_v48  ;;  %v8878_v58 = vld [vmem:[%s9247_s2 + $0x108] sm:$0xff] }
 0x603   : > { %3755 = vmatmul.f32.gmra.mxu0 %v8720_v13 }
 0x604   : > { %4427 = vmatpush.msk.msrb.mxu3 %vm2780_vm6, %v10857_v0  ;;  %vm10878_vm6 = vmmov %vm10832_vm0  ;;  %v10908_v0 = vld [vmem:[#allocation91_spill] sm:$0xff] }
 0x606   : > { %4428 = vmatpush.msk.msrb.mxu3 %vm2778_vm8, %v10859_v43  ;;  %vm2756_vm8 = vcmp.ge.f32.partialorder %v10881_v27, %v10880_v3  ;;  %v10910_v43 = vld [vmem:[#allocation209_spill] sm:$0xff]  ;;  %v10924_v3 = vld [vmem:[#allocation59_spill] sm:$0xff] }
 0x607   : > { %4406 = vmatmul.msk.f32.gmra.mxu3 %vm10864_vm7, %v8561_v18  ;;  %vm10887_vm7 = vcmp.ge.f32.partialorder %v10886_v23, %v8094_v1  ;;  %v8831_v1 = vld [vmem:[%s9247_s2 + $0xf0] sm:$0xff] }
 0x608   : > { %4429 = vmatpush.msk.msrb.mxu3 %vm2776_vm9, %v10861_v52  ;;  %3856 = vmatmul.f32.gmra.mxu1 %v8735_v17  ;;  %vm2754_vm9 = vcmp.ge.f32.partialorder %v10883_v40, %v10882_v8  ;;  %v10912_v52 = vld [vmem:[#allocation204_spill] sm:$0xff]  ;;  %v10926_v8 = vld [vmem:[#allocation55_spill] sm:$0xff] }
 0x609   : > { %3535 = vmatmul.f32.gmra.mxu2 %v8574_v21  ;;  %v8774_v21 = vld [vmem:[%s9247_s2 + $0xd0] sm:$0xff] }
 0x60a   : > { %4430 = vmatpush.msk.msrb.mxu3 %vm2774_vm14, %v10863_v32  ;;  %vm10885_vm14 = vcmp.ge.f32.partialorder %v10884_v37, %v8102_v4  ;;  %v10892_v4 = vld [vmem:[#allocation53_spill] sm:$0xff]  ;;  %v8909_v32 = vld [vmem:[%s9247_s2 + $0x118] sm:$0xff] }
 0x60b   : > { %3758 = vmatmul.f32.gmra.mxu0 %v8747_v20 }
 0x60c   : > { %4431 = vmatpush.msk.msrb.mxu3 %vm2772_vm12, %v10866_v63  ;;  %vm10891_vm12 = vcmp.ge.f32.partialorder %v10890_v12, %v8110_v35  ;;  %v10898_v35 = vld [vmem:[#allocation111_spill] sm:$0xff] }
 0x60d   : > { %v4641_v63 = vld [vmem:[%s9247_s2 + $0x120] sm:$0xff] }
 0x60e   : > { %4432 = vmatpush.msk.msrb.mxu3 %vm2770_vm11, %v10868_v38  ;;  %vm10893_vm11 = vcmp.ge.f32.partialorder %v10892_v4, %v10858_v29  ;;  %v8932_v38 = vld [vmem:[%s9247_s2 + $0x128] sm:$0xff] }
 0x60f   : > { %4407 = vmatmul.msk.f32.gmra.mxu3 %vm10832_vm0, %v8580_v33  ;;  %vm10900_vm0 = vcmp.ge.f32.partialorder %v10899_v42, %v10865_v9  ;;  %v10917_v9 = vld [vmem:[#allocation197_spill] sm:$0xff] }
 0x610   : > { %4433 = vmatpush.msk.msrb.mxu3 %vm2768_vm15, %v10870_v55  ;;  %3859 = vmatmul.f32.gmra.mxu1 %v8762_v24  ;;  %vm10895_vm15 = vcmp.ge.f32.partialorder %v10894_v28, %v10860_v26  ;;  %v4639_v26 = vld [vmem:[%s9247_s2 + $0x110] sm:$0xff] }
 0x611   : > { %3538 = vmatmul.f32.gmra.mxu2 %v10879_v31 }
 0x612   : > { %4434 = vmatpush.msk.msrb.mxu3 %vm2766_vm4, %v10872_v62  ;;  %vm10897_vm4 = vcmp.ge.f32.partialorder %v10896_v25, %v10862_v45  ;;  %v10914_v45 = vld [vmem:[#allocation199_spill] sm:$0xff]  ;;  %v8947_v62 = vld [vmem:[%s9247_s2 + $0x138] sm:$0xff] }
 0x613   : > { %3761 = vmatmul.f32.gmra.mxu0 %v8774_v21 }
 0x614   : > { %4435 = vmatpush.msk.msrb.mxu3 %vm2764_vm1, %v10874_v16  ;;  %vm10902_vm1 = vcmp.ge.f32.partialorder %v10901_v60, %v10867_v59  ;;  %v10919_v59 = vld [vmem:[#allocation107_spill] sm:$0xff] }
 0x616   : > { %4436 = vmatpush.msk.msrb.mxu3 %vm2762_vm13, %v10875_v56  ;;  %vm10904_vm13 = vcmp.ge.f32.partialorder %v10903_v14, %v10869_v36  ;;  %v10921_v56 = vld [vmem:[#allocation70_spill] sm:$0xff] }
 0x617   : > { %4408 = vmatmul.msk.f32.gmra.mxu3 %vm10878_vm6, %v8599_v47  ;;  %vm10911_vm6 = vcmp.ge.f32.partialorder %v10910_v43, %v8313_v57  ;;  %v10916_v57 = vld [vmem:[#allocation121_spill] sm:$0xff] }
 0x618   : > { %4437 = vmatpush.msk.msrb.mxu3 %vm2760_vm2, %v10876_v54  ;;  %3862 = vmatmul.f32.gmra.mxu1 %v8789_v30  ;;  %vm10906_vm2 = vcmp.ge.f32.partialorder %v10905_v53, %v10871_v41  ;;  %v4643_v41 = vld [vmem:[%s9247_s2 + $0x130] sm:$0xff]  ;;  %v10922_v54 = vld [vmem:[#allocation48_spill] sm:$0xff] }
 0x619   : > { %3541 = vmatmul.f32.gmra.mxu2 %v10888_v10  ;;  %v10928_v10 = vld [vmem:[#allocation38_spill] sm:$0xff] }
 0x61a   : > { %4438 = vmatpush.msk.msrb.mxu3 %vm2758_vm3, %v10877_v34  ;;  %vm10909_vm3 = vcmp.ge.f32.partialorder %v10908_v0, %v10873_v7 }
 0x61b   : > { %3764 = vmatmul.f32.gmra.mxu0 %v8801_v11 }
 0x61c   : > { %4439 = vmatpush.msk.msrb.mxu3 %vm2756_vm8, %v10881_v27  ;;  %vm10913_vm8 = vcmp.ge.f32.partialorder %v10912_v52, %v8334_v48  ;;  %v10925_v27 = vld [vmem:[#allocation28_spill] sm:$0xff] }
 0x61e   : > { %4440 = vmatpush.msk.msrb.mxu3 %vm2754_vm9, %v10883_v40  ;;  %vm10915_vm9 = vcmp.ge.f32.partialorder %v10914_v45, %v8378_v2  ;;  %v10918_v2 = vld [vmem:[#allocation193_spill] sm:$0xff] }
 0x61f   : > { %3621 = vmatmul.f32.vlgmr.msrb.gmra.mxu3 %v10889_v19 }
 0x620   : > { %4504 = vmatpush.msk.msra.mxu3 %vm10885_vm14, %v10884_v37  ;;  %3865 = vmatmul.f32.gmra.mxu1 %v8817_v61  ;;  %v8968_v37 = vpop.f32.mrf.mxu2 }
 0x621   : > { %3544 = vmatmul.f32.gmra.mxu2 %v8639_v15 }
 0x622   : > { %4505 = vmatpush.msk.msra.mxu3 %vm10887_vm7, %v10886_v23  ;;  %v10927_v23 = vld [vmem:[#allocation47_spill] sm:$0xff] }
 0x623   : > { %3767 = vmatmul.f32.gmra.mxu0 %v8831_v1 }
 0x624   : > { %4506 = vmatpush.msk.msra.mxu3 %vm10891_vm12, %v10890_v12  ;;  %v10929_v12 = vld [vmem:[#allocation170_spill] sm:$0xff] }
 0x626   : > { %4507 = vmatpush.msk.msra.mxu3 %vm10893_vm11, %v10892_v4 }
 0x627   : > { %3624 = vmatmul.f32.gmra.mxu3 %v10898_v35 }
 0x628   : > { %4508 = vmatpush.msk.msra.mxu3 %vm10895_vm15, %v10894_v28  ;;  %3868 = vmatmul.f32.gmra.mxu1 %v8847_v39  ;;  %v8854_v50 = vpop.f32.mrf.mxu0  ;;  %v10930_v28 = vld [vmem:[#allocation90_spill] sm:$0xff] }
 0x629   : > { %3547 = vmatmul.f32.gmra.mxu2 %v8675_v49 }
 0x62a   : > { %4509 = vmatpush.msk.msra.mxu3 %vm10897_vm4, %v10896_v25 }
 0x62b   : > { %3770 = vmatmul.f32.gmra.mxu0 %v4637_v44 }
 0x62c   : > { %4510 = vmatpush.msk.msra.mxu3 %vm10900_vm0, %v10899_v42  ;;  %v10932_v42 = vld [vmem:[#allocation42_spill] sm:$0xff] }
 0x62d   : > { %v8860_v15 = vpop.f32.mrf.mxu1 }
 0x62e   : > { %4511 = vmatpush.msk.msra.mxu3 %vm10902_vm1, %v10901_v60 }
 0x62f   : > { %3627 = vmatmul.f32.gmra.mxu3 %v10907_v5 }
 0x630   : > { %4512 = vmatpush.msk.msra.mxu3 %vm10904_vm13, %v10903_v14  ;;  %3871 = vmatmul.f32.gmra.mxu1 %v8878_v58  ;;  %v8885_v29 = vpop.f32.mrf.mxu0  ;;  %v10933_v14 = vld [vmem:[#allocation201_spill] sm:$0xff] }
 0x631   : > { %3550 = vmatmul.f32.gmra.mxu2 %v8693_v22 }
 0x632   : > { %4513 = vmatpush.msk.msra.mxu3 %vm10906_vm2, %v10905_v53 }
 0x633   : > { %3773 = vmatmul.f32.gmra.mxu0 %v4639_v26 }
 0x634   : > { %4514 = vmatpush.msk.msra.mxu3 %vm10909_vm3, %v10908_v0 }
 0x635   : > { %v8891_v49 = vpop.f32.mrf.mxu1 }
 0x636   : > { %4515 = vmatpush.msk.msra.mxu3 %vm10911_vm6, %v10910_v43 }
 0x637   : > { %3630 = vmatmul.f32.gmra.mxu3 %v10916_v57 }
 0x638   : > { %4516 = vmatpush.msk.msra.mxu3 %vm10913_vm8, %v10912_v52  ;;  %3874 = vmatmul.f32.gmra.mxu1 %v8909_v32  ;;  %v8916_v48 = vpop.f32.mrf.mxu0 }
 0x639   : > { %3553 = vmatmul.f32.gmra.mxu2 %v8720_v13  ;;  %v10920_v13 = vld [vmem:[#allocation34_spill] sm:$0xff] }
 0x63a   : > { %4517 = vmatpush.msk.msra.mxu3 %vm10915_vm9, %v10914_v45 }
 0x63b   : > { %3776 = vmatmul.f32.gmra.mxu0 %v4641_v63 }
 0x63c   : > { %4518 = vmatpush.msk.msra.mxu3 %vm2757_vm5, %v10917_v9  ;;  %vm3500_vm5 = vcmask 1043456  }
 0x63d   : > { %v8922_v22 = vpop.f32.mrf.mxu1 }
 0x63e   : > { %4519 = vmatpush.msk.msra.mxu3 %vm2755_vm10, %v10918_v2  ;;  %vm10937_vm10 = vcmask 457728  }
 0x63f   : > { %3633 = vmatmul.f32.gmra.mxu3 %v10919_v59  ;;  %vm10938_vm14 = vmmov %vm10937_vm10 }
 0x640   : > { %3877 = vmatmul.f32.gmra.mxu1 %v8932_v38  ;;  %v8935_v36 = vpop.f32.mrf.mxu0  ;;  %vm10939_vm7 = vmmov %vm10937_vm10 }
 0x641   : > { %3556 = vmatmul.f32.gmra.mxu2 %v8747_v20  ;;  %v10923_v20 = vld [vmem:[#allocation62_spill] sm:$0xff]  ;;  %vm10940_vm12 = vmmov %vm10939_vm7 }
 0x642   : > { %vm10941_vm11 = vmmov %vm10939_vm7 }
 0x643   : > { %3779 = vmatmul.f32.gmra.mxu0 %v4643_v41  ;;  %vm10942_vm15 = vmmov %vm10939_vm7 }
 0x644   : > { %vm10943_vm4 = vmmov %vm10939_vm7 }
 0x645   : > { %v8937_v55 = vpop.f32.mrf.mxu1  ;;  %vm10944_vm0 = vmmov %vm10943_vm4 }
 0x647   : > { %3636 = vmatmul.f32.gmra.mxu3 %v10920_v13 }
 0x648   : > { %3880 = vmatmul.f32.gmra.mxu1 %v8947_v62  ;;  %v8950_v7 = vpop.f32.mrf.mxu0 }
 0x649   : > { %3559 = vmatmul.f32.gmra.mxu2 %v8774_v21 }
 0x64b   : > { %3782 = vmatmul.f32.gmra.mxu0 %v10921_v56 }
 0x64c   : > { %v3453_v4 = vpop.f32.mrf.mxu2 }
 0x64d   : > { %v8952_v16 = vpop.f32.mrf.mxu1 }
 0x64f   : > { %3639 = vmatmul.f32.gmra.mxu3 %v10922_v54 }
 0x650   : > { %3883 = vmatmul.f32.gmra.mxu1 %v10923_v20  ;;  %v8958_v34 = vpop.f32.mrf.mxu0 }
 0x651   : > { %3562 = vmatmul.f32.gmra.mxu2 %v8801_v11 }
 0x653   : > { %3785 = vmatmul.f32.gmra.mxu0 %v10924_v3  ;;  %v3491_v3 = vmax.f32 %v8968_v37, %v3453_v4 }
 0x655   : > { %v8960_v31 = vpop.f32.mrf.mxu1 }
 0x657   : > { %3642 = vmatmul.f32.gmra.mxu3 %v10925_v27 }
 0x658   : > { %3886 = vmatmul.f32.gmra.mxu1 %v10926_v8  ;;  %v8966_v40 = vpop.f32.mrf.mxu0 }
 0x659   : > { %3565 = vmatmul.f32.gmra.mxu2 %v8831_v1  ;;  %v10931_v1 = vld [vmem:[#allocation95_spill] sm:$0xff] }
 0x65b   : > { %3788 = vmatmul.f32.gmra.mxu0 %v10927_v23 }
 0x65d   : > { %v8970_v21 = vpop.f32.mrf.mxu1 }
 0x65f   : > { %3645 = vmatmul.f32.gmra.mxu3 %v8654_v46  ;;  %v3456_v46 = vpop.f32.mrf.mxu2 }
 0x660   : > { %3889 = vmatmul.f32.gmra.mxu1 %v10928_v10  ;;  %v8976_v19 = vpop.f32.mrf.mxu0 }
 0x661   : > { %3568 = vmatmul.f32.gmra.mxu2 %v4637_v44 }
 0x663   : > { %3791 = vmatmul.f32.gmra.mxu0 %v10929_v12 }
 0x665   : > { %v8978_v11 = vpop.f32.mrf.mxu1 }
 0x667   : > { %3648 = vmatmul.f32.gmra.mxu3 %v8686_v51  ;;  %v10934_v51 = vld [vmem:[#allocation207_spill] sm:$0xff]  ;;  %v3459_v53 = vpop.f32.mrf.mxu2 }
 0x668   : > { %3892 = vmatmul.f32.gmra.mxu1 %v10930_v28  ;;  %v8983_v25 = vpop.f32.mrf.mxu0  ;;  %v3493_v27 = vmax.f32 %v3456_v46, %v3459_v53 }
 0x669   : > { %3571 = vmatmul.f32.gmra.mxu2 %v4639_v26 }
 0x66a   : > { %v3495_v12 = vmax.f32 %v3491_v3, %v3493_v27 }
 0x66b   : > { %3794 = vmatmul.f32.gmra.mxu0 %v10931_v1  ;;  %v4648_v1 = vld [vmem:[%s9247_s2 + $0x170] sm:$0xff] }
 0x66d   : > { %v8985_v35 = vpop.f32.mrf.mxu1 }
 0x66f   : > { %3651 = vmatmul.f32.gmra.mxu3 %v8708_v6  ;;  %v3521_v6 = vpop.f32.mrf.mxu2 }
 0x670   : > { %3895 = vmatmul.f32.gmra.mxu1 %v10932_v42  ;;  %v8990_v60 = vpop.f32.mrf.mxu0 }
 0x671   : > { %3574 = vmatmul.f32.gmra.mxu2 %v4641_v63 }
 0x673   : > { %3797 = vmatmul.f32.gmra.mxu0 %v10933_v14 }
 0x675   : > { %v8993_v44 = vpop.f32.mrf.mxu1 }
 0x677   : > { %3654 = vmatmul.f32.gmra.mxu3 %v8735_v17  ;;  %v4645_v17 = vld [vmem:[%s9247_s2 + $0x140] sm:$0xff]  ;;  %v3524_v45 = vpop.f32.mrf.mxu2 }
 0x678   : > { %3898 = vmatmul.f32.gmra.mxu1 %v10934_v51  ;;  %v8997_v5 = vpop.f32.mrf.mxu0  ;;  %v4649_v51 = vld [vmem:[%s9247_s2 + $0x180] sm:$0xff] }
 0x679   : > { %3577 = vmatmul.f32.gmra.mxu2 %v4643_v41 }
 0x67d   : > { %v8999_v0 = vpop.f32.mrf.mxu1 }
 0x67f   : > { %3657 = vmatmul.f32.gmra.mxu3 %v8762_v24  ;;  %v4646_v24 = vld [vmem:[%s9247_s2 + $0x150] sm:$0xff]  ;;  %v3527_v63 = vpop.f32.mrf.mxu2 }
 0x680   : > { %v9002_v43 = vpop.f32.mrf.mxu0 }
 0x681   : > { %3580 = vmatmul.f32.gmra.mxu2 %v4645_v17 }
 0x682   : > { %v3479_v26 = vpop.f32.mrf.mxu3 }
 0x685   : > { %v9004_v52 = vpop.f32.mrf.mxu1 }
 0x687   : > { %3660 = vmatmul.f32.gmra.mxu3 %v8789_v30  ;;  %v4647_v30 = vld [vmem:[%s9247_s2 + $0x160] sm:$0xff]  ;;  %v3530_v56 = vpop.f32.mrf.mxu2 }
 0x688   : > { %v9010_v57 = vpop.f32.mrf.mxu0 }
 0x689   : > { %3583 = vmatmul.f32.gmra.mxu2 %v4646_v24 }
 0x68a   : > { %v3482_v9 = vpop.f32.mrf.mxu3 }
 0x68d   : > { %v9012_v2 = vpop.f32.mrf.mxu1 }
 0x68f   : > { %3663 = vmatmul.f32.gmra.mxu3 %v8817_v61  ;;  %v3492_v61 = vmax.f32 %v3479_v26, %v3482_v9  ;;  %v3533_v42 = vpop.f32.mrf.mxu2 }
 0x690   : > { %v9018_v59 = vpop.f32.mrf.mxu0 }
 0x691   : > { %3586 = vmatmul.f32.gmra.mxu2 %v4647_v30 }
 0x692   : > { %v3485_v41 = vpop.f32.mrf.mxu3 }
 0x695   : > { %v9020_v13 = vpop.f32.mrf.mxu1 }
 0x697   : > { %3666 = vmatmul.f32.gmra.mxu3 %v8847_v39  ;;  %v3536_v53 = vpop.f32.mrf.mxu2 }
 0x698   : > { %v3765_v54 = vpop.f32.mrf.mxu0 }
 0x699   : > { %3589 = vmatmul.f32.gmra.mxu2 %v4648_v1 }
 0x69a   : > { %v3488_v20 = vpop.f32.mrf.mxu3 }
 0x69b   : > { %v3494_v8 = vmax.f32 %v3485_v41, %v3488_v20  ;;  %v10935_v20 = vld [vmem:[#allocation190_spill] sm:$0xff] }
 0x69d   : > { %v3496_v23 = vmax.f32 %v3492_v61, %v3494_v8  ;;  %v3866_v10 = vpop.f32.mrf.mxu1  ;;  %v9064_v61 = vadd.f32 %v8993_v44, %v8990_v60  ;;  %v9080_v60 = vadd.f32 %v8999_v0, %v8997_v5  ;;  %v4653_v5 = vld [vmem:[%s9247_s2 + $0x158] sm:$0xff]  ;;  %v9098_v0 = vadd.f32 %v9004_v52, %v9002_v43 }
 0x69e   : > { %v3867_v3 = vadd.f32 %v3866_v10, %v3765_v54  ;;  %v9114_v43 = vadd.f32 %v9012_v2, %v9010_v57  ;;  %v9126_v57 = vadd.f32 %v9020_v13, %v9018_v59 }
 0x69f   : > { %v3499_v28 = vrot.slane %v3496_v23, 4  ;;  %3669 = vmatmul.f32.gmra.mxu3 %v8878_v58  ;;  %v9044_v58 = vadd.f32 %v8978_v11, %v8976_v19  ;;  %v9056_v41 = vpop.f32.mrf.mxu2 }
 0x6a0   : > { %v3768_v37 = vpop.f32.mrf.mxu0 }
 0x6a1   : > { %v3501_v39 = vsel %vm3500_vm5, %v3495_v12, %v3499_v28  ;;  %3592 = vmatmul.f32.gmra.mxu2 %v4649_v51  ;;  %v4652_v28 = vld [vmem:[%s9247_s2 + $0x1a0] sm:$0xff] }
 0x6a2   : > { %3503 = vst [vmem:[%s9033_s15] sm:$0xff] %v3501_v39  ;;  %v3622_v4 = vpop.f32.mrf.mxu3 }
 0x6a3   : > { %v9036_v46 = vadd.f32 %v3622_v4, %v3521_v6  ;;  %v4650_v6 = vld [vmem:[%s9247_s2 + $0x190] sm:$0xff] }
 0x6a5   : > { %v3869_v14 = vpop.f32.mrf.mxu1 }
 0x6a6   : > { %v3870_v23 = vadd.f32 %v3869_v14, %v3768_v37 }
 0x6a7   : > { %3672 = vmatmul.f32.gmra.mxu3 %v8909_v32  ;;  %v9054_v32 = vadd.f32 %v8985_v35, %v8983_v25 }
 0x6a8   : > { %v3771_v26 = vpop.f32.mrf.mxu0 }
 0x6a9   : > { %3595 = vmatmul.f32.gmra.mxu2 %v4650_v6 }
 0x6aa   : > { %v3625_v17 = vpop.f32.mrf.mxu3 }
 0x6ab   : > { %v9046_v9 = vadd.f32 %v3625_v17, %v3524_v45 }
 0x6ad   : > { %v3872_v24 = vpop.f32.mrf.mxu1 }
 0x6ae   : > { %v3873_v1 = vadd.f32 %v3872_v24, %v3771_v26  ;;  %v4654_v26 = vld [vmem:[%s9247_s2 + $0x168] sm:$0xff] }
 0x6af   : > { %3675 = vmatmul.f32.gmra.mxu3 %v8932_v38  ;;  %v9066_v38 = vpop.f32.mrf.mxu2 }
 0x6b0   : > { %v3774_v19 = vpop.f32.mrf.mxu0 }
 0x6b1   : > { %3598 = vmatmul.f32.gmra.mxu2 %v10935_v20 }
 0x6b2   : > { %v3628_v11 = vpop.f32.mrf.mxu3 }
 0x6b3   : > { %v9058_v30 = vadd.f32 %v3628_v11, %v3527_v63  ;;  %v10936_v63 = vld [vmem:[#allocation188_spill] sm:$0xff] }
 0x6b5   : > { %v3875_v45 = vpop.f32.mrf.mxu1 }
 0x6b6   : > { %v3876_v51 = vadd.f32 %v3875_v45, %v3774_v19  ;;  %v4655_v19 = vld [vmem:[%s9247_s2 + $0x178] sm:$0xff] }
 0x6b7   : > { %3678 = vmatmul.f32.gmra.mxu3 %v8947_v62  ;;  %v4651_v62 = vld [vmem:[%s9247_s2 + $0x148] sm:$0xff]  ;;  %v9082_v44 = vpop.f32.mrf.mxu2 }
 0x6b8   : > { %v9068_v25 = vpop.f32.mrf.mxu0 }
 0x6b9   : > { %3601 = vmatmul.f32.gmra.mxu2 %v10936_v63 }
 0x6ba   : > { %v3631_v35 = vpop.f32.mrf.mxu3 }
 0x6bb   : > { %v9070_v27 = vadd.f32 %v3631_v35, %v3530_v56 }
 0x6bd   : > { %v9072_v8 = vpop.f32.mrf.mxu1 }
 0x6bf   : > { %3681 = vmatmul.f32.gmra.mxu3 %v4651_v62  ;;  %v9100_v39 = vpop.f32.mrf.mxu2 }
 0x6c0   : > { %v9084_v54 = vpop.f32.mrf.mxu0 }
 0x6c1   : > { %3800 = vmatmul.f32.vlgmr.msra.gmra.mxu2 %v4652_v28 }
 0x6c2   : > { %v3634_v56 = vpop.f32.mrf.mxu3 }
 0x6c3   : > { %v9086_v10 = vadd.f32 %v3634_v56, %v3533_v42 }
 0x6c5   : > { %v9088_v12 = vpop.f32.mrf.mxu1 }
 0x6c7   : > { %3684 = vmatmul.f32.gmra.mxu3 %v4653_v5  ;;  %v3551_v52 = vpop.f32.mrf.mxu2 }
 0x6c8   : > { %v9102_v42 = vpop.f32.mrf.mxu0 }
 0x6c9   : > { %3803 = vmatmul.f32.gmra.mxu2 %v10936_v63 }
 0x6ca   : > { %v3637_v37 = vpop.f32.mrf.mxu3 }
 0x6cb   : > { %v9104_v4 = vadd.f32 %v3637_v37, %v3536_v53  ;;  %v3825_v53 = vadd.f32 %v8860_v15, %v8854_v50  ;;  %v3828_v50 = vadd.f32 %v8891_v49, %v8885_v29 }
 0x6cd   : > { %v9106_v14 = vpop.f32.mrf.mxu1  ;;  %v3909_v45 = vmax.f32 %v3825_v53, %v9044_v58  ;;  %v4656_v58 = vld [vmem:[%s9247_s2 + $0x188] sm:$0xff]  ;;  %v3911_v59 = vmax.f32 %v3828_v50, %v9054_v32 }
 0x6cf   : > { %3687 = vmatmul.f32.gmra.mxu3 %v4654_v26  ;;  %v3554_v20 = vpop.f32.mrf.mxu2  ;;  %v3831_v26 = vadd.f32 %v8922_v22, %v8916_v48  ;;  %v4658_v22 = vld [vmem:[%s9247_s2 + $0x1a8] sm:$0xff] }
 0x6d0   : > { %v3786_v17 = vpop.f32.mrf.mxu0 }
 0x6d1   : > { %v3913_v53 = vmax.f32 %v3831_v26, %v9064_v61 }
 0x6d2   : > { %v9116_v24 = vpop.f32.mrf.mxu3 }
 0x6d5   : > { %v3887_v6 = vpop.f32.mrf.mxu1 }
 0x6d6   : > { %v3888_v11 = vadd.f32 %v3887_v6, %v3786_v17  ;;  %v4657_v17 = vld [vmem:[%s9247_s2 + $0x198] sm:$0xff] }
 0x6d7   : > { %3690 = vmatmul.f32.gmra.mxu3 %v4655_v19 }
 0x6d8   : > { %v3923_v2 = vmax.f32 %v3867_v3, %v3888_v11  ;;  %v3789_v35 = vpop.f32.mrf.mxu0  ;;  %v3557_v3 = vpop.f32.mrf.mxu2 }
 0x6da   : > { %v9128_v63 = vmax.f32 %v3909_v45, %v3923_v2  ;;  %v9130_v62 = vpop.f32.mrf.mxu3  ;;  %v3834_v45 = vadd.f32 %v8937_v55, %v8935_v36  ;;  %v4659_v36 = vld [vmem:[%s9247_s2 + $0x1b8] sm:$0xff] }
 0x6dd   : > { %v3890_v15 = vpop.f32.mrf.mxu1 }
 0x6de   : > { %v3891_v56 = vadd.f32 %v3890_v15, %v3789_v35  ;;  %v3915_v35 = vmax.f32 %v3834_v45, %v9080_v60 }
 0x6df   : > { %3693 = vmatmul.f32.gmra.mxu3 %v4656_v58 }
 0x6e0   : > { %v3925_v13 = vmax.f32 %v3870_v23, %v3891_v56  ;;  %v3792_v28 = vpop.f32.mrf.mxu0  ;;  %v3560_v23 = vpop.f32.mrf.mxu2 }
 0x6e2   : > { %v9138_v5 = vmax.f32 %v3911_v59, %v3925_v13  ;;  %v9140_v37 = vpop.f32.mrf.mxu3 }
 0x6e5   : > { %v3893_v29 = vpop.f32.mrf.mxu1 }
 0x6e6   : > { %v3894_v49 = vadd.f32 %v3893_v29, %v3792_v28 }
 0x6e7   : > { %3696 = vmatmul.f32.gmra.mxu3 %v4657_v17 }
 0x6e8   : > { %v3927_v32 = vmax.f32 %v3873_v1, %v3894_v49  ;;  %v3795_v19 = vpop.f32.mrf.mxu0  ;;  %v3563_v15 = vpop.f32.mrf.mxu2 }
 0x6ea   : > { %v9148_v6 = vmax.f32 %v3913_v53, %v3927_v32  ;;  %v3649_v11 = vpop.f32.mrf.mxu3 }
 0x6ed   : > { %v3896_v2 = vpop.f32.mrf.mxu1 }
 0x6ee   : > { %v3897_v48 = vadd.f32 %v3896_v2, %v3795_v19 }
 0x6ef   : > { %3699 = vmatmul.f32.gmra.mxu3 %v4658_v22 }
 0x6f0   : > { %v3929_v50 = vmax.f32 %v3876_v51, %v3897_v48  ;;  %v3566_v13 = vpop.f32.mrf.mxu2 }
 0x6f2   : > { %v9156_v61 = vmax.f32 %v3915_v35, %v3929_v50  ;;  %v3652_v1 = vpop.f32.mrf.mxu3 }
 0x6f3   : > { %v3653_v56 = vadd.f32 %v3652_v1, %v3551_v52 }
 0x6f5   : > { %v3914_v58 = vmax.f32 %v9070_v27, %v3653_v56 }
 0x6f7   : > { %3702 = vmatmul.f32.gmra.mxu3 %v4659_v36 }
 0x6f8   : > { %v3569_v29 = vpop.f32.mrf.mxu2 }
 0x6fa   : > { %v3655_v55 = vpop.f32.mrf.mxu3 }
 0x6fb   : > { %v3656_v59 = vadd.f32 %v3655_v55, %v3554_v20  ;;  %v3644_v55 = vadd.f32 %v9130_v62, %v9066_v38 }
 0x6fd   : > { %v3916_v28 = vmax.f32 %v9086_v10, %v3656_v59 }
 0x6ff   : > { %3901 = vmatmul.f32.vlgmr.msra.gmra.mxu3 %v4658_v22 }
 0x700   : > { %v3572_v27 = vpop.f32.mrf.mxu2 }
 0x702   : > { %v3658_v60 = vpop.f32.mrf.mxu3 }
 0x703   : > { %v3659_v51 = vadd.f32 %v3658_v60, %v3557_v3 }
 0x705   : > { %v3918_v26 = vmax.f32 %v9104_v4, %v3659_v51 }
 0x707   : > { %3904 = vmatmul.f32.gmra.mxu3 %v4659_v36 }
 0x708   : > { %v3575_v19 = vpop.f32.mrf.mxu2 }
 0x70a   : > { %v3661_v52 = vpop.f32.mrf.mxu3 }
 0x70b   : > { %v9164_v49 = vadd.f32 %v3661_v52, %v3560_v23  ;;  %v3647_v52 = vadd.f32 %v9140_v37, %v9082_v44 }
 0x710   : > { %v3578_v48 = vpop.f32.mrf.mxu2 }
 0x712   : > { %v3664_v17 = vpop.f32.mrf.mxu3 }
 0x713   : > { %v3665_v53 = vadd.f32 %v3664_v17, %v3563_v15 }
 0x718   : > { %v3581_v35 = vpop.f32.mrf.mxu2 }
 0x71a   : > { %v3667_v32 = vpop.f32.mrf.mxu3 }
 0x71b   : > { %v3668_v45 = vadd.f32 %v3667_v32, %v3566_v13  ;;  %v3908_v13 = vmax.f32 %v9036_v46, %v3644_v55  ;;  %v3910_v32 = vmax.f32 %v9046_v9, %v3647_v52 }
 0x720   : > { %v3584_v4 = vpop.f32.mrf.mxu2 }
 0x722   : > { %v3670_v20 = vpop.f32.mrf.mxu3 }
 0x723   : > { %v3671_v2 = vadd.f32 %v3670_v20, %v3569_v29 }
 0x728   : > { %v3587_v23 = vpop.f32.mrf.mxu2 }
 0x72a   : > { %v3673_v10 = vpop.f32.mrf.mxu3 }
 0x72b   : > { %v3674_v22 = vadd.f32 %v3673_v10, %v3572_v27  ;;  %v3650_v10 = vadd.f32 %v3649_v11, %v9100_v39 }
 0x730   : > { %v3590_v60 = vpop.f32.mrf.mxu2 }
 0x732   : > { %v3676_v3 = vpop.f32.mrf.mxu3 }
 0x733   : > { %v3677_v50 = vadd.f32 %v3676_v3, %v3575_v19  ;;  %v3912_v3 = vmax.f32 %v9058_v30, %v3650_v10  ;;  %v3641_v30 = vadd.f32 %v9116_v24, %v9056_v41  ;;  %v3840_v24 = vadd.f32 %v8960_v31, %v8958_v34 }
 0x738   : > { %v3593_v20 = vpop.f32.mrf.mxu2 }
 0x73a   : > { %v3679_v1 = vpop.f32.mrf.mxu3 }
 0x73b   : > { %v3680_v56 = vadd.f32 %v3679_v1, %v3578_v48 }
 0x742   : > { %v3682_v36 = vpop.f32.mrf.mxu3 }
 0x74a   : > { %v3685_v15 = vpop.f32.mrf.mxu3 }
 0x74b   : > { %v3686_v59 = vadd.f32 %v3685_v15, %v3584_v4 }
 0x74d   : > { %v3922_v51 = vmax.f32 %v3665_v53, %v3686_v59  ;;  %v3596_v53 = vpop.f32.mrf.mxu2 }
 0x74f   : > { %v3936_v29 = vmax.f32 %v3908_v13, %v3922_v51 }
 0x752   : > { %v3688_v27 = vpop.f32.mrf.mxu3 }
 0x753   : > { %v3689_v17 = vadd.f32 %v3688_v27, %v3587_v23 }
 0x755   : > { %v3924_v19 = vmax.f32 %v3668_v45, %v3689_v17  ;;  %v3599_v23 = vpop.f32.mrf.mxu2  ;;  %v3920_v17 = vmax.f32 %v3641_v30, %v9164_v49  ;;  %v3879_v49 = vadd.f32 %v9072_v8, %v9068_v25  ;;  %v4660_v25 = vld [vmem:[%s9248_s3] sm:$0xff]  ;;  %v3919_v8 = vmax.f32 %v3840_v24, %v9114_v43 }
 0x757   : > { %v3938_v48 = vmax.f32 %v3910_v32, %v3924_v19 }
 0x75a   : > { %v3691_v38 = vpop.f32.mrf.mxu3 }
 0x75b   : > { %v3692_v62 = vadd.f32 %v3691_v38, %v3590_v60 }
 0x75d   : > { %v3926_v4 = vmax.f32 %v3671_v2, %v3692_v62  ;;  %v3602_v52 = vpop.f32.mrf.mxu2  ;;  %v3683_v2 = vadd.f32 %v3682_v36, %v3581_v35  ;;  %v3882_v36 = vadd.f32 %v9088_v12, %v9084_v54 }
 0x75f   : > { %v3940_v46 = vmax.f32 %v3912_v3, %v3926_v4 }
 0x762   : > { %v3694_v1 = vpop.f32.mrf.mxu3 }
 0x763   : > { %v3695_v55 = vadd.f32 %v3694_v1, %v3593_v20  ;;  %v3885_v20 = vadd.f32 %v9106_v14, %v9102_v42 }
 0x765   : > { %v3928_v15 = vmax.f32 %v3674_v22, %v3695_v55 }
 0x767   : > { %v3942_v44 = vmax.f32 %v3914_v58, %v3928_v15  ;;  %v3801_v58 = vpop.f32.mrf.mxu2 }
 0x76a   : > { %v3697_v37 = vpop.f32.mrf.mxu3 }
 0x76b   : > { %v3698_v59 = vadd.f32 %v3697_v37, %v3596_v53 }
 0x76d   : > { %v3930_v9 = vmax.f32 %v3677_v50, %v3698_v59 }
 0x76f   : > { %v3944_v45 = vmax.f32 %v3916_v28, %v3930_v9  ;;  %v3798_v28 = vpop.f32.mrf.mxu0  ;;  %v3804_v50 = vpop.f32.mrf.mxu2 }
 0x772   : > { %v3700_v13 = vpop.f32.mrf.mxu3 }
 0x773   : > { %v3701_v51 = vadd.f32 %v3700_v13, %v3599_v23 }
 0x775   : > { %v3932_v39 = vmax.f32 %v3680_v56, %v3701_v51  ;;  %v3899_v56 = vpop.f32.mrf.mxu1 }
 0x776   : > { %v3900_v38 = vadd.f32 %v3899_v56, %v3798_v28 }
 0x777   : > { %v3946_v11 = vmax.f32 %v3918_v26, %v3932_v39  ;;  %v3843_v26 = vadd.f32 %v8970_v21, %v8966_v40  ;;  %v3837_v40 = vadd.f32 %v8952_v16, %v8950_v7 }
 0x778   : > { %v3931_v12 = vmax.f32 %v3879_v49, %v3900_v38 }
 0x779   : > { %v3921_v21 = vmax.f32 %v3843_v26, %v9126_v57  ;;  %v3917_v42 = vmax.f32 %v3837_v40, %v9098_v0 }
 0x77a   : > { %v3703_v60 = vpop.f32.mrf.mxu3 }
 0x77b   : > { %v3704_v27 = vadd.f32 %v3703_v60, %v3602_v52  ;;  %v3945_v7 = vmax.f32 %v3917_v42, %v3931_v12 }
 0x77d   : > { %v3934_v22 = vmax.f32 %v3683_v2, %v3704_v27 }
 0x77f   : > { %v3948_v32 = vmax.f32 %v3920_v17, %v3934_v22 }
 0x781   : > { %3959 = vmatpush.msrb.mxu2 %v3948_v32 }
 0x782   : > { %v3902_v19 = vpop.f32.mrf.mxu3 }
 0x783   : > { %3960 = vmatpush.msrb.mxu2 %v3946_v11  ;;  %v3903_v41 = vadd.f32 %v3902_v19, %v3801_v58 }
 0x785   : > { %3961 = vmatpush.msrb.mxu2 %v3944_v45  ;;  %v3933_v34 = vmax.f32 %v3882_v36, %v3903_v41 }
 0x787   : > { %3962 = vmatpush.msrb.mxu2 %v3942_v44  ;;  %v3947_v14 = vmax.f32 %v3919_v8, %v3933_v34 }
 0x789   : > { %3963 = vmatpush.msrb.mxu2 %v3940_v46 }
 0x78a   : > { %v3905_v35 = vpop.f32.mrf.mxu3 }
 0x78b   : > { %3964 = vmatpush.msrb.mxu2 %v3938_v48  ;;  %v3906_v10 = vadd.f32 %v3905_v35, %v3804_v50 }
 0x78d   : > { %3965 = vmatpush.msrb.mxu2 %v3936_v29  ;;  %v3935_v31 = vmax.f32 %v3885_v20, %v3906_v10 }
 0x78e   : > { %4473 = vmatmul.msk.f32.vlgmr.msrb.gmra.mxu2 %vm10937_vm10, %v4660_v25 }
 0x78f   : > { %v3949_v54 = vmax.f32 %v3921_v21, %v3935_v31 }
 0x791   : > { %3988 = vmatpush.msrb.mxu3 %v3949_v54 }
 0x793   : > { %3989 = vmatpush.msrb.mxu3 %v3947_v14 }
 0x795   : > { %3990 = vmatpush.msrb.mxu3 %v3945_v7 }
 0x796   : > { %4474 = vmatmul.msk.f32.gmra.mxu2 %vm10938_vm14, %v8561_v18 }
 0x797   : > { %3991 = vmatpush.msrb.mxu3 %v9156_v61 }
 0x799   : > { %3992 = vmatpush.msrb.mxu3 %v9148_v6 }
 0x79b   : > { %3993 = vmatpush.msrb.mxu3 %v9138_v5 }
 0x79d   : > { %3994 = vmatpush.msrb.mxu3 %v9128_v63 }
 0x79e   : > { %4477 = vmatmul.msk.f32.vlgmr.msrb.gmra.mxu3 %vm10939_vm7, %v4660_v25  ;;  %4475 = vmatmul.msk.f32.gmra.mxu2 %vm10940_vm12, %v8580_v33 }
 0x7a6   : > { %4478 = vmatmul.msk.f32.gmra.mxu3 %vm10941_vm11, %v8561_v18  ;;  %4476 = vmatmul.msk.f32.gmra.mxu2 %vm10942_vm15, %v8599_v47 }
 0x7ae   : > { %4479 = vmatmul.msk.f32.gmra.mxu3 %vm10943_vm4, %v8580_v33 }
 0x7b6   : > { %4480 = vmatmul.msk.f32.gmra.mxu3 %vm10944_vm0, %v8599_v47  ;;  %v4066_v47 = vld [vmem:[%s9033_s15] sm:$0xff] (%p4788_p5) }
 0x7b7   : > { %4067 = vst [vmem:[%s4035_s5] sm:$0xff] (%p4788_p5), %v4066_v47 }
 0x811   : > { %v3967_v16 = vpop.f32.mrf.mxu2 }
 0x819   : > { %v3970_v43 = vpop.f32.mrf.mxu2 }
 0x81a   : > { %v4008_v62 = vmax.f32 %v3967_v16, %v3970_v43 }
 0x821   : > { %v3996_v0 = vpop.f32.mrf.mxu3  ;;  %v3973_v63 = vpop.f32.mrf.mxu2 }
 0x829   : > { %v3999_v57 = vpop.f32.mrf.mxu3  ;;  %v3976_v6 = vpop.f32.mrf.mxu2 }
 0x82a   : > { %v4009_v29 = vmax.f32 %v3996_v0, %v3999_v57  ;;  %v4010_v48 = vmax.f32 %v3973_v63, %v3976_v6 }
 0x82c   : > { %v4012_v46 = vmax.f32 %v4008_v62, %v4010_v48 }
 0x831   : > { %v4002_v5 = vpop.f32.mrf.mxu3 }
 0x839   : > { %v4005_v61 = vpop.f32.mrf.mxu3 }
 0x83a   : > { %v4011_v18 = vmax.f32 %v4002_v5, %v4005_v61 }
 0x83c   : > { %v4013_v3 = vmax.f32 %v4009_v29, %v4011_v18 }
 0x83d   : > { %4027 = sbr.rel (!%p4788_p5) target bundleno = 2122 (0x84a), region = 40 }
 0x83e   : > { %v4016_v4 = vrot.slane %v4013_v3, 4 }
 0x840   : > { %v4017_v33 = vsel %vm3500_vm5, %v4012_v46, %v4016_v4 }
 0x841   : > { %4481 = vst [vmem:[%s9033_s15 + $0x8] sm:$0xff] %v4017_v33 }
 0x848   : > { %v4068_v53 = vld [vmem:[%s9033_s15 + $0x8] sm:$0xff] }
 0x849   : > { %4069 = vst [vmem:[%s4035_s5 + $0x10] sm:$0xff] %v4068_v53 }
 0x84a PF: > { %s14_s21 = sadd.s32 1, %s4715_s21   ;;  %s10945_s15 = smov %s4695_s16 }
 0x84b   : > { %p11_p11 = scmp.ge.s32.totalorder %s14_s21, 6   ;;  %s10946_s16 = smov %s4799_s30 }
 0x84c   : > { %s10947_s17 = smov %s4707_s19  ;;  %s10948_s18 = smov %s4711_s20 }
 0x84d   : > { %s10949_s19 = smov %s10952_s22  ;;  %s10950_s20 = smov %s10956_s23 }
 0x84e   :  { %13 = sbr.rel (!%p11_p11) target bundleno = 4 (0x4), region = 108 }

</bundles_post_ra>
